<compile_context>
chip_gen: v7x
topology: tpu7x:2x2x1
jax: 0.10.0
libtpu: 0.0.40
codegen_flags: <defaults>
</compile_context>

<pallas_src>
import jax
import jax.numpy as jnp
from jax.experimental import pallas as pl
from jax.experimental.pallas import tpu as pltpu


MAX_TILE_B = 64   # cap keeps the lane-padded working set inside v7x's 64 MiB VMEM


def _pick_tiling(batch):
    """TILE_B (multiple of 16 for bf16 sublane tiling), grid >= 2, padded batch."""
    b16 = ((batch + 15) // 16) * 16
    tile = min(MAX_TILE_B, max(16, 16 * ((b16 // 2 + 15) // 16)))
    grid = max(2, -(-b16 // tile))          # >=2 steps -> both TCs on v7x
    return tile, grid, grid * tile


# ---------------------------------------------------------------------------
# In-kernel helpers (traced inside the Pallas kernel)
# ---------------------------------------------------------------------------
def _sub2(x, k, n, axis):
    """Elements k, k+2, ..., k+2*(n-1) along an OUTER (untiled) axis.

    Contiguous slice + reshape-split + static index -> pure vreg-row selection,
    no strided slicing on tiled dims.
    """
    a, r = divmod(k, 2)
    sl = [slice(None)] * x.ndim
    sl[axis] = slice(2 * a, 2 * a + 2 * n)
    x = x[tuple(sl)]
    x = x.reshape(x.shape[:axis] + (n, 2) + x.shape[axis + 1:])
    idx = [slice(None)] * x.ndim
    idx[axis + 1] = r
    return x[tuple(idx)]


def _pad_hw(x, pad_h, pad_w):
    """Zero-pad the two leading (outer) spatial dims of an (H, W, B, C) value."""
    h, w, tb, c = x.shape
    dt = x.dtype
    x = jnp.concatenate(
        [jnp.zeros((pad_h[0], w, tb, c), dt), x,
         jnp.zeros((pad_h[1], w, tb, c), dt)], axis=0)
    hp = h + pad_h[0] + pad_h[1]
    x = jnp.concatenate(
        [jnp.zeros((hp, pad_w[0], tb, c), dt), x,
         jnp.zeros((hp, pad_w[1], tb, c), dt)], axis=1)
    return x


def _conv3x3_s2_gemm(xpad, w_ref, b_ref, oh, ow):
    """3x3 / stride-2 conv + bias + ReLU as a SINGLE im2col GEMM.

    xpad : (2*oh+2, 2*ow+2, tb, cin) zero-padded activations (bf16 value)
    w_ref: (9*cin, cout) reshaped HWIO weights (bf16), b_ref: (1, cout) f32
    returns (oh*ow*tb, cout) f32
    """
    _, _, tb, cin = xpad.shape
    taps = []
    for kh in range(3):
        xh = _sub2(xpad, kh, oh, axis=0)                 # (oh, Wp, tb, cin)
        for kw in range(3):
            taps.append(_sub2(xh, kw, ow, axis=1))       # (oh, ow, tb, cin)
    lhs = jnp.concatenate(taps, axis=-1)                 # (oh, ow, tb, 9*cin)
    lhs = lhs.reshape(oh * ow * tb, 9 * cin)
    acc = jnp.dot(lhs, w_ref[...], preferred_element_type=jnp.float32)
    return jnp.maximum(acc + b_ref[...], 0.0)


# ---------------------------------------------------------------------------
# Fused kernel: conv1 -> conv2 -> conv3 -> avg_pool, all VMEM-resident
# ---------------------------------------------------------------------------
def mnist_cnn_kernel(x_ref, w1_ref, b1_ref, w2_ref, b2_ref, w3_ref, b3_ref,
                     out_ref):
    tb = x_ref.shape[1]

    # conv1 (1 -> 16): LHS was im2col'ed in the wrapper (K = 9, zero-padded to 16).
    lhs1 = x_ref[...].reshape(196 * tb, 16)
    a1 = jnp.dot(lhs1, w1_ref[...], preferred_element_type=jnp.float32)
    o1 = jnp.maximum(a1 + b1_ref[...], 0.0)
    o1 = o1.astype(jnp.bfloat16).reshape(14, 14, tb, 16)    # (H, W, B, C)

    # conv2 (16 -> 16): pad to (16,16), one GEMM with K = 144.
    x2 = _pad_hw(o1, (1, 1), (1, 1))                         # (16, 16, tb, 16)
    a2 = _conv3x3_s2_gemm(x2, w2_ref, b2_ref, 7, 7)          # (49*tb, 16) f32
    o2 = a2.astype(jnp.bfloat16).reshape(7, 7, tb, 16)

    # conv3 (16 -> 10): pad to (10,10) (last row/col are shape filler, values
    # never selected by the even/odd tap split), one GEMM with K = 144.
    x3 = _pad_hw(o2, (1, 2), (1, 2))                         # (10, 10, tb, 16)
    a3 = _conv3x3_s2_gemm(x3, w3_ref, b3_ref, 4, 4)          # (16*tb, 10) f32

    # avg_pool2d(4): mean over the 16 spatial positions -> (tb, 10)
    out_ref[...] = jnp.mean(a3.reshape(16, tb, 10), axis=0)


# ---------------------------------------------------------------------------
# Wrapper: layout prep (cheap, input-sized XLA glue) + pallas_call
# ---------------------------------------------------------------------------
def _build_conv1_lhs(x, bp):
    """conv1 im2col LHS: (196, bp, 16) bf16; K = 9 taps zero-padded to 16."""
    b = x.shape[0]
    img = x.reshape(b, 28, 28)
    if bp != b:
        img = jnp.pad(img, ((0, bp - b), (0, 0), (0, 0)))
    xpad = jnp.pad(img, ((0, 0), (1, 0), (1, 0)))            # 29 x 29, top/left pad
    taps = [xpad[:, kh:kh + 28:2, kw:kw + 28:2]              # (bp, 14, 14) each
            for kh in range(3) for kw in range(3)]
    p = jnp.stack(taps, axis=-1)                             # (bp, 14, 14, 9)
    p = jnp.pad(p, ((0, 0), (0, 0), (0, 0), (0, 7)))         # K -> 16
    p = p.reshape(bp, 196, 16).transpose(1, 0, 2)            # (196, bp, 16)
    return p.astype(jnp.bfloat16)


@jax.jit
def mnist_cnn_forward(x, params):
    (w1, b1), (w2, b2), (w3, b3) = params
    batch = x.shape[0]
    tile, grid, bp = _pick_tiling(batch)

    x1 = _build_conv1_lhs(x, bp)
    w1m = jnp.pad(w1.reshape(9, 16), ((0, 7), (0, 0))).astype(jnp.bfloat16)
    w2m = w2.reshape(144, 16).astype(jnp.bfloat16)
    w3m = w3.reshape(144, 10).astype(jnp.bfloat16)

    flops = 2 * bp * (196 * 16 * 16 + 49 * 144 * 16 + 16 * 144 * 10)
    bytes_accessed = (x1.size * 2 + (w1m.size + w2m.size + w3m.size) * 2
                      + (b1.size + b2.size + b3.size) * 4 + bp * 10 * 4)

    vmem_spec = pl.BlockSpec(memory_space=pltpu.MemorySpace.VMEM)

    out = pl.pallas_call(
        mnist_cnn_kernel,
        out_shape=jax.ShapeDtypeStruct((bp, 10), jnp.float32),
        grid=(grid,),
        in_specs=[
            pl.BlockSpec((196, tile, 16), lambda i: (0, i, 0)),  # conv1 im2col LHS
            vmem_spec,   # w1m (16, 16)   bf16, untiled VMEM-resident
            vmem_spec,   # b1  (1, 16)    f32
            vmem_spec,   # w2m (144, 16)  bf16
            vmem_spec,   # b2  (1, 16)    f32
            vmem_spec,   # w3m (144, 10)  bf16
            vmem_spec,   # b3  (1, 10)    f32
        ],
        out_specs=pl.BlockSpec((tile, 10), lambda i: (i, 0)),
        compiler_params=pltpu.CompilerParams(
            dimension_semantics=("parallel",),       # batch tiles over TensorCores
            vmem_limit_bytes=40 * 1024 * 1024,       # fits v7x's 64 MiB with headroom
        ),
        cost_estimate=pl.CostEstimate(
            flops=flops, transcendentals=0, bytes_accessed=bytes_accessed),
    )(x1, w1m, b1.reshape(1, 16), w2m, b2.reshape(1, 16), w3m, b3.reshape(1, 10))

    return out[:batch]


# ---------------------------------------------------------------------------
# Parameters + pure-JAX reference (matches Mnist_CNN.forward)
# ---------------------------------------------------------------------------
def init_params(key):
    def conv_init(k, cin, cout):
        kw_, kb_ = jax.random.split(k)
        fan_in = cin * 3 * 3
        bound = 1.0 / jnp.sqrt(fan_in)
        w = jax.random.uniform(kw_, (3, 3, cin, cout), jnp.float32, -bound, bound)
        bb = jax.random.uniform(kb_, (cout,), jnp.float32, -bound, bound)
        return w, bb

    k1, k2, k3 = jax.random.split(key, 3)
    return [conv_init(k1, 1, 16), conv_init(k2, 16, 16), conv_init(k3, 16, 10)]


def mnist_cnn_reference(x, params):
    xb = x.reshape(-1, 28, 28, 1)
    for w, bb in params:
        xb = jax.lax.conv_general_dilated(
            xb, w, window_strides=(2, 2), padding=((1, 1), (1, 1)),
            dimension_numbers=("NHWC", "HWIO", "NHWC"))
        xb = jax.nn.relu(xb + bb)
    return jnp.mean(xb, axis=(1, 2))


if __name__ == "__main__":
    key = jax.random.PRNGKey(0)
    kx, kp = jax.random.split(key)

    batch = 2
    x = jax.random.normal(kx, (batch, 784), dtype=jnp.float32)
    params = init_params(kp)

    out = jax.block_until_ready(mnist_cnn_forward(x, params))
    assert out.shape == (batch, 10), out.shape

    ref = jax.block_until_ready(mnist_cnn_reference(x, params))
    # bf16 MXU inputs with f32 accumulation: ~1e-2 level agreement expected;
    # real layout/indexing bugs would show up as O(0.1-1) errors.
    err = jnp.max(jnp.abs(out - ref))
    assert jnp.allclose(out, ref, atol=3e-2, rtol=3e-2), f"mismatch vs reference: {err}"

    print("KERNEL_OK")
</pallas_src>

<mosaic_0001>
module attributes {stable_mosaic.version = 11 : i64} {
  func.func @mnist_cnn_kernel(%arg0: i32, %arg1: memref<196x16x16xbf16, #tpu.memory_space<vmem>>, %arg2: memref<16x16xbf16, #tpu.memory_space<vmem>>, %arg3: memref<1x16xf32, #tpu.memory_space<vmem>>, %arg4: memref<144x16xbf16, #tpu.memory_space<vmem>>, %arg5: memref<1x16xf32, #tpu.memory_space<vmem>>, %arg6: memref<144x10xbf16, #tpu.memory_space<vmem>>, %arg7: memref<1x10xf32, #tpu.memory_space<vmem>>, %arg8: memref<16x10xf32, #tpu.memory_space<vmem>>) attributes {dimension_semantics = [#tpu.dimension_semantics<parallel>], iteration_bounds = array<i64: 2>, scalar_prefetch = 0 : i64, scratch_operands = 0 : i64, tpu.core_type = #tpu.core_type<tc>, window_params = [{transform_indices = @transform_0, window_bounds = array<i64: 196, 16, 16>}, {pipeline_mode = #tpu.pipeline_mode<synchronous>, transform_indices = @transform_1, window_bounds = array<i64: 16, 16>}, {pipeline_mode = #tpu.pipeline_mode<synchronous>, transform_indices = @transform_2, window_bounds = array<i64: 1, 16>}, {pipeline_mode = #tpu.pipeline_mode<synchronous>, transform_indices = @transform_3, window_bounds = array<i64: 144, 16>}, {pipeline_mode = #tpu.pipeline_mode<synchronous>, transform_indices = @transform_4, window_bounds = array<i64: 1, 16>}, {pipeline_mode = #tpu.pipeline_mode<synchronous>, transform_indices = @transform_5, window_bounds = array<i64: 144, 10>}, {pipeline_mode = #tpu.pipeline_mode<synchronous>, transform_indices = @transform_6, window_bounds = array<i64: 1, 10>}, {transform_indices = @transform_7, window_bounds = array<i64: 16, 10>}]} {
    %c0 = arith.constant 0 : index
    %c0_0 = arith.constant 0 : index
    %c0_1 = arith.constant 0 : index
    %0 = vector.load %arg1[%c0, %c0_0, %c0_1] : memref<196x16x16xbf16, #tpu.memory_space<vmem>>, vector<196x16x16xbf16>
    %1 = vector.shape_cast %0 : vector<196x16x16xbf16> to vector<3136x16xbf16>
    %c0_2 = arith.constant 0 : index
    %c0_3 = arith.constant 0 : index
    %2 = vector.load %arg2[%c0_2, %c0_3] : memref<16x16xbf16, #tpu.memory_space<vmem>>, vector<16x16xbf16>
    %cst = arith.constant dense<0.000000e+00> : vector<3136x16xf32>
    %3 = tpu.matmul %1, %2, %cst {dimension_numbers = #tpu.dot_dimension_numbers<[1], [0], [0], [1], [0, 0, 1, 1], [], []>} : vector<3136x16xbf16>, vector<16x16xbf16>, vector<3136x16xf32> -> vector<3136x16xf32>
    %c0_4 = arith.constant 0 : index
    %c0_5 = arith.constant 0 : index
    %4 = vector.load %arg3[%c0_4, %c0_5] : memref<1x16xf32, #tpu.memory_space<vmem>>, vector<1x16xf32>
    %5 = vector.broadcast %4 : vector<1x16xf32> to vector<3136x16xf32>
    %6 = arith.addf %3, %5 : vector<3136x16xf32>
    %cst_6 = arith.constant 0.000000e+00 : f32
    %7 = vector.broadcast %cst_6 : f32 to vector<3136x16xf32>
    %8 = arith.maximumf %6, %7 : vector<3136x16xf32>
    %9 = arith.truncf %8 : vector<3136x16xf32> to vector<3136x16xbf16>
    %10 = vector.shape_cast %9 : vector<3136x16xbf16> to vector<14x14x16x16xbf16>
    %cst_7 = arith.constant 0.000000e+00 : bf16
    %11 = vector.broadcast %cst_7 : bf16 to vector<1x14x16x16xbf16>
    %cst_8 = arith.constant 0.000000e+00 : bf16
    %12 = vector.broadcast %cst_8 : bf16 to vector<1x14x16x16xbf16>
    %13 = tpu.concatenate %11, %10, %12 in 0 : vector<1x14x16x16xbf16>, vector<14x14x16x16xbf16>, vector<1x14x16x16xbf16> -> vector<16x14x16x16xbf16>
    %cst_9 = arith.constant 0.000000e+00 : bf16
    %14 = vector.broadcast %cst_9 : bf16 to vector<16x1x16x16xbf16>
    %cst_10 = arith.constant 0.000000e+00 : bf16
    %15 = vector.broadcast %cst_10 : bf16 to vector<16x1x16x16xbf16>
    %16 = tpu.concatenate %14, %13, %15 in 1 : vector<16x1x16x16xbf16>, vector<16x14x16x16xbf16>, vector<16x1x16x16xbf16> -> vector<16x16x16x16xbf16>
    %17 = vector.extract_strided_slice %16 {offsets = [0, 0, 0, 0], sizes = [14, 16, 16, 16], strides = [1, 1, 1, 1]} : vector<16x16x16x16xbf16> to vector<14x16x16x16xbf16>
    %18 = vector.shape_cast %17 : vector<14x16x16x16xbf16> to vector<7x2x16x16x16xbf16>
    %19 = vector.extract_strided_slice %18 {offsets = [0, 0, 0, 0, 0], sizes = [7, 1, 16, 16, 16], strides = [1, 1, 1, 1, 1]} : vector<7x2x16x16x16xbf16> to vector<7x1x16x16x16xbf16>
    %20 = vector.shape_cast %19 : vector<7x1x16x16x16xbf16> to vector<7x16x16x16xbf16>
    %21 = vector.extract_strided_slice %20 {offsets = [0, 0, 0, 0], sizes = [7, 14, 16, 16], strides = [1, 1, 1, 1]} : vector<7x16x16x16xbf16> to vector<7x14x16x16xbf16>
    %22 = vector.shape_cast %21 : vector<7x14x16x16xbf16> to vector<7x7x2x16x16xbf16>
    %23 = vector.extract_strided_slice %22 {offsets = [0, 0, 0, 0, 0], sizes = [7, 7, 1, 16, 16], strides = [1, 1, 1, 1, 1]} : vector<7x7x2x16x16xbf16> to vector<7x7x1x16x16xbf16>
    %24 = vector.shape_cast %23 : vector<7x7x1x16x16xbf16> to vector<7x7x16x16xbf16>
    %25 = vector.extract_strided_slice %20 {offsets = [0, 0, 0, 0], sizes = [7, 14, 16, 16], strides = [1, 1, 1, 1]} : vector<7x16x16x16xbf16> to vector<7x14x16x16xbf16>
    %26 = vector.shape_cast %25 : vector<7x14x16x16xbf16> to vector<7x7x2x16x16xbf16>
    %27 = vector.extract_strided_slice %26 {offsets = [0, 0, 1, 0, 0], sizes = [7, 7, 1, 16, 16], strides = [1, 1, 1, 1, 1]} : vector<7x7x2x16x16xbf16> to vector<7x7x1x16x16xbf16>
    %28 = vector.shape_cast %27 : vector<7x7x1x16x16xbf16> to vector<7x7x16x16xbf16>
    %29 = vector.extract_strided_slice %20 {offsets = [0, 2, 0, 0], sizes = [7, 14, 16, 16], strides = [1, 1, 1, 1]} : vector<7x16x16x16xbf16> to vector<7x14x16x16xbf16>
    %30 = vector.shape_cast %29 : vector<7x14x16x16xbf16> to vector<7x7x2x16x16xbf16>
    %31 = vector.extract_strided_slice %30 {offsets = [0, 0, 0, 0, 0], sizes = [7, 7, 1, 16, 16], strides = [1, 1, 1, 1, 1]} : vector<7x7x2x16x16xbf16> to vector<7x7x1x16x16xbf16>
    %32 = vector.shape_cast %31 : vector<7x7x1x16x16xbf16> to vector<7x7x16x16xbf16>
    %33 = vector.extract_strided_slice %16 {offsets = [0, 0, 0, 0], sizes = [14, 16, 16, 16], strides = [1, 1, 1, 1]} : vector<16x16x16x16xbf16> to vector<14x16x16x16xbf16>
    %34 = vector.shape_cast %33 : vector<14x16x16x16xbf16> to vector<7x2x16x16x16xbf16>
    %35 = vector.extract_strided_slice %34 {offsets = [0, 1, 0, 0, 0], sizes = [7, 1, 16, 16, 16], strides = [1, 1, 1, 1, 1]} : vector<7x2x16x16x16xbf16> to vector<7x1x16x16x16xbf16>
    %36 = vector.shape_cast %35 : vector<7x1x16x16x16xbf16> to vector<7x16x16x16xbf16>
    %37 = vector.extract_strided_slice %36 {offsets = [0, 0, 0, 0], sizes = [7, 14, 16, 16], strides = [1, 1, 1, 1]} : vector<7x16x16x16xbf16> to vector<7x14x16x16xbf16>
    %38 = vector.shape_cast %37 : vector<7x14x16x16xbf16> to vector<7x7x2x16x16xbf16>
    %39 = vector.extract_strided_slice %38 {offsets = [0, 0, 0, 0, 0], sizes = [7, 7, 1, 16, 16], strides = [1, 1, 1, 1, 1]} : vector<7x7x2x16x16xbf16> to vector<7x7x1x16x16xbf16>
    %40 = vector.shape_cast %39 : vector<7x7x1x16x16xbf16> to vector<7x7x16x16xbf16>
    %41 = vector.extract_strided_slice %36 {offsets = [0, 0, 0, 0], sizes = [7, 14, 16, 16], strides = [1, 1, 1, 1]} : vector<7x16x16x16xbf16> to vector<7x14x16x16xbf16>
    %42 = vector.shape_cast %41 : vector<7x14x16x16xbf16> to vector<7x7x2x16x16xbf16>
    %43 = vector.extract_strided_slice %42 {offsets = [0, 0, 1, 0, 0], sizes = [7, 7, 1, 16, 16], strides = [1, 1, 1, 1, 1]} : vector<7x7x2x16x16xbf16> to vector<7x7x1x16x16xbf16>
    %44 = vector.shape_cast %43 : vector<7x7x1x16x16xbf16> to vector<7x7x16x16xbf16>
    %45 = vector.extract_strided_slice %36 {offsets = [0, 2, 0, 0], sizes = [7, 14, 16, 16], strides = [1, 1, 1, 1]} : vector<7x16x16x16xbf16> to vector<7x14x16x16xbf16>
    %46 = vector.shape_cast %45 : vector<7x14x16x16xbf16> to vector<7x7x2x16x16xbf16>
    %47 = vector.extract_strided_slice %46 {offsets = [0, 0, 0, 0, 0], sizes = [7, 7, 1, 16, 16], strides = [1, 1, 1, 1, 1]} : vector<7x7x2x16x16xbf16> to vector<7x7x1x16x16xbf16>
    %48 = vector.shape_cast %47 : vector<7x7x1x16x16xbf16> to vector<7x7x16x16xbf16>
    %49 = vector.extract_strided_slice %16 {offsets = [2, 0, 0, 0], sizes = [14, 16, 16, 16], strides = [1, 1, 1, 1]} : vector<16x16x16x16xbf16> to vector<14x16x16x16xbf16>
    %50 = vector.shape_cast %49 : vector<14x16x16x16xbf16> to vector<7x2x16x16x16xbf16>
    %51 = vector.extract_strided_slice %50 {offsets = [0, 0, 0, 0, 0], sizes = [7, 1, 16, 16, 16], strides = [1, 1, 1, 1, 1]} : vector<7x2x16x16x16xbf16> to vector<7x1x16x16x16xbf16>
    %52 = vector.shape_cast %51 : vector<7x1x16x16x16xbf16> to vector<7x16x16x16xbf16>
    %53 = vector.extract_strided_slice %52 {offsets = [0, 0, 0, 0], sizes = [7, 14, 16, 16], strides = [1, 1, 1, 1]} : vector<7x16x16x16xbf16> to vector<7x14x16x16xbf16>
    %54 = vector.shape_cast %53 : vector<7x14x16x16xbf16> to vector<7x7x2x16x16xbf16>
    %55 = vector.extract_strided_slice %54 {offsets = [0, 0, 0, 0, 0], sizes = [7, 7, 1, 16, 16], strides = [1, 1, 1, 1, 1]} : vector<7x7x2x16x16xbf16> to vector<7x7x1x16x16xbf16>
    %56 = vector.shape_cast %55 : vector<7x7x1x16x16xbf16> to vector<7x7x16x16xbf16>
    %57 = vector.extract_strided_slice %52 {offsets = [0, 0, 0, 0], sizes = [7, 14, 16, 16], strides = [1, 1, 1, 1]} : vector<7x16x16x16xbf16> to vector<7x14x16x16xbf16>
    %58 = vector.shape_cast %57 : vector<7x14x16x16xbf16> to vector<7x7x2x16x16xbf16>
    %59 = vector.extract_strided_slice %58 {offsets = [0, 0, 1, 0, 0], sizes = [7, 7, 1, 16, 16], strides = [1, 1, 1, 1, 1]} : vector<7x7x2x16x16xbf16> to vector<7x7x1x16x16xbf16>
    %60 = vector.shape_cast %59 : vector<7x7x1x16x16xbf16> to vector<7x7x16x16xbf16>
    %61 = vector.extract_strided_slice %52 {offsets = [0, 2, 0, 0], sizes = [7, 14, 16, 16], strides = [1, 1, 1, 1]} : vector<7x16x16x16xbf16> to vector<7x14x16x16xbf16>
    %62 = vector.shape_cast %61 : vector<7x14x16x16xbf16> to vector<7x7x2x16x16xbf16>
    %63 = vector.extract_strided_slice %62 {offsets = [0, 0, 0, 0, 0], sizes = [7, 7, 1, 16, 16], strides = [1, 1, 1, 1, 1]} : vector<7x7x2x16x16xbf16> to vector<7x7x1x16x16xbf16>
    %64 = vector.shape_cast %63 : vector<7x7x1x16x16xbf16> to vector<7x7x16x16xbf16>
    %65 = tpu.concatenate %24, %28, %32, %40, %44, %48, %56, %60, %64 in 3 : vector<7x7x16x16xbf16>, vector<7x7x16x16xbf16>, vector<7x7x16x16xbf16>, vector<7x7x16x16xbf16>, vector<7x7x16x16xbf16>, vector<7x7x16x16xbf16>, vector<7x7x16x16xbf16>, vector<7x7x16x16xbf16>, vector<7x7x16x16xbf16> -> vector<7x7x16x144xbf16>
    %66 = vector.shape_cast %65 : vector<7x7x16x144xbf16> to vector<784x144xbf16>
    %c0_11 = arith.constant 0 : index
    %c0_12 = arith.constant 0 : index
    %67 = vector.load %arg4[%c0_11, %c0_12] : memref<144x16xbf16, #tpu.memory_space<vmem>>, vector<144x16xbf16>
    %cst_13 = arith.constant dense<0.000000e+00> : vector<784x16xf32>
    %68 = tpu.matmul %66, %67, %cst_13 {dimension_numbers = #tpu.dot_dimension_numbers<[1], [0], [0], [1], [0, 0, 1, 1], [], []>} : vector<784x144xbf16>, vector<144x16xbf16>, vector<784x16xf32> -> vector<784x16xf32>
    %c0_14 = arith.constant 0 : index
    %c0_15 = arith.constant 0 : index
    %69 = vector.load %arg5[%c0_14, %c0_15] : memref<1x16xf32, #tpu.memory_space<vmem>>, vector<1x16xf32>
    %70 = vector.broadcast %69 : vector<1x16xf32> to vector<784x16xf32>
    %71 = arith.addf %68, %70 : vector<784x16xf32>
    %cst_16 = arith.constant 0.000000e+00 : f32
    %72 = vector.broadcast %cst_16 : f32 to vector<784x16xf32>
    %73 = arith.maximumf %71, %72 : vector<784x16xf32>
    %74 = arith.truncf %73 : vector<784x16xf32> to vector<784x16xbf16>
    %75 = vector.shape_cast %74 : vector<784x16xbf16> to vector<7x7x16x16xbf16>
    %cst_17 = arith.constant 0.000000e+00 : bf16
    %76 = vector.broadcast %cst_17 : bf16 to vector<1x7x16x16xbf16>
    %cst_18 = arith.constant 0.000000e+00 : bf16
    %77 = vector.broadcast %cst_18 : bf16 to vector<2x7x16x16xbf16>
    %78 = tpu.concatenate %76, %75, %77 in 0 : vector<1x7x16x16xbf16>, vector<7x7x16x16xbf16>, vector<2x7x16x16xbf16> -> vector<10x7x16x16xbf16>
    %cst_19 = arith.constant 0.000000e+00 : bf16
    %79 = vector.broadcast %cst_19 : bf16 to vector<10x1x16x16xbf16>
    %cst_20 = arith.constant 0.000000e+00 : bf16
    %80 = vector.broadcast %cst_20 : bf16 to vector<10x2x16x16xbf16>
    %81 = tpu.concatenate %79, %78, %80 in 1 : vector<10x1x16x16xbf16>, vector<10x7x16x16xbf16>, vector<10x2x16x16xbf16> -> vector<10x10x16x16xbf16>
    %82 = vector.extract_strided_slice %81 {offsets = [0, 0, 0, 0], sizes = [8, 10, 16, 16], strides = [1, 1, 1, 1]} : vector<10x10x16x16xbf16> to vector<8x10x16x16xbf16>
    %83 = vector.shape_cast %82 : vector<8x10x16x16xbf16> to vector<4x2x10x16x16xbf16>
    %84 = vector.extract_strided_slice %83 {offsets = [0, 0, 0, 0, 0], sizes = [4, 1, 10, 16, 16], strides = [1, 1, 1, 1, 1]} : vector<4x2x10x16x16xbf16> to vector<4x1x10x16x16xbf16>
    %85 = vector.shape_cast %84 : vector<4x1x10x16x16xbf16> to vector<4x10x16x16xbf16>
    %86 = vector.extract_strided_slice %85 {offsets = [0, 0, 0, 0], sizes = [4, 8, 16, 16], strides = [1, 1, 1, 1]} : vector<4x10x16x16xbf16> to vector<4x8x16x16xbf16>
    %87 = vector.shape_cast %86 : vector<4x8x16x16xbf16> to vector<4x4x2x16x16xbf16>
    %88 = vector.extract_strided_slice %87 {offsets = [0, 0, 0, 0, 0], sizes = [4, 4, 1, 16, 16], strides = [1, 1, 1, 1, 1]} : vector<4x4x2x16x16xbf16> to vector<4x4x1x16x16xbf16>
    %89 = vector.shape_cast %88 : vector<4x4x1x16x16xbf16> to vector<4x4x16x16xbf16>
    %90 = vector.extract_strided_slice %85 {offsets = [0, 0, 0, 0], sizes = [4, 8, 16, 16], strides = [1, 1, 1, 1]} : vector<4x10x16x16xbf16> to vector<4x8x16x16xbf16>
    %91 = vector.shape_cast %90 : vector<4x8x16x16xbf16> to vector<4x4x2x16x16xbf16>
    %92 = vector.extract_strided_slice %91 {offsets = [0, 0, 1, 0, 0], sizes = [4, 4, 1, 16, 16], strides = [1, 1, 1, 1, 1]} : vector<4x4x2x16x16xbf16> to vector<4x4x1x16x16xbf16>
    %93 = vector.shape_cast %92 : vector<4x4x1x16x16xbf16> to vector<4x4x16x16xbf16>
    %94 = vector.extract_strided_slice %85 {offsets = [0, 2, 0, 0], sizes = [4, 8, 16, 16], strides = [1, 1, 1, 1]} : vector<4x10x16x16xbf16> to vector<4x8x16x16xbf16>
    %95 = vector.shape_cast %94 : vector<4x8x16x16xbf16> to vector<4x4x2x16x16xbf16>
    %96 = vector.extract_strided_slice %95 {offsets = [0, 0, 0, 0, 0], sizes = [4, 4, 1, 16, 16], strides = [1, 1, 1, 1, 1]} : vector<4x4x2x16x16xbf16> to vector<4x4x1x16x16xbf16>
    %97 = vector.shape_cast %96 : vector<4x4x1x16x16xbf16> to vector<4x4x16x16xbf16>
    %98 = vector.extract_strided_slice %81 {offsets = [0, 0, 0, 0], sizes = [8, 10, 16, 16], strides = [1, 1, 1, 1]} : vector<10x10x16x16xbf16> to vector<8x10x16x16xbf16>
    %99 = vector.shape_cast %98 : vector<8x10x16x16xbf16> to vector<4x2x10x16x16xbf16>
    %100 = vector.extract_strided_slice %99 {offsets = [0, 1, 0, 0, 0], sizes = [4, 1, 10, 16, 16], strides = [1, 1, 1, 1, 1]} : vector<4x2x10x16x16xbf16> to vector<4x1x10x16x16xbf16>
    %101 = vector.shape_cast %100 : vector<4x1x10x16x16xbf16> to vector<4x10x16x16xbf16>
    %102 = vector.extract_strided_slice %101 {offsets = [0, 0, 0, 0], sizes = [4, 8, 16, 16], strides = [1, 1, 1, 1]} : vector<4x10x16x16xbf16> to vector<4x8x16x16xbf16>
    %103 = vector.shape_cast %102 : vector<4x8x16x16xbf16> to vector<4x4x2x16x16xbf16>
    %104 = vector.extract_strided_slice %103 {offsets = [0, 0, 0, 0, 0], sizes = [4, 4, 1, 16, 16], strides = [1, 1, 1, 1, 1]} : vector<4x4x2x16x16xbf16> to vector<4x4x1x16x16xbf16>
    %105 = vector.shape_cast %104 : vector<4x4x1x16x16xbf16> to vector<4x4x16x16xbf16>
    %106 = vector.extract_strided_slice %101 {offsets = [0, 0, 0, 0], sizes = [4, 8, 16, 16], strides = [1, 1, 1, 1]} : vector<4x10x16x16xbf16> to vector<4x8x16x16xbf16>
    %107 = vector.shape_cast %106 : vector<4x8x16x16xbf16> to vector<4x4x2x16x16xbf16>
    %108 = vector.extract_strided_slice %107 {offsets = [0, 0, 1, 0, 0], sizes = [4, 4, 1, 16, 16], strides = [1, 1, 1, 1, 1]} : vector<4x4x2x16x16xbf16> to vector<4x4x1x16x16xbf16>
    %109 = vector.shape_cast %108 : vector<4x4x1x16x16xbf16> to vector<4x4x16x16xbf16>
    %110 = vector.extract_strided_slice %101 {offsets = [0, 2, 0, 0], sizes = [4, 8, 16, 16], strides = [1, 1, 1, 1]} : vector<4x10x16x16xbf16> to vector<4x8x16x16xbf16>
    %111 = vector.shape_cast %110 : vector<4x8x16x16xbf16> to vector<4x4x2x16x16xbf16>
    %112 = vector.extract_strided_slice %111 {offsets = [0, 0, 0, 0, 0], sizes = [4, 4, 1, 16, 16], strides = [1, 1, 1, 1, 1]} : vector<4x4x2x16x16xbf16> to vector<4x4x1x16x16xbf16>
    %113 = vector.shape_cast %112 : vector<4x4x1x16x16xbf16> to vector<4x4x16x16xbf16>
    %114 = vector.extract_strided_slice %81 {offsets = [2, 0, 0, 0], sizes = [8, 10, 16, 16], strides = [1, 1, 1, 1]} : vector<10x10x16x16xbf16> to vector<8x10x16x16xbf16>
    %115 = vector.shape_cast %114 : vector<8x10x16x16xbf16> to vector<4x2x10x16x16xbf16>
    %116 = vector.extract_strided_slice %115 {offsets = [0, 0, 0, 0, 0], sizes = [4, 1, 10, 16, 16], strides = [1, 1, 1, 1, 1]} : vector<4x2x10x16x16xbf16> to vector<4x1x10x16x16xbf16>
    %117 = vector.shape_cast %116 : vector<4x1x10x16x16xbf16> to vector<4x10x16x16xbf16>
    %118 = vector.extract_strided_slice %117 {offsets = [0, 0, 0, 0], sizes = [4, 8, 16, 16], strides = [1, 1, 1, 1]} : vector<4x10x16x16xbf16> to vector<4x8x16x16xbf16>
    %119 = vector.shape_cast %118 : vector<4x8x16x16xbf16> to vector<4x4x2x16x16xbf16>
    %120 = vector.extract_strided_slice %119 {offsets = [0, 0, 0, 0, 0], sizes = [4, 4, 1, 16, 16], strides = [1, 1, 1, 1, 1]} : vector<4x4x2x16x16xbf16> to vector<4x4x1x16x16xbf16>
    %121 = vector.shape_cast %120 : vector<4x4x1x16x16xbf16> to vector<4x4x16x16xbf16>
    %122 = vector.extract_strided_slice %117 {offsets = [0, 0, 0, 0], sizes = [4, 8, 16, 16], strides = [1, 1, 1, 1]} : vector<4x10x16x16xbf16> to vector<4x8x16x16xbf16>
    %123 = vector.shape_cast %122 : vector<4x8x16x16xbf16> to vector<4x4x2x16x16xbf16>
    %124 = vector.extract_strided_slice %123 {offsets = [0, 0, 1, 0, 0], sizes = [4, 4, 1, 16, 16], strides = [1, 1, 1, 1, 1]} : vector<4x4x2x16x16xbf16> to vector<4x4x1x16x16xbf16>
    %125 = vector.shape_cast %124 : vector<4x4x1x16x16xbf16> to vector<4x4x16x16xbf16>
    %126 = vector.extract_strided_slice %117 {offsets = [0, 2, 0, 0], sizes = [4, 8, 16, 16], strides = [1, 1, 1, 1]} : vector<4x10x16x16xbf16> to vector<4x8x16x16xbf16>
    %127 = vector.shape_cast %126 : vector<4x8x16x16xbf16> to vector<4x4x2x16x16xbf16>
    %128 = vector.extract_strided_slice %127 {offsets = [0, 0, 0, 0, 0], sizes = [4, 4, 1, 16, 16], strides = [1, 1, 1, 1, 1]} : vector<4x4x2x16x16xbf16> to vector<4x4x1x16x16xbf16>
    %129 = vector.shape_cast %128 : vector<4x4x1x16x16xbf16> to vector<4x4x16x16xbf16>
    %130 = tpu.concatenate %89, %93, %97, %105, %109, %113, %121, %125, %129 in 3 : vector<4x4x16x16xbf16>, vector<4x4x16x16xbf16>, vector<4x4x16x16xbf16>, vector<4x4x16x16xbf16>, vector<4x4x16x16xbf16>, vector<4x4x16x16xbf16>, vector<4x4x16x16xbf16>, vector<4x4x16x16xbf16>, vector<4x4x16x16xbf16> -> vector<4x4x16x144xbf16>
    %131 = vector.shape_cast %130 : vector<4x4x16x144xbf16> to vector<256x144xbf16>
    %c0_21 = arith.constant 0 : index
    %c0_22 = arith.constant 0 : index
    %132 = vector.load %arg6[%c0_21, %c0_22] : memref<144x10xbf16, #tpu.memory_space<vmem>>, vector<144x10xbf16>
    %cst_23 = arith.constant dense<0.000000e+00> : vector<256x10xf32>
    %133 = tpu.matmul %131, %132, %cst_23 {dimension_numbers = #tpu.dot_dimension_numbers<[1], [0], [0], [1], [0, 0, 1, 1], [], []>} : vector<256x144xbf16>, vector<144x10xbf16>, vector<256x10xf32> -> vector<256x10xf32>
    %c0_24 = arith.constant 0 : index
    %c0_25 = arith.constant 0 : index
    %134 = vector.load %arg7[%c0_24, %c0_25] : memref<1x10xf32, #tpu.memory_space<vmem>>, vector<1x10xf32>
    %135 = vector.broadcast %134 : vector<1x10xf32> to vector<256x10xf32>
    %136 = arith.addf %133, %135 : vector<256x10xf32>
    %cst_26 = arith.constant 0.000000e+00 : f32
    %137 = vector.broadcast %cst_26 : f32 to vector<256x10xf32>
    %138 = arith.maximumf %136, %137 : vector<256x10xf32>
    %139 = vector.shape_cast %138 : vector<256x10xf32> to vector<16x16x10xf32>
    %cst_27 = arith.constant dense<0.000000e+00> : vector<16x10xf32>
    %140 = vector.multi_reduction <add>, %139, %cst_27 [0] : vector<16x16x10xf32> to vector<16x10xf32>
    %cst_28 = arith.constant 1.600000e+01 : f32
    %141 = vector.broadcast %cst_28 : f32 to vector<16x10xf32>
    %142 = arith.divf %140, %141 : vector<16x10xf32>
    %c0_29 = arith.constant 0 : index
    %c0_30 = arith.constant 0 : index
    %143 = vector.load %arg8[%c0_29, %c0_30] : memref<16x10xf32, #tpu.memory_space<vmem>>, vector<16x10xf32>
    tpu.vector_store %arg8[%c0_29, %c0_30], %142 {strides = array<i32>} : memref<16x10xf32, #tpu.memory_space<vmem>>, vector<16x10xf32>,
    return
  }
  func.func @transform_0(%arg0: i32) -> (i32, i32, i32) {
    %c0_i32 = arith.constant 0 : i32
    %c0_i32_0 = arith.constant 0 : i32
    %c0_i32_1 = arith.constant 0 : i32
    return %c0_i32, %arg0, %c0_i32_0 : i32, i32, i32
  }
  func.func @transform_1(%arg0: i32) -> (i32, i32) {
    %c0_i32 = arith.constant 0 : i32
    %c0_i32_0 = arith.constant 0 : i32
    %c0_i32_1 = arith.constant 0 : i32
    return %c0_i32, %c0_i32_0 : i32, i32
  }
  func.func @transform_2(%arg0: i32) -> (i32, i32) {
    %c0_i32 = arith.constant 0 : i32
    %c0_i32_0 = arith.constant 0 : i32
    %c0_i32_1 = arith.constant 0 : i32
    return %c0_i32, %c0_i32_0 : i32, i32
  }
  func.func @transform_3(%arg0: i32) -> (i32, i32) {
    %c0_i32 = arith.constant 0 : i32
    %c0_i32_0 = arith.constant 0 : i32
    %c0_i32_1 = arith.constant 0 : i32
    return %c0_i32, %c0_i32_0 : i32, i32
  }
  func.func @transform_4(%arg0: i32) -> (i32, i32) {
    %c0_i32 = arith.constant 0 : i32
    %c0_i32_0 = arith.constant 0 : i32
    %c0_i32_1 = arith.constant 0 : i32
    return %c0_i32, %c0_i32_0 : i32, i32
  }
  func.func @transform_5(%arg0: i32) -> (i32, i32) {
    %c0_i32 = arith.constant 0 : i32
    %c0_i32_0 = arith.constant 0 : i32
    %c0_i32_1 = arith.constant 0 : i32
    return %c0_i32, %c0_i32_0 : i32, i32
  }
  func.func @transform_6(%arg0: i32) -> (i32, i32) {
    %c0_i32 = arith.constant 0 : i32
    %c0_i32_0 = arith.constant 0 : i32
    %c0_i32_1 = arith.constant 0 : i32
    return %c0_i32, %c0_i32_0 : i32, i32
  }
  func.func @transform_7(%arg0: i32) -> (i32, i32) {
    %c0_i32 = arith.constant 0 : i32
    %c0_i32_0 = arith.constant 0 : i32
    return %arg0, %c0_i32 : i32, i32
  }
}

</mosaic_0001>

<bundles_post_ra>
// kernel: mnist_cnn_forward.1
= control target key start
LH: loop header
LB: loop body
LE: loop exit
PB: predicated region body
PF: predicated region fallthrough
CT: control target
= control target key end

     0   :  { %s10647_s24 = smov 0   ;;  %s10649_s25 = smov 0   ;;  %s14362_s0 = inlined_call_operand.vmem [shape: bf16[196,32,16], index: 0, kind: input, shape index: {}]   ;;  %s14363_s1 = inlined_call_operand.vmem [shape: bf16[16,16], index: 1, kind: input, shape index: {}]   ;;  %s14364_s2 = inlined_call_operand.vmem [shape: f32[1,16], index: 2, kind: input, shape index: {}]   ;;  %s14365_s3 = inlined_call_operand.vmem [shape: bf16[144,16], index: 3, kind: input, shape index: {}]   ;;  %s14366_s4 = inlined_call_operand.vmem [shape: f32[1,16], index: 4, kind: input, shape index: {}]   ;;  %s14367_s5 = inlined_call_operand.vmem [shape: bf16[144,10], index: 5, kind: input, shape index: {}]   ;;  %s14368_s6 = inlined_call_operand.vmem [shape: f32[1,10], index: 6, kind: input, shape index: {}]   ;;  %s14369_s7 = inlined_call_operand.vmem [shape: f32[32,10], index: 7, kind: output, shape index: {}]  }
   0x1   :  { %s10651_s26 = smov 0  }
   0x2 LB: > { %s9242_s27 = sadd.s32 4294967295, %s10597_s26   ;;  %s10664_s28 = sadd.s32 1, %s10597_s26   ;;  %s10597_s26 = sphi %s10651_s26, %s14610_s26   ;;  %s10593_s25 = sphi %s10649_s25, %s14609_s25   ;;  %s10589_s24 = sphi %s10647_s24, %s14608_s24  }
   0x3   : > { %s21_s29 = ssub.s32 %s10597_s26, %s10664_s28  ;;  %s24_s30 = sadd.s32 1, %s10593_s25 }
   0x4   : > { %p22_p0 = scmp.eq.s32.totalorder %s21_s29, 0  ;;  %p31_p1 = scmp.ne.s32.totalorder %s10593_s25, %s10589_s24 }
   0x5   : > { %p32_p2 = scmp.eq.s32.totalorder %s10597_s26, 0  ;;  %p9245_p4 = scmp.ge.s32.totalorder %s10597_s26, 2 }
   0x6   : > { %s10673_s8 = scalar_select %p22_p0, %s10593_s25, %s24_s30  }
   0x7   : > { %p33_p3 = por %p32_p2, %p31_p1  ;;  %227 = sbr.rel (%p9245_p4) target bundleno = 116 (0x74), region = 40 }
   0xe   : > { %230 = sbr.rel (!%p33_p3) target bundleno = 116 (0x74), region = 44  ;;  %s232_s9 = sand.u32 (%p33_p3), 1, %s10593_s25  }
   0xf   : > { %s9725_s10 = sshll.u32 (%p33_p3), %s10597_s26, 3  ;;  %s10319_s11 = smul.u32 (%p33_p3), 1568, %s232_s9 }
  0x10   : > { %s10681_s14 = scalar_lea.vmem (%p33_p3), %s14362_s0, %s9725_s10 }
  0x11   : > { %v253_v0 = vld [vmem:[%s10681_s14] sm:$0xff] (%p33_p3)   ;;  %v257_v1 = vld [vmem:[%s10681_s14 + $0x10] sm:$0xff] (%p33_p3)   ;;  %s10689_s15 = scalar_lea.vmem (%p33_p3), [#allocation2], %s10319_s11 }
  0x12   : > { %v261_v2 = vld [vmem:[%s10681_s14 + $0x20] sm:$0xff] (%p33_p3)   ;;  %v265_v3 = vld [vmem:[%s10681_s14 + $0x30] sm:$0xff] (%p33_p3)   ;;  %254 = vst [vmem:[%s10689_s15] sm:$0xff] (%p33_p3), %v253_v0   ;;  %258 = vst [vmem:[%s10689_s15 + $0x8] sm:$0xff] (%p33_p3), %v257_v1  }
  0x13   : > { %v269_v4 = vld [vmem:[%s10681_s14 + $0x40] sm:$0xff] (%p33_p3)   ;;  %v273_v5 = vld [vmem:[%s10681_s14 + $0x50] sm:$0xff] (%p33_p3)   ;;  %262 = vst [vmem:[%s10689_s15 + $0x10] sm:$0xff] (%p33_p3), %v261_v2   ;;  %266 = vst [vmem:[%s10689_s15 + $0x18] sm:$0xff] (%p33_p3), %v265_v3  }
  0x14   : > { %270 = vst [vmem:[%s10689_s15 + $0x20] sm:$0xff] (%p33_p3), %v269_v4   ;;  %274 = vst [vmem:[%s10689_s15 + $0x28] sm:$0xff] (%p33_p3), %v273_v5   ;;  %v277_v6 = vld [vmem:[%s10681_s14 + $0x60] sm:$0xff] (%p33_p3)   ;;  %v281_v7 = vld [vmem:[%s10681_s14 + $0x70] sm:$0xff] (%p33_p3)  }
  0x15   : > { %v285_v8 = vld [vmem:[%s10681_s14 + $0x80] sm:$0xff]   ;;  %278 = vst [vmem:[%s10689_s15 + $0x30] sm:$0xff] %v277_v6   ;;  %282 = vst [vmem:[%s10689_s15 + $0x38] sm:$0xff] %v281_v7   ;;  %v289_v9 = vld [vmem:[%s10681_s14 + $0x90] sm:$0xff]  }
  0x16   : > { %286 = vst [vmem:[%s10689_s15 + $0x40] sm:$0xff] %v285_v8   ;;  %v293_v10 = vld [vmem:[%s10681_s14 + $0xa0] sm:$0xff]   ;;  %v297_v11 = vld [vmem:[%s10681_s14 + $0xb0] sm:$0xff]   ;;  %290 = vst [vmem:[%s10689_s15 + $0x48] sm:$0xff] %v289_v9  }
  0x17   : > { %294 = vst [vmem:[%s10689_s15 + $0x50] sm:$0xff] %v293_v10   ;;  %298 = vst [vmem:[%s10689_s15 + $0x58] sm:$0xff] %v297_v11   ;;  %v301_v12 = vld [vmem:[%s10681_s14 + $0xc0] sm:$0xff]   ;;  %v305_v13 = vld [vmem:[%s10681_s14 + $0xd0] sm:$0xff]  }
  0x18   : > { %v309_v14 = vld [vmem:[%s10681_s14 + $0xe0] sm:$0xff]   ;;  %302 = vst [vmem:[%s10689_s15 + $0x60] sm:$0xff] %v301_v12   ;;  %306 = vst [vmem:[%s10689_s15 + $0x68] sm:$0xff] %v305_v13   ;;  %v313_v15 = vld [vmem:[%s10681_s14 + $0xf0] sm:$0xff]  }
  0x19   : > { %310 = vst [vmem:[%s10689_s15 + $0x70] sm:$0xff] %v309_v14   ;;  %v317_v16 = vld [vmem:[%s10681_s14 + $0x100] sm:$0xff]   ;;  %v321_v17 = vld [vmem:[%s10681_s14 + $0x110] sm:$0xff]   ;;  %314 = vst [vmem:[%s10689_s15 + $0x78] sm:$0xff] %v313_v15  }
  0x1a   : > { %318 = vst [vmem:[%s10689_s15 + $0x80] sm:$0xff] %v317_v16   ;;  %322 = vst [vmem:[%s10689_s15 + $0x88] sm:$0xff] %v321_v17   ;;  %v325_v18 = vld [vmem:[%s10681_s14 + $0x120] sm:$0xff]   ;;  %v329_v19 = vld [vmem:[%s10681_s14 + $0x130] sm:$0xff]  }
  0x1b   : > { %v333_v20 = vld [vmem:[%s10681_s14 + $0x140] sm:$0xff]   ;;  %326 = vst [vmem:[%s10689_s15 + $0x90] sm:$0xff] %v325_v18   ;;  %330 = vst [vmem:[%s10689_s15 + $0x98] sm:$0xff] %v329_v19   ;;  %v337_v21 = vld [vmem:[%s10681_s14 + $0x150] sm:$0xff]  }
  0x1c   : > { %334 = vst [vmem:[%s10689_s15 + $0xa0] sm:$0xff] %v333_v20   ;;  %v341_v22 = vld [vmem:[%s10681_s14 + $0x160] sm:$0xff]   ;;  %v345_v23 = vld [vmem:[%s10681_s14 + $0x170] sm:$0xff]   ;;  %338 = vst [vmem:[%s10689_s15 + $0xa8] sm:$0xff] %v337_v21  }
  0x1d   : > { %342 = vst [vmem:[%s10689_s15 + $0xb0] sm:$0xff] %v341_v22   ;;  %346 = vst [vmem:[%s10689_s15 + $0xb8] sm:$0xff] %v345_v23   ;;  %v349_v24 = vld [vmem:[%s10681_s14 + $0x180] sm:$0xff]   ;;  %v353_v25 = vld [vmem:[%s10681_s14 + $0x190] sm:$0xff]  }
  0x1e   : > { %v357_v26 = vld [vmem:[%s10681_s14 + $0x1a0] sm:$0xff]   ;;  %350 = vst [vmem:[%s10689_s15 + $0xc0] sm:$0xff] %v349_v24   ;;  %354 = vst [vmem:[%s10689_s15 + $0xc8] sm:$0xff] %v353_v25   ;;  %v361_v27 = vld [vmem:[%s10681_s14 + $0x1b0] sm:$0xff]  }
  0x1f   : > { %358 = vst [vmem:[%s10689_s15 + $0xd0] sm:$0xff] %v357_v26   ;;  %v365_v28 = vld [vmem:[%s10681_s14 + $0x1c0] sm:$0xff]   ;;  %v369_v29 = vld [vmem:[%s10681_s14 + $0x1d0] sm:$0xff]   ;;  %362 = vst [vmem:[%s10689_s15 + $0xd8] sm:$0xff] %v361_v27  }
  0x20   : > { %366 = vst [vmem:[%s10689_s15 + $0xe0] sm:$0xff] %v365_v28   ;;  %370 = vst [vmem:[%s10689_s15 + $0xe8] sm:$0xff] %v369_v29   ;;  %v373_v30 = vld [vmem:[%s10681_s14 + $0x1e0] sm:$0xff]   ;;  %v377_v31 = vld [vmem:[%s10681_s14 + $0x1f0] sm:$0xff]  }
  0x21   : > { %v381_v32 = vld [vmem:[%s10681_s14 + $0x200] sm:$0xff]   ;;  %374 = vst [vmem:[%s10689_s15 + $0xf0] sm:$0xff] %v373_v30   ;;  %378 = vst [vmem:[%s10689_s15 + $0xf8] sm:$0xff] %v377_v31   ;;  %v385_v33 = vld [vmem:[%s10681_s14 + $0x210] sm:$0xff]  }
  0x22   : > { %382 = vst [vmem:[%s10689_s15 + $0x100] sm:$0xff] %v381_v32   ;;  %v389_v34 = vld [vmem:[%s10681_s14 + $0x220] sm:$0xff]   ;;  %v393_v35 = vld [vmem:[%s10681_s14 + $0x230] sm:$0xff]   ;;  %386 = vst [vmem:[%s10689_s15 + $0x108] sm:$0xff] %v385_v33  }
  0x23   : > { %390 = vst [vmem:[%s10689_s15 + $0x110] sm:$0xff] %v389_v34   ;;  %394 = vst [vmem:[%s10689_s15 + $0x118] sm:$0xff] %v393_v35   ;;  %v397_v36 = vld [vmem:[%s10681_s14 + $0x240] sm:$0xff]   ;;  %v401_v37 = vld [vmem:[%s10681_s14 + $0x250] sm:$0xff]  }
  0x24   : > { %v405_v38 = vld [vmem:[%s10681_s14 + $0x260] sm:$0xff]   ;;  %398 = vst [vmem:[%s10689_s15 + $0x120] sm:$0xff] %v397_v36   ;;  %402 = vst [vmem:[%s10689_s15 + $0x128] sm:$0xff] %v401_v37   ;;  %v409_v39 = vld [vmem:[%s10681_s14 + $0x270] sm:$0xff]  }
  0x25   : > { %406 = vst [vmem:[%s10689_s15 + $0x130] sm:$0xff] %v405_v38   ;;  %v413_v40 = vld [vmem:[%s10681_s14 + $0x280] sm:$0xff]   ;;  %v417_v41 = vld [vmem:[%s10681_s14 + $0x290] sm:$0xff]   ;;  %410 = vst [vmem:[%s10689_s15 + $0x138] sm:$0xff] %v409_v39  }
  0x26   : > { %414 = vst [vmem:[%s10689_s15 + $0x140] sm:$0xff] %v413_v40   ;;  %418 = vst [vmem:[%s10689_s15 + $0x148] sm:$0xff] %v417_v41   ;;  %v421_v42 = vld [vmem:[%s10681_s14 + $0x2a0] sm:$0xff]   ;;  %v425_v43 = vld [vmem:[%s10681_s14 + $0x2b0] sm:$0xff]  }
  0x27   : > { %v429_v44 = vld [vmem:[%s10681_s14 + $0x2c0] sm:$0xff]   ;;  %422 = vst [vmem:[%s10689_s15 + $0x150] sm:$0xff] %v421_v42   ;;  %426 = vst [vmem:[%s10689_s15 + $0x158] sm:$0xff] %v425_v43   ;;  %v433_v45 = vld [vmem:[%s10681_s14 + $0x2d0] sm:$0xff]  }
  0x28   : > { %430 = vst [vmem:[%s10689_s15 + $0x160] sm:$0xff] %v429_v44   ;;  %v437_v46 = vld [vmem:[%s10681_s14 + $0x2e0] sm:$0xff]   ;;  %v441_v47 = vld [vmem:[%s10681_s14 + $0x2f0] sm:$0xff]   ;;  %434 = vst [vmem:[%s10689_s15 + $0x168] sm:$0xff] %v433_v45  }
  0x29   : > { %438 = vst [vmem:[%s10689_s15 + $0x170] sm:$0xff] %v437_v46   ;;  %442 = vst [vmem:[%s10689_s15 + $0x178] sm:$0xff] %v441_v47   ;;  %v445_v48 = vld [vmem:[%s10681_s14 + $0x300] sm:$0xff]   ;;  %v449_v49 = vld [vmem:[%s10681_s14 + $0x310] sm:$0xff]  }
  0x2a   : > { %v453_v50 = vld [vmem:[%s10681_s14 + $0x320] sm:$0xff]   ;;  %446 = vst [vmem:[%s10689_s15 + $0x180] sm:$0xff] %v445_v48   ;;  %450 = vst [vmem:[%s10689_s15 + $0x188] sm:$0xff] %v449_v49   ;;  %v457_v51 = vld [vmem:[%s10681_s14 + $0x330] sm:$0xff]  }
  0x2b   : > { %454 = vst [vmem:[%s10689_s15 + $0x190] sm:$0xff] %v453_v50   ;;  %v461_v52 = vld [vmem:[%s10681_s14 + $0x340] sm:$0xff]   ;;  %v465_v53 = vld [vmem:[%s10681_s14 + $0x350] sm:$0xff]   ;;  %458 = vst [vmem:[%s10689_s15 + $0x198] sm:$0xff] %v457_v51  }
  0x2c   : > { %462 = vst [vmem:[%s10689_s15 + $0x1a0] sm:$0xff] %v461_v52   ;;  %466 = vst [vmem:[%s10689_s15 + $0x1a8] sm:$0xff] %v465_v53   ;;  %v469_v54 = vld [vmem:[%s10681_s14 + $0x360] sm:$0xff]   ;;  %v473_v55 = vld [vmem:[%s10681_s14 + $0x370] sm:$0xff]  }
  0x2d   : > { %v477_v56 = vld [vmem:[%s10681_s14 + $0x380] sm:$0xff]   ;;  %470 = vst [vmem:[%s10689_s15 + $0x1b0] sm:$0xff] %v469_v54   ;;  %474 = vst [vmem:[%s10689_s15 + $0x1b8] sm:$0xff] %v473_v55   ;;  %v481_v57 = vld [vmem:[%s10681_s14 + $0x390] sm:$0xff]  }
  0x2e   : > { %478 = vst [vmem:[%s10689_s15 + $0x1c0] sm:$0xff] %v477_v56   ;;  %v485_v58 = vld [vmem:[%s10681_s14 + $0x3a0] sm:$0xff]   ;;  %v489_v59 = vld [vmem:[%s10681_s14 + $0x3b0] sm:$0xff]   ;;  %482 = vst [vmem:[%s10689_s15 + $0x1c8] sm:$0xff] %v481_v57  }
  0x2f   : > { %486 = vst [vmem:[%s10689_s15 + $0x1d0] sm:$0xff] %v485_v58   ;;  %490 = vst [vmem:[%s10689_s15 + $0x1d8] sm:$0xff] %v489_v59   ;;  %v493_v60 = vld [vmem:[%s10681_s14 + $0x3c0] sm:$0xff]   ;;  %v497_v61 = vld [vmem:[%s10681_s14 + $0x3d0] sm:$0xff]  }
  0x30   : > { %v501_v62 = vld [vmem:[%s10681_s14 + $0x3e0] sm:$0xff]   ;;  %494 = vst [vmem:[%s10689_s15 + $0x1e0] sm:$0xff] %v493_v60   ;;  %498 = vst [vmem:[%s10689_s15 + $0x1e8] sm:$0xff] %v497_v61   ;;  %v505_v63 = vld [vmem:[%s10681_s14 + $0x3f0] sm:$0xff]  }
  0x31   : > { %502 = vst [vmem:[%s10689_s15 + $0x1f0] sm:$0xff] %v501_v62   ;;  %v509_v0 = vld [vmem:[%s10681_s14 + $0x400] sm:$0xff]   ;;  %v513_v1 = vld [vmem:[%s10681_s14 + $0x410] sm:$0xff]   ;;  %506 = vst [vmem:[%s10689_s15 + $0x1f8] sm:$0xff] %v505_v63  }
  0x32   : > { %510 = vst [vmem:[%s10689_s15 + $0x200] sm:$0xff] %v509_v0   ;;  %514 = vst [vmem:[%s10689_s15 + $0x208] sm:$0xff] %v513_v1   ;;  %v517_v2 = vld [vmem:[%s10681_s14 + $0x420] sm:$0xff]   ;;  %v521_v3 = vld [vmem:[%s10681_s14 + $0x430] sm:$0xff]  }
  0x33   : > { %v525_v4 = vld [vmem:[%s10681_s14 + $0x440] sm:$0xff]   ;;  %518 = vst [vmem:[%s10689_s15 + $0x210] sm:$0xff] %v517_v2   ;;  %522 = vst [vmem:[%s10689_s15 + $0x218] sm:$0xff] %v521_v3   ;;  %v529_v5 = vld [vmem:[%s10681_s14 + $0x450] sm:$0xff]  }
  0x34   : > { %526 = vst [vmem:[%s10689_s15 + $0x220] sm:$0xff] %v525_v4   ;;  %v533_v6 = vld [vmem:[%s10681_s14 + $0x460] sm:$0xff]   ;;  %v537_v7 = vld [vmem:[%s10681_s14 + $0x470] sm:$0xff]   ;;  %530 = vst [vmem:[%s10689_s15 + $0x228] sm:$0xff] %v529_v5  }
  0x35   : > { %534 = vst [vmem:[%s10689_s15 + $0x230] sm:$0xff] %v533_v6   ;;  %538 = vst [vmem:[%s10689_s15 + $0x238] sm:$0xff] %v537_v7   ;;  %v541_v8 = vld [vmem:[%s10681_s14 + $0x480] sm:$0xff]   ;;  %v545_v9 = vld [vmem:[%s10681_s14 + $0x490] sm:$0xff]  }
  0x36   : > { %v549_v10 = vld [vmem:[%s10681_s14 + $0x4a0] sm:$0xff]   ;;  %542 = vst [vmem:[%s10689_s15 + $0x240] sm:$0xff] %v541_v8   ;;  %546 = vst [vmem:[%s10689_s15 + $0x248] sm:$0xff] %v545_v9   ;;  %v553_v11 = vld [vmem:[%s10681_s14 + $0x4b0] sm:$0xff]  }
  0x37   : > { %550 = vst [vmem:[%s10689_s15 + $0x250] sm:$0xff] %v549_v10   ;;  %v557_v12 = vld [vmem:[%s10681_s14 + $0x4c0] sm:$0xff]   ;;  %v561_v13 = vld [vmem:[%s10681_s14 + $0x4d0] sm:$0xff]   ;;  %554 = vst [vmem:[%s10689_s15 + $0x258] sm:$0xff] %v553_v11  }
  0x38   : > { %558 = vst [vmem:[%s10689_s15 + $0x260] sm:$0xff] %v557_v12   ;;  %562 = vst [vmem:[%s10689_s15 + $0x268] sm:$0xff] %v561_v13   ;;  %v565_v14 = vld [vmem:[%s10681_s14 + $0x4e0] sm:$0xff]   ;;  %v569_v15 = vld [vmem:[%s10681_s14 + $0x4f0] sm:$0xff]  }
  0x39   : > { %v573_v16 = vld [vmem:[%s10681_s14 + $0x500] sm:$0xff]   ;;  %566 = vst [vmem:[%s10689_s15 + $0x270] sm:$0xff] %v565_v14   ;;  %570 = vst [vmem:[%s10689_s15 + $0x278] sm:$0xff] %v569_v15   ;;  %v577_v17 = vld [vmem:[%s10681_s14 + $0x510] sm:$0xff]  }
  0x3a   : > { %574 = vst [vmem:[%s10689_s15 + $0x280] sm:$0xff] %v573_v16   ;;  %v581_v18 = vld [vmem:[%s10681_s14 + $0x520] sm:$0xff]   ;;  %v585_v19 = vld [vmem:[%s10681_s14 + $0x530] sm:$0xff]   ;;  %578 = vst [vmem:[%s10689_s15 + $0x288] sm:$0xff] %v577_v17  }
  0x3b   : > { %582 = vst [vmem:[%s10689_s15 + $0x290] sm:$0xff] %v581_v18   ;;  %586 = vst [vmem:[%s10689_s15 + $0x298] sm:$0xff] %v585_v19   ;;  %v589_v20 = vld [vmem:[%s10681_s14 + $0x540] sm:$0xff]   ;;  %v593_v21 = vld [vmem:[%s10681_s14 + $0x550] sm:$0xff]  }
  0x3c   : > { %v597_v22 = vld [vmem:[%s10681_s14 + $0x560] sm:$0xff]   ;;  %590 = vst [vmem:[%s10689_s15 + $0x2a0] sm:$0xff] %v589_v20   ;;  %594 = vst [vmem:[%s10689_s15 + $0x2a8] sm:$0xff] %v593_v21   ;;  %v601_v23 = vld [vmem:[%s10681_s14 + $0x570] sm:$0xff]  }
  0x3d   : > { %598 = vst [vmem:[%s10689_s15 + $0x2b0] sm:$0xff] %v597_v22   ;;  %v605_v24 = vld [vmem:[%s10681_s14 + $0x580] sm:$0xff]   ;;  %v609_v25 = vld [vmem:[%s10681_s14 + $0x590] sm:$0xff]   ;;  %602 = vst [vmem:[%s10689_s15 + $0x2b8] sm:$0xff] %v601_v23  }
  0x3e   : > { %606 = vst [vmem:[%s10689_s15 + $0x2c0] sm:$0xff] %v605_v24   ;;  %610 = vst [vmem:[%s10689_s15 + $0x2c8] sm:$0xff] %v609_v25   ;;  %v613_v26 = vld [vmem:[%s10681_s14 + $0x5a0] sm:$0xff]   ;;  %v617_v27 = vld [vmem:[%s10681_s14 + $0x5b0] sm:$0xff]  }
  0x3f   : > { %v621_v28 = vld [vmem:[%s10681_s14 + $0x5c0] sm:$0xff]   ;;  %614 = vst [vmem:[%s10689_s15 + $0x2d0] sm:$0xff] %v613_v26   ;;  %618 = vst [vmem:[%s10689_s15 + $0x2d8] sm:$0xff] %v617_v27   ;;  %v625_v29 = vld [vmem:[%s10681_s14 + $0x5d0] sm:$0xff]  }
  0x40   : > { %622 = vst [vmem:[%s10689_s15 + $0x2e0] sm:$0xff] %v621_v28   ;;  %v629_v30 = vld [vmem:[%s10681_s14 + $0x5e0] sm:$0xff]   ;;  %v633_v31 = vld [vmem:[%s10681_s14 + $0x5f0] sm:$0xff]   ;;  %626 = vst [vmem:[%s10689_s15 + $0x2e8] sm:$0xff] %v625_v29  }
  0x41   : > { %630 = vst [vmem:[%s10689_s15 + $0x2f0] sm:$0xff] %v629_v30   ;;  %634 = vst [vmem:[%s10689_s15 + $0x2f8] sm:$0xff] %v633_v31   ;;  %v637_v32 = vld [vmem:[%s10681_s14 + $0x600] sm:$0xff]   ;;  %v641_v33 = vld [vmem:[%s10681_s14 + $0x610] sm:$0xff]  }
  0x42   : > { %v645_v34 = vld [vmem:[%s10681_s14 + $0x620] sm:$0xff]   ;;  %638 = vst [vmem:[%s10689_s15 + $0x300] sm:$0xff] %v637_v32   ;;  %642 = vst [vmem:[%s10689_s15 + $0x308] sm:$0xff] %v641_v33   ;;  %v649_v35 = vld [vmem:[%s10681_s14 + $0x630] sm:$0xff]  }
  0x43   : > { %646 = vst [vmem:[%s10689_s15 + $0x310] sm:$0xff] %v645_v34   ;;  %v653_v36 = vld [vmem:[%s10681_s14 + $0x640] sm:$0xff]   ;;  %v657_v37 = vld [vmem:[%s10681_s14 + $0x650] sm:$0xff]   ;;  %650 = vst [vmem:[%s10689_s15 + $0x318] sm:$0xff] %v649_v35  }
  0x44   : > { %654 = vst [vmem:[%s10689_s15 + $0x320] sm:$0xff] %v653_v36   ;;  %658 = vst [vmem:[%s10689_s15 + $0x328] sm:$0xff] %v657_v37   ;;  %v661_v38 = vld [vmem:[%s10681_s14 + $0x660] sm:$0xff]   ;;  %v665_v39 = vld [vmem:[%s10681_s14 + $0x670] sm:$0xff]  }
  0x45   : > { %v669_v40 = vld [vmem:[%s10681_s14 + $0x680] sm:$0xff]   ;;  %662 = vst [vmem:[%s10689_s15 + $0x330] sm:$0xff] %v661_v38   ;;  %666 = vst [vmem:[%s10689_s15 + $0x338] sm:$0xff] %v665_v39   ;;  %v673_v41 = vld [vmem:[%s10681_s14 + $0x690] sm:$0xff]  }
  0x46   : > { %670 = vst [vmem:[%s10689_s15 + $0x340] sm:$0xff] %v669_v40   ;;  %v677_v42 = vld [vmem:[%s10681_s14 + $0x6a0] sm:$0xff]   ;;  %v681_v43 = vld [vmem:[%s10681_s14 + $0x6b0] sm:$0xff]   ;;  %674 = vst [vmem:[%s10689_s15 + $0x348] sm:$0xff] %v673_v41  }
  0x47   : > { %678 = vst [vmem:[%s10689_s15 + $0x350] sm:$0xff] %v677_v42   ;;  %682 = vst [vmem:[%s10689_s15 + $0x358] sm:$0xff] %v681_v43   ;;  %v685_v44 = vld [vmem:[%s10681_s14 + $0x6c0] sm:$0xff]   ;;  %v689_v45 = vld [vmem:[%s10681_s14 + $0x6d0] sm:$0xff]  }
  0x48   : > { %v693_v46 = vld [vmem:[%s10681_s14 + $0x6e0] sm:$0xff]   ;;  %686 = vst [vmem:[%s10689_s15 + $0x360] sm:$0xff] %v685_v44   ;;  %690 = vst [vmem:[%s10689_s15 + $0x368] sm:$0xff] %v689_v45   ;;  %v697_v47 = vld [vmem:[%s10681_s14 + $0x6f0] sm:$0xff]  }
  0x49   : > { %694 = vst [vmem:[%s10689_s15 + $0x370] sm:$0xff] %v693_v46   ;;  %v701_v48 = vld [vmem:[%s10681_s14 + $0x700] sm:$0xff]   ;;  %v705_v49 = vld [vmem:[%s10681_s14 + $0x710] sm:$0xff]   ;;  %698 = vst [vmem:[%s10689_s15 + $0x378] sm:$0xff] %v697_v47  }
  0x4a   : > { %702 = vst [vmem:[%s10689_s15 + $0x380] sm:$0xff] %v701_v48   ;;  %706 = vst [vmem:[%s10689_s15 + $0x388] sm:$0xff] %v705_v49   ;;  %v709_v50 = vld [vmem:[%s10681_s14 + $0x720] sm:$0xff]   ;;  %v713_v51 = vld [vmem:[%s10681_s14 + $0x730] sm:$0xff]  }
  0x4b   : > { %v717_v52 = vld [vmem:[%s10681_s14 + $0x740] sm:$0xff]   ;;  %710 = vst [vmem:[%s10689_s15 + $0x390] sm:$0xff] %v709_v50   ;;  %714 = vst [vmem:[%s10689_s15 + $0x398] sm:$0xff] %v713_v51   ;;  %v721_v53 = vld [vmem:[%s10681_s14 + $0x750] sm:$0xff]  }
  0x4c   : > { %718 = vst [vmem:[%s10689_s15 + $0x3a0] sm:$0xff] %v717_v52   ;;  %v725_v54 = vld [vmem:[%s10681_s14 + $0x760] sm:$0xff]   ;;  %v729_v55 = vld [vmem:[%s10681_s14 + $0x770] sm:$0xff]   ;;  %722 = vst [vmem:[%s10689_s15 + $0x3a8] sm:$0xff] %v721_v53  }
  0x4d   : > { %726 = vst [vmem:[%s10689_s15 + $0x3b0] sm:$0xff] %v725_v54   ;;  %730 = vst [vmem:[%s10689_s15 + $0x3b8] sm:$0xff] %v729_v55   ;;  %v733_v56 = vld [vmem:[%s10681_s14 + $0x780] sm:$0xff]   ;;  %v737_v57 = vld [vmem:[%s10681_s14 + $0x790] sm:$0xff]  }
  0x4e   : > { %v741_v58 = vld [vmem:[%s10681_s14 + $0x7a0] sm:$0xff]   ;;  %734 = vst [vmem:[%s10689_s15 + $0x3c0] sm:$0xff] %v733_v56   ;;  %738 = vst [vmem:[%s10689_s15 + $0x3c8] sm:$0xff] %v737_v57   ;;  %v745_v59 = vld [vmem:[%s10681_s14 + $0x7b0] sm:$0xff]  }
  0x4f   : > { %742 = vst [vmem:[%s10689_s15 + $0x3d0] sm:$0xff] %v741_v58   ;;  %v749_v60 = vld [vmem:[%s10681_s14 + $0x7c0] sm:$0xff]   ;;  %v753_v61 = vld [vmem:[%s10681_s14 + $0x7d0] sm:$0xff]   ;;  %746 = vst [vmem:[%s10689_s15 + $0x3d8] sm:$0xff] %v745_v59  }
  0x50   : > { %750 = vst [vmem:[%s10689_s15 + $0x3e0] sm:$0xff] %v749_v60   ;;  %754 = vst [vmem:[%s10689_s15 + $0x3e8] sm:$0xff] %v753_v61   ;;  %v757_v62 = vld [vmem:[%s10681_s14 + $0x7e0] sm:$0xff]   ;;  %v761_v63 = vld [vmem:[%s10681_s14 + $0x7f0] sm:$0xff]  }
  0x51   : > { %v765_v0 = vld [vmem:[%s10681_s14 + $0x800] sm:$0xff]   ;;  %758 = vst [vmem:[%s10689_s15 + $0x3f0] sm:$0xff] %v757_v62   ;;  %762 = vst [vmem:[%s10689_s15 + $0x3f8] sm:$0xff] %v761_v63   ;;  %v769_v1 = vld [vmem:[%s10681_s14 + $0x810] sm:$0xff]  }
  0x52   : > { %766 = vst [vmem:[%s10689_s15 + $0x400] sm:$0xff] %v765_v0   ;;  %v773_v2 = vld [vmem:[%s10681_s14 + $0x820] sm:$0xff]   ;;  %v777_v3 = vld [vmem:[%s10681_s14 + $0x830] sm:$0xff]   ;;  %770 = vst [vmem:[%s10689_s15 + $0x408] sm:$0xff] %v769_v1  }
  0x53   : > { %774 = vst [vmem:[%s10689_s15 + $0x410] sm:$0xff] %v773_v2   ;;  %778 = vst [vmem:[%s10689_s15 + $0x418] sm:$0xff] %v777_v3   ;;  %v781_v4 = vld [vmem:[%s10681_s14 + $0x840] sm:$0xff]   ;;  %v785_v5 = vld [vmem:[%s10681_s14 + $0x850] sm:$0xff]  }
  0x54   : > { %v789_v6 = vld [vmem:[%s10681_s14 + $0x860] sm:$0xff]   ;;  %782 = vst [vmem:[%s10689_s15 + $0x420] sm:$0xff] %v781_v4   ;;  %786 = vst [vmem:[%s10689_s15 + $0x428] sm:$0xff] %v785_v5   ;;  %v793_v7 = vld [vmem:[%s10681_s14 + $0x870] sm:$0xff]  }
  0x55   : > { %790 = vst [vmem:[%s10689_s15 + $0x430] sm:$0xff] %v789_v6   ;;  %v797_v8 = vld [vmem:[%s10681_s14 + $0x880] sm:$0xff]   ;;  %v801_v9 = vld [vmem:[%s10681_s14 + $0x890] sm:$0xff]   ;;  %794 = vst [vmem:[%s10689_s15 + $0x438] sm:$0xff] %v793_v7  }
  0x56   : > { %798 = vst [vmem:[%s10689_s15 + $0x440] sm:$0xff] %v797_v8   ;;  %802 = vst [vmem:[%s10689_s15 + $0x448] sm:$0xff] %v801_v9   ;;  %v805_v10 = vld [vmem:[%s10681_s14 + $0x8a0] sm:$0xff]   ;;  %v809_v11 = vld [vmem:[%s10681_s14 + $0x8b0] sm:$0xff]  }
  0x57   : > { %v813_v12 = vld [vmem:[%s10681_s14 + $0x8c0] sm:$0xff]   ;;  %806 = vst [vmem:[%s10689_s15 + $0x450] sm:$0xff] %v805_v10   ;;  %810 = vst [vmem:[%s10689_s15 + $0x458] sm:$0xff] %v809_v11   ;;  %v817_v13 = vld [vmem:[%s10681_s14 + $0x8d0] sm:$0xff]  }
  0x58   : > { %814 = vst [vmem:[%s10689_s15 + $0x460] sm:$0xff] %v813_v12   ;;  %v821_v14 = vld [vmem:[%s10681_s14 + $0x8e0] sm:$0xff]   ;;  %v825_v15 = vld [vmem:[%s10681_s14 + $0x8f0] sm:$0xff]   ;;  %818 = vst [vmem:[%s10689_s15 + $0x468] sm:$0xff] %v817_v13  }
  0x59   : > { %822 = vst [vmem:[%s10689_s15 + $0x470] sm:$0xff] %v821_v14   ;;  %826 = vst [vmem:[%s10689_s15 + $0x478] sm:$0xff] %v825_v15   ;;  %v829_v16 = vld [vmem:[%s10681_s14 + $0x900] sm:$0xff]   ;;  %v833_v17 = vld [vmem:[%s10681_s14 + $0x910] sm:$0xff]  }
  0x5a   : > { %v837_v18 = vld [vmem:[%s10681_s14 + $0x920] sm:$0xff]   ;;  %830 = vst [vmem:[%s10689_s15 + $0x480] sm:$0xff] %v829_v16   ;;  %834 = vst [vmem:[%s10689_s15 + $0x488] sm:$0xff] %v833_v17   ;;  %v841_v19 = vld [vmem:[%s10681_s14 + $0x930] sm:$0xff]  }
  0x5b   : > { %838 = vst [vmem:[%s10689_s15 + $0x490] sm:$0xff] %v837_v18   ;;  %v845_v20 = vld [vmem:[%s10681_s14 + $0x940] sm:$0xff]   ;;  %v849_v21 = vld [vmem:[%s10681_s14 + $0x950] sm:$0xff]   ;;  %842 = vst [vmem:[%s10689_s15 + $0x498] sm:$0xff] %v841_v19  }
  0x5c   : > { %846 = vst [vmem:[%s10689_s15 + $0x4a0] sm:$0xff] %v845_v20   ;;  %850 = vst [vmem:[%s10689_s15 + $0x4a8] sm:$0xff] %v849_v21   ;;  %v853_v22 = vld [vmem:[%s10681_s14 + $0x960] sm:$0xff]   ;;  %v857_v23 = vld [vmem:[%s10681_s14 + $0x970] sm:$0xff]  }
  0x5d   : > { %v861_v24 = vld [vmem:[%s10681_s14 + $0x980] sm:$0xff]   ;;  %854 = vst [vmem:[%s10689_s15 + $0x4b0] sm:$0xff] %v853_v22   ;;  %858 = vst [vmem:[%s10689_s15 + $0x4b8] sm:$0xff] %v857_v23   ;;  %v865_v25 = vld [vmem:[%s10681_s14 + $0x990] sm:$0xff]  }
  0x5e   : > { %862 = vst [vmem:[%s10689_s15 + $0x4c0] sm:$0xff] %v861_v24   ;;  %v869_v26 = vld [vmem:[%s10681_s14 + $0x9a0] sm:$0xff]   ;;  %v873_v27 = vld [vmem:[%s10681_s14 + $0x9b0] sm:$0xff]   ;;  %866 = vst [vmem:[%s10689_s15 + $0x4c8] sm:$0xff] %v865_v25  }
  0x5f   : > { %870 = vst [vmem:[%s10689_s15 + $0x4d0] sm:$0xff] %v869_v26   ;;  %874 = vst [vmem:[%s10689_s15 + $0x4d8] sm:$0xff] %v873_v27   ;;  %v877_v28 = vld [vmem:[%s10681_s14 + $0x9c0] sm:$0xff]   ;;  %v881_v29 = vld [vmem:[%s10681_s14 + $0x9d0] sm:$0xff]  }
  0x60   : > { %v885_v30 = vld [vmem:[%s10681_s14 + $0x9e0] sm:$0xff]   ;;  %878 = vst [vmem:[%s10689_s15 + $0x4e0] sm:$0xff] %v877_v28   ;;  %882 = vst [vmem:[%s10689_s15 + $0x4e8] sm:$0xff] %v881_v29   ;;  %v889_v31 = vld [vmem:[%s10681_s14 + $0x9f0] sm:$0xff]  }
  0x61   : > { %886 = vst [vmem:[%s10689_s15 + $0x4f0] sm:$0xff] %v885_v30   ;;  %v893_v32 = vld [vmem:[%s10681_s14 + $0xa00] sm:$0xff]   ;;  %v897_v33 = vld [vmem:[%s10681_s14 + $0xa10] sm:$0xff]   ;;  %890 = vst [vmem:[%s10689_s15 + $0x4f8] sm:$0xff] %v889_v31  }
  0x62   : > { %894 = vst [vmem:[%s10689_s15 + $0x500] sm:$0xff] %v893_v32   ;;  %898 = vst [vmem:[%s10689_s15 + $0x508] sm:$0xff] %v897_v33   ;;  %v901_v34 = vld [vmem:[%s10681_s14 + $0xa20] sm:$0xff]   ;;  %v905_v35 = vld [vmem:[%s10681_s14 + $0xa30] sm:$0xff]  }
  0x63   : > { %v909_v36 = vld [vmem:[%s10681_s14 + $0xa40] sm:$0xff]   ;;  %902 = vst [vmem:[%s10689_s15 + $0x510] sm:$0xff] %v901_v34   ;;  %906 = vst [vmem:[%s10689_s15 + $0x518] sm:$0xff] %v905_v35   ;;  %v913_v37 = vld [vmem:[%s10681_s14 + $0xa50] sm:$0xff]  }
  0x64   : > { %910 = vst [vmem:[%s10689_s15 + $0x520] sm:$0xff] %v909_v36   ;;  %v917_v38 = vld [vmem:[%s10681_s14 + $0xa60] sm:$0xff]   ;;  %v921_v39 = vld [vmem:[%s10681_s14 + $0xa70] sm:$0xff]   ;;  %914 = vst [vmem:[%s10689_s15 + $0x528] sm:$0xff] %v913_v37  }
  0x65   : > { %918 = vst [vmem:[%s10689_s15 + $0x530] sm:$0xff] %v917_v38   ;;  %922 = vst [vmem:[%s10689_s15 + $0x538] sm:$0xff] %v921_v39   ;;  %v925_v40 = vld [vmem:[%s10681_s14 + $0xa80] sm:$0xff]   ;;  %v929_v41 = vld [vmem:[%s10681_s14 + $0xa90] sm:$0xff]  }
  0x66   : > { %v933_v42 = vld [vmem:[%s10681_s14 + $0xaa0] sm:$0xff]   ;;  %926 = vst [vmem:[%s10689_s15 + $0x540] sm:$0xff] %v925_v40   ;;  %930 = vst [vmem:[%s10689_s15 + $0x548] sm:$0xff] %v929_v41   ;;  %v937_v43 = vld [vmem:[%s10681_s14 + $0xab0] sm:$0xff]  }
  0x67   : > { %934 = vst [vmem:[%s10689_s15 + $0x550] sm:$0xff] %v933_v42   ;;  %v941_v44 = vld [vmem:[%s10681_s14 + $0xac0] sm:$0xff]   ;;  %v945_v45 = vld [vmem:[%s10681_s14 + $0xad0] sm:$0xff]   ;;  %938 = vst [vmem:[%s10689_s15 + $0x558] sm:$0xff] %v937_v43  }
  0x68   : > { %942 = vst [vmem:[%s10689_s15 + $0x560] sm:$0xff] %v941_v44   ;;  %946 = vst [vmem:[%s10689_s15 + $0x568] sm:$0xff] %v945_v45   ;;  %v949_v46 = vld [vmem:[%s10681_s14 + $0xae0] sm:$0xff]   ;;  %v953_v47 = vld [vmem:[%s10681_s14 + $0xaf0] sm:$0xff]  }
  0x69   : > { %v957_v48 = vld [vmem:[%s10681_s14 + $0xb00] sm:$0xff]   ;;  %950 = vst [vmem:[%s10689_s15 + $0x570] sm:$0xff] %v949_v46   ;;  %954 = vst [vmem:[%s10689_s15 + $0x578] sm:$0xff] %v953_v47   ;;  %v961_v49 = vld [vmem:[%s10681_s14 + $0xb10] sm:$0xff]  }
  0x6a   : > { %958 = vst [vmem:[%s10689_s15 + $0x580] sm:$0xff] %v957_v48   ;;  %v965_v50 = vld [vmem:[%s10681_s14 + $0xb20] sm:$0xff]   ;;  %v969_v51 = vld [vmem:[%s10681_s14 + $0xb30] sm:$0xff]   ;;  %962 = vst [vmem:[%s10689_s15 + $0x588] sm:$0xff] %v961_v49  }
  0x6b   : > { %966 = vst [vmem:[%s10689_s15 + $0x590] sm:$0xff] %v965_v50   ;;  %970 = vst [vmem:[%s10689_s15 + $0x598] sm:$0xff] %v969_v51   ;;  %v973_v52 = vld [vmem:[%s10681_s14 + $0xb40] sm:$0xff]   ;;  %v977_v53 = vld [vmem:[%s10681_s14 + $0xb50] sm:$0xff]  }
  0x6c   : > { %v981_v54 = vld [vmem:[%s10681_s14 + $0xb60] sm:$0xff]   ;;  %974 = vst [vmem:[%s10689_s15 + $0x5a0] sm:$0xff] %v973_v52   ;;  %978 = vst [vmem:[%s10689_s15 + $0x5a8] sm:$0xff] %v977_v53   ;;  %v985_v55 = vld [vmem:[%s10681_s14 + $0xb70] sm:$0xff]  }
  0x6d   : > { %982 = vst [vmem:[%s10689_s15 + $0x5b0] sm:$0xff] %v981_v54   ;;  %v989_v56 = vld [vmem:[%s10681_s14 + $0xb80] sm:$0xff]   ;;  %v993_v57 = vld [vmem:[%s10681_s14 + $0xb90] sm:$0xff]   ;;  %986 = vst [vmem:[%s10689_s15 + $0x5b8] sm:$0xff] %v985_v55  }
  0x6e   : > { %990 = vst [vmem:[%s10689_s15 + $0x5c0] sm:$0xff] %v989_v56   ;;  %994 = vst [vmem:[%s10689_s15 + $0x5c8] sm:$0xff] %v993_v57   ;;  %v997_v58 = vld [vmem:[%s10681_s14 + $0xba0] sm:$0xff]   ;;  %v1001_v59 = vld [vmem:[%s10681_s14 + $0xbb0] sm:$0xff]  }
  0x6f   : > { %v1005_v60 = vld [vmem:[%s10681_s14 + $0xbc0] sm:$0xff]   ;;  %998 = vst [vmem:[%s10689_s15 + $0x5d0] sm:$0xff] %v997_v58   ;;  %1002 = vst [vmem:[%s10689_s15 + $0x5d8] sm:$0xff] %v1001_v59   ;;  %v1009_v61 = vld [vmem:[%s10681_s14 + $0xbd0] sm:$0xff]  }
  0x70   : > { %1006 = vst [vmem:[%s10689_s15 + $0x5e0] sm:$0xff] %v1005_v60   ;;  %v1013_v62 = vld [vmem:[%s10681_s14 + $0xbe0] sm:$0xff]   ;;  %v1017_v63 = vld [vmem:[%s10681_s14 + $0xbf0] sm:$0xff]   ;;  %1010 = vst [vmem:[%s10689_s15 + $0x5e8] sm:$0xff] %v1009_v61  }
  0x71   : > { %1014 = vst [vmem:[%s10689_s15 + $0x5f0] sm:$0xff] %v1013_v62   ;;  %1018 = vst [vmem:[%s10689_s15 + $0x5f8] sm:$0xff] %v1017_v63   ;;  %v1021_v0 = vld [vmem:[%s10681_s14 + $0xc00] sm:$0xff]   ;;  %v1025_v1 = vld [vmem:[%s10681_s14 + $0xc10] sm:$0xff]  }
  0x72   : > { %v1029_v2 = vld [vmem:[%s10681_s14 + $0xc20] sm:$0xff]   ;;  %1022 = vst [vmem:[%s10689_s15 + $0x600] sm:$0xff] %v1021_v0   ;;  %1026 = vst [vmem:[%s10689_s15 + $0x608] sm:$0xff] %v1025_v1   ;;  %v1033_v3 = vld [vmem:[%s10681_s14 + $0xc30] sm:$0xff]  }
  0x73   : > { %1030 = vst [vmem:[%s10689_s15 + $0x610] sm:$0xff] %v1029_v2   ;;  %1034 = vst [vmem:[%s10689_s15 + $0x618] sm:$0xff] %v1033_v3  }
  0x74 PF: > { %p9248_p5 = scmp.ge.s32.totalorder %s10597_s26, 1  ;;  %p1842_p6 = scmp.lt.s32.totalorder %s10597_s26, 3 }
  0x76   : > { %p1843_p7 = pnand %p9248_p5, %p1842_p6 }
  0x78   : > { %1846 = sbr.rel (%p1843_p7) target bundleno = 1762 (0x6e2), region = 85 }
  0x7f   : > { %v10353_v4 = vld [vmem:[%s14363_s1] sm:$0xff]   ;;  %s1849_s18 = sand.u32 1, %s10589_s24   ;;  %vm3275_vm0 = vcmask 130048   ;;  %v14370_v45 = vmov 0   ;;  %s10600_s21 = smov 48   ;;  %vm7010_vm1 = vcmask 261120  }
  0x80   : > { %s10320_s19 = smul.u32 1568, %s1849_s18  ;;  %9923 = vmatprep.subr.bf16.mxu0 %v10353_v4  ;;  %10317 = vmatprep.subr.bf16.mxu1 %v10353_v4  ;;  %s10601_s22 = smov 16   ;;  %vm7097_vm2 = vcmask 392192   ;;  %vm7190_vm3 = vcmask 523264   ;;  %vm7289_vm4 = vcmask 654336   ;;  %vm7388_vm5 = vcmask 785408  }
  0x81   : > { %9924 = vmatpush3.bf16.msra.mxu0 %v10353_v4  ;;  %10318 = vmatpush3.bf16.msra.mxu1 %v10353_v4  ;;  %s10602_s23 = smov 96   ;;  %s10603_s24 = smov 32   ;;  %vm7481_vm6 = vcmask 916480   ;;  %vm9112_vm7 = vcmask 80896  }
  0x82   : > { %s11083_s20 = scalar_lea.vmem [#allocation2], %s10320_s19  ;;  %6352 = vrot.lane.b32.xlu1 %v14370_v45, %s10600_s21  ;;  %6096 = vrot.lane.b32.xlu0 %v14370_v45, %s10601_s22  ;;  %s10604_s9 = smov 80  }
  0x83   : > { %v10354_v5 = vld [vmem:[%s11083_s20] sm:$0xff]   ;;  %v10355_v6 = vld [vmem:[%s11083_s20 + $0x8] sm:$0xff]   ;;  %v10358_v9 = vld [vmem:[%s11083_s20 + $0x10] sm:$0xff]   ;;  %7819 = vmatprep.subr.bf16.mxu1 %v14370_v45  ;;  %s10605_s10 = smov 64   ;;  %s10606_s11 = smov 112  }
  0x84   : > { %9925 = vmatprep.mubr.msk.bf16.mxu0 %vm3275_vm0, %v10354_v5  ;;  %v10356_v7 = vld [vmem:[%s11083_s20 + $0x520] sm:$0xff]   ;;  %v10357_v8 = vld [vmem:[%s11083_s20 + $0x528] sm:$0xff]   ;;  %v10360_v10 = vld [vmem:[%s11083_s20 + $0x530] sm:$0xff]  }
  0x85   : > { %9926 = vmatmul.mubr.msk.bf16.vlgmr.msra.gmra.mrb[0].mxu0 %vm3275_vm0, %v10355_v6  ;;  %10253 = vmatprep.mubr.msk.bf16.mxu1 %vm3275_vm0, %v10356_v7  ;;  %v10359_v11 = vld [vmem:[%s11083_s20 + $0x18] sm:$0xff]   ;;  %v10362_v12 = vld [vmem:[%s11083_s20 + $0x20] sm:$0xff]   ;;  %v10363_v15 = vld [vmem:[%s11083_s20 + $0x28] sm:$0xff]  }
  0x86   : > { %10254 = vmatmul.mubr.msk.bf16.vlgmr.msra.gmra.mrb[0].mxu1 %vm3275_vm0, %v10357_v8  ;;  %9929 = vmatprep.mubr.msk.bf16.mxu0 %vm3275_vm0, %v10358_v9  ;;  %v10361_v13 = vld [vmem:[%s11083_s20 + $0x538] sm:$0xff]   ;;  %v10364_v14 = vld [vmem:[%s11083_s20 + $0x540] sm:$0xff]   ;;  %v10365_v16 = vld [vmem:[%s11083_s20 + $0x30] sm:$0xff]  }
  0x87   : > { %10257 = vmatprep.mubr.msk.bf16.mxu1 %vm3275_vm0, %v10360_v10  ;;  %v10366_v17 = vld [vmem:[%s11083_s20 + $0x548] sm:$0xff]   ;;  %v10367_v18 = vld [vmem:[%s11083_s20 + $0x38] sm:$0xff]   ;;  %v10368_v19 = vld [vmem:[%s11083_s20 + $0x40] sm:$0xff]   ;;  %6696 = vrot.lane.b32.xlu1 %v14370_v45, %s10602_s23 }
  0x88   : > { %v10369_v20 = vld [vmem:[%s11083_s20 + $0x48] sm:$0xff]   ;;  %v10370_v21 = vld [vmem:[%s11083_s20 + $0x50] sm:$0xff]   ;;  %v10371_v22 = vld [vmem:[%s11083_s20 + $0x58] sm:$0xff]   ;;  %6224 = vrot.lane.b32.xlu0 %v14370_v45, %s10603_s24 }
  0x89   : > { %v10372_v23 = vld [vmem:[%s11083_s20 + $0x60] sm:$0xff]   ;;  %v10373_v24 = vld [vmem:[%s11083_s20 + $0x68] sm:$0xff]   ;;  %v10374_v25 = vld [vmem:[%s11083_s20 + $0x70] sm:$0xff]  }
  0x8a   : > { %v10406_v26 = vld [vmem:[%s11083_s20 + $0x550] sm:$0xff]   ;;  %v10407_v27 = vld [vmem:[%s11083_s20 + $0x558] sm:$0xff]   ;;  %v10376_v29 = vld [vmem:[%s11083_s20 + $0x80] sm:$0xff]  }
  0x8b   : > { %v10375_v28 = vld [vmem:[%s11083_s20 + $0x78] sm:$0xff]   ;;  %v10410_v30 = vld [vmem:[%s11083_s20 + $0x560] sm:$0xff]   ;;  %v10411_v31 = vld [vmem:[%s11083_s20 + $0x568] sm:$0xff]  }
  0x8c   : > { %v10377_v32 = vld [vmem:[%s11083_s20 + $0x88] sm:$0xff]   ;;  %v10378_v33 = vld [vmem:[%s11083_s20 + $0x90] sm:$0xff]   ;;  %v10415_v35 = vld [vmem:[%s11083_s20 + $0x578] sm:$0xff]  }
  0x8d   : > { %9930 = vmatmul.mubr.msk.bf16.gmra.mrb[4].mxu0 %vm3275_vm0, %v10359_v11  ;;  %v10414_v34 = vld [vmem:[%s11083_s20 + $0x570] sm:$0xff]   ;;  %v10379_v36 = vld [vmem:[%s11083_s20 + $0x98] sm:$0xff]   ;;  %v10380_v37 = vld [vmem:[%s11083_s20 + $0xa0] sm:$0xff]  }
  0x8e   : > { %9933 = vmatprep.mubr.msk.bf16.mxu0 %vm3275_vm0, %v10362_v12  ;;  %10258 = vmatmul.mubr.msk.bf16.gmra.mrb[4].mxu1 %vm3275_vm0, %v10361_v13  ;;  %v10418_v38 = vld [vmem:[%s11083_s20 + $0x580] sm:$0xff]   ;;  %v10419_v39 = vld [vmem:[%s11083_s20 + $0x588] sm:$0xff]   ;;  %v10382_v41 = vld [vmem:[%s11083_s20 + $0xb0] sm:$0xff]  }
  0x8f   : > { %10261 = vmatprep.mubr.msk.bf16.mxu1 %vm3275_vm0, %v10364_v14  ;;  %v10381_v40 = vld [vmem:[%s11083_s20 + $0xa8] sm:$0xff]   ;;  %v10422_v42 = vld [vmem:[%s11083_s20 + $0x590] sm:$0xff]   ;;  %v10423_v43 = vld [vmem:[%s11083_s20 + $0x598] sm:$0xff]  }
  0x90   : > { %v10383_v44 = vld [vmem:[%s11083_s20 + $0xb8] sm:$0xff]   ;;  %v10384_v46 = vld [vmem:[%s11083_s20 + $0xc0] sm:$0xff]   ;;  %v10427_v48 = vld [vmem:[%s11083_s20 + $0x5a8] sm:$0xff]  }
  0x91   : > { %v10426_v47 = vld [vmem:[%s11083_s20 + $0x5a0] sm:$0xff]   ;;  %v10385_v49 = vld [vmem:[%s11083_s20 + $0xc8] sm:$0xff]   ;;  %v10386_v50 = vld [vmem:[%s11083_s20 + $0xd0] sm:$0xff]  }
  0x92   : > { %v10430_v51 = vld [vmem:[%s11083_s20 + $0x5b0] sm:$0xff]   ;;  %v10387_v52 = vld [vmem:[%s11083_s20 + $0xd8] sm:$0xff]   ;;  %v10388_v54 = vld [vmem:[%s11083_s20 + $0xe0] sm:$0xff]  }
  0x93   : > { %v10431_v53 = vld [vmem:[%s11083_s20 + $0x5b8] sm:$0xff]   ;;  %v10434_v55 = vld [vmem:[%s11083_s20 + $0x5c0] sm:$0xff]   ;;  %v10389_v56 = vld [vmem:[%s11083_s20 + $0xe8] sm:$0xff]  }
  0x94   : > { %v10435_v57 = vld [vmem:[%s11083_s20 + $0x5c8] sm:$0xff]   ;;  %v10390_v58 = vld [vmem:[%s11083_s20 + $0xf0] sm:$0xff]   ;;  %v10391_v60 = vld [vmem:[%s11083_s20 + $0xf8] sm:$0xff]  }
  0x95   : > { %9934 = vmatmul.mubr.msk.bf16.gmra.mrb[8].mxu0 %vm3275_vm0, %v10363_v15  ;;  %v10438_v59 = vld [vmem:[%s11083_s20 + $0x5d0] sm:$0xff]   ;;  %v10439_v61 = vld [vmem:[%s11083_s20 + $0x5d8] sm:$0xff]   ;;  %v10392_v62 = vld [vmem:[%s11083_s20 + $0x100] sm:$0xff]  }
  0x96   : > { %9937 = vmatprep.mubr.msk.bf16.mxu0 %vm3275_vm0, %v10365_v16  ;;  %10262 = vmatmul.mubr.msk.bf16.gmra.mrb[8].mxu1 %vm3275_vm0, %v10366_v17  ;;  %v10442_v63 = vld [vmem:[%s11083_s20 + $0x5e0] sm:$0xff]   ;;  %v10393_v0 = vld [vmem:[%s11083_s20 + $0x108] sm:$0xff]   ;;  %v10394_v2 = vld [vmem:[%s11083_s20 + $0x110] sm:$0xff]  }
  0x97   : > { %10265 = vmatprep.mubr.msk.bf16.mxu1 %vm3275_vm0, %v10406_v26  ;;  %v10443_v1 = vld [vmem:[%s11083_s20 + $0x5e8] sm:$0xff]   ;;  %v10446_v3 = vld [vmem:[%s11083_s20 + $0x5f0] sm:$0xff]   ;;  %v10395_v4 = vld [vmem:[%s11083_s20 + $0x118] sm:$0xff]  }
  0x98   : > { %v10447_v5 = vld [vmem:[%s11083_s20 + $0x5f8] sm:$0xff]   ;;  %v10396_v6 = vld [vmem:[%s11083_s20 + $0x120] sm:$0xff]   ;;  %v10397_v8 = vld [vmem:[%s11083_s20 + $0x128] sm:$0xff]  }
  0x99   : > { %v10450_v7 = vld [vmem:[%s11083_s20 + $0x600] sm:$0xff]   ;;  %v10451_v9 = vld [vmem:[%s11083_s20 + $0x608] sm:$0xff]   ;;  %v10398_v10 = vld [vmem:[%s11083_s20 + $0x130] sm:$0xff]  }
  0x9a   : > { %v10454_v11 = vld [vmem:[%s11083_s20 + $0x610] sm:$0xff]   ;;  %v10399_v12 = vld [vmem:[%s11083_s20 + $0x138] sm:$0xff]   ;;  %v10400_v14 = vld [vmem:[%s11083_s20 + $0x140] sm:$0xff]  }
  0x9b   : > { %v10455_v13 = vld [vmem:[%s11083_s20 + $0x618] sm:$0xff]   ;;  %v10401_v15 = vld [vmem:[%s11083_s20 + $0x148] sm:$0xff]   ;;  %v10402_v16 = vld [vmem:[%s11083_s20 + $0x150] sm:$0xff]  }
  0x9c   : > { %v10403_v17 = vld [vmem:[%s11083_s20 + $0x158] sm:$0xff]   ;;  %v10420_v26 = vld [vmem:[%s11083_s20 + $0x1a0] sm:$0xff]  }
  0x9d   : > { %9938 = vmatmul.mubr.msk.bf16.gmra.mrb[12].mxu0 %vm3275_vm0, %v10367_v18  ;;  %v10404_v18 = vld [vmem:[%s11083_s20 + $0x160] sm:$0xff]  }
  0x9e   : > { %9941 = vmatprep.mubr.msk.bf16.mxu0 %vm3275_vm0, %v10368_v19  ;;  %10266 = vmatmul.mubr.msk.bf16.gmra.mrb[12].mxu1 %vm3275_vm0, %v10407_v27  ;;  %v10405_v19 = vld [vmem:[%s11083_s20 + $0x168] sm:$0xff]  }
  0x9f   : > { %10269 = vmatprep.mubr.msk.bf16.mxu1 %vm3275_vm0, %v10410_v30  ;;  %v10421_v27 = vld [vmem:[%s11083_s20 + $0x1a8] sm:$0xff]  }
  0xa5   : > { %9942 = vmatmul.mubr.msk.bf16.gmra.mrb[16].mxu0 %vm3275_vm0, %v10369_v20  ;;  %v10408_v20 = vld [vmem:[%s11083_s20 + $0x170] sm:$0xff]  }
  0xa6   : > { %9945 = vmatprep.mubr.msk.bf16.mxu0 %vm3275_vm0, %v10370_v21  ;;  %10270 = vmatmul.mubr.msk.bf16.gmra.mrb[16].mxu1 %vm3275_vm0, %v10411_v31  ;;  %v10409_v21 = vld [vmem:[%s11083_s20 + $0x178] sm:$0xff]  }
  0xa7   : > { %10273 = vmatprep.mubr.msk.bf16.mxu1 %vm3275_vm0, %v10414_v34 }
  0xad   : > { %9946 = vmatmul.mubr.msk.bf16.gmra.mrb[20].mxu0 %vm3275_vm0, %v10371_v22  ;;  %v10412_v22 = vld [vmem:[%s11083_s20 + $0x180] sm:$0xff]  }
  0xae   : > { %9949 = vmatprep.mubr.msk.bf16.mxu0 %vm3275_vm0, %v10372_v23  ;;  %10274 = vmatmul.mubr.msk.bf16.gmra.mrb[20].mxu1 %vm3275_vm0, %v10415_v35  ;;  %v10413_v23 = vld [vmem:[%s11083_s20 + $0x188] sm:$0xff]  }
  0xaf   : > { %10277 = vmatprep.mubr.msk.bf16.mxu1 %vm3275_vm0, %v10418_v38 }
  0xb5   : > { %9950 = vmatmul.mubr.msk.bf16.gmra.mrb[24].mxu0 %vm3275_vm0, %v10373_v24  ;;  %v10416_v24 = vld [vmem:[%s11083_s20 + $0x190] sm:$0xff]  }
  0xb6   : > { %9953 = vmatprep.mubr.msk.bf16.mxu0 %vm3275_vm0, %v10374_v25  ;;  %10278 = vmatmul.mubr.msk.bf16.gmra.mrb[24].mxu1 %vm3275_vm0, %v10419_v39  ;;  %v10417_v25 = vld [vmem:[%s11083_s20 + $0x198] sm:$0xff]  }
  0xb7   : > { %10281 = vmatprep.mubr.msk.bf16.mxu1 %vm3275_vm0, %v10422_v42 }
  0xbd   : > { %9954 = vmatmul.mubr.msk.bf16.gmra.mrb[28].mxu0 %vm3275_vm0, %v10375_v28  ;;  %v10424_v28 = vld [vmem:[%s11083_s20 + $0x1b0] sm:$0xff]  }
  0xbe   : > { %9957 = vmatprep.mubr.msk.bf16.mxu0 %vm3275_vm0, %v10376_v29  ;;  %10282 = vmatmul.mubr.msk.bf16.gmra.mrb[28].mxu1 %vm3275_vm0, %v10423_v43  ;;  %v11270_v29 = vld [vmem:[%s14364_s2] ss:$0 sm:$0xff] }
  0xbf   : > { %10285 = vmatprep.mubr.msk.bf16.mxu1 %vm3275_vm0, %v10426_v47 }
  0xc5   : > { %9958 = vmatmul.mubr.msk.bf16.gmra.mrb[32].mxu0 %vm3275_vm0, %v10377_v32 }
  0xc6   : > { %9961 = vmatprep.mubr.msk.bf16.mxu0 %vm3275_vm0, %v10378_v33  ;;  %10286 = vmatmul.mubr.msk.bf16.gmra.mrb[32].mxu1 %vm3275_vm0, %v10427_v48  ;;  %v10425_v33 = vld [vmem:[%s11083_s20 + $0x1b8] sm:$0xff]  }
  0xc7   : > { %10289 = vmatprep.mubr.msk.bf16.mxu1 %vm3275_vm0, %v10430_v51 }
  0xcd   : > { %9962 = vmatmul.mubr.msk.bf16.gmra.mrb[36].mxu0 %vm3275_vm0, %v10379_v36 }
  0xce   : > { %9965 = vmatprep.mubr.msk.bf16.mxu0 %vm3275_vm0, %v10380_v37  ;;  %10290 = vmatmul.mubr.msk.bf16.gmra.mrb[36].mxu1 %vm3275_vm0, %v10431_v53  ;;  %v10428_v37 = vld [vmem:[%s11083_s20 + $0x1c0] sm:$0xff]  }
  0xcf   : > { %10293 = vmatprep.mubr.msk.bf16.mxu1 %vm3275_vm0, %v10434_v55 }
  0xd5   : > { %9966 = vmatmul.mubr.msk.bf16.gmra.mrb[40].mxu0 %vm3275_vm0, %v10381_v40 }
  0xd6   : > { %9969 = vmatprep.mubr.msk.bf16.mxu0 %vm3275_vm0, %v10382_v41  ;;  %10294 = vmatmul.mubr.msk.bf16.gmra.mrb[40].mxu1 %vm3275_vm0, %v10435_v57 }
  0xd7   : > { %10297 = vmatprep.mubr.msk.bf16.mxu1 %vm3275_vm0, %v10438_v59 }
  0xdd   : > { %9970 = vmatmul.mubr.msk.bf16.gmra.mrb[44].mxu0 %vm3275_vm0, %v10383_v44 }
  0xde   : > { %9973 = vmatprep.mubr.msk.bf16.mxu0 %vm3275_vm0, %v10384_v46  ;;  %10298 = vmatmul.mubr.msk.bf16.gmra.mrb[44].mxu1 %vm3275_vm0, %v10439_v61 }
  0xdf   : > { %10301 = vmatprep.mubr.msk.bf16.mxu1 %vm3275_vm0, %v10442_v63  ;;  %v10429_v63 = vld [vmem:[%s11083_s20 + $0x1c8] sm:$0xff]  }
  0xe5   : > { %9974 = vmatmul.mubr.msk.bf16.gmra.mrb[48].mxu0 %vm3275_vm0, %v10385_v49 }
  0xe6   : > { %9977 = vmatprep.mubr.msk.bf16.mxu0 %vm3275_vm0, %v10386_v50  ;;  %10302 = vmatmul.mubr.msk.bf16.gmra.mrb[48].mxu1 %vm3275_vm0, %v10443_v1 }
  0xe7   : > { %10305 = vmatprep.mubr.msk.bf16.mxu1 %vm3275_vm0, %v10446_v3 }
  0xed   : > { %9978 = vmatmul.mubr.msk.bf16.gmra.mrb[52].mxu0 %vm3275_vm0, %v10387_v52 }
  0xee   : > { %9981 = vmatprep.mubr.msk.bf16.mxu0 %vm3275_vm0, %v10388_v54  ;;  %10306 = vmatmul.mubr.msk.bf16.gmra.mrb[52].mxu1 %vm3275_vm0, %v10447_v5 }
  0xef   : > { %10309 = vmatprep.mubr.msk.bf16.mxu1 %vm3275_vm0, %v10450_v7 }
  0xf5   : > { %9982 = vmatmul.mubr.msk.bf16.gmra.mrb[56].mxu0 %vm3275_vm0, %v10389_v56 }
  0xf6   : > { %9985 = vmatprep.mubr.msk.bf16.mxu0 %vm3275_vm0, %v10390_v58  ;;  %10310 = vmatmul.mubr.msk.bf16.gmra.mrb[56].mxu1 %vm3275_vm0, %v10451_v9 }
  0xf7   : > { %10313 = vmatprep.mubr.msk.bf16.mxu1 %vm3275_vm0, %v10454_v11 }
  0xfd   : > { %9986 = vmatmul.mubr.msk.bf16.gmra.mrb[60].mxu0 %vm3275_vm0, %v10391_v60 }
  0xfe   : > { %9989 = vmatprep.mubr.msk.bf16.mxu0 %vm3275_vm0, %v10392_v62  ;;  %10314 = vmatmul.mubr.msk.bf16.gmra.mrb[60].mxu1 %vm3275_vm0, %v10455_v13 }
 0x105   : > { %9990 = vmatmul.mubr.msk.bf16.gmra.mrb[64].mxu0 %vm3275_vm0, %v10393_v0 }
 0x106   : > { %9993 = vmatprep.mubr.msk.bf16.mxu0 %vm3275_vm0, %v10394_v2 }
 0x10d   : > { %9994 = vmatmul.mubr.msk.bf16.gmra.mrb[68].mxu0 %vm3275_vm0, %v10395_v4  ;;  %v10432_v4 = vld [vmem:[%s11083_s20 + $0x1d0] sm:$0xff]  }
 0x10e   : > { %9997 = vmatprep.mubr.msk.bf16.mxu0 %vm3275_vm0, %v10396_v6 }
 0x115   : > { %9998 = vmatmul.mubr.msk.bf16.gmra.mrb[72].mxu0 %vm3275_vm0, %v10397_v8 }
 0x116   : > { %10001 = vmatprep.mubr.msk.bf16.mxu0 %vm3275_vm0, %v10398_v10 }
 0x11d   : > { %10002 = vmatmul.mubr.msk.bf16.gmra.mrb[76].mxu0 %vm3275_vm0, %v10399_v12 }
 0x11e   : > { %10005 = vmatprep.mubr.msk.bf16.mxu0 %vm3275_vm0, %v10400_v14 }
 0x125   : > { %10006 = vmatmul.mubr.msk.bf16.gmra.mrb[80].mxu0 %vm3275_vm0, %v10401_v15 }
 0x126   : > { %10009 = vmatprep.mubr.msk.bf16.mxu0 %vm3275_vm0, %v10402_v16 }
 0x12d   : > { %10010 = vmatmul.mubr.msk.bf16.gmra.mrb[84].mxu0 %vm3275_vm0, %v10403_v17 }
 0x12e   : > { %10013 = vmatprep.mubr.msk.bf16.mxu0 %vm3275_vm0, %v10404_v18 }
 0x135   : > { %10014 = vmatmul.mubr.msk.bf16.gmra.mrb[88].mxu0 %vm3275_vm0, %v10405_v19 }
 0x136   : > { %10017 = vmatprep.mubr.msk.bf16.mxu0 %vm3275_vm0, %v10408_v20 }
 0x13d   : > { %10018 = vmatmul.mubr.msk.bf16.gmra.mrb[92].mxu0 %vm3275_vm0, %v10409_v21 }
 0x13e   : > { %10021 = vmatprep.mubr.msk.bf16.mxu0 %vm3275_vm0, %v10412_v22 }
 0x145   : > { %10022 = vmatmul.mubr.msk.bf16.gmra.mrb[96].mxu0 %vm3275_vm0, %v10413_v23 }
 0x146   : > { %10025 = vmatprep.mubr.msk.bf16.mxu0 %vm3275_vm0, %v10416_v24 }
 0x14d   : > { %10026 = vmatmul.mubr.msk.bf16.gmra.mrb[100].mxu0 %vm3275_vm0, %v10417_v25 }
 0x14e   : > { %10029 = vmatprep.mubr.msk.bf16.mxu0 %vm3275_vm0, %v10420_v26 }
 0x155   : > { %10030 = vmatmul.mubr.msk.bf16.gmra.mrb[104].mxu0 %vm3275_vm0, %v10421_v27 }
 0x156   : > { %10033 = vmatprep.mubr.msk.bf16.mxu0 %vm3275_vm0, %v10424_v28 }
 0x158   : > { %v9927_v30 = vpop.f32.mrb[0].mxu0 }
 0x159   : > { %v3907_v31 = vadd.f32 %v9927_v30, %v11270_v29  ;;  %v3898_v32 = vpop.f32.mrb[1].mxu0  ;;  %v10255_v36 = vpop.f32.mrb[0].mxu1  ;;  %v10433_v30 = vld [vmem:[%s11083_s20 + $0x1d8] sm:$0xff]  }
 0x15a   : > { %v3899_v34 = vadd.f32 %v11270_v29, %v3898_v32  ;;  %v9928_v35 = vpop.f32.mrb[2].mxu0  ;;  %v5219_v40 = vadd.f32 %v10255_v36, %v11270_v29  ;;  %v5210_v41 = vpop.f32.mrb[1].mxu1 }
 0x15b   : > { %v3910_v38 = vadd.f32 %v9928_v35, %v11270_v29  ;;  %v3901_v39 = vpop.f32.mrb[3].mxu0  ;;  %v5211_v43 = vadd.f32 %v11270_v29, %v5210_v41  ;;  %v10256_v44 = vpop.f32.mrb[2].mxu1  ;;  %v5467_v46 = vmax.f32 %v3907_v31, 0.0  ;;  %v10436_v35 = vld [vmem:[%s11083_s20 + $0x1e0] sm:$0xff]  }
 0x15c   : > { %v3902_v42 = vadd.f32 %v11270_v29, %v3901_v39  ;;  %v5795_v48 = vmax.f32 %v5219_v40, 0.0  ;;  %v5222_v49 = vadd.f32 %v10256_v44, %v11270_v29  ;;  %v5213_v50 = vpop.f32.mrb[3].mxu1  ;;  %v5465_v51 = vmax.f32 %v3899_v34, 0.0 }
 0x15d   : > { %v5468_v47 = vmax.f32 %v3910_v38, 0.0  ;;  %10034 = vmatmul.mubr.msk.bf16.gmra.mrb[108].mxu0 %vm3275_vm0, %v10425_v33  ;;  %v5793_v53 = vmax.f32 %v5211_v43, 0.0  ;;  %v5214_v54 = vadd.f32 %v11270_v29, %v5213_v50 }
 0x15e   : > { %v5466_v52 = vmax.f32 %v3902_v42, 0.0  ;;  %10037 = vmatprep.mubr.msk.bf16.mxu0 %vm3275_vm0, %v10428_v37  ;;  %v5796_v55 = vmax.f32 %v5222_v49, 0.0 }
 0x15f   : > { %v5858_v56 = vpack.c.bf16 %v5468_v47, %v5467_v46  ;;  %v5794_v58 = vmax.f32 %v5214_v54, 0.0 }
 0x160   : > { %v9931_v57 = vpop.f32.mrb[4].mxu0  ;;  %v5857_v59 = vpack.c.bf16 %v5466_v52, %v5465_v51  ;;  %v11285_v60 = vpack.c.bf16 %v5796_v55, %v5795_v48 }
 0x161   : > { %v3923_v61 = vadd.f32 %v9931_v57, %v11270_v29  ;;  %6354 = vrot.lane.b32.xlu1 %v5858_v56, %s10600_s21  ;;  %6592 = vrot.lane.b32.xlu0 %v5858_v56, %s10604_s9  ;;  %v3914_v62 = vpop.f32.mrb[5].mxu0  ;;  %v10259_v2 = vpop.f32.mrb[4].mxu1  ;;  %v11292_v3 = vpack.c.bf16 %v5794_v58, %v5793_v53 }
 0x162   : > { %14423 = vst [vmem:[#allocation3_spill] sm:$0xff] %v11285_v60  ;;  %v3915_v0 = vadd.f32 %v11270_v29, %v3914_v62  ;;  %v9932_v1 = vpop.f32.mrb[6].mxu0  ;;  %v5235_v7 = vadd.f32 %v10259_v2, %v11270_v29  ;;  %v5226_v8 = vpop.f32.mrb[5].mxu1  ;;  %v10437_v62 = vld [vmem:[%s11083_s20 + $0x1e8] sm:$0xff]  }
 0x163   : > { %14424 = vst [vmem:[#allocation4_spill] sm:$0xff] %v11292_v3  ;;  %v3926_v5 = vadd.f32 %v9932_v1, %v11270_v29  ;;  %v3917_v6 = vpop.f32.mrb[7].mxu0  ;;  %v5227_v10 = vadd.f32 %v11270_v29, %v5226_v8  ;;  %v10260_v11 = vpop.f32.mrb[6].mxu1  ;;  %v5471_v12 = vmax.f32 %v3923_v61, 0.0 }
 0x164   : > { %v3918_v9 = vadd.f32 %v11270_v29, %v3917_v6  ;;  %v5799_v14 = vmax.f32 %v5235_v7, 0.0  ;;  %v5238_v15 = vadd.f32 %v10260_v11, %v11270_v29  ;;  %v5229_v16 = vpop.f32.mrb[7].mxu1  ;;  %v5469_v17 = vmax.f32 %v3915_v0, 0.0 }
 0x165   : > { %v5472_v13 = vmax.f32 %v3926_v5, 0.0  ;;  %10038 = vmatmul.mubr.msk.bf16.gmra.mrb[112].mxu0 %vm3275_vm0, %v10429_v63  ;;  %6768 = vrot.lane.b32.xlu0 %v11285_v60, %s10602_s23  ;;  %v5797_v19 = vmax.f32 %v5227_v10, 0.0  ;;  %v5230_v20 = vadd.f32 %v11270_v29, %v5229_v16  ;;  %v10478_v63 = vld [vmem:[%s14365_s3] sm:$0xff]   ;;  %v10481_v10 = vld [vmem:[%s14365_s3 + $0x8] sm:$0xff]  }
 0x166   : > { %v5470_v18 = vmax.f32 %v3918_v9, 0.0  ;;  %6487 = vrot.lane.b32.xlu1 %v5857_v59, %s10605_s10  ;;  %10041 = vmatprep.mubr.msk.bf16.mxu0 %vm3275_vm0, %v10432_v4  ;;  %v5800_v21 = vmax.f32 %v5238_v15, 0.0  ;;  %v10440_v4 = vld [vmem:[%s11083_s20 + $0x1f0] sm:$0xff]  }
 0x167   : > { %v5860_v22 = vpack.c.bf16 %v5472_v13, %v5471_v12  ;;  %v5798_v23 = vmax.f32 %v5230_v20, 0.0  ;;  %7820 = vmatpush1.bf16.msra.mxu1 %v10478_v63 }
 0x168   : > { %v9935_v24 = vpop.f32.mrb[8].mxu0  ;;  %v5859_v25 = vpack.c.bf16 %v5470_v18, %v5469_v17  ;;  %v11306_v26 = vpack.c.bf16 %v5800_v21, %v5799_v14  ;;  %7821 = vmatprep.subr.bf16.mxu1 %v14370_v45  ;;  %v10441_v18 = vld [vmem:[%s11083_s20 + $0x1f8] sm:$0xff]  }
 0x169   : > { %v3939_v27 = vadd.f32 %v9935_v24, %v11270_v29  ;;  %6869 = vrot.lane.b32.xlu0 %v11292_v3, %s10606_s11  ;;  %v3930_v28 = vpop.f32.mrb[9].mxu0  ;;  %v11314_v33 = vpack.c.bf16 %v5798_v23, %v5797_v19  ;;  %v10263_v34 = vpop.f32.mrb[8].mxu1  ;;  %v10482_v19 = vld [vmem:[%s14365_s3 + $0x10] sm:$0xff]  }
 0x16a   : > { %14425 = vst [vmem:[#allocation5_spill] sm:$0xff] %v11306_v26  ;;  %v3931_v31 = vadd.f32 %v11270_v29, %v3930_v28  ;;  %6594 = vrot.lane.b32.xlu1 %v5860_v22, %s10604_s9  ;;  %v9936_v32 = vpop.f32.mrb[10].mxu0  ;;  %v5251_v38 = vadd.f32 %v10263_v34, %v11270_v29  ;;  %v5242_v39 = vpop.f32.mrb[9].mxu1 }
 0x16b   : > { %14426 = vst [vmem:[#allocation6_spill] sm:$0xff] %v11314_v33  ;;  %v3942_v36 = vadd.f32 %v9936_v32, %v11270_v29  ;;  %v3933_v37 = vpop.f32.mrb[11].mxu0  ;;  %v5243_v41 = vadd.f32 %v11270_v29, %v5242_v39  ;;  %v10264_v42 = vpop.f32.mrb[10].mxu1  ;;  %v5475_v43 = vmax.f32 %v3939_v27, 0.0  ;;  %7822 = vmatpush1.bf16.msra.mxu1 %v10481_v10  ;;  %v10445_v39 = vld [vmem:[%s11083_s20 + $0x208] sm:$0xff]  }
 0x16c   : > { %v3934_v40 = vadd.f32 %v11270_v29, %v3933_v37  ;;  %v5803_v46 = vmax.f32 %v5251_v38, 0.0  ;;  %v5254_v47 = vadd.f32 %v10264_v42, %v11270_v29  ;;  %v5245_v48 = vpop.f32.mrb[11].mxu1  ;;  %v5473_v49 = vmax.f32 %v3931_v31, 0.0  ;;  %7823 = vmatprep.subr.bf16.mxu1 %v14370_v45 }
 0x16d   : > { %v5476_v44 = vmax.f32 %v3942_v36, 0.0  ;;  %10042 = vmatmul.mubr.msk.bf16.gmra.mrb[116].mxu0 %vm3275_vm0, %v10433_v30  ;;  %6356 = vrot.lane.b32.xlu0 %v5860_v22, %s10600_s21  ;;  %v5801_v51 = vmax.f32 %v5243_v41, 0.0  ;;  %v5246_v52 = vadd.f32 %v11270_v29, %v5245_v48  ;;  %v10444_v22 = vld [vmem:[%s11083_s20 + $0x200] sm:$0xff]   ;;  %v10485_v30 = vld [vmem:[%s14365_s3 + $0x18] sm:$0xff]  }
 0x16e   : > { %v5474_v50 = vmax.f32 %v3934_v40, 0.0  ;;  %6871 = vrot.lane.b32.xlu1 %v11314_v33, %s10606_s11  ;;  %10045 = vmatprep.mubr.msk.bf16.mxu0 %vm3275_vm0, %v10436_v35  ;;  %v5804_v53 = vmax.f32 %v5254_v47, 0.0  ;;  %v10486_v40 = vld [vmem:[%s14365_s3 + $0x20] sm:$0xff]  }
 0x16f   : > { %v5862_v54 = vpack.c.bf16 %v5476_v44, %v5475_v43  ;;  %v5802_v56 = vmax.f32 %v5246_v52, 0.0  ;;  %7824 = vmatpush1.bf16.msra.mxu1 %v10482_v19  ;;  %v10448_v43 = vld [vmem:[%s11083_s20 + $0x210] sm:$0xff]  }
 0x170   : > { %v9939_v55 = vpop.f32.mrb[12].mxu0  ;;  %v5861_v57 = vpack.c.bf16 %v5474_v50, %v5473_v49  ;;  %v11329_v61 = vpack.c.bf16 %v5804_v53, %v5803_v46  ;;  %7825 = vmatprep.subr.bf16.mxu1 %v14370_v45  ;;  %v10489_v50 = vld [vmem:[%s14365_s3 + $0x28] sm:$0xff]   ;;  %v10456_v19 = vld [vmem:[%s11083_s20 + $0x230] sm:$0xff]  }
 0x171   : > { %v3955_v58 = vadd.f32 %v9939_v55, %v11270_v29  ;;  %v3946_v59 = vpop.f32.mrb[13].mxu0  ;;  %6489 = vrot.lane.b32.xlu0 %v5859_v25, %s10605_s10  ;;  %v6025_v2 = vpack.c.bf16 %v5802_v56, %v5801_v51 }
 0x172   : > { %14427 = vst [vmem:[#allocation7_spill] sm:$0xff] %v11329_v61  ;;  %v3947_v0 = vadd.f32 %v11270_v29, %v3946_v59  ;;  %6358 = vrot.lane.b32.xlu1 %v5862_v54, %s10600_s21  ;;  %v9940_v1 = vpop.f32.mrb[14].mxu0  ;;  %v10490_v59 = vld [vmem:[%s14365_s3 + $0x30] sm:$0xff]  }
 0x173   : > { %v3958_v5 = vadd.f32 %v9940_v1, %v11270_v29  ;;  %v3949_v6 = vpop.f32.mrb[15].mxu0  ;;  %v5479_v8 = vmax.f32 %v3955_v58, 0.0  ;;  %7826 = vmatpush1.bf16.msra.mxu1 %v10485_v30  ;;  %v10449_v58 = vld [vmem:[%s11083_s20 + $0x218] sm:$0xff]  }
 0x174   : > { %v3950_v7 = vadd.f32 %v11270_v29, %v3949_v6  ;;  %v5477_v11 = vmax.f32 %v3947_v0, 0.0  ;;  %7827 = vmatprep.subr.bf16.mxu1 %v14370_v45  ;;  %v10452_v0 = vld [vmem:[%s11083_s20 + $0x220] sm:$0xff]  }
 0x175   : > { %v5480_v9 = vmax.f32 %v3958_v5, 0.0  ;;  %10046 = vmatmul.mubr.msk.bf16.gmra.mrb[120].mxu0 %vm3275_vm0, %v10437_v62  ;;  %6596 = vrot.lane.b32.xlu0 %v5862_v54, %s10604_s9 }
 0x176   : > { %v5478_v12 = vmax.f32 %v3950_v7, 0.0  ;;  %6491 = vrot.lane.b32.xlu1 %v5861_v57, %s10605_s10  ;;  %10049 = vmatprep.mubr.msk.bf16.mxu0 %vm3275_vm0, %v10440_v4  ;;  %v10493_v7 = vld [vmem:[%s14365_s3 + $0x38] sm:$0xff]  }
 0x177   : > { %v5864_v13 = vpack.c.bf16 %v5480_v9, %v5479_v8  ;;  %7828 = vmatpush1.bf16.msra.mxu1 %v10486_v40 }
 0x178   : > { %v9943_v14 = vpop.f32.mrb[16].mxu0  ;;  %v5863_v15 = vpack.c.bf16 %v5478_v12, %v5477_v11  ;;  %7829 = vmatprep.subr.bf16.mxu1 %v14370_v45 }
 0x179   : > { %v3971_v16 = vadd.f32 %v9943_v14, %v11270_v29  ;;  %v3962_v17 = vpop.f32.mrb[17].mxu0  ;;  %6571 = vrot.lane.b32.xlu0 %v6025_v2, %s10605_s10 }
 0x17a   : > { %v3963_v20 = vadd.f32 %v11270_v29, %v3962_v17  ;;  %6598 = vrot.lane.b32.xlu1 %v5864_v13, %s10604_s9  ;;  %v9944_v21 = vpop.f32.mrb[18].mxu0 }
 0x17b   : > { %v3974_v23 = vadd.f32 %v9944_v21, %v11270_v29  ;;  %v3965_v24 = vpop.f32.mrb[19].mxu0  ;;  %v5483_v27 = vmax.f32 %v3971_v16, 0.0  ;;  %7830 = vmatpush1.bf16.msra.mxu1 %v10489_v50  ;;  %v10494_v16 = vld [vmem:[%s14365_s3 + $0x40] sm:$0xff]  }
 0x17c   : > { %v3966_v25 = vadd.f32 %v11270_v29, %v3965_v24  ;;  %v5481_v31 = vmax.f32 %v3963_v20, 0.0  ;;  %7831 = vmatprep.subr.bf16.mxu1 %v14370_v45 }
 0x17d   : > { %v5484_v28 = vmax.f32 %v3974_v23, 0.0  ;;  %10050 = vmatmul.mubr.msk.bf16.gmra.mrb[124].mxu0 %vm3275_vm0, %v10441_v18  ;;  %6360 = vrot.lane.b32.xlu0 %v5864_v13, %s10600_s21 }
 0x17e   : > { %v5482_v32 = vmax.f32 %v3966_v25, 0.0  ;;  %10053 = vmatprep.mubr.msk.bf16.mxu0 %vm3275_vm0, %v10444_v22 }
 0x17f   : > { %v5866_v34 = vpack.c.bf16 %v5484_v28, %v5483_v27  ;;  %7832 = vmatpush1.bf16.msra.mxu1 %v10490_v59 }
 0x180   : > { %v9947_v35 = vpop.f32.mrb[20].mxu0  ;;  %v5865_v36 = vpack.c.bf16 %v5482_v32, %v5481_v31  ;;  %7833 = vmatprep.subr.bf16.mxu1 %v14370_v45 }
 0x181   : > { %v3987_v37 = vadd.f32 %v9947_v35, %v11270_v29  ;;  %v3978_v38 = vpop.f32.mrb[21].mxu0  ;;  %6493 = vrot.lane.b32.xlu0 %v5863_v15, %s10605_s10  ;;  %6362 = vrot.lane.b32.xlu1 %v5866_v34, %s10600_s21  ;;  %v10453_v15 = vld [vmem:[%s11083_s20 + $0x228] sm:$0xff]   ;;  %v10457_v35 = vld [vmem:[%s11083_s20 + $0x238] sm:$0xff]  }
 0x182   : > { %v3979_v41 = vadd.f32 %v11270_v29, %v3978_v38  ;;  %v9948_v42 = vpop.f32.mrb[22].mxu0  ;;  %v10458_v38 = vld [vmem:[%s11083_s20 + $0x240] sm:$0xff]  }
 0x183   : > { %v3990_v44 = vadd.f32 %v9948_v42, %v11270_v29  ;;  %v3981_v46 = vpop.f32.mrb[23].mxu0  ;;  %v5487_v48 = vmax.f32 %v3987_v37, 0.0  ;;  %7834 = vmatpush1.bf16.msra.mxu1 %v10493_v7  ;;  %v10461_v7 = vld [vmem:[%s11083_s20 + $0x258] sm:$0xff]  }
 0x184   : > { %v3982_v47 = vadd.f32 %v11270_v29, %v3981_v46  ;;  %v5485_v51 = vmax.f32 %v3979_v41, 0.0  ;;  %7835 = vmatprep.subr.bf16.mxu1 %v14370_v45 }
 0x185   : > { %v5488_v49 = vmax.f32 %v3990_v44, 0.0  ;;  %10054 = vmatmul.mubr.msk.bf16.gmra.mrb[128].mxu0 %vm3275_vm0, %v10445_v39  ;;  %6600 = vrot.lane.b32.xlu0 %v5866_v34, %s10604_s9 }
 0x186   : > { %v5486_v52 = vmax.f32 %v3982_v47, 0.0  ;;  %6495 = vrot.lane.b32.xlu1 %v5865_v36, %s10605_s10  ;;  %10057 = vmatprep.mubr.msk.bf16.mxu0 %vm3275_vm0, %v10448_v43 }
 0x187   : > { %v5868_v53 = vpack.c.bf16 %v5488_v49, %v5487_v48  ;;  %7836 = vmatpush1.bf16.msra.mxu1 %v10494_v16 }
 0x188   : > { %v9951_v54 = vpop.f32.mrb[24].mxu0  ;;  %v5867_v55 = vpack.c.bf16 %v5486_v52, %v5485_v51  ;;  %8919 = vmatprep.subr.bf16.mxu1 %v14370_v45  ;;  %v10459_v52 = vld [vmem:[%s11083_s20 + $0x248] sm:$0xff]  }
 0x189   : > { %v4003_v56 = vadd.f32 %v9951_v54, %v11270_v29  ;;  %v3994_v57 = vpop.f32.mrb[25].mxu0  ;;  %6364 = vrot.lane.b32.xlu0 %v5868_v53, %s10600_s21 }
 0x18a   : > { %v3995_v62 = vadd.f32 %v11270_v29, %v3994_v57  ;;  %6602 = vrot.lane.b32.xlu1 %v5868_v53, %s10604_s9  ;;  %v9952_v63 = vpop.f32.mrb[26].mxu0 }
 0x18b   : > { %v4006_v1 = vadd.f32 %v9952_v63, %v11270_v29  ;;  %v3997_v2 = vpop.f32.mrb[27].mxu0  ;;  %v5491_v5 = vmax.f32 %v4003_v56, 0.0 }
 0x18c   : > { %v3998_v4 = vadd.f32 %v11270_v29, %v3997_v2  ;;  %v5489_v8 = vmax.f32 %v3995_v62, 0.0 }
 0x18d   : > { %v5492_v6 = vmax.f32 %v4006_v1, 0.0  ;;  %10058 = vmatmul.mubr.msk.bf16.gmra.mrb[132].mxu0 %vm3275_vm0, %v10449_v58  ;;  %6497 = vrot.lane.b32.xlu0 %v5867_v55, %s10605_s10  ;;  %v10460_v55 = vld [vmem:[%s11083_s20 + $0x250] sm:$0xff]  }
 0x18e   : > { %v5490_v9 = vmax.f32 %v3998_v4, 0.0  ;;  %10061 = vmatprep.mubr.msk.bf16.mxu0 %vm3275_vm0, %v10452_v0 }
 0x18f   : > { %v5870_v10 = vpack.c.bf16 %v5492_v6, %v5491_v5 }
 0x190   : > { %v9955_v11 = vpop.f32.mrb[28].mxu0  ;;  %v5869_v12 = vpack.c.bf16 %v5490_v9, %v5489_v8 }
 0x191   : > { %v4019_v13 = vadd.f32 %v9955_v11, %v11270_v29  ;;  %v4010_v14 = vpop.f32.mrb[29].mxu0  ;;  %6604 = vrot.lane.b32.xlu0 %v5870_v10, %s10604_s9  ;;  %v10462_v10 = vld [vmem:[%s11083_s20 + $0x260] sm:$0xff]  }
 0x192   : > { %v4011_v17 = vadd.f32 %v11270_v29, %v4010_v14  ;;  %v9956_v18 = vpop.f32.mrb[30].mxu0  ;;  %6499 = vrot.lane.b32.xlu1 %v5869_v12, %s10605_s10 }
 0x193   : > { %v4022_v20 = vadd.f32 %v9956_v18, %v11270_v29  ;;  %v4013_v21 = vpop.f32.mrb[31].mxu0  ;;  %v5495_v23 = vmax.f32 %v4019_v13, 0.0 }
 0x194   : > { %v4014_v22 = vadd.f32 %v11270_v29, %v4013_v21  ;;  %v5493_v25 = vmax.f32 %v4011_v17, 0.0 }
 0x195   : > { %v5496_v24 = vmax.f32 %v4022_v20, 0.0  ;;  %10062 = vmatmul.mubr.msk.bf16.gmra.mrb[136].mxu0 %vm3275_vm0, %v10453_v15 }
 0x196   : > { %v5494_v27 = vmax.f32 %v4014_v22, 0.0  ;;  %10065 = vmatprep.mubr.msk.bf16.mxu0 %vm3275_vm0, %v10456_v19 }
 0x197   : > { %v11422_v28 = vpack.c.bf16 %v5496_v24, %v5495_v23  ;;  %v10463_v23 = vld [vmem:[%s11083_s20 + $0x268] sm:$0xff]  }
 0x198   : > { %v9959_v30 = vpop.f32.mrb[32].mxu0  ;;  %v5871_v31 = vpack.c.bf16 %v5494_v27, %v5493_v25  ;;  %v10464_v27 = vld [vmem:[%s11083_s20 + $0x270] sm:$0xff]  }
 0x199   : > { %v4035_v32 = vadd.f32 %v9959_v30, %v11270_v29  ;;  %v4026_v34 = vpop.f32.mrb[33].mxu0  ;;  %9655 = vmatprep.mubr.msk.bf16.mxu1 %vm3275_vm0, %v11422_v28  ;;  %6698 = vrot.lane.b32.xlu0 %v11422_v28, %s10602_s23 }
 0x19a   : > { %v4027_v36 = vadd.f32 %v11270_v29, %v4026_v34  ;;  %v9960_v37 = vpop.f32.mrb[34].mxu0  ;;  %6098 = vrot.lane.b32.xlu1 %v5871_v31, %s10601_s22 }
 0x19b   : > { %v4038_v39 = vadd.f32 %v9960_v37, %v11270_v29  ;;  %v4029_v40 = vpop.f32.mrb[35].mxu0  ;;  %v5499_v42 = vmax.f32 %v4035_v32, 0.0 }
 0x19c   : > { %v4030_v41 = vadd.f32 %v11270_v29, %v4029_v40  ;;  %v5497_v44 = vmax.f32 %v4027_v36, 0.0 }
 0x19d   : > { %v5500_v43 = vmax.f32 %v4038_v39, 0.0  ;;  %10066 = vmatmul.mubr.msk.bf16.gmra.mrb[140].mxu0 %vm3275_vm0, %v10457_v35  ;;  %6226 = vrot.lane.b32.xlu0 %v11422_v28, %s10603_s24 }
 0x19e   : > { %v5498_v46 = vmax.f32 %v4030_v41, 0.0  ;;  %10069 = vmatprep.mubr.msk.bf16.mxu0 %vm3275_vm0, %v10458_v38 }
 0x19f   : > { %v11439_v47 = vpack.c.bf16 %v5500_v43, %v5499_v42  ;;  %v10465_v43 = vld [vmem:[%s11083_s20 + $0x278] sm:$0xff]  }
 0x1a0   : > { %v9963_v48 = vpop.f32.mrb[36].mxu0  ;;  %v5873_v49 = vpack.c.bf16 %v5498_v46, %v5497_v44 }
 0x1a1   : > { %v4051_v50 = vadd.f32 %v9963_v48, %v11270_v29  ;;  %v4042_v51 = vpop.f32.mrb[37].mxu0  ;;  %6789 = vrot.lane.b32.xlu0 %v5871_v31, %s10606_s11  ;;  %6700 = vrot.lane.b32.xlu1 %v11439_v47, %s10602_s23  ;;  %v10466_v48 = vld [vmem:[%s11083_s20 + $0x280] sm:$0xff]  }
 0x1a2   : > { %v4043_v53 = vadd.f32 %v11270_v29, %v4042_v51  ;;  %v9964_v54 = vpop.f32.mrb[38].mxu0 }
 0x1a3   : > { %v4054_v56 = vadd.f32 %v9964_v54, %v11270_v29  ;;  %v4045_v57 = vpop.f32.mrb[39].mxu0  ;;  %v5503_v59 = vmax.f32 %v4051_v50, 0.0 }
 0x1a4   : > { %v4046_v58 = vadd.f32 %v11270_v29, %v4045_v57  ;;  %v5501_v63 = vmax.f32 %v4043_v53, 0.0 }
 0x1a5   : > { %v5504_v62 = vmax.f32 %v4054_v56, 0.0  ;;  %10070 = vmatmul.mubr.msk.bf16.gmra.mrb[144].mxu0 %vm3275_vm0, %v10459_v52  ;;  %6100 = vrot.lane.b32.xlu0 %v5873_v49, %s10601_s22 }
 0x1a6   : > { %v5502_v0 = vmax.f32 %v4046_v58, 0.0  ;;  %6228 = vrot.lane.b32.xlu1 %v11439_v47, %s10603_s24  ;;  %10073 = vmatprep.mubr.msk.bf16.mxu0 %vm3275_vm0, %v10460_v55 }
 0x1a7   : > { %v11455_v1 = vpack.c.bf16 %v5504_v62, %v5503_v59 }
 0x1a8   : > { %v9967_v2 = vpop.f32.mrb[40].mxu0  ;;  %v5875_v4 = vpack.c.bf16 %v5502_v0, %v5501_v63  ;;  %v10467_v63 = vld [vmem:[%s11083_s20 + $0x288] sm:$0xff]  }
 0x1a9   : > { %v4067_v5 = vadd.f32 %v9967_v2, %v11270_v29  ;;  %v4058_v6 = vpop.f32.mrb[41].mxu0  ;;  %6702 = vrot.lane.b32.xlu0 %v11455_v1, %s10602_s23 }
 0x1aa   : > { %v4059_v8 = vadd.f32 %v11270_v29, %v4058_v6  ;;  %6791 = vrot.lane.b32.xlu1 %v5873_v49, %s10606_s11  ;;  %v9968_v9 = vpop.f32.mrb[42].mxu0 }
 0x1ab   : > { %v4070_v11 = vadd.f32 %v9968_v9, %v11270_v29  ;;  %v4061_v12 = vpop.f32.mrb[43].mxu0  ;;  %v5507_v14 = vmax.f32 %v4067_v5, 0.0 }
 0x1ac   : > { %v4062_v13 = vadd.f32 %v11270_v29, %v4061_v12  ;;  %v5505_v16 = vmax.f32 %v4059_v8, 0.0 }
 0x1ad   : > { %v5508_v15 = vmax.f32 %v4070_v11, 0.0  ;;  %10074 = vmatmul.mubr.msk.bf16.gmra.mrb[148].mxu0 %vm3275_vm0, %v10461_v7  ;;  %6230 = vrot.lane.b32.xlu0 %v11455_v1, %s10603_s24 }
 0x1ae   : > { %v5506_v17 = vmax.f32 %v4062_v13, 0.0  ;;  %6102 = vrot.lane.b32.xlu1 %v5875_v4, %s10601_s22  ;;  %10077 = vmatprep.mubr.msk.bf16.mxu0 %vm3275_vm0, %v10462_v10  ;;  %v11521_v13 = vpop.permute.xlu0 %6096 }
 0x1af   : > { %v11471_v18 = vpack.c.bf16 %v5508_v15, %v5507_v14  ;;  %v11523_v15 = vpop.permute.xlu1 %6352 }
 0x1b0   : > { %v9971_v19 = vpop.f32.mrb[44].mxu0  ;;  %v5877_v20 = vpack.c.bf16 %v5506_v17, %v5505_v16  ;;  %14429 = vst [vmem:[#allocation9_spill] sm:$0xff] %v11523_v15 }
 0x1b1   : > { %v4083_v21 = vadd.f32 %v9971_v19, %v11270_v29  ;;  %v4074_v22 = vpop.f32.mrb[45].mxu0  ;;  %6793 = vrot.lane.b32.xlu0 %v5875_v4, %s10606_s11  ;;  %v10468_v4 = vld [vmem:[%s11083_s20 + $0x290] sm:$0xff]  }
 0x1b2   : > { %v4075_v24 = vadd.f32 %v11270_v29, %v4074_v22  ;;  %6704 = vrot.lane.b32.xlu1 %v11471_v18, %s10602_s23  ;;  %v9972_v25 = vpop.f32.mrb[46].mxu0 }
 0x1b3   : > { %v4086_v30 = vadd.f32 %v9972_v25, %v11270_v29  ;;  %v4077_v31 = vpop.f32.mrb[47].mxu0  ;;  %v5511_v34 = vmax.f32 %v4083_v21, 0.0 }
 0x1b4   : > { %v4078_v32 = vadd.f32 %v11270_v29, %v4077_v31  ;;  %v5509_v36 = vmax.f32 %v4075_v24, 0.0 }
 0x1b5   : > { %v5512_v35 = vmax.f32 %v4086_v30, 0.0  ;;  %10078 = vmatmul.mubr.msk.bf16.gmra.mrb[152].mxu0 %vm3275_vm0, %v10463_v23  ;;  %6104 = vrot.lane.b32.xlu0 %v5877_v20, %s10601_s22  ;;  %v10470_v23 = vld [vmem:[%s11083_s20 + $0x2a0] sm:$0xff]  }
 0x1b6   : > { %v5510_v37 = vmax.f32 %v4078_v32, 0.0  ;;  %6232 = vrot.lane.b32.xlu1 %v11471_v18, %s10603_s24  ;;  %10081 = vmatprep.mubr.msk.bf16.mxu0 %vm3275_vm0, %v10464_v27  ;;  %v11536_v32 = vpop.permute.xlu0 %6224 }
 0x1b7   : > { %v11487_v38 = vpack.c.bf16 %v5512_v35, %v5511_v34  ;;  %14430 = vst [vmem:[#allocation10_spill] sm:$0xff] %v11536_v32 }
 0x1b8   : > { %v9975_v39 = vpop.f32.mrb[48].mxu0  ;;  %v5879_v40 = vpack.c.bf16 %v5510_v37, %v5509_v36  ;;  %v11539_v36 = vpop.permute.xlu1 %6696 }
 0x1b9   : > { %v4099_v41 = vadd.f32 %v9975_v39, %v11270_v29  ;;  %v4090_v42 = vpop.f32.mrb[49].mxu0  ;;  %6706 = vrot.lane.b32.xlu0 %v11487_v38, %s10602_s23  ;;  %14431 = vst [vmem:[#allocation11_spill] sm:$0xff] %v11539_v36 }
 0x1ba   : > { %v4091_v44 = vadd.f32 %v11270_v29, %v4090_v42  ;;  %6795 = vrot.lane.b32.xlu1 %v5877_v20, %s10606_s11  ;;  %v9976_v46 = vpop.f32.mrb[50].mxu0  ;;  %v10469_v20 = vld [vmem:[%s11083_s20 + $0x298] sm:$0xff]  }
 0x1bb   : > { %v4102_v49 = vadd.f32 %v9976_v46, %v11270_v29  ;;  %v4093_v50 = vpop.f32.mrb[51].mxu0  ;;  %v5515_v52 = vmax.f32 %v4099_v41, 0.0  ;;  %v10472_v46 = vld [vmem:[%s11083_s20 + $0x2b0] sm:$0xff]  }
 0x1bc   : > { %v4094_v51 = vadd.f32 %v11270_v29, %v4093_v50  ;;  %v5513_v54 = vmax.f32 %v4091_v44, 0.0 }
 0x1bd   : > { %v5516_v53 = vmax.f32 %v4102_v49, 0.0  ;;  %10082 = vmatmul.mubr.msk.bf16.gmra.mrb[156].mxu0 %vm3275_vm0, %v10465_v43  ;;  %6234 = vrot.lane.b32.xlu0 %v11487_v38, %s10603_s24  ;;  %v10471_v43 = vld [vmem:[%s11083_s20 + $0x2a8] sm:$0xff]  }
 0x1be   : > { %v5514_v55 = vmax.f32 %v4094_v51, 0.0  ;;  %6106 = vrot.lane.b32.xlu1 %v5879_v40, %s10601_s22  ;;  %10085 = vmatprep.mubr.msk.bf16.mxu0 %vm3275_vm0, %v10466_v48 }
 0x1bf   : > { %v11503_v56 = vpack.c.bf16 %v5516_v53, %v5515_v52 }
 0x1c0   : > { %v9979_v57 = vpop.f32.mrb[52].mxu0  ;;  %v5881_v58 = vpack.c.bf16 %v5514_v55, %v5513_v54 }
 0x1c1   : > { %14428 = vst [vmem:[#allocation8_spill] sm:$0xff] %v11503_v56  ;;  %v4115_v59 = vadd.f32 %v9979_v57, %v11270_v29  ;;  %v4106_v62 = vpop.f32.mrb[53].mxu0  ;;  %6797 = vrot.lane.b32.xlu0 %v5879_v40, %s10606_s11 }
 0x1c2   : > { %v4107_v0 = vadd.f32 %v11270_v29, %v4106_v62  ;;  %6708 = vrot.lane.b32.xlu1 %v11503_v56, %s10602_s23  ;;  %v9980_v2 = vpop.f32.mrb[54].mxu0 }
 0x1c3   : > { %v4118_v5 = vadd.f32 %v9980_v2, %v11270_v29  ;;  %v4109_v6 = vpop.f32.mrb[55].mxu0  ;;  %v5519_v8 = vmax.f32 %v4115_v59, 0.0 }
 0x1c4   : > { %v4110_v7 = vadd.f32 %v11270_v29, %v4109_v6  ;;  %v5517_v10 = vmax.f32 %v4107_v0, 0.0 }
 0x1c5   : > { %v5520_v9 = vmax.f32 %v4118_v5, 0.0  ;;  %10086 = vmatmul.mubr.msk.bf16.gmra.mrb[160].mxu0 %vm3275_vm0, %v10467_v63  ;;  %6108 = vrot.lane.b32.xlu0 %v5881_v58, %s10601_s22 }
 0x1c6   : > { %v5518_v11 = vmax.f32 %v4110_v7, 0.0  ;;  %6236 = vrot.lane.b32.xlu1 %v11503_v56, %s10603_s24  ;;  %10089 = vmatprep.mubr.msk.bf16.mxu0 %vm3275_vm0, %v10468_v4  ;;  %v10473_v4 = vld [vmem:[%s11083_s20 + $0x2b8] sm:$0xff]  }
 0x1c7   : > { %v11519_v12 = vpack.c.bf16 %v5520_v9, %v5519_v8  ;;  %v10474_v9 = vld [vmem:[%s11083_s20 + $0x2c0] sm:$0xff]  }
 0x1c8   : > { %v9983_v14 = vpop.f32.mrb[56].mxu0  ;;  %v5883_v16 = vpack.c.bf16 %v5518_v11, %v5517_v10 }
 0x1c9   : > { %v4131_v17 = vadd.f32 %v9983_v14, %v11270_v29  ;;  %v4122_v19 = vpop.f32.mrb[57].mxu0  ;;  %6238 = vrot.lane.b32.xlu0 %v11519_v12, %s10603_s24 }
 0x1ca   : > { %v4123_v21 = vadd.f32 %v11270_v29, %v4122_v19  ;;  %6799 = vrot.lane.b32.xlu1 %v5881_v58, %s10606_s11  ;;  %v9984_v22 = vpop.f32.mrb[58].mxu0 }
 0x1cb   : > { %v4134_v24 = vadd.f32 %v9984_v22, %v11270_v29  ;;  %v4125_v25 = vpop.f32.mrb[59].mxu0  ;;  %v5523_v30 = vmax.f32 %v4131_v17, 0.0 }
 0x1cc   : > { %v4126_v27 = vadd.f32 %v11270_v29, %v4125_v25  ;;  %v5521_v34 = vmax.f32 %v4123_v21, 0.0 }
 0x1cd   : > { %v5524_v31 = vmax.f32 %v4134_v24, 0.0  ;;  %10090 = vmatmul.mubr.msk.bf16.gmra.mrb[164].mxu0 %vm3275_vm0, %v10469_v20  ;;  %6801 = vrot.lane.b32.xlu0 %v5883_v16, %s10606_s11 }
 0x1ce   : > { %v5522_v35 = vmax.f32 %v4126_v27, 0.0  ;;  %6110 = vrot.lane.b32.xlu1 %v5883_v16, %s10601_s22  ;;  %10093 = vmatprep.mubr.msk.bf16.mxu0 %vm3275_vm0, %v10470_v23 }
 0x1cf   : > { %v5886_v37 = vpack.c.bf16 %v5524_v31, %v5523_v30 }
 0x1d0   : > { %v9987_v39 = vpop.f32.mrb[60].mxu0  ;;  %v5885_v40 = vpack.c.bf16 %v5522_v35, %v5521_v34  ;;  %v10475_v34 = vld [vmem:[%s11083_s20 + $0x2c8] sm:$0xff]  }
 0x1d1   : > { %v4147_v41 = vadd.f32 %v9987_v39, %v11270_v29  ;;  %v4138_v42 = vpop.f32.mrb[61].mxu0  ;;  %6606 = vrot.lane.b32.xlu0 %v5886_v37, %s10604_s9  ;;  %v10476_v39 = vld [vmem:[%s11083_s20 + $0x2d0] sm:$0xff]  }
 0x1d2   : > { %v9988_v44 = vpop.f32.mrb[62].mxu0  ;;  %6501 = vrot.lane.b32.xlu1 %v5885_v40, %s10605_s10  ;;  %v4139_v48 = vadd.f32 %v11270_v29, %v4138_v42 }
 0x1d3   : > { %v4150_v49 = vadd.f32 %v9988_v44, %v11270_v29  ;;  %v11549_v50 = vpop.permute.xlu0 %6592  ;;  %v11551_v51 = vpop.permute.xlu1 %6354  ;;  %v5527_v53 = vmax.f32 %v4147_v41, 0.0 }
 0x1d4   : > { %v4141_v52 = vpop.f32.mrb[63].mxu0  ;;  %v5525_v57 = vmax.f32 %v4139_v48, 0.0 }
 0x1d5   : > { %v5528_v54 = vmax.f32 %v4150_v49, 0.0  ;;  %v4142_v55 = vadd.f32 %v11270_v29, %v4141_v52  ;;  %10094 = vmatmul.mubr.msk.bf16.gmra.mrb[168].mxu0 %vm3275_vm0, %v10471_v43  ;;  %6366 = vrot.lane.b32.xlu0 %v5886_v37, %s10600_s21 }
 0x1d6   : > { %10097 = vmatprep.mubr.msk.bf16.mxu0 %vm3275_vm0, %v10472_v46 }
 0x1d7   : > { %v5526_v58 = vmax.f32 %v4142_v55, 0.0  ;;  %v11557_v59 = vpop.permute.xlu0 %6768  ;;  %v5888_v62 = vpack.c.bf16 %v5528_v54, %v5527_v53 }
 0x1d8   : > { %14432 = vst [vmem:[#allocation12_spill] sm:$0xff] %v11557_v59  ;;  %v9991_v63 = vpop.f32.mrb[64].mxu0  ;;  %v11563_v6 = vpop.permute.xlu1 %6487 }
 0x1d9   : > { %v4163_v0 = vadd.f32 %v9991_v63, %v11270_v29  ;;  %v4154_v2 = vpop.f32.mrb[65].mxu0  ;;  %6608 = vrot.lane.b32.xlu0 %v5888_v62, %s10604_s9  ;;  %6368 = vrot.lane.b32.xlu1 %v5888_v62, %s10600_s21  ;;  %v5887_v5 = vpack.c.bf16 %v5526_v58, %v5525_v57  ;;  %v10477_v63 = vld [vmem:[%s11083_s20 + $0x2d8] sm:$0xff]  }
 0x1da   : > { %v4155_v7 = vadd.f32 %v11270_v29, %v4154_v2  ;;  %v9992_v8 = vpop.f32.mrb[66].mxu0 }
 0x1db   : > { %v4166_v10 = vadd.f32 %v9992_v8, %v11270_v29  ;;  %v11568_v11 = vpop.permute.xlu0 %6869  ;;  %v4157_v14 = vpop.f32.mrb[67].mxu0  ;;  %v5531_v17 = vmax.f32 %v4163_v0, 0.0 }
 0x1dc   : > { %14433 = vst [vmem:[#allocation13_spill] sm:$0xff] %v11568_v11  ;;  %v4158_v16 = vadd.f32 %v11270_v29, %v4157_v14  ;;  %v5529_v20 = vmax.f32 %v4155_v7, 0.0  ;;  %v11576_v24 = vpop.permute.xlu1 %6594 }
 0x1dd   : > { %v5532_v19 = vmax.f32 %v4166_v10, 0.0  ;;  %10098 = vmatmul.mubr.msk.bf16.gmra.mrb[172].mxu0 %vm3275_vm0, %v10473_v4  ;;  %6503 = vrot.lane.b32.xlu1 %v5887_v5, %s10605_s10  ;;  %v10479_v4 = vld [vmem:[%s11083_s20 + $0x2e0] sm:$0xff]  }
 0x1de   : > { %v5530_v21 = vmax.f32 %v4158_v16, 0.0  ;;  %10101 = vmatprep.mubr.msk.bf16.mxu0 %vm3275_vm0, %v10474_v9 }
 0x1df   : > { %v11574_v22 = vpop.permute.xlu0 %6356  ;;  %v5890_v23 = vpack.c.bf16 %v5532_v19, %v5531_v17 }
 0x1e0   : > { %v9995_v25 = vpop.f32.mrb[68].mxu0  ;;  %v5889_v27 = vpack.c.bf16 %v5530_v21, %v5529_v20  ;;  %v11590_v48 = vpop.permute.xlu1 %6871 }
 0x1e1   : > { %v4179_v30 = vadd.f32 %v9995_v25, %v11270_v29  ;;  %v4170_v31 = vpop.f32.mrb[69].mxu0  ;;  %6370 = vrot.lane.b32.xlu0 %v5890_v23, %s10600_s21  ;;  %6610 = vrot.lane.b32.xlu1 %v5890_v23, %s10604_s9  ;;  %14434 = vst [vmem:[#allocation14_spill] sm:$0xff] %v11590_v48 }
 0x1e2   : > { %v4171_v35 = vadd.f32 %v11270_v29, %v4170_v31  ;;  %v9996_v37 = vpop.f32.mrb[70].mxu0  ;;  %v10480_v31 = vld [vmem:[%s11083_s20 + $0x2e8] sm:$0xff]  }
 0x1e3   : > { %v4182_v40 = vadd.f32 %v9996_v37, %v11270_v29  ;;  %v4173_v41 = vpop.f32.mrb[71].mxu0  ;;  %v11585_v42 = vpop.permute.xlu0 %6489  ;;  %v5535_v44 = vmax.f32 %v4179_v30, 0.0 }
 0x1e4   : > { %v4174_v43 = vadd.f32 %v11270_v29, %v4173_v41  ;;  %v5533_v49 = vmax.f32 %v4171_v35, 0.0  ;;  %v11604_v9 = vpop.permute.xlu1 %6358 }
 0x1e5   : > { %v5536_v46 = vmax.f32 %v4182_v40, 0.0  ;;  %10102 = vmatmul.mubr.msk.bf16.gmra.mrb[176].mxu0 %vm3275_vm0, %v10475_v34  ;;  %6505 = vrot.lane.b32.xlu0 %v5889_v27, %s10605_s10 }
 0x1e6   : > { %v5534_v52 = vmax.f32 %v4174_v43, 0.0  ;;  %10105 = vmatprep.mubr.msk.bf16.mxu0 %vm3275_vm0, %v10476_v39  ;;  %v10483_v39 = vld [vmem:[%s11083_s20 + $0x2f0] sm:$0xff]  }
 0x1e7   : > { %v11593_v53 = vpop.permute.xlu0 %6596  ;;  %v5892_v54 = vpack.c.bf16 %v5536_v46, %v5535_v44 }
 0x1e8   : > { %v9999_v55 = vpop.f32.mrb[72].mxu0  ;;  %v5891_v57 = vpack.c.bf16 %v5534_v52, %v5533_v49  ;;  %v11616_v34 = vpop.permute.xlu1 %6491 }
 0x1e9   : > { %v4195_v58 = vadd.f32 %v9999_v55, %v11270_v29  ;;  %v4186_v62 = vpop.f32.mrb[73].mxu0  ;;  %6612 = vrot.lane.b32.xlu0 %v5892_v54, %s10604_s9  ;;  %6372 = vrot.lane.b32.xlu1 %v5892_v54, %s10600_s21 }
 0x1ea   : > { %v4187_v0 = vadd.f32 %v11270_v29, %v4186_v62  ;;  %v10000_v2 = vpop.f32.mrb[74].mxu0 }
 0x1eb   : > { %v4198_v5 = vadd.f32 %v10000_v2, %v11270_v29  ;;  %v4189_v7 = vpop.f32.mrb[75].mxu0  ;;  %v11602_v8 = vpop.permute.xlu0 %6571  ;;  %v5539_v14 = vmax.f32 %v4195_v58, 0.0 }
 0x1ec   : > { %14435 = vst [vmem:[#allocation15_spill] sm:$0xff] %v11602_v8  ;;  %v4190_v10 = vadd.f32 %v11270_v29, %v4189_v7  ;;  %v5537_v17 = vmax.f32 %v4187_v0, 0.0  ;;  %v11629_v58 = vpop.permute.xlu1 %6598 }
 0x1ed   : > { %v5540_v16 = vmax.f32 %v4198_v5, 0.0  ;;  %10106 = vmatmul.mubr.msk.bf16.gmra.mrb[180].mxu0 %vm3275_vm0, %v10477_v63  ;;  %6507 = vrot.lane.b32.xlu1 %v5891_v57, %s10605_s10 }
 0x1ee   : > { %v5538_v19 = vmax.f32 %v4190_v10, 0.0  ;;  %10109 = vmatprep.mubr.msk.bf16.mxu0 %vm3275_vm0, %v10479_v4  ;;  %v10484_v4 = vld [vmem:[%s11083_s20 + $0x2f8] sm:$0xff]   ;;  %v10487_v10 = vld [vmem:[%s11083_s20 + $0x300] sm:$0xff]  }
 0x1ef   : > { %v5894_v20 = vpack.c.bf16 %v5540_v16, %v5539_v14  ;;  %v11610_v21 = vpop.permute.xlu0 %6360 }
 0x1f0   : > { %v5893_v23 = vpack.c.bf16 %v5538_v19, %v5537_v17  ;;  %v10003_v25 = vpop.f32.mrb[76].mxu0 }
 0x1f1   : > { %v4211_v27 = vadd.f32 %v10003_v25, %v11270_v29  ;;  %v4202_v30 = vpop.f32.mrb[77].mxu0  ;;  %6374 = vrot.lane.b32.xlu0 %v5894_v20, %s10600_s21  ;;  %6614 = vrot.lane.b32.xlu1 %v5894_v20, %s10604_s9 }
 0x1f2   : > { %v4203_v35 = vadd.f32 %v11270_v29, %v4202_v30  ;;  %v10004_v37 = vpop.f32.mrb[78].mxu0 }
 0x1f3   : > { %v4214_v40 = vadd.f32 %v10004_v37, %v11270_v29  ;;  %v4205_v41 = vpop.f32.mrb[79].mxu0  ;;  %v11621_v43 = vpop.permute.xlu0 %6493  ;;  %v5543_v46 = vmax.f32 %v4211_v27, 0.0 }
 0x1f4   : > { %v4206_v44 = vadd.f32 %v11270_v29, %v4205_v41  ;;  %v5541_v52 = vmax.f32 %v4203_v35, 0.0  ;;  %v11634_v29 = vld [vmem:[%s14364_s2] ss:$0 sm:$0xff]  ;;  %v11645_v19 = vpop.permute.xlu1 %6362 }
 0x1f5   : > { %v5544_v49 = vmax.f32 %v4214_v40, 0.0  ;;  %10110 = vmatmul.mubr.msk.bf16.gmra.mrb[184].mxu0 %vm3275_vm0, %v10480_v31  ;;  %6509 = vrot.lane.b32.xlu0 %v5893_v23, %s10605_s10 }
 0x1f6   : > { %v5542_v54 = vmax.f32 %v4206_v44, 0.0  ;;  %10113 = vmatprep.mubr.msk.bf16.mxu0 %vm3275_vm0, %v10483_v39  ;;  %v10488_v44 = vld [vmem:[%s11083_s20 + $0x308] sm:$0xff]  }
 0x1f7   : > { %v5896_v55 = vpack.c.bf16 %v5544_v49, %v5543_v46  ;;  %v11627_v57 = vpop.permute.xlu0 %6600 }
 0x1f8   : > { %v5895_v62 = vpack.c.bf16 %v5542_v54, %v5541_v52  ;;  %v10007_v63 = vpop.f32.mrb[80].mxu0  ;;  %v11656_v46 = vpop.permute.xlu1 %6495  ;;  %v10491_v54 = vld [vmem:[%s11083_s20 + $0x310] sm:$0xff]  }
 0x1f9   : > { %v4227_v0 = vadd.f32 %v11634_v29, %v10007_v63  ;;  %v4218_v2 = vpop.f32.mrb[81].mxu0  ;;  %6616 = vrot.lane.b32.xlu0 %v5896_v55, %s10604_s9  ;;  %6376 = vrot.lane.b32.xlu1 %v5896_v55, %s10600_s21 }
 0x1fa   : > { %v4219_v5 = vadd.f32 %v11634_v29, %v4218_v2  ;;  %v10008_v7 = vpop.f32.mrb[82].mxu0 }
 0x1fb   : > { %v4230_v14 = vadd.f32 %v11634_v29, %v10008_v7  ;;  %v4221_v16 = vpop.f32.mrb[83].mxu0  ;;  %v11643_v17 = vpop.permute.xlu0 %6364  ;;  %v5547_v23 = vmax.f32 %v4227_v0, 0.0 }
 0x1fc   : > { %v4222_v20 = vadd.f32 %v11634_v29, %v4221_v16  ;;  %v5545_v27 = vmax.f32 %v4219_v5, 0.0  ;;  %v11671_v16 = vpop.permute.xlu1 %6602 }
 0x1fd   : > { %v5548_v25 = vmax.f32 %v4230_v14, 0.0  ;;  %10114 = vmatmul.mubr.msk.bf16.gmra.mrb[188].mxu0 %vm3275_vm0, %v10484_v4  ;;  %6511 = vrot.lane.b32.xlu1 %v5895_v62, %s10605_s10  ;;  %v6889_v4 = vsel %vm3275_vm0, 0, %v11521_v13 }
 0x1fe   : > { %v5546_v30 = vmax.f32 %v4222_v20, 0.0  ;;  %10117 = vmatprep.mubr.msk.bf16.mxu0 %vm3275_vm0, %v10487_v10 }
 0x1ff   : > { %v5898_v31 = vpack.c.bf16 %v5548_v25, %v5547_v23  ;;  %v11651_v39 = vpop.permute.xlu0 %6497  ;;  %v11675_v25 = vsel %vm7010_vm1, %v6889_v4, %v11536_v32 }
 0x200   : > { %v5897_v35 = vpack.c.bf16 %v5546_v30, %v5545_v27  ;;  %v10011_v37 = vpop.f32.mrb[84].mxu0  ;;  %14437 = vst [vmem:[#allocation17_spill] sm:$0xff] %v11675_v25  ;;  %v10492_v30 = vld [vmem:[%s11083_s20 + $0x318] sm:$0xff]  }
 0x201   : > { %v4243_v40 = vadd.f32 %v11634_v29, %v10011_v37  ;;  %v4234_v41 = vpop.f32.mrb[85].mxu0  ;;  %6618 = vrot.lane.b32.xlu1 %v5898_v31, %s10604_s9  ;;  %v11684_v31 = vsel %vm7097_vm2, %v11675_v25, %v11523_v15 }
 0x202   : > { %v4235_v49 = vadd.f32 %v11634_v29, %v4234_v41  ;;  %v10012_v52 = vpop.f32.mrb[86].mxu0  ;;  %6513 = vrot.lane.b32.xlu0 %v5897_v35, %s10605_s10  ;;  %14438 = vst [vmem:[#allocation18_spill] sm:$0xff] %v11684_v31 }
 0x203   : > { %v4246_v55 = vadd.f32 %v11634_v29, %v10012_v52  ;;  %v4237_v62 = vpop.f32.mrb[87].mxu0  ;;  %v5551_v0 = vmax.f32 %v4243_v40, 0.0  ;;  %v11669_v14 = vpop.permute.xlu0 %6604  ;;  %v10495_v40 = vld [vmem:[%s11083_s20 + $0x320] sm:$0xff]  }
 0x204   : > { %v4238_v63 = vadd.f32 %v11634_v29, %v4237_v62  ;;  %v5549_v5 = vmax.f32 %v4235_v49, 0.0  ;;  %v11692_v52 = vpop.permute.xlu1 %6499 }
 0x205   : > { %v5552_v2 = vmax.f32 %v4246_v55, 0.0  ;;  %10118 = vmatmul.mubr.msk.bf16.gmra.mrb[192].mxu0 %vm3275_vm0, %v10488_v44  ;;  %v7192_v55 = vsel %vm7190_vm3, %v11684_v31, %v11563_v6 }
 0x206   : > { %v5550_v7 = vmax.f32 %v4238_v63, 0.0  ;;  %10121 = vmatprep.mubr.msk.bf16.mxu0 %vm3275_vm0, %v10491_v54 }
 0x207   : > { %v11667_v10 = vpack.c.bf16 %v5552_v2, %v5551_v0 }
 0x208   : > { %v5899_v20 = vpack.c.bf16 %v5550_v7, %v5549_v5  ;;  %v10015_v23 = vpop.f32.mrb[88].mxu0  ;;  %v7291_v7 = vsel %vm7289_vm4, %v7192_v55, %v11549_v50  ;;  %v10497_v55 = vld [vmem:[%s11083_s20 + $0x330] sm:$0xff]  }
 0x209   : > { %14436 = vst [vmem:[#allocation16_spill] sm:$0xff] %v11667_v10  ;;  %v4259_v13 = vadd.f32 %v11634_v29, %v10015_v23  ;;  %v4250_v27 = vpop.f32.mrb[89].mxu0  ;;  %6710 = vrot.lane.b32.xlu1 %v11667_v10, %s10602_s23 }
 0x20a   : > { %v4251_v35 = vadd.f32 %v11634_v29, %v4250_v27  ;;  %v10016_v37 = vpop.f32.mrb[90].mxu0  ;;  %6112 = vrot.lane.b32.xlu0 %v5899_v20, %s10601_s22 }
 0x20b   : > { %v4262_v41 = vadd.f32 %v11634_v29, %v10016_v37  ;;  %v4253_v44 = vpop.f32.mrb[91].mxu0  ;;  %v11690_v49 = vpop.permute.xlu0 %6698  ;;  %v5555_v62 = vmax.f32 %v4259_v13, 0.0 }
 0x20c   : > { %v4254_v54 = vadd.f32 %v11634_v29, %v4253_v44  ;;  %v5553_v0 = vmax.f32 %v4251_v35, 0.0  ;;  %v11708_v23 = vpop.permute.xlu1 %6098  ;;  %v10496_v35 = vld [vmem:[%s11083_s20 + $0x328] sm:$0xff]  }
 0x20d   : > { %v5556_v63 = vmax.f32 %v4262_v41, 0.0  ;;  %10122 = vmatmul.mubr.msk.bf16.gmra.mrb[196].mxu0 %vm3275_vm0, %v10492_v30  ;;  %6240 = vrot.lane.b32.xlu1 %v11667_v10, %s10603_s24 }
 0x20e   : > { %v5554_v2 = vmax.f32 %v4254_v54, 0.0  ;;  %10125 = vmatprep.mubr.msk.bf16.mxu0 %vm3275_vm0, %v10495_v40  ;;  %v7390_v54 = vsel %vm7388_vm5, %v7291_v7, %v11539_v36  ;;  %v7101_v7 = vsel %vm7097_vm2, %v11675_v25, %v11551_v51 }
 0x20f   : > { %v11702_v4 = vpack.c.bf16 %v5556_v63, %v5555_v62  ;;  %v11704_v5 = vpop.permute.xlu0 %6226 }
 0x210   : > { %v5901_v6 = vpack.c.bf16 %v5554_v2, %v5553_v0  ;;  %v10019_v13 = vpop.f32.mrb[92].mxu0 }
 0x211   : > { %v4275_v27 = vadd.f32 %v11634_v29, %v10019_v13  ;;  %v4266_v30 = vpop.f32.mrb[93].mxu0  ;;  %6712 = vrot.lane.b32.xlu0 %v11702_v4, %s10602_s23  ;;  %6803 = vrot.lane.b32.xlu1 %v5899_v20, %s10606_s11 }
 0x212   : > { %v4267_v37 = vadd.f32 %v11634_v29, %v4266_v30  ;;  %v10020_v40 = vpop.f32.mrb[94].mxu0 }
 0x213   : > { %v4278_v50 = vadd.f32 %v11634_v29, %v10020_v40  ;;  %v4269_v41 = vpop.f32.mrb[95].mxu0  ;;  %v6790_v44 = vpop.permute.xlu0 %6789  ;;  %v5559_v2 = vmax.f32 %v4275_v27, 0.0 }
 0x214   : > { %v4270_v62 = vadd.f32 %v11634_v29, %v4269_v41  ;;  %v7483_v63 = vsel %vm7481_vm6, %v7390_v54, %v6790_v44  ;;  %v6701_v0 = vpop.permute.xlu1 %6700  ;;  %v5557_v13 = vmax.f32 %v4267_v37, 0.0  ;;  %v10498_v54 = vld [vmem:[%s11083_s20 + $0x338] sm:$0xff]  }
 0x215   : > { %v5560_v20 = vmax.f32 %v4278_v50, 0.0  ;;  %10126 = vmatmul.mubr.msk.bf16.gmra.mrb[200].mxu0 %vm3275_vm0, %v10496_v35  ;;  %6242 = vrot.lane.b32.xlu0 %v11702_v4, %s10603_s24  ;;  %v7194_v35 = vsel %vm7190_vm3, %v7101_v7, %v11585_v42 }
 0x216   : > { %v5558_v30 = vmax.f32 %v4270_v62, 0.0  ;;  %6114 = vrot.lane.b32.xlu1 %v5901_v6, %s10601_s22  ;;  %7852 = vmatmul.mubr.bf16.vlgmr.msra.gmra.mrb[64].mxu1 %v7483_v63  ;;  %v7293_v63 = vsel %vm7289_vm4, %v7194_v35, %v11576_v24  ;;  %v7103_v35 = vsel %vm7097_vm2, %v11675_v25, %v11574_v22 }
 0x217   : > { %v11729_v40 = vpack.c.bf16 %v5560_v20, %v5559_v2  ;;  %9656 = vmatprep.mubr.msk.bf16.mxu1 %vm3275_vm0, %v11439_v47  ;;  %v11733_v27 = vpop.permute.xlu0 %6100  ;;  %10129 = vmatprep.mubr.msk.bf16.mxu0 %vm3275_vm0, %v10497_v55 }
 0x218   : > { %v5903_v37 = vpack.c.bf16 %v5558_v30, %v5557_v13  ;;  %v11738_v50 = vpop.permute.xlu1 %6228  ;;  %v10023_v41 = vpop.f32.mrb[96].mxu0  ;;  %v10499_v13 = vld [vmem:[%s11083_s20 + $0x340] sm:$0xff]   ;;  %v7392_v30 = vsel %vm7388_vm5, %v7293_v63, %v11690_v49  ;;  %v7196_v49 = vsel %vm7190_vm3, %v7103_v35, %v11616_v34  ;;  %v10500_v34 = vld [vmem:[%s11083_s20 + $0x348] sm:$0xff]  }
 0x219   : > { %v4291_v44 = vadd.f32 %v11634_v29, %v10023_v41  ;;  %v4282_v51 = vpop.f32.mrb[97].mxu0  ;;  %6805 = vrot.lane.b32.xlu0 %v5901_v6, %s10606_s11 }
 0x21a   : > { %v4283_v62 = vadd.f32 %v11634_v29, %v4282_v51  ;;  %6714 = vrot.lane.b32.xlu1 %v11729_v40, %s10602_s23  ;;  %v10024_v55 = vpop.f32.mrb[98].mxu0 }
 0x21b   : > { %v4294_v42 = vadd.f32 %v11634_v29, %v10024_v55  ;;  %v4285_v2 = vpop.f32.mrb[99].mxu0  ;;  %v11749_v20 = vpop.permute.xlu0 %6702  ;;  %v5563_v41 = vmax.f32 %v4291_v44, 0.0 }
 0x21c   : > { %v4286_v6 = vadd.f32 %v11634_v29, %v4285_v2  ;;  %v6792_v7 = vpop.permute.xlu1 %6791  ;;  %v5561_v55 = vmax.f32 %v4283_v62, 0.0 }
 0x21d   : > { %v5564_v51 = vmax.f32 %v4294_v42, 0.0  ;;  %10130 = vmatmul.mubr.msk.bf16.gmra.mrb[204].mxu0 %vm3275_vm0, %v10498_v54  ;;  %6116 = vrot.lane.b32.xlu0 %v5903_v37, %s10601_s22  ;;  %v7486_v24 = vsel %vm7481_vm6, %v7392_v30, %v6792_v7  ;;  %v7295_v30 = vsel %vm7289_vm4, %v7196_v49, %v11593_v53 }
 0x21e   : > { %v5562_v45 = vmax.f32 %v4286_v6, 0.0  ;;  %6244 = vrot.lane.b32.xlu1 %v11729_v40, %s10603_s24  ;;  %7860 = vmatmul.mubr.bf16.gmra.mrb[68].mxu1 %v7486_v24  ;;  %v10501_v24 = vld [vmem:[%s11083_s20 + $0x350] sm:$0xff]  }
 0x21f   : > { %v11765_v44 = vpack.c.bf16 %v5564_v51, %v5563_v41  ;;  %9657 = vmatprep.mubr.msk.bf16.mxu1 %vm3275_vm0, %v11455_v1  ;;  %v11769_v54 = vpop.permute.xlu0 %6230  ;;  %10133 = vmatprep.mubr.msk.bf16.mxu0 %vm3275_vm0, %v10499_v13 }
 0x220   : > { %v5905_v22 = vpack.c.bf16 %v5562_v45, %v5561_v55  ;;  %v11772_v62 = vpop.permute.xlu1 %6102  ;;  %v10027_v63 = vpop.f32.mrb[100].mxu0  ;;  %v7394_v45 = vsel %vm7388_vm5, %v7295_v30, %v6701_v0 }
 0x221   : > { %v4307_v42 = vadd.f32 %v11634_v29, %v10027_v63  ;;  %v4298_v2 = vpop.f32.mrb[101].mxu0  ;;  %6716 = vrot.lane.b32.xlu0 %v11765_v44, %s10602_s23 }
 0x222   : > { %v4299_v6 = vadd.f32 %v11634_v29, %v4298_v2  ;;  %6807 = vrot.lane.b32.xlu1 %v5903_v37, %s10606_s11  ;;  %v10028_v13 = vpop.f32.mrb[102].mxu0  ;;  %v7105_v37 = vsel %vm7097_vm2, %v11675_v25, %v11604_v9 }
 0x223   : > { %v4310_v7 = vadd.f32 %v11634_v29, %v10028_v13  ;;  %v4301_v41 = vpop.f32.mrb[103].mxu0  ;;  %v6794_v51 = vpop.permute.xlu0 %6793  ;;  %v5567_v32 = vmax.f32 %v4307_v42, 0.0  ;;  %v7198_v2 = vsel %vm7190_vm3, %v7105_v37, %v11621_v43  ;;  %v7107_v37 = vsel %vm7097_vm2, %v11675_v25, %v11610_v21 }
 0x224   : > { %v4302_v35 = vadd.f32 %v11634_v29, %v4301_v41  ;;  %v6705_v55 = vpop.permute.xlu1 %6704  ;;  %v7489_v63 = vsel %vm7481_vm6, %v7394_v45, %v6794_v51  ;;  %v5565_v53 = vmax.f32 %v4299_v6, 0.0 }
 0x225   : > { %v5568_v31 = vmax.f32 %v4310_v7, 0.0  ;;  %10134 = vmatmul.mubr.msk.bf16.gmra.mrb[208].mxu0 %vm3275_vm0, %v10500_v34  ;;  %6246 = vrot.lane.b32.xlu0 %v11765_v44, %s10603_s24  ;;  %v7297_v7 = vsel %vm7289_vm4, %v7198_v2, %v11629_v58 }
 0x226   : > { %v5566_v0 = vmax.f32 %v4302_v35, 0.0  ;;  %6118 = vrot.lane.b32.xlu1 %v5905_v22, %s10601_s22  ;;  %7868 = vmatmul.mubr.bf16.gmra.mrb[72].mxu1 %v7489_v63  ;;  %v7396_v35 = vsel %vm7388_vm5, %v7297_v7, %v11749_v20  ;;  %v7200_v20 = vsel %vm7190_vm3, %v7107_v37, %v11656_v46  ;;  %v10504_v46 = vld [vmem:[%s11083_s20 + $0x368] sm:$0xff]  }
 0x227   : > { %v11794_v49 = vpack.c.bf16 %v5568_v31, %v5567_v32  ;;  %9658 = vmatprep.mubr.msk.bf16.mxu1 %vm3275_vm0, %v11471_v18  ;;  %v11798_v42 = vpop.permute.xlu0 %6104  ;;  %10137 = vmatprep.mubr.msk.bf16.mxu0 %vm3275_vm0, %v10501_v24  ;;  %v10502_v32 = vld [vmem:[%s11083_s20 + $0x358] sm:$0xff]   ;;  %v10503_v24 = vld [vmem:[%s11083_s20 + $0x360] sm:$0xff]  }
 0x228   : > { %v5907_v34 = vpack.c.bf16 %v5566_v0, %v5565_v53  ;;  %v11803_v30 = vpop.permute.xlu1 %6232  ;;  %v10031_v6 = vpop.f32.mrb[104].mxu0 }
 0x229   : > { %v4323_v13 = vadd.f32 %v11634_v29, %v10031_v6  ;;  %v4314_v9 = vpop.f32.mrb[105].mxu0  ;;  %6809 = vrot.lane.b32.xlu0 %v5905_v22, %s10606_s11 }
 0x22a   : > { %v4315_v31 = vadd.f32 %v11634_v29, %v4314_v9  ;;  %6718 = vrot.lane.b32.xlu1 %v11794_v49, %s10602_s23  ;;  %v10032_v45 = vpop.f32.mrb[106].mxu0 }
 0x22b   : > { %v4326_v43 = vadd.f32 %v11634_v29, %v10032_v45  ;;  %v4317_v41 = vpop.f32.mrb[107].mxu0  ;;  %v11814_v51 = vpop.permute.xlu0 %6706  ;;  %v5571_v53 = vmax.f32 %v4323_v13, 0.0 }
 0x22c   : > { %v4318_v22 = vadd.f32 %v11634_v29, %v4317_v41  ;;  %v6796_v63 = vpop.permute.xlu1 %6795  ;;  %v5569_v2 = vmax.f32 %v4315_v31, 0.0 }
 0x22d   : > { %v5572_v0 = vmax.f32 %v4326_v43, 0.0  ;;  %10138 = vmatmul.mubr.msk.bf16.gmra.mrb[212].mxu0 %vm3275_vm0, %v10502_v32  ;;  %6120 = vrot.lane.b32.xlu0 %v5907_v34, %s10601_s22  ;;  %v7492_v58 = vsel %vm7481_vm6, %v7396_v35, %v6796_v63  ;;  %v7299_v43 = vsel %vm7289_vm4, %v7200_v20, %v11627_v57 }
 0x22e   : > { %v5570_v6 = vmax.f32 %v4318_v22, 0.0  ;;  %6248 = vrot.lane.b32.xlu1 %v11794_v49, %s10603_s24  ;;  %7876 = vmatmul.mubr.bf16.gmra.mrb[76].mxu1 %v7492_v58  ;;  %v7398_v35 = vsel %vm7388_vm5, %v7299_v43, %v6705_v55 }
 0x22f   : > { %v11830_v13 = vpack.c.bf16 %v5572_v0, %v5571_v53  ;;  %9659 = vmatprep.mubr.msk.bf16.mxu1 %vm3275_vm0, %v11487_v38  ;;  %v11834_v9 = vpop.permute.xlu0 %6234  ;;  %10141 = vmatprep.mubr.msk.bf16.mxu0 %vm3275_vm0, %v10503_v24  ;;  %v10505_v0 = vld [vmem:[%s11083_s20 + $0x370] sm:$0xff]  }
 0x230   : > { %v5909_v21 = vpack.c.bf16 %v5570_v6, %v5569_v2  ;;  %v11837_v32 = vpop.permute.xlu1 %6106  ;;  %v10035_v31 = vpop.f32.mrb[108].mxu0 }
 0x231   : > { %14439 = vst [vmem:[#allocation19_spill] sm:$0xff] %v11830_v13  ;;  %v4339_v45 = vadd.f32 %v11634_v29, %v10035_v31  ;;  %v4330_v7 = vpop.f32.mrb[109].mxu0  ;;  %6720 = vrot.lane.b32.xlu0 %v11830_v13, %s10602_s23 }
 0x232   : > { %v4331_v41 = vadd.f32 %v11634_v29, %v4330_v7  ;;  %6811 = vrot.lane.b32.xlu1 %v5907_v34, %s10606_s11  ;;  %v10036_v24 = vpop.f32.mrb[110].mxu0  ;;  %v10267_v34 = vpop.f32.mrb[12].mxu1  ;;  %v7109_v7 = vsel %vm7097_vm2, %v11675_v25, %v11645_v19 }
 0x233   : > { %v4342_v22 = vadd.f32 %v11634_v29, %v10036_v24  ;;  %v4333_v63 = vpop.f32.mrb[111].mxu0  ;;  %v6798_v53 = vpop.permute.xlu0 %6797  ;;  %v5575_v6 = vmax.f32 %v4339_v45, 0.0  ;;  %v5267_v19 = vadd.f32 %v11634_v29, %v10267_v34 }
 0x234   : > { %v4334_v58 = vadd.f32 %v11634_v29, %v4333_v63  ;;  %v11851_v37 = vpop.permute.xlu1 %6708  ;;  %v7495_v2 = vsel %vm7481_vm6, %v7398_v35, %v6798_v53  ;;  %v5573_v55 = vmax.f32 %v4331_v41, 0.0  ;;  %v5258_v31 = vpop.f32.mrb[13].mxu1  ;;  %v7202_v41 = vsel %vm7190_vm3, %v7109_v7, %v11651_v39 }
 0x235   : > { %v5576_v57 = vmax.f32 %v4342_v22, 0.0  ;;  %10142 = vmatmul.mubr.msk.bf16.gmra.mrb[216].mxu0 %vm3275_vm0, %v10504_v46  ;;  %6250 = vrot.lane.b32.xlu0 %v11830_v13, %s10603_s24  ;;  %v10268_v46 = vpop.f32.mrb[14].mxu1  ;;  %v5259_v63 = vadd.f32 %v11634_v29, %v5258_v31  ;;  %v7111_v53 = vsel %vm7097_vm2, %v11675_v25, %v11643_v17  ;;  %v7301_v7 = vsel %vm7289_vm4, %v7202_v41, %v11671_v16 }
 0x236   : > { %v5574_v20 = vmax.f32 %v4334_v58, 0.0  ;;  %6122 = vrot.lane.b32.xlu1 %v5909_v21, %s10601_s22  ;;  %7884 = vmatmul.mubr.bf16.gmra.mrb[80].mxu1 %v7495_v2  ;;  %v5270_v39 = vadd.f32 %v11634_v29, %v10268_v46  ;;  %v10507_v46 = vld [vmem:[%s11083_s20 + $0x380] sm:$0xff]   ;;  %v7204_v48 = vsel %vm7190_vm3, %v7111_v53, %v11692_v52 }
 0x237   : > { %v11861_v43 = vpack.c.bf16 %v5576_v57, %v5575_v6  ;;  %9660 = vmatprep.mubr.msk.bf16.mxu1 %vm3275_vm0, %v11503_v56  ;;  %v11865_v45 = vpop.permute.xlu0 %6108  ;;  %10145 = vmatprep.mubr.msk.bf16.mxu0 %vm3275_vm0, %v10505_v0  ;;  %v10506_v0 = vld [vmem:[%s11083_s20 + $0x378] sm:$0xff]   ;;  %v5261_v6 = vpop.f32.mrb[15].mxu1 }
 0x238   : > { %v5911_v24 = vpack.c.bf16 %v5574_v20, %v5573_v55  ;;  %v11870_v35 = vpop.permute.xlu1 %6236  ;;  %v10039_v22 = vpop.f32.mrb[112].mxu0  ;;  %v5807_v55 = vmax.f32 %v5267_v19, 0.0  ;;  %v5805_v20 = vmax.f32 %v5259_v63, 0.0  ;;  %v5262_v17 = vadd.f32 %v11634_v29, %v5261_v6 }
 0x239   : > { %14440 = vst [vmem:[#allocation20_spill] sm:$0xff] %v11861_v43  ;;  %v4355_v58 = vadd.f32 %v11634_v29, %v10039_v22  ;;  %v4346_v2 = vpop.f32.mrb[113].mxu0  ;;  %6813 = vrot.lane.b32.xlu0 %v5909_v21, %s10606_s11  ;;  %v10271_v31 = vpop.f32.mrb[16].mxu1  ;;  %v5808_v8 = vmax.f32 %v5270_v39, 0.0  ;;  %v7400_v19 = vsel %vm7388_vm5, %v7301_v7, %v11814_v51 }
 0x23a   : > { %v4347_v57 = vadd.f32 %v11634_v29, %v4346_v2  ;;  %6252 = vrot.lane.b32.xlu1 %v11861_v43, %s10603_s24  ;;  %v10040_v34 = vpop.f32.mrb[114].mxu0  ;;  %v5283_v2 = vadd.f32 %v11634_v29, %v10271_v31  ;;  %v5806_v59 = vmax.f32 %v5262_v17, 0.0  ;;  %v5274_v16 = vpop.f32.mrb[17].mxu1 }
 0x23b   : > { %v4358_v21 = vadd.f32 %v11634_v29, %v10040_v34  ;;  %v4349_v22 = vpop.f32.mrb[115].mxu0  ;;  %v11888_v25 = vpop.permute.xlu0 %6238  ;;  %v5579_v41 = vmax.f32 %v4355_v58, 0.0  ;;  %v11900_v31 = vpack.c.bf16 %v5808_v8, %v5807_v55  ;;  %v5275_v17 = vadd.f32 %v11634_v29, %v5274_v16 }
 0x23c   : > { %14441 = vst [vmem:[#allocation21_spill] sm:$0xff] %v11888_v25  ;;  %v4350_v63 = vadd.f32 %v11634_v29, %v4349_v22  ;;  %v6800_v6 = vpop.permute.xlu1 %6799  ;;  %v10272_v11 = vpop.f32.mrb[18].mxu1  ;;  %v5577_v52 = vmax.f32 %v4347_v57, 0.0  ;;  %v11903_v51 = vpack.c.bf16 %v5806_v59, %v5805_v20  ;;  %v5811_v8 = vmax.f32 %v5283_v2, 0.0 }
 0x23d   : > { %v5580_v34 = vmax.f32 %v4358_v21, 0.0  ;;  %10146 = vmatmul.mubr.msk.bf16.gmra.mrb[220].mxu0 %vm3275_vm0, %v10506_v0  ;;  %6124 = vrot.lane.b32.xlu0 %v5911_v24, %s10601_s22  ;;  %v7498_v39 = vsel %vm7481_vm6, %v7400_v19, %v6800_v6  ;;  %14442 = vst [vmem:[#allocation22_spill] sm:$0xff] %v11900_v31  ;;  %v5277_v58 = vpop.f32.mrb[19].mxu1  ;;  %v5286_v57 = vadd.f32 %v11634_v29, %v10272_v11  ;;  %v5809_v20 = vmax.f32 %v5275_v17, 0.0  ;;  %v10508_v6 = vld [vmem:[%s11083_s20 + $0x388] sm:$0xff]  }
 0x23e   : > { %v5578_v53 = vmax.f32 %v4350_v63, 0.0  ;;  %6815 = vrot.lane.b32.xlu1 %v5911_v24, %s10606_s11  ;;  %7892 = vmatmul.mubr.bf16.gmra.mrb[84].mxu1 %v7498_v39  ;;  %14443 = vst [vmem:[#allocation23_spill] sm:$0xff] %v11903_v51  ;;  %v10275_v55 = vpop.f32.mrb[20].mxu1  ;;  %v5278_v22 = vadd.f32 %v11634_v29, %v5277_v58  ;;  %v7303_v19 = vsel %vm7289_vm4, %v7204_v48, %v11669_v14 }
 0x23f   : > { %v5914_v7 = vpack.c.bf16 %v5580_v34, %v5579_v41  ;;  %9661 = vmatprep.mubr.msk.bf16.mxu1 %vm3275_vm0, %v11519_v12  ;;  %v6802_v0 = vpop.permute.xlu0 %6801  ;;  %10149 = vmatprep.mubr.msk.bf16.mxu0 %vm3275_vm0, %v10507_v46  ;;  %v5812_v46 = vmax.f32 %v5286_v57, 0.0  ;;  %v5299_v2 = vadd.f32 %v11634_v29, %v10275_v55  ;;  %v5290_v11 = vpop.f32.mrb[21].mxu1  ;;  %v7402_v16 = vsel %vm7388_vm5, %v7303_v19, %v11851_v37  ;;  %v10509_v57 = vld [vmem:[%s11083_s20 + $0x390] sm:$0xff]  }
 0x240   : > { %v5913_v21 = vpack.c.bf16 %v5578_v53, %v5577_v52  ;;  %v11910_v24 = vpop.permute.xlu1 %6110  ;;  %v10043_v59 = vpop.f32.mrb[116].mxu0  ;;  %v5810_v48 = vmax.f32 %v5278_v22, 0.0  ;;  %v5291_v14 = vadd.f32 %v11634_v29, %v5290_v11  ;;  %v7501_v58 = vsel %vm7481_vm6, %v7402_v16, %v6802_v0 }
 0x241   : > { %14444 = vst [vmem:[#allocation24_spill] sm:$0xff] %v11910_v24  ;;  %v4371_v63 = vadd.f32 %v11634_v29, %v10043_v59  ;;  %v4362_v12 = vpop.f32.mrb[117].mxu0  ;;  %v10276_v39 = vpop.f32.mrb[22].mxu1  ;;  %v11929_v37 = vpack.c.bf16 %v5812_v46, %v5811_v8 }
 0x242   : > { %v4363_v41 = vadd.f32 %v11634_v29, %v4362_v12  ;;  %6620 = vrot.lane.b32.xlu1 %v5914_v7, %s10604_s9  ;;  %v10044_v34 = vpop.f32.mrb[118].mxu0  ;;  %6515 = vrot.lane.b32.xlu0 %v5913_v21, %s10605_s10  ;;  %v11932_v19 = vpack.c.bf16 %v5810_v48, %v5809_v20  ;;  %v5815_v21 = vmax.f32 %v5299_v2, 0.0  ;;  %v5293_v22 = vpop.f32.mrb[23].mxu1  ;;  %v5813_v11 = vmax.f32 %v5291_v14, 0.0 }
 0x243   : > { %v4374_v52 = vadd.f32 %v11634_v29, %v10044_v34  ;;  %v4365_v53 = vpop.f32.mrb[119].mxu0  ;;  %v11925_v17 = vpop.permute.xlu0 %6606  ;;  %14445 = vst [vmem:[#allocation25_spill] sm:$0xff] %v11929_v37  ;;  %v5583_v55 = vmax.f32 %v4371_v63, 0.0  ;;  %v5302_v34 = vadd.f32 %v11634_v29, %v10276_v39  ;;  %v5294_v26 = vadd.f32 %v11634_v29, %v5293_v22 }
 0x244   : > { %v4366_v59 = vadd.f32 %v11634_v29, %v4365_v53  ;;  %14446 = vst [vmem:[#allocation26_spill] sm:$0xff] %v11932_v19  ;;  %v10279_v33 = vpop.f32.mrb[24].mxu1  ;;  %v5581_v0 = vmax.f32 %v4363_v41, 0.0  ;;  %v11937_v8 = vpop.permute.xlu1 %6501 }
 0x245   : > { %v5584_v12 = vmax.f32 %v4374_v52, 0.0  ;;  %10150 = vmatmul.mubr.msk.bf16.gmra.mrb[224].mxu0 %vm3275_vm0, %v10508_v6  ;;  %v5315_v20 = vadd.f32 %v11634_v29, %v10279_v33  ;;  %v5306_v63 = vpop.f32.mrb[25].mxu1  ;;  %v5816_v2 = vmax.f32 %v5302_v34, 0.0  ;;  %v5814_v41 = vmax.f32 %v5294_v26, 0.0 }
 0x246   : > { %v5582_v16 = vmax.f32 %v4366_v59, 0.0  ;;  %6378 = vrot.lane.b32.xlu1 %v5914_v7, %s10600_s21  ;;  %7900 = vmatmul.mubr.bf16.gmra.mrb[88].mxu1 %v7501_v58  ;;  %v10280_v48 = vpop.f32.mrb[26].mxu1  ;;  %v5307_v52 = vadd.f32 %v11634_v29, %v5306_v63 }
 0x247   : > { %v5916_v46 = vpack.c.bf16 %v5584_v12, %v5583_v55  ;;  %9662 = vmatprep.mubr.msk.bf16.mxu1 %vm3275_vm0, %v11667_v10  ;;  %v11943_v6 = vpop.permute.xlu0 %6366  ;;  %10153 = vmatprep.mubr.msk.bf16.mxu0 %vm3275_vm0, %v10509_v57  ;;  %v5819_v7 = vmax.f32 %v5315_v20, 0.0  ;;  %v5309_v33 = vpop.f32.mrb[27].mxu1  ;;  %v10510_v55 = vld [vmem:[%s11083_s20 + $0x398] sm:$0xff]   ;;  %v11950_v59 = vpack.c.bf16 %v5816_v2, %v5815_v21  ;;  %v11952_v22 = vpack.c.bf16 %v5814_v41, %v5813_v11 }
 0x248   : > { %v5915_v14 = vpack.c.bf16 %v5582_v16, %v5581_v0  ;;  %v10047_v39 = vpop.f32.mrb[120].mxu0  ;;  %v5318_v26 = vadd.f32 %v11634_v29, %v10280_v48  ;;  %v10283_v57 = vpop.f32.mrb[28].mxu1  ;;  %v10511_v0 = vld [vmem:[%s11083_s20 + $0x3a0] sm:$0xff]   ;;  %v5817_v16 = vmax.f32 %v5307_v52, 0.0  ;;  %v5310_v20 = vadd.f32 %v11634_v29, %v5309_v33 }
 0x249   : > { %v4387_v53 = vadd.f32 %v11634_v29, %v10047_v39  ;;  %v4378_v58 = vpop.f32.mrb[121].mxu0  ;;  %6380 = vrot.lane.b32.xlu0 %v5916_v46, %s10600_s21  ;;  %14447 = vst [vmem:[#allocation27_spill] sm:$0xff] %v11950_v59  ;;  %14448 = vst [vmem:[#allocation28_spill] sm:$0xff] %v11952_v22  ;;  %v5331_v63 = vadd.f32 %v11634_v29, %v10283_v57  ;;  %v5322_v39 = vpop.f32.mrb[29].mxu1 }
 0x24a   : > { %v4379_v12 = vadd.f32 %v11634_v29, %v4378_v58  ;;  %6622 = vrot.lane.b32.xlu1 %v5916_v46, %s10604_s9  ;;  %v10048_v34 = vpop.f32.mrb[122].mxu0  ;;  %v5820_v11 = vmax.f32 %v5318_v26, 0.0  ;;  %v5323_v41 = vadd.f32 %v11634_v29, %v5322_v39  ;;  %v5818_v46 = vmax.f32 %v5310_v20, 0.0  ;;  %v10284_v59 = vpop.f32.mrb[30].mxu1 }
 0x24b   : > { %v4390_v21 = vadd.f32 %v11634_v29, %v10048_v34  ;;  %v4381_v2 = vpop.f32.mrb[123].mxu0  ;;  %v5587_v48 = vmax.f32 %v4387_v53, 0.0  ;;  %v11963_v60 = vpop.permute.xlu1 %6368  ;;  %v5823_v57 = vmax.f32 %v5331_v63, 0.0 }
 0x24c   : > { %v5585_v3 = vmax.f32 %v4379_v12, 0.0  ;;  %v4382_v58 = vadd.f32 %v11634_v29, %v4381_v2  ;;  %v11967_v33 = vpack.c.bf16 %v5820_v11, %v5819_v7  ;;  %v5821_v34 = vmax.f32 %v5323_v41, 0.0  ;;  %v5325_v26 = vpop.f32.mrb[31].mxu1 }
 0x24d   : > { %v5588_v52 = vmax.f32 %v4390_v21, 0.0  ;;  %10154 = vmatmul.mubr.msk.bf16.gmra.mrb[228].mxu0 %vm3275_vm0, %v10510_v55  ;;  %6517 = vrot.lane.b32.xlu0 %v5915_v14, %s10605_s10  ;;  %v11970_v53 = vpack.c.bf16 %v5818_v46, %v5817_v16  ;;  %v5334_v12 = vadd.f32 %v11634_v29, %v10284_v59  ;;  %v5326_v20 = vadd.f32 %v11634_v29, %v5325_v26  ;;  %v10287_v39 = vpop.f32.mrb[32].mxu1  ;;  %v11974_v55 = vpop.permute.xlu0 %6608 }
 0x24e   : > { %14449 = vst [vmem:[#allocation29_spill] sm:$0xff] %v11967_v33  ;;  %v5586_v22 = vmax.f32 %v4382_v58, 0.0  ;;  %10157 = vmatprep.mubr.msk.bf16.mxu0 %vm3275_vm0, %v10511_v0  ;;  %v5347_v14 = vadd.f32 %v11634_v29, %v10287_v39  ;;  %v5338_v7 = vpop.f32.mrb[33].mxu1 }
 0x24f   : > { %14450 = vst [vmem:[#allocation30_spill] sm:$0xff] %v11970_v53  ;;  %v5918_v21 = vpack.c.bf16 %v5588_v52, %v5587_v48  ;;  %v11977_v2 = vpop.permute.xlu1 %6503  ;;  %v5824_v0 = vmax.f32 %v5334_v12, 0.0  ;;  %v5822_v16 = vmax.f32 %v5326_v20, 0.0  ;;  %v5339_v41 = vadd.f32 %v11634_v29, %v5338_v7  ;;  %v10512_v48 = vld [vmem:[%s11083_s20 + $0x3a8] sm:$0xff]   ;;  %v10288_v46 = vpop.f32.mrb[34].mxu1 }
 0x250   : > { %v5917_v63 = vpack.c.bf16 %v5586_v22, %v5585_v3  ;;  %v10051_v11 = vpop.f32.mrb[124].mxu0  ;;  %v10513_v3 = vld [vmem:[%s11083_s20 + $0x3b0] sm:$0xff]   ;;  %v5341_v12 = vpop.f32.mrb[35].mxu1  ;;  %v5827_v53 = vmax.f32 %v5347_v14, 0.0  ;;  %v5350_v33 = vadd.f32 %v11634_v29, %v10288_v46 }
 0x251   : > { %v4403_v59 = vadd.f32 %v11634_v29, %v10051_v11  ;;  %v4394_v58 = vpop.f32.mrb[125].mxu0  ;;  %6624 = vrot.lane.b32.xlu0 %v5918_v21, %s10604_s9  ;;  %6382 = vrot.lane.b32.xlu1 %v5918_v21, %s10600_s21  ;;  %v11986_v22 = vpack.c.bf16 %v5824_v0, %v5823_v57  ;;  %v11988_v39 = vpack.c.bf16 %v5822_v16, %v5821_v34  ;;  %v5825_v19 = vmax.f32 %v5339_v41, 0.0  ;;  %v10291_v37 = vpop.f32.mrb[36].mxu1 }
 0x252   : > { %v4395_v52 = vadd.f32 %v11634_v29, %v4394_v58  ;;  %v10052_v26 = vpop.f32.mrb[126].mxu0  ;;  %v5342_v58 = vadd.f32 %v11634_v29, %v5341_v12  ;;  %v5828_v34 = vmax.f32 %v5350_v33, 0.0  ;;  %v5363_v0 = vadd.f32 %v11634_v29, %v10291_v37  ;;  %v5354_v16 = vpop.f32.mrb[37].mxu1 }
 0x253   : > { %14451 = vst [vmem:[#allocation31_spill] sm:$0xff] %v11986_v22  ;;  %14452 = vst [vmem:[#allocation32_spill] sm:$0xff] %v11988_v39  ;;  %v4406_v20 = vadd.f32 %v11634_v29, %v10052_v26  ;;  %v4397_v7 = vpop.f32.mrb[127].mxu0  ;;  %v11991_v11 = vpop.permute.xlu0 %6370  ;;  %v5591_v31 = vmax.f32 %v4403_v59, 0.0  ;;  %v5355_v46 = vadd.f32 %v11634_v29, %v5354_v16 }
 0x254   : > { %v4398_v21 = vadd.f32 %v11634_v29, %v4397_v7  ;;  %v5589_v26 = vmax.f32 %v4395_v52, 0.0  ;;  %v11999_v22 = vpop.permute.xlu1 %6610  ;;  %v5826_v41 = vmax.f32 %v5342_v58, 0.0  ;;  %v10292_v59 = vpop.f32.mrb[38].mxu1  ;;  %v5831_v33 = vmax.f32 %v5363_v0, 0.0 }
 0x255   : > { %v5592_v57 = vmax.f32 %v4406_v20, 0.0  ;;  %10158 = vmatmul.mubr.msk.bf16.gmra.mrb[232].mxu0 %vm3275_vm0, %v10512_v48  ;;  %6519 = vrot.lane.b32.xlu1 %v5917_v63, %s10605_s10  ;;  %v12005_v48 = vpack.c.bf16 %v5828_v34, %v5827_v53  ;;  %v5366_v37 = vadd.f32 %v11634_v29, %v10292_v59  ;;  %v5357_v63 = vpop.f32.mrb[39].mxu1  ;;  %v5829_v53 = vmax.f32 %v5355_v46, 0.0 }
 0x256   : > { %v5590_v14 = vmax.f32 %v4398_v21, 0.0  ;;  %10161 = vmatprep.mubr.msk.bf16.mxu0 %vm3275_vm0, %v10513_v3  ;;  %v12008_v21 = vpack.c.bf16 %v5826_v41, %v5825_v19  ;;  %v10295_v3 = vpop.f32.mrb[40].mxu1  ;;  %v5358_v34 = vadd.f32 %v11634_v29, %v5357_v63 }
 0x257   : > { %v5920_v12 = vpack.c.bf16 %v5592_v57, %v5591_v31  ;;  %v12003_v20 = vpop.permute.xlu0 %6505  ;;  %14453 = vst [vmem:[#allocation33_spill] sm:$0xff] %v12005_v48  ;;  %v10514_v31 = vld [vmem:[%s11083_s20 + $0x3b8] sm:$0xff]   ;;  %v5832_v57 = vmax.f32 %v5366_v37, 0.0  ;;  %v5370_v0 = vpop.f32.mrb[41].mxu1  ;;  %v5379_v19 = vadd.f32 %v11634_v29, %v10295_v3 }
 0x258   : > { %v5919_v52 = vpack.c.bf16 %v5590_v14, %v5589_v26  ;;  %v10055_v7 = vpop.f32.mrb[128].mxu0  ;;  %14454 = vst [vmem:[#allocation34_spill] sm:$0xff] %v12008_v21  ;;  %v10515_v14 = vld [vmem:[%s11083_s20 + $0x3c0] sm:$0xff]   ;;  %v5371_v41 = vadd.f32 %v11634_v29, %v5370_v0 }
 0x259   : > { %v4419_v58 = vadd.f32 %v11634_v29, %v10055_v7  ;;  %v4410_v16 = vpop.f32.mrb[129].mxu0  ;;  %6384 = vrot.lane.b32.xlu0 %v5920_v12, %s10600_s21  ;;  %6626 = vrot.lane.b32.xlu1 %v5920_v12, %s10604_s9  ;;  %v10296_v7 = vpop.f32.mrb[42].mxu1  ;;  %v12020_v39 = vpack.c.bf16 %v5832_v57, %v5831_v33  ;;  %v5830_v12 = vmax.f32 %v5358_v34, 0.0  ;;  %v5835_v0 = vmax.f32 %v5379_v19, 0.0 }
 0x25a   : > { %v4411_v59 = vadd.f32 %v11634_v29, %v4410_v16  ;;  %v10056_v26 = vpop.f32.mrb[130].mxu0  ;;  %v5373_v16 = vpop.f32.mrb[43].mxu1 }
 0x25b   : > { %v4422_v21 = vadd.f32 %v11634_v29, %v10056_v26  ;;  %v4413_v48 = vpop.f32.mrb[131].mxu0  ;;  %14455 = vst [vmem:[#allocation35_spill] sm:$0xff] %v12020_v39  ;;  %v5595_v46 = vmax.f32 %v4419_v58, 0.0  ;;  %v12023_v51 = vpop.permute.xlu1 %6372  ;;  %v12027_v3 = vpack.c.bf16 %v5830_v12, %v5829_v53  ;;  %v5382_v26 = vadd.f32 %v11634_v29, %v10296_v7 }
 0x25c   : > { %v5593_v37 = vmax.f32 %v4411_v59, 0.0  ;;  %v4414_v63 = vadd.f32 %v11634_v29, %v4413_v48  ;;  %v10299_v33 = vpop.f32.mrb[44].mxu1  ;;  %v5833_v58 = vmax.f32 %v5371_v41, 0.0  ;;  %v5374_v48 = vadd.f32 %v11634_v29, %v5373_v16 }
 0x25d   : > { %v5596_v61 = vmax.f32 %v4422_v21, 0.0  ;;  %10162 = vmatmul.mubr.msk.bf16.gmra.mrb[236].mxu0 %vm3275_vm0, %v10514_v31  ;;  %6521 = vrot.lane.b32.xlu0 %v5919_v52, %s10605_s10  ;;  %14456 = vst [vmem:[#allocation36_spill] sm:$0xff] %v12027_v3  ;;  %v5395_v34 = vadd.f32 %v11634_v29, %v10299_v33  ;;  %v5386_v59 = vpop.f32.mrb[45].mxu1  ;;  %v12033_v31 = vpop.permute.xlu0 %6612  ;;  %v5836_v52 = vmax.f32 %v5382_v26, 0.0 }
 0x25e   : > { %v5594_v57 = vmax.f32 %v4414_v63, 0.0  ;;  %10165 = vmatprep.mubr.msk.bf16.mxu0 %vm3275_vm0, %v10515_v14  ;;  %v5387_v53 = vadd.f32 %v11634_v29, %v5386_v59  ;;  %v10300_v19 = vpop.f32.mrb[46].mxu1  ;;  %v5834_v14 = vmax.f32 %v5374_v48, 0.0  ;;  %v10517_v59 = vld [vmem:[%s11083_s20 + $0x3d0] sm:$0xff]  }
 0x25f   : > { %v5922_v21 = vpack.c.bf16 %v5596_v61, %v5595_v46  ;;  %v12036_v12 = vpop.permute.xlu1 %6507  ;;  %v5839_v41 = vmax.f32 %v5395_v34, 0.0  ;;  %v5398_v16 = vadd.f32 %v11634_v29, %v10300_v19  ;;  %v10516_v61 = vld [vmem:[%s11083_s20 + $0x3c8] sm:$0xff]   ;;  %v12043_v46 = vpack.c.bf16 %v5836_v52, %v5835_v0  ;;  %v5389_v26 = vpop.f32.mrb[47].mxu1 }
 0x260   : > { %v5921_v7 = vpack.c.bf16 %v5594_v57, %v5593_v37  ;;  %v10059_v63 = vpop.f32.mrb[132].mxu0  ;;  %v12047_v3 = vpack.c.bf16 %v5834_v14, %v5833_v58  ;;  %v10303_v34 = vpop.f32.mrb[48].mxu1  ;;  %v5837_v10 = vmax.f32 %v5387_v53, 0.0 }
 0x261   : > { %v4435_v33 = vadd.f32 %v11634_v29, %v10059_v63  ;;  %v4426_v39 = vpop.f32.mrb[133].mxu0  ;;  %6628 = vrot.lane.b32.xlu0 %v5922_v21, %s10604_s9  ;;  %6386 = vrot.lane.b32.xlu1 %v5922_v21, %s10600_s21  ;;  %14457 = vst [vmem:[#allocation37_spill] sm:$0xff] %v12043_v46  ;;  %v5840_v48 = vmax.f32 %v5398_v16, 0.0  ;;  %v12053_v21 = vld [vmem:[%s14364_s2] ss:$0 sm:$0xff]  ;;  %v5402_v58 = vpop.f32.mrb[49].mxu1 }
 0x262   : > { %v4427_v37 = vadd.f32 %v11634_v29, %v4426_v39  ;;  %v10060_v57 = vpop.f32.mrb[134].mxu0  ;;  %14458 = vst [vmem:[#allocation38_spill] sm:$0xff] %v12047_v3  ;;  %v5390_v0 = vadd.f32 %v12053_v21, %v5389_v26  ;;  %v5411_v52 = vadd.f32 %v12053_v21, %v10303_v34  ;;  %v5403_v53 = vadd.f32 %v12053_v21, %v5402_v58 }
 0x263   : > { %v4438_v19 = vadd.f32 %v11634_v29, %v10060_v57  ;;  %v4429_v63 = vpop.f32.mrb[135].mxu0  ;;  %v12058_v46 = vpack.c.bf16 %v5840_v48, %v5839_v41  ;;  %v5599_v14 = vmax.f32 %v4435_v33, 0.0  ;;  %v10304_v57 = vpop.f32.mrb[50].mxu1 }
 0x264   : > { %v4430_v39 = vadd.f32 %v12053_v21, %v4429_v63  ;;  %v5838_v29 = vmax.f32 %v5390_v0, 0.0  ;;  %v5597_v3 = vmax.f32 %v4427_v37, 0.0  ;;  %v12063_v26 = vpop.permute.xlu0 %6374  ;;  %v5843_v34 = vmax.f32 %v5411_v52, 0.0  ;;  %v5405_v48 = vpop.f32.mrb[51].mxu1 }
 0x265   : > { %14459 = vst [vmem:[#allocation39_spill] sm:$0xff] %v12058_v46  ;;  %v5600_v16 = vmax.f32 %v4438_v19, 0.0  ;;  %10166 = vmatmul.mubr.msk.bf16.gmra.mrb[240].mxu0 %vm3275_vm0, %v10516_v61  ;;  %6523 = vrot.lane.b32.xlu1 %v5921_v7, %s10605_s10  ;;  %v5414_v41 = vadd.f32 %v12053_v21, %v10304_v57  ;;  %v12067_v19 = vpop.permute.xlu1 %6614  ;;  %v5841_v7 = vmax.f32 %v5403_v53, 0.0  ;;  %v5406_v63 = vadd.f32 %v12053_v21, %v5405_v48  ;;  %v10307_v0 = vpop.f32.mrb[52].mxu1 }
 0x266   : > { %v5598_v43 = vmax.f32 %v4430_v39, 0.0  ;;  %10169 = vmatprep.mubr.msk.bf16.mxu0 %vm3275_vm0, %v10517_v59  ;;  %v12069_v61 = vpack.c.bf16 %v5838_v29, %v5837_v10  ;;  %v5427_v59 = vadd.f32 %v12053_v21, %v10307_v0  ;;  %v5418_v52 = vpop.f32.mrb[53].mxu1  ;;  %v10518_v10 = vld [vmem:[%s11083_s20 + $0x3d8] sm:$0xff]  }
 0x267   : > { %v5924_v33 = vpack.c.bf16 %v5600_v16, %v5599_v14  ;;  %v5844_v58 = vmax.f32 %v5414_v41, 0.0  ;;  %v5842_v14 = vmax.f32 %v5406_v63, 0.0  ;;  %v5419_v16 = vadd.f32 %v12053_v21, %v5418_v52  ;;  %v10308_v29 = vpop.f32.mrb[54].mxu1 }
 0x268   : > { %14460 = vst [vmem:[#allocation40_spill] sm:$0xff] %v12069_v61  ;;  %v5923_v37 = vpack.c.bf16 %v5598_v43, %v5597_v3  ;;  %v10063_v39 = vpop.f32.mrb[136].mxu0  ;;  %v10519_v3 = vld [vmem:[%s11083_s20 + $0x3e0] sm:$0xff]   ;;  %v5847_v48 = vmax.f32 %v5427_v59, 0.0  ;;  %v5430_v0 = vadd.f32 %v12053_v21, %v10308_v29 }
 0x269   : > { %v4451_v57 = vadd.f32 %v12053_v21, %v10063_v39  ;;  %v4442_v46 = vpop.f32.mrb[137].mxu0  ;;  %6388 = vrot.lane.b32.xlu0 %v5924_v33, %s10600_s21  ;;  %6630 = vrot.lane.b32.xlu1 %v5924_v33, %s10604_s9  ;;  %v12080_v41 = vpack.c.bf16 %v5844_v58, %v5843_v34  ;;  %v5421_v39 = vpop.f32.mrb[55].mxu1  ;;  %v12084_v56 = vpack.c.bf16 %v5842_v14, %v5841_v7  ;;  %v5845_v52 = vmax.f32 %v5419_v16, 0.0 }
 0x26a   : > { %v4443_v53 = vadd.f32 %v12053_v21, %v4442_v46  ;;  %v10064_v43 = vpop.f32.mrb[138].mxu0  ;;  %v5848_v24 = vmax.f32 %v5430_v0, 0.0  ;;  %v5422_v46 = vadd.f32 %v12053_v21, %v5421_v39  ;;  %v10311_v13 = vpop.f32.mrb[56].mxu1 }
 0x26b   : > { %14461 = vst [vmem:[#allocation41_spill] sm:$0xff] %v12080_v41  ;;  %v4454_v61 = vadd.f32 %v12053_v21, %v10064_v43  ;;  %v4445_v25 = vpop.f32.mrb[139].mxu0  ;;  %14462 = vst [vmem:[#allocation42_spill] sm:$0xff] %v12084_v56  ;;  %v12087_v63 = vpop.permute.xlu1 %6376  ;;  %v5603_v34 = vmax.f32 %v4451_v57, 0.0  ;;  %v5443_v29 = vadd.f32 %v12053_v21, %v10311_v13 }
 0x26c   : > { %v4446_v33 = vadd.f32 %v12053_v21, %v4445_v25  ;;  %14463 = vst [vmem:[#allocation43_spill] sm:$0xff] %v12087_v63  ;;  %v5601_v58 = vmax.f32 %v4443_v53, 0.0  ;;  %v5434_v7 = vpop.f32.mrb[57].mxu1  ;;  %v12094_v25 = vpack.c.bf16 %v5848_v24, %v5847_v48  ;;  %v5846_v16 = vmax.f32 %v5422_v46, 0.0  ;;  %v12097_v57 = vpop.permute.xlu0 %6509 }
 0x26d   : > { %v5604_v59 = vmax.f32 %v4454_v61, 0.0  ;;  %10170 = vmatmul.mubr.msk.bf16.gmra.mrb[244].mxu0 %vm3275_vm0, %v10518_v10  ;;  %6525 = vrot.lane.b32.xlu0 %v5923_v37, %s10605_s10  ;;  %v5435_v43 = vadd.f32 %v12053_v21, %v5434_v7  ;;  %v10312_v0 = vpop.f32.mrb[58].mxu1  ;;  %v5851_v53 = vmax.f32 %v5443_v29, 0.0 }
 0x26e   : > { %v5602_v14 = vmax.f32 %v4446_v33, 0.0  ;;  %10173 = vmatprep.mubr.msk.bf16.mxu0 %vm3275_vm0, %v10519_v3  ;;  %14464 = vst [vmem:[#allocation44_spill] sm:$0xff] %v12094_v25  ;;  %v5446_v10 = vadd.f32 %v12053_v21, %v10312_v0  ;;  %v5437_v37 = vpop.f32.mrb[59].mxu1  ;;  %v12102_v3 = vpack.c.bf16 %v5846_v16, %v5845_v52 }
 0x26f   : > { %v5926_v61 = vpack.c.bf16 %v5604_v59, %v5603_v34  ;;  %v12100_v39 = vpop.permute.xlu1 %6511  ;;  %v5849_v24 = vmax.f32 %v5435_v43, 0.0  ;;  %v5438_v48 = vadd.f32 %v12053_v21, %v5437_v37  ;;  %v10520_v34 = vld [vmem:[%s11083_s20 + $0x3e8] sm:$0xff]   ;;  %v10315_v29 = vpop.f32.mrb[60].mxu1 }
 0x270   : > { %v5925_v13 = vpack.c.bf16 %v5602_v14, %v5601_v58  ;;  %v10067_v33 = vpop.f32.mrb[140].mxu0  ;;  %14465 = vst [vmem:[#allocation45_spill] sm:$0xff] %v12102_v3  ;;  %v5852_v59 = vmax.f32 %v5446_v10, 0.0  ;;  %v10521_v58 = vld [vmem:[%s11083_s20 + $0x3f0] sm:$0xff]   ;;  %v5459_v52 = vadd.f32 %v12053_v21, %v10315_v29  ;;  %v5450_v16 = vpop.f32.mrb[61].mxu1 }
 0x271   : > { %v4467_v46 = vadd.f32 %v12053_v21, %v10067_v33  ;;  %v4458_v7 = vpop.f32.mrb[141].mxu0  ;;  %6632 = vrot.lane.b32.xlu0 %v5926_v61, %s10604_s9  ;;  %v5850_v14 = vmax.f32 %v5438_v48, 0.0  ;;  %v5451_v61 = vadd.f32 %v12053_v21, %v5450_v16  ;;  %v10316_v41 = vpop.f32.mrb[62].mxu1 }
 0x272   : > { %v4459_v0 = vadd.f32 %v12053_v21, %v4458_v7  ;;  %v10068_v25 = vpop.f32.mrb[142].mxu0  ;;  %6527 = vrot.lane.b32.xlu1 %v5925_v13, %s10605_s10  ;;  %v12113_v33 = vpack.c.bf16 %v5852_v59, %v5851_v53  ;;  %v5855_v13 = vmax.f32 %v5459_v52, 0.0  ;;  %v5462_v48 = vadd.f32 %v12053_v21, %v10316_v41  ;;  %v5453_v29 = vpop.f32.mrb[63].mxu1 }
 0x273   : > { %v4470_v43 = vadd.f32 %v12053_v21, %v10068_v25  ;;  %v4461_v37 = vpop.f32.mrb[143].mxu0  ;;  %v12117_v3 = vpack.c.bf16 %v5850_v14, %v5849_v24  ;;  %v5607_v7 = vmax.f32 %v4467_v46, 0.0  ;;  %v12121_v63 = vpop.permute.xlu0 %6616  ;;  %v5853_v59 = vmax.f32 %v5451_v61, 0.0 }
 0x274   : > { %14466 = vst [vmem:[#allocation46_spill] sm:$0xff] %v12113_v33  ;;  %v4462_v10 = vadd.f32 %v12053_v21, %v4461_v37  ;;  %v5605_v25 = vmax.f32 %v4459_v0, 0.0  ;;  %v5454_v16 = vadd.f32 %v12053_v21, %v5453_v29  ;;  %v12127_v46 = vpop.permute.xlu1 %6618 }
 0x275   : > { %14467 = vst [vmem:[#allocation47_spill] sm:$0xff] %v12117_v3  ;;  %v5608_v56 = vmax.f32 %v4470_v43, 0.0  ;;  %10174 = vmatmul.mubr.msk.bf16.gmra.mrb[248].mxu0 %vm3275_vm0, %v10520_v34  ;;  %v5856_v34 = vmax.f32 %v5462_v48, 0.0  ;;  %v6891_v43 = vsel %vm3275_vm0, 0, %v11708_v23  ;;  %v10523_v23 = vld [vmem:[%s11083_s20 + $0x400] sm:$0xff]  }
 0x276   : > { %v5606_v53 = vmax.f32 %v4462_v10, 0.0  ;;  %10177 = vmatprep.mubr.msk.bf16.mxu0 %vm3275_vm0, %v10521_v58  ;;  %v5854_v41 = vmax.f32 %v5454_v16, 0.0  ;;  %v10522_v58 = vld [vmem:[%s11083_s20 + $0x3f8] sm:$0xff]  }
 0x277   : > { %v12125_v24 = vpack.c.bf16 %v5608_v56, %v5607_v7  ;;  %v12135_v61 = vpack.c.bf16 %v5856_v34, %v5855_v13  ;;  %v7014_v56 = vsel %vm7010_vm1, %v6891_v43, %v11704_v5  ;;  %v12139_v10 = vpop.permute.xlu0 %6513 }
 0x278   : > { %v5927_v14 = vpack.c.bf16 %v5606_v53, %v5605_v25  ;;  %v10071_v52 = vpop.f32.mrb[144].mxu0  ;;  %v12144_v29 = vpack.c.bf16 %v5854_v41, %v5853_v59  ;;  %v7112_v34 = vsel %vm7097_vm2, %v7014_v56, %v11523_v15 }
 0x279   : > { %14468 = vst [vmem:[#allocation48_spill] sm:$0xff] %v12125_v24  ;;  %v4483_v0 = vadd.f32 %v12053_v21, %v10071_v52  ;;  %v4474_v37 = vpop.f32.mrb[145].mxu0  ;;  %6722 = vrot.lane.b32.xlu0 %v12125_v24, %s10602_s23  ;;  %14469 = vst [vmem:[#allocation49_spill] sm:$0xff] %v12135_v61  ;;  %v7206_v59 = vsel %vm7190_vm3, %v7112_v34, %v11937_v8  ;;  %v10524_v8 = vld [vmem:[%s11083_s20 + $0x408] sm:$0xff]  }
 0x27a   : > { %v4475_v7 = vadd.f32 %v12053_v21, %v4474_v37  ;;  %v10072_v48 = vpop.f32.mrb[146].mxu0  ;;  %6126 = vrot.lane.b32.xlu1 %v5927_v14, %s10601_s22  ;;  %14470 = vst [vmem:[#allocation50_spill] sm:$0xff] %v12144_v29 }
 0x27b   : > { %v4486_v25 = vadd.f32 %v12053_v21, %v10072_v48  ;;  %v4477_v53 = vpop.f32.mrb[147].mxu0  ;;  %v6711_v16 = vpop.permute.xlu1 %6710  ;;  %v5611_v5 = vmax.f32 %v4483_v0, 0.0 }
 0x27c   : > { %v4478_v13 = vadd.f32 %v12053_v21, %v4477_v53  ;;  %v5609_v41 = vmax.f32 %v4475_v7, 0.0  ;;  %v12158_v48 = vpop.permute.xlu0 %6112  ;;  %v6894_v7 = vsel %vm3275_vm0, %v11422_v28, %v11733_v27 }
 0x27d   : > { %v5612_v52 = vmax.f32 %v4486_v25, 0.0  ;;  %10178 = vmatmul.mubr.msk.bf16.gmra.mrb[252].mxu0 %vm3275_vm0, %v10522_v58  ;;  %6254 = vrot.lane.b32.xlu0 %v12125_v24, %s10603_s24  ;;  %v7305_v25 = vsel %vm7289_vm4, %v7206_v59, %v11925_v17 }
 0x27e   : > { %v5610_v43 = vmax.f32 %v4478_v13, 0.0  ;;  %10181 = vmatprep.mubr.msk.bf16.mxu0 %vm3275_vm0, %v10523_v23 }
 0x27f   : > { %v12156_v37 = vpack.c.bf16 %v5612_v52, %v5611_v5  ;;  %v12160_v0 = vpop.permute.xlu1 %6240  ;;  %v10525_v52 = vld [vmem:[%s11083_s20 + $0x410] sm:$0xff]  }
 0x280   : > { %v5929_v56 = vpack.c.bf16 %v5610_v43, %v5609_v41  ;;  %v10075_v58 = vpop.f32.mrb[148].mxu0  ;;  %v7403_v41 = vsel %vm7388_vm5, %v7305_v25, %v11539_v36  ;;  %v7016_v43 = vsel %vm7010_vm1, %v6894_v7, %v11738_v50 }
 0x281   : > { %v4499_v53 = vadd.f32 %v12053_v21, %v10075_v58  ;;  %v4490_v61 = vpop.f32.mrb[149].mxu0  ;;  %6817 = vrot.lane.b32.xlu0 %v5927_v14, %s10606_s11  ;;  %6724 = vrot.lane.b32.xlu1 %v12156_v37, %s10602_s23 }
 0x282   : > { %v4491_v23 = vadd.f32 %v12053_v21, %v4490_v61  ;;  %v10076_v13 = vpop.f32.mrb[150].mxu0  ;;  %v7114_v61 = vsel %vm7097_vm2, %v7016_v43, %v11943_v6 }
 0x283   : > { %v4502_v34 = vadd.f32 %v12053_v21, %v10076_v13  ;;  %v4493_v5 = vpop.f32.mrb[151].mxu0  ;;  %v12174_v17 = vpop.permute.xlu0 %6712  ;;  %v5615_v58 = vmax.f32 %v4499_v53, 0.0  ;;  %v7208_v50 = vsel %vm7190_vm3, %v7114_v61, %v11977_v2  ;;  %v10526_v2 = vld [vmem:[%s11083_s20 + $0x418] sm:$0xff]   ;;  %v10527_v61 = vld [vmem:[%s11083_s20 + $0x420] sm:$0xff]  }
 0x284   : > { %v4494_v59 = vadd.f32 %v12053_v21, %v4493_v5  ;;  %v6804_v14 = vpop.permute.xlu1 %6803  ;;  %v5613_v13 = vmax.f32 %v4491_v23, 0.0 }
 0x285   : > { %v5616_v28 = vmax.f32 %v4502_v34, 0.0  ;;  %10182 = vmatmul.mubr.msk.bf16.gmra.mrb[0].mxu0 %vm3275_vm0, %v10524_v8  ;;  %6128 = vrot.lane.b32.xlu0 %v5929_v56, %s10601_s22  ;;  %v7504_v27 = vsel %vm7481_vm6, %v7403_v41, %v6804_v14  ;;  %v6897_v41 = vsel %vm3275_vm0, %v11439_v47, %v11772_v62 }
 0x286   : > { %v5614_v5 = vmax.f32 %v4494_v59, 0.0  ;;  %6256 = vrot.lane.b32.xlu1 %v12156_v37, %s10603_s24  ;;  %7908 = vmatmul.mubr.bf16.gmra.mrb[92].mxu1 %v7504_v27  ;;  %v7307_v59 = vsel %vm7289_vm4, %v7208_v50, %v11974_v55  ;;  %v7018_v47 = vsel %vm7010_vm1, %v6897_v41, %v11769_v54  ;;  %v10528_v41 = vld [vmem:[%s11083_s20 + $0x428] sm:$0xff]  }
 0x287   : > { %v12191_v25 = vpack.c.bf16 %v5616_v28, %v5615_v58  ;;  %9663 = vmatprep.mubr.msk.bf16.mxu1 %vm3275_vm0, %v11702_v4  ;;  %v12195_v53 = vpop.permute.xlu0 %6242  ;;  %10185 = vmatprep.mubr.msk.bf16.mxu0 %vm3275_vm0, %v10525_v52  ;;  %v7405_v43 = vsel %vm7388_vm5, %v7307_v59, %v6711_v16 }
 0x288   : > { %v5931_v6 = vpack.c.bf16 %v5614_v5, %v5613_v13  ;;  %v12198_v8 = vpop.permute.xlu1 %6114  ;;  %v10079_v7 = vpop.f32.mrb[152].mxu0 }
 0x289   : > { %v4515_v23 = vadd.f32 %v12053_v21, %v10079_v7  ;;  %v4506_v34 = vpop.f32.mrb[153].mxu0  ;;  %6726 = vrot.lane.b32.xlu0 %v12191_v25, %s10602_s23  ;;  %v7116_v7 = vsel %vm7097_vm2, %v7018_v47, %v11963_v60 }
 0x28a   : > { %v4507_v14 = vadd.f32 %v12053_v21, %v4506_v34  ;;  %6819 = vrot.lane.b32.xlu1 %v5929_v56, %s10606_s11  ;;  %v10080_v52 = vpop.f32.mrb[154].mxu0  ;;  %v7210_v54 = vsel %vm7190_vm3, %v7116_v7, %v12003_v20 }
 0x28b   : > { %v4518_v58 = vadd.f32 %v12053_v21, %v10080_v52  ;;  %v4509_v28 = vpop.f32.mrb[155].mxu0  ;;  %v6806_v27 = vpop.permute.xlu0 %6805  ;;  %v5619_v50 = vmax.f32 %v4515_v23, 0.0 }
 0x28c   : > { %v4510_v13 = vadd.f32 %v12053_v21, %v4509_v28  ;;  %v12215_v5 = vpop.permute.xlu1 %6714  ;;  %v7507_v55 = vsel %vm7481_vm6, %v7405_v43, %v6806_v27  ;;  %v5617_v62 = vmax.f32 %v4507_v14, 0.0  ;;  %v6900_v43 = vsel %vm3275_vm0, %v11455_v1, %v11798_v42 }
 0x28d   : > { %v5620_v56 = vmax.f32 %v4518_v58, 0.0  ;;  %10186 = vmatmul.mubr.msk.bf16.gmra.mrb[4].mxu0 %vm3275_vm0, %v10526_v2  ;;  %6258 = vrot.lane.b32.xlu0 %v12191_v25, %s10603_s24  ;;  %v7309_v28 = vsel %vm7289_vm4, %v7210_v54, %v11999_v22 }
 0x28e   : > { %v5618_v16 = vmax.f32 %v4510_v13, 0.0  ;;  %6130 = vrot.lane.b32.xlu1 %v5931_v6, %s10601_s22  ;;  %7916 = vmatmul.mubr.bf16.gmra.mrb[96].mxu1 %v7507_v55  ;;  %v7407_v55 = vsel %vm7388_vm5, %v7309_v28, %v12174_v17  ;;  %v6903_v28 = vsel %vm3275_vm0, %v11471_v18, %v11837_v32 }
 0x28f   : > { %v12226_v34 = vpack.c.bf16 %v5620_v56, %v5619_v50  ;;  %9664 = vmatprep.mubr.msk.bf16.mxu1 %vm3275_vm0, %v11729_v40  ;;  %v12230_v23 = vpop.permute.xlu0 %6116  ;;  %10189 = vmatprep.mubr.msk.bf16.mxu0 %vm3275_vm0, %v10527_v61  ;;  %v7020_v50 = vsel %vm7010_vm1, %v6900_v43, %v11803_v30  ;;  %v7022_v18 = vsel %vm7010_vm1, %v6903_v28, %v11834_v9 }
 0x290   : > { %v5933_v2 = vpack.c.bf16 %v5618_v16, %v5617_v62  ;;  %v12235_v59 = vpop.permute.xlu1 %6244  ;;  %v10083_v14 = vpop.f32.mrb[156].mxu0  ;;  %v7118_v62 = vsel %vm7097_vm2, %v7020_v50, %v11991_v11 }
 0x291   : > { %v4531_v52 = vadd.f32 %v12053_v21, %v10083_v14  ;;  %v4522_v60 = vpop.f32.mrb[157].mxu0  ;;  %6821 = vrot.lane.b32.xlu0 %v5931_v6, %s10606_s11  ;;  %v10529_v6 = vld [vmem:[%s11083_s20 + $0x430] sm:$0xff]   ;;  %v7212_v30 = vsel %vm7190_vm3, %v7118_v62, %v12036_v12  ;;  %v10530_v12 = vld [vmem:[%s11083_s20 + $0x438] sm:$0xff]  }
 0x292   : > { %v4523_v58 = vadd.f32 %v12053_v21, %v4522_v60  ;;  %6728 = vrot.lane.b32.xlu1 %v12226_v34, %s10602_s23  ;;  %v10084_v20 = vpop.f32.mrb[158].mxu0  ;;  %v7311_v43 = vsel %vm7289_vm4, %v7212_v30, %v12033_v31 }
 0x293   : > { %v4534_v27 = vadd.f32 %v12053_v21, %v10084_v20  ;;  %v4525_v61 = vpop.f32.mrb[159].mxu0  ;;  %v12249_v13 = vpop.permute.xlu0 %6716  ;;  %v5623_v56 = vmax.f32 %v4531_v52, 0.0 }
 0x294   : > { %v4526_v1 = vadd.f32 %v12053_v21, %v4525_v61  ;;  %v6808_v42 = vpop.permute.xlu1 %6807  ;;  %v5621_v16 = vmax.f32 %v4523_v58, 0.0 }
 0x295   : > { %v5624_v47 = vmax.f32 %v4534_v27, 0.0  ;;  %10190 = vmatmul.mubr.msk.bf16.gmra.mrb[8].mxu0 %vm3275_vm0, %v10528_v41  ;;  %6132 = vrot.lane.b32.xlu0 %v5933_v2, %s10601_s22  ;;  %v7510_v22 = vsel %vm7481_vm6, %v7407_v55, %v6808_v42  ;;  %v7409_v27 = vsel %vm7388_vm5, %v7311_v43, %v12215_v5 }
 0x296   : > { %v5622_v17 = vmax.f32 %v4526_v1, 0.0  ;;  %6260 = vrot.lane.b32.xlu1 %v12226_v34, %s10603_s24  ;;  %7924 = vmatmul.mubr.bf16.gmra.mrb[100].mxu1 %v7510_v22  ;;  %v10531_v1 = vld [vmem:[%s11083_s20 + $0x440] sm:$0xff]  }
 0x297   : > { %v12266_v7 = vpack.c.bf16 %v5624_v47, %v5623_v56  ;;  %9665 = vmatprep.mubr.msk.bf16.mxu1 %vm3275_vm0, %v11765_v44  ;;  %v12270_v54 = vpop.permute.xlu0 %6246  ;;  %10193 = vmatprep.mubr.msk.bf16.mxu0 %vm3275_vm0, %v10529_v6  ;;  %v7120_v47 = vsel %vm7097_vm2, %v7022_v18, %v12023_v51 }
 0x298   : > { %v5935_v11 = vpack.c.bf16 %v5622_v17, %v5621_v16  ;;  %v12273_v14 = vpop.permute.xlu1 %6118  ;;  %v10087_v52 = vpop.f32.mrb[160].mxu0  ;;  %v7214_v9 = vsel %vm7190_vm3, %v7120_v47, %v12097_v57 }
 0x299   : > { %v4547_v60 = vadd.f32 %v12053_v21, %v10087_v52  ;;  %v4538_v41 = vpop.f32.mrb[161].mxu0  ;;  %6730 = vrot.lane.b32.xlu0 %v12266_v7, %s10602_s23  ;;  %v7313_v43 = vsel %vm7289_vm4, %v7214_v9, %v12067_v19 }
 0x29a   : > { %v4539_v58 = vadd.f32 %v12053_v21, %v4538_v41  ;;  %6823 = vrot.lane.b32.xlu1 %v5933_v2, %s10606_s11  ;;  %v10088_v20 = vpop.f32.mrb[162].mxu0  ;;  %v6906_v41 = vsel %vm3275_vm0, %v11487_v38, %v11865_v45 }
 0x29b   : > { %v4550_v61 = vadd.f32 %v12053_v21, %v10088_v20  ;;  %v4541_v6 = vpop.f32.mrb[163].mxu0  ;;  %v6810_v55 = vpop.permute.xlu0 %6809  ;;  %v5627_v2 = vmax.f32 %v4547_v60, 0.0  ;;  %v10532_v60 = vld [vmem:[%s11083_s20 + $0x448] sm:$0xff]  }
 0x29c   : > { %v4542_v42 = vadd.f32 %v12053_v21, %v4541_v6  ;;  %v12291_v31 = vpop.permute.xlu1 %6718  ;;  %v7513_v50 = vsel %vm7481_vm6, %v7409_v27, %v6810_v55  ;;  %v5625_v32 = vmax.f32 %v4539_v58, 0.0  ;;  %v7411_v27 = vsel %vm7388_vm5, %v7313_v43, %v12249_v13 }
 0x29d   : > { %v5628_v56 = vmax.f32 %v4550_v61, 0.0  ;;  %10194 = vmatmul.mubr.msk.bf16.gmra.mrb[12].mxu0 %vm3275_vm0, %v10530_v12  ;;  %6262 = vrot.lane.b32.xlu0 %v12266_v7, %s10603_s24  ;;  %v7024_v61 = vsel %vm7010_vm1, %v6906_v41, %v11870_v35 }
 0x29e   : > { %v5626_v5 = vmax.f32 %v4542_v42, 0.0  ;;  %6134 = vrot.lane.b32.xlu1 %v5935_v11, %s10601_s22  ;;  %7932 = vmatmul.mubr.bf16.gmra.mrb[104].mxu1 %v7513_v50 }
 0x29f   : > { %v12302_v22 = vpack.c.bf16 %v5628_v56, %v5627_v2  ;;  %9666 = vmatprep.mubr.msk.bf16.mxu1 %vm3275_vm0, %v11794_v49  ;;  %v12306_v62 = vpop.permute.xlu0 %6120  ;;  %10197 = vmatprep.mubr.msk.bf16.mxu0 %vm3275_vm0, %v10531_v1  ;;  %v7122_v1 = vsel %vm7097_vm2, %v7024_v61, %v12063_v26  ;;  %v14472_v2 = vld [vmem:[#allocation19_spill] sm:$0xff] }
 0x2a0   : > { %v5937_v16 = vpack.c.bf16 %v5626_v5, %v5625_v32  ;;  %v12311_v17 = vpop.permute.xlu1 %6248  ;;  %v10091_v30 = vpop.f32.mrb[164].mxu0  ;;  %v7216_v35 = vsel %vm7190_vm3, %v7122_v1, %v12100_v39  ;;  %v10534_v39 = vld [vmem:[%s11083_s20 + $0x458] sm:$0xff]  }
 0x2a1   : > { %v4563_v52 = vadd.f32 %v12053_v21, %v10091_v30  ;;  %v4554_v51 = vpop.f32.mrb[165].mxu0  ;;  %6825 = vrot.lane.b32.xlu0 %v5935_v11, %s10606_s11  ;;  %v10533_v11 = vld [vmem:[%s11083_s20 + $0x450] sm:$0xff]   ;;  %v7315_v9 = vsel %vm7289_vm4, %v7216_v35, %v12121_v63 }
 0x2a2   : > { %v4555_v12 = vadd.f32 %v12053_v21, %v4554_v51  ;;  %6732 = vrot.lane.b32.xlu1 %v12302_v22, %s10602_s23  ;;  %v10092_v57 = vpop.f32.mrb[166].mxu0  ;;  %v14473_v51 = vld [vmem:[#allocation24_spill] sm:$0xff] }
 0x2a3   : > { %v4566_v58 = vadd.f32 %v12053_v21, %v10092_v57  ;;  %v4557_v20 = vpop.f32.mrb[167].mxu0  ;;  %v12325_v28 = vpop.permute.xlu0 %6720  ;;  %v5631_v6 = vmax.f32 %v4563_v52, 0.0 }
 0x2a4   : > { %v4558_v38 = vadd.f32 %v12053_v21, %v4557_v20  ;;  %v6812_v45 = vpop.permute.xlu1 %6811  ;;  %v5629_v42 = vmax.f32 %v4555_v12, 0.0  ;;  %v7413_v12 = vsel %vm7388_vm5, %v7315_v9, %v12291_v31  ;;  %v10535_v20 = vld [vmem:[%s11083_s20 + $0x460] sm:$0xff]  }
 0x2a5   : > { %v5632_v55 = vmax.f32 %v4566_v58, 0.0  ;;  %10198 = vmatmul.mubr.msk.bf16.gmra.mrb[16].mxu0 %vm3275_vm0, %v10532_v60  ;;  %6136 = vrot.lane.b32.xlu0 %v5937_v16, %s10601_s22  ;;  %v7516_v19 = vsel %vm7481_vm6, %v7411_v27, %v6812_v45  ;;  %v14474_v60 = vld [vmem:[#allocation8_spill] sm:$0xff]  ;;  %v14475_v45 = vld [vmem:[#allocation21_spill] sm:$0xff] }
 0x2a6   : > { %v5630_v13 = vmax.f32 %v4558_v38, 0.0  ;;  %6264 = vrot.lane.b32.xlu1 %v12302_v22, %s10603_s24  ;;  %7940 = vmatmul.mubr.bf16.gmra.mrb[108].mxu1 %v7516_v19  ;;  %v6909_v41 = vsel %vm3275_vm0, %v14474_v60, %v14473_v51  ;;  %v10537_v51 = vld [vmem:[%s11083_s20 + $0x470] sm:$0xff]  }
 0x2a7   : > { %v12342_v50 = vpack.c.bf16 %v5632_v55, %v5631_v6  ;;  %9667 = vmatprep.mubr.msk.bf16.mxu1 %vm3275_vm0, %v14472_v2  ;;  %v12346_v56 = vpop.permute.xlu0 %6250  ;;  %10201 = vmatprep.mubr.msk.bf16.mxu0 %vm3275_vm0, %v10533_v11  ;;  %v7026_v31 = vsel %vm7010_vm1, %v6909_v41, %v14475_v45  ;;  %v14476_v55 = vld [vmem:[#allocation43_spill] sm:$0xff] }
 0x2a8   : > { %v5939_v26 = vpack.c.bf16 %v5630_v13, %v5629_v42  ;;  %v12349_v18 = vpop.permute.xlu1 %6122  ;;  %v10095_v32 = vpop.f32.mrb[168].mxu0  ;;  %v7124_v19 = vsel %vm7097_vm2, %v7026_v31, %v14476_v55  ;;  %v14477_v42 = vld [vmem:[#allocation20_spill] sm:$0xff] }
 0x2a9   : > { %14471 = vst [vmem:[#allocation51_spill] sm:$0xff] %v12342_v50  ;;  %v4579_v5 = vadd.f32 %v12053_v21, %v10095_v32  ;;  %v4570_v47 = vpop.f32.mrb[169].mxu0  ;;  %6266 = vrot.lane.b32.xlu0 %v12342_v50, %s10603_s24  ;;  %v7218_v13 = vsel %vm7190_vm3, %v7124_v19, %v12139_v10 }
 0x2aa   : > { %v4571_v30 = vadd.f32 %v12053_v21, %v4570_v47  ;;  %6827 = vrot.lane.b32.xlu1 %v5937_v16, %s10606_s11  ;;  %v10096_v52 = vpop.f32.mrb[170].mxu0  ;;  %v7317_v10 = vsel %vm7289_vm4, %v7218_v13, %v12127_v46 }
 0x2ab   : > { %v4582_v57 = vadd.f32 %v12053_v21, %v10096_v52  ;;  %v4573_v43 = vpop.f32.mrb[171].mxu0  ;;  %v6814_v58 = vpop.permute.xlu0 %6813  ;;  %v5635_v16 = vmax.f32 %v4579_v5, 0.0 }
 0x2ac   : > { %v4574_v11 = vadd.f32 %v12053_v21, %v4573_v43  ;;  %v12367_v63 = vpop.permute.xlu1 %6252  ;;  %v7519_v27 = vsel %vm7481_vm6, %v7413_v12, %v6814_v58  ;;  %v5633_v61 = vmax.f32 %v4571_v30, 0.0  ;;  %v7415_v12 = vsel %vm7388_vm5, %v7317_v10, %v12325_v28 }
 0x2ad   : > { %v5636_v38 = vmax.f32 %v4582_v57, 0.0  ;;  %10202 = vmatmul.mubr.msk.bf16.gmra.mrb[20].mxu0 %vm3275_vm0, %v10534_v39  ;;  %6829 = vrot.lane.b32.xlu0 %v5939_v26, %s10606_s11  ;;  %v10536_v39 = vld [vmem:[%s11083_s20 + $0x468] sm:$0xff]  }
 0x2ae   : > { %v5634_v6 = vmax.f32 %v4574_v11, 0.0  ;;  %6138 = vrot.lane.b32.xlu1 %v5939_v26, %s10601_s22  ;;  %7948 = vmatmul.mubr.bf16.gmra.mrb[112].mxu1 %v7519_v27 }
 0x2af   : > { %v5942_v1 = vpack.c.bf16 %v5636_v38, %v5635_v16  ;;  %9668 = vmatprep.mubr.msk.bf16.mxu1 %vm3275_vm0, %v14477_v42  ;;  %10205 = vmatprep.mubr.msk.bf16.mxu0 %vm3275_vm0, %v10535_v20  ;;  %v12382_v5 = vpop.permute.xlu0 %6124 }
 0x2b0   : > { %v5941_v35 = vpack.c.bf16 %v5634_v6, %v5633_v61  ;;  %v10099_v32 = vpop.f32.mrb[172].mxu0  ;;  %v6816_v9 = vpop.permute.xlu1 %6815  ;;  %v10538_v6 = vld [vmem:[%s11083_s20 + $0x478] sm:$0xff]  }
 0x2b1   : > { %v4595_v26 = vadd.f32 %v12053_v21, %v10099_v32  ;;  %v4586_v47 = vpop.f32.mrb[173].mxu0  ;;  %6634 = vrot.lane.b32.xlu0 %v5942_v1, %s10604_s9  ;;  %v7522_v20 = vsel %vm7481_vm6, %v7415_v12, %v6816_v9 }
 0x2b2   : > { %v4587_v30 = vadd.f32 %v12053_v21, %v4586_v47  ;;  %v10100_v52 = vpop.f32.mrb[174].mxu0  ;;  %6529 = vrot.lane.b32.xlu1 %v5941_v35, %s10605_s10 }
 0x2b3   : > { %v4598_v60 = vadd.f32 %v12053_v21, %v10100_v52  ;;  %v4589_v41 = vpop.f32.mrb[175].mxu0  ;;  %v5639_v43 = vmax.f32 %v4595_v26, 0.0 }
 0x2b4   : > { %v4590_v57 = vadd.f32 %v12053_v21, %v4589_v41  ;;  %v5637_v11 = vmax.f32 %v4587_v30, 0.0  ;;  %v12400_v16 = vpop.permute.xlu0 %6515  ;;  %v12404_v38 = vpop.permute.xlu1 %6620 }
 0x2b5   : > { %v5640_v58 = vmax.f32 %v4598_v60, 0.0  ;;  %10206 = vmatmul.mubr.msk.bf16.gmra.mrb[24].mxu0 %vm3275_vm0, %v10536_v39  ;;  %6390 = vrot.lane.b32.xlu0 %v5942_v1, %s10600_s21  ;;  %v10539_v1 = vld [vmem:[%s11083_s20 + $0x480] sm:$0xff]  }
 0x2b6   : > { %v5638_v27 = vmax.f32 %v4590_v57, 0.0  ;;  %7956 = vmatmul.mubr.bf16.gmra.mrb[116].mxu1 %v7522_v20  ;;  %10209 = vmatprep.mubr.msk.bf16.mxu0 %vm3275_vm0, %v10537_v51  ;;  %v10540_v57 = vld [vmem:[%s11083_s20 + $0x488] sm:$0xff]   ;;  %v10541_v20 = vld [vmem:[%s11083_s20 + $0x490] sm:$0xff]  }
 0x2b7   : > { %v5944_v46 = vpack.c.bf16 %v5640_v58, %v5639_v43  ;;  %9669 = vmatprep.mubr.msk.bf16.mxu1 %vm3275_vm0, %v12125_v24 }
 0x2b8   : > { %v5943_v28 = vpack.c.bf16 %v5638_v27, %v5637_v11  ;;  %v10103_v45 = vpop.f32.mrb[176].mxu0  ;;  %v12418_v39 = vpop.permute.xlu1 %6378 }
 0x2b9   : > { %v4611_v31 = vadd.f32 %v12053_v21, %v10103_v45  ;;  %v4602_v61 = vpop.f32.mrb[177].mxu0  ;;  %6636 = vrot.lane.b32.xlu0 %v5944_v46, %s10604_s9  ;;  %6392 = vrot.lane.b32.xlu1 %v5944_v46, %s10600_s21 }
 0x2ba   : > { %v4603_v55 = vadd.f32 %v12053_v21, %v4602_v61  ;;  %v10104_v19 = vpop.f32.mrb[178].mxu0 }
 0x2bb   : > { %v4614_v42 = vadd.f32 %v12053_v21, %v10104_v19  ;;  %v4605_v13 = vpop.f32.mrb[179].mxu0  ;;  %v12413_v35 = vpop.permute.xlu0 %6380  ;;  %v5643_v26 = vmax.f32 %v4611_v31, 0.0 }
 0x2bc   : > { %v4606_v32 = vadd.f32 %v12053_v21, %v4605_v13  ;;  %v5641_v9 = vmax.f32 %v4603_v55, 0.0  ;;  %v12430_v46 = vpop.permute.xlu1 %6622 }
 0x2bd   : > { %v5644_v47 = vmax.f32 %v4614_v42, 0.0  ;;  %10210 = vmatmul.mubr.msk.bf16.gmra.mrb[28].mxu0 %vm3275_vm0, %v10538_v6  ;;  %6531 = vrot.lane.b32.xlu1 %v5943_v28, %s10605_s10 }
 0x2be   : > { %v5642_v30 = vmax.f32 %v4606_v32, 0.0  ;;  %10213 = vmatprep.mubr.msk.bf16.mxu0 %vm3275_vm0, %v10539_v1 }
 0x2bf   : > { %v5946_v52 = vpack.c.bf16 %v5644_v47, %v5643_v26  ;;  %v12421_v60 = vpop.permute.xlu0 %6517  ;;  %v10542_v47 = vld [vmem:[%s11083_s20 + $0x498] sm:$0xff]  }
 0x2c0   : > { %v5945_v51 = vpack.c.bf16 %v5642_v30, %v5641_v9  ;;  %v10107_v10 = vpop.f32.mrb[180].mxu0 }
 0x2c1   : > { %v4627_v41 = vadd.f32 %v12053_v21, %v10107_v10  ;;  %v4618_v12 = vpop.f32.mrb[181].mxu0  ;;  %6394 = vrot.lane.b32.xlu0 %v5946_v52, %s10600_s21  ;;  %6638 = vrot.lane.b32.xlu1 %v5946_v52, %s10604_s9  ;;  %v10543_v52 = vld [vmem:[%s11083_s20 + $0x4a0] sm:$0xff]  }
 0x2c2   : > { %v4619_v43 = vadd.f32 %v12053_v21, %v4618_v12  ;;  %v10108_v58 = vpop.f32.mrb[182].mxu0 }
 0x2c3   : > { %v4630_v11 = vadd.f32 %v12053_v21, %v10108_v58  ;;  %v4621_v27 = vpop.f32.mrb[183].mxu0  ;;  %v5647_v45 = vmax.f32 %v4627_v41, 0.0  ;;  %v12436_v19 = vpop.permute.xlu0 %6624 }
 0x2c4   : > { %v4622_v28 = vadd.f32 %v12053_v21, %v4621_v27  ;;  %v5645_v61 = vmax.f32 %v4619_v43, 0.0  ;;  %v12438_v42 = vpop.permute.xlu1 %6382 }
 0x2c5   : > { %v5648_v31 = vmax.f32 %v4630_v11, 0.0  ;;  %10214 = vmatmul.mubr.msk.bf16.gmra.mrb[32].mxu0 %vm3275_vm0, %v10540_v57  ;;  %6533 = vrot.lane.b32.xlu0 %v5945_v51, %s10605_s10 }
 0x2c6   : > { %v5646_v6 = vmax.f32 %v4622_v28, 0.0  ;;  %10217 = vmatprep.mubr.msk.bf16.mxu0 %vm3275_vm0, %v10541_v20 }
 0x2c7   : > { %v5948_v55 = vpack.c.bf16 %v5648_v31, %v5647_v45 }
 0x2c8   : > { %v5947_v1 = vpack.c.bf16 %v5646_v6, %v5645_v61  ;;  %v10111_v13 = vpop.f32.mrb[184].mxu0  ;;  %v12452_v58 = vpop.permute.xlu1 %6519 }
 0x2c9   : > { %v4643_v32 = vadd.f32 %v12053_v21, %v10111_v13  ;;  %v4634_v26 = vpop.f32.mrb[185].mxu0  ;;  %6640 = vrot.lane.b32.xlu0 %v5948_v55, %s10604_s9  ;;  %6396 = vrot.lane.b32.xlu1 %v5948_v55, %s10600_s21  ;;  %v10544_v55 = vld [vmem:[%s11083_s20 + $0x4a8] sm:$0xff]  }
 0x2ca   : > { %v4635_v9 = vadd.f32 %v12053_v21, %v4634_v26  ;;  %v10112_v30 = vpop.f32.mrb[186].mxu0 }
 0x2cb   : > { %v4646_v51 = vadd.f32 %v12053_v21, %v10112_v30  ;;  %v4637_v10 = vpop.f32.mrb[187].mxu0  ;;  %v12447_v41 = vpop.permute.xlu0 %6384  ;;  %v5651_v57 = vmax.f32 %v4643_v32, 0.0  ;;  %v10545_v32 = vld [vmem:[%s11083_s20 + $0x4b0] sm:$0xff]  }
 0x2cc   : > { %v4638_v12 = vadd.f32 %v12053_v21, %v4637_v10  ;;  %v5649_v20 = vmax.f32 %v4635_v9, 0.0  ;;  %v12464_v9 = vpop.permute.xlu1 %6626 }
 0x2cd   : > { %v5652_v43 = vmax.f32 %v4646_v51, 0.0  ;;  %10218 = vmatmul.mubr.msk.bf16.gmra.mrb[36].mxu0 %vm3275_vm0, %v10542_v47  ;;  %6535 = vrot.lane.b32.xlu1 %v5947_v1, %s10605_s10 }
 0x2ce   : > { %v5650_v11 = vmax.f32 %v4638_v12, 0.0  ;;  %10221 = vmatprep.mubr.msk.bf16.mxu0 %vm3275_vm0, %v10543_v52 }
 0x2cf   : > { %v5950_v27 = vpack.c.bf16 %v5652_v43, %v5651_v57  ;;  %v12455_v31 = vpop.permute.xlu0 %6521 }
 0x2d0   : > { %v5949_v28 = vpack.c.bf16 %v5650_v11, %v5649_v20  ;;  %v10115_v45 = vpop.f32.mrb[188].mxu0 }
 0x2d1   : > { %v4659_v61 = vadd.f32 %v12053_v21, %v10115_v45  ;;  %v4650_v6 = vpop.f32.mrb[189].mxu0  ;;  %6398 = vrot.lane.b32.xlu0 %v5950_v27, %s10600_s21  ;;  %6642 = vrot.lane.b32.xlu1 %v5950_v27, %s10604_s9 }
 0x2d2   : > { %v4651_v1 = vadd.f32 %v12053_v21, %v4650_v6  ;;  %v10116_v13 = vpop.f32.mrb[190].mxu0 }
 0x2d3   : > { %v4662_v26 = vadd.f32 %v12053_v21, %v10116_v13  ;;  %v4653_v47 = vpop.f32.mrb[191].mxu0  ;;  %v5655_v52 = vmax.f32 %v4659_v61, 0.0  ;;  %v12470_v43 = vpop.permute.xlu0 %6628 }
 0x2d4   : > { %v4654_v30 = vadd.f32 %v12053_v21, %v4653_v47  ;;  %v5653_v10 = vmax.f32 %v4651_v1, 0.0  ;;  %v12472_v11 = vpop.permute.xlu1 %6386  ;;  %v10547_v1 = vld [vmem:[%s11083_s20 + $0x4c0] sm:$0xff]  }
 0x2d5   : > { %v5656_v51 = vmax.f32 %v4662_v26, 0.0  ;;  %10222 = vmatmul.mubr.msk.bf16.gmra.mrb[40].mxu0 %vm3275_vm0, %v10544_v55  ;;  %6537 = vrot.lane.b32.xlu0 %v5949_v28, %s10605_s10  ;;  %v10546_v28 = vld [vmem:[%s11083_s20 + $0x4b8] sm:$0xff]  }
 0x2d6   : > { %v5654_v12 = vmax.f32 %v4654_v30, 0.0  ;;  %10225 = vmatprep.mubr.msk.bf16.mxu0 %vm3275_vm0, %v10545_v32 }
 0x2d7   : > { %v5952_v57 = vpack.c.bf16 %v5656_v51, %v5655_v52 }
 0x2d8   : > { %v5951_v20 = vpack.c.bf16 %v5654_v12, %v5653_v10  ;;  %v10119_v27 = vpop.f32.mrb[192].mxu0  ;;  %v12486_v51 = vpop.permute.xlu1 %6523 }
 0x2d9   : > { %v4675_v45 = vadd.f32 %v12053_v21, %v10119_v27  ;;  %v4666_v61 = vpop.f32.mrb[193].mxu0  ;;  %6644 = vrot.lane.b32.xlu0 %v5952_v57, %s10604_s9  ;;  %6400 = vrot.lane.b32.xlu1 %v5952_v57, %s10600_s21 }
 0x2da   : > { %v4667_v6 = vadd.f32 %v12053_v21, %v4666_v61  ;;  %v10120_v55 = vpop.f32.mrb[194].mxu0 }
 0x2db   : > { %v4678_v13 = vadd.f32 %v12053_v21, %v10120_v55  ;;  %v4669_v32 = vpop.f32.mrb[195].mxu0  ;;  %v12481_v26 = vpop.permute.xlu0 %6388  ;;  %v5659_v30 = vmax.f32 %v4675_v45, 0.0 }
 0x2dc   : > { %14478 = vst [vmem:[#allocation19_spill] sm:$0xff] %v12481_v26  ;;  %v4670_v47 = vadd.f32 %v12053_v21, %v4669_v32  ;;  %v5657_v10 = vmax.f32 %v4667_v6, 0.0  ;;  %v10549_v6 = vld [vmem:[%s11083_s20 + $0x4d0] sm:$0xff]  }
 0x2dd   : > { %v5660_v52 = vmax.f32 %v4678_v13, 0.0  ;;  %10226 = vmatmul.mubr.msk.bf16.gmra.mrb[44].mxu0 %vm3275_vm0, %v10546_v28  ;;  %6539 = vrot.lane.b32.xlu1 %v5951_v20, %s10605_s10  ;;  %v10548_v28 = vld [vmem:[%s11083_s20 + $0x4c8] sm:$0xff]  }
 0x2de   : > { %v5658_v12 = vmax.f32 %v4670_v47, 0.0  ;;  %10229 = vmatprep.mubr.msk.bf16.mxu0 %vm3275_vm0, %v10547_v1  ;;  %v12500_v1 = vld [vmem:[%s14364_s2] ss:$0 sm:$0xff] }
 0x2df   : > { %v5954_v57 = vpack.c.bf16 %v5660_v52, %v5659_v30  ;;  %v12489_v55 = vpop.permute.xlu0 %6525  ;;  %v12503_v52 = vpop.permute.xlu1 %6630 }
 0x2e0   : > { %v5953_v27 = vpack.c.bf16 %v5658_v12, %v5657_v10  ;;  %v10123_v61 = vpop.f32.mrb[196].mxu0 }
 0x2e1   : > { %v4691_v32 = vadd.f32 %v12053_v21, %v10123_v61  ;;  %v4682_v45 = vpop.f32.mrb[197].mxu0  ;;  %6646 = vrot.lane.b32.xlu1 %v5954_v57, %s10604_s9 }
 0x2e2   : > { %v4683_v20 = vadd.f32 %v12053_v21, %v4682_v45  ;;  %v10124_v13 = vpop.f32.mrb[198].mxu0  ;;  %6541 = vrot.lane.b32.xlu0 %v5953_v27, %s10605_s10 }
 0x2e3   : > { %v4694_v47 = vadd.f32 %v12500_v1, %v10124_v13  ;;  %v4685_v30 = vpop.f32.mrb[199].mxu0  ;;  %v5663_v12 = vmax.f32 %v4691_v32, 0.0  ;;  %v12510_v45 = vpop.permute.xlu0 %6632  ;;  %v12515_v13 = vld [vmem:[%s14366_s4] ss:$0 sm:$0xff]  ;;  %v6911_v32 = vsel %vm3275_vm0, 0, %v12158_v48 }
 0x2e4   : > { %v4686_v10 = vadd.f32 %v12500_v1, %v4685_v30  ;;  %v5661_v21 = vmax.f32 %v4683_v20, 0.0  ;;  %14480 = vst [vmem:[#allocation8_spill] sm:$0xff] %v12510_v45 }
 0x2e5   : > { %v5664_v57 = vmax.f32 %v4694_v47, 0.0  ;;  %10230 = vmatmul.mubr.msk.bf16.gmra.mrb[48].mxu0 %vm3275_vm0, %v10548_v28  ;;  %v12519_v28 = vpop.permute.xlu1 %6527 }
 0x2e6   : > { %v5662_v27 = vmax.f32 %v4686_v10, 0.0  ;;  %10233 = vmatprep.mubr.msk.bf16.mxu0 %vm3275_vm0, %v10549_v6  ;;  %14481 = vst [vmem:[#allocation21_spill] sm:$0xff] %v12519_v28  ;;  %v7028_v6 = vsel %vm7010_vm1, %v6911_v32, %v12160_v0 }
 0x2e7   : > { %v12508_v61 = vpack.c.bf16 %v5664_v57, %v5663_v12  ;;  %v10550_v57 = vld [vmem:[%s11083_s20 + $0x4d8] sm:$0xff]  }
 0x2e8   : > { %v5955_v47 = vpack.c.bf16 %v5662_v27, %v5661_v21  ;;  %v10127_v20 = vpop.f32.mrb[200].mxu0  ;;  %v10551_v27 = vld [vmem:[%s11083_s20 + $0x4e0] sm:$0xff]  }
 0x2e9   : > { %14479 = vst [vmem:[#allocation24_spill] sm:$0xff] %v12508_v61  ;;  %v4707_v30 = vadd.f32 %v12500_v1, %v10127_v20  ;;  %v7853_v10 = vpop.f32.mrb[64].mxu1  ;;  %v4698_v12 = vpop.f32.mrb[201].mxu0  ;;  %6734 = vrot.lane.b32.xlu1 %v12508_v61, %s10602_s23  ;;  %v7125_v20 = vsel %vm7097_vm2, %v7028_v6, %v11523_v15 }
 0x2ea   : > { %v7854_v33 = vadd.f32 %v12515_v13, %v7853_v10  ;;  %v4699_v29 = vadd.f32 %v12500_v1, %v4698_v12  ;;  %v7855_v48 = vpop.f32.mrb[65].mxu1  ;;  %v10128_v21 = vpop.f32.mrb[202].mxu0  ;;  %6140 = vrot.lane.b32.xlu0 %v5955_v47, %s10601_s22  ;;  %v7220_v12 = vsel %vm7190_vm3, %v7125_v20, %v12400_v16 }
 0x2eb   : > { %v4710_v3 = vadd.f32 %v12500_v1, %v10128_v21  ;;  %v7856_v0 = vpop.f32.mrb[66].mxu1  ;;  %v4701_v32 = vpop.f32.mrb[203].mxu0  ;;  %v5667_v48 = vmax.f32 %v4707_v30, 0.0 }
 0x2ec   : > { %v7857_v24 = vadd.f32 %v12515_v13, %v7856_v0  ;;  %v4702_v45 = vadd.f32 %v12500_v1, %v4701_v32  ;;  %v12536_v28 = vpop.permute.xlu0 %6722  ;;  %v7858_v10 = vpop.f32.mrb[67].mxu1  ;;  %v8244_v21 = vmax.f32 %v7854_v33, 0.0  ;;  %v5665_v26 = vmax.f32 %v4699_v29, 0.0 }
 0x2ed   : > { %v5668_v50 = vmax.f32 %v4710_v3, 0.0  ;;  %10234 = vmatmul.mubr.msk.bf16.gmra.mrb[52].mxu0 %vm3275_vm0, %v10550_v57  ;;  %6268 = vrot.lane.b32.xlu1 %v12508_v61, %s10603_s24  ;;  %v12546_v10 = vpop.permute.xlu1 %6126  ;;  %v7319_v33 = vsel %vm7289_vm4, %v7220_v12, %v12404_v38  ;;  %v10553_v12 = vld [vmem:[%s11083_s20 + $0x4f0] sm:$0xff]  }
 0x2ee   : > { %v8245_v6 = vmax.f32 %v7857_v24, 0.0  ;;  %v5666_v0 = vmax.f32 %v4702_v45, 0.0  ;;  %10237 = vmatprep.mubr.msk.bf16.mxu0 %vm3275_vm0, %v10551_v27  ;;  %14482 = vst [vmem:[#allocation43_spill] sm:$0xff] %v12546_v10 }
 0x2ef   : > { %v12544_v32 = vpack.c.bf16 %v5668_v50, %v5667_v48  ;;  %v10552_v50 = vld [vmem:[%s11083_s20 + $0x4e8] sm:$0xff]  }
 0x2f0   : > { %v12548_v15 = vpack.c.bf16 %v8245_v6, %v8244_v21  ;;  %v5957_v16 = vpack.c.bf16 %v5666_v0, %v5665_v26  ;;  %v12550_v3 = vpop.permute.xlu0 %6254  ;;  %v10131_v30 = vpop.f32.mrb[204].mxu0  ;;  %v14485_v6 = vld [vmem:[#allocation16_spill] sm:$0xff] }
 0x2f1   : > { %14484 = vst [vmem:[#allocation52_spill] sm:$0xff] %v12550_v3  ;;  %v4723_v29 = vadd.f32 %v12500_v1, %v10131_v30  ;;  %v7861_v24 = vpop.f32.mrb[68].mxu1  ;;  %v4714_v45 = vpop.f32.mrb[205].mxu0  ;;  %6736 = vrot.lane.b32.xlu0 %v12544_v32, %s10602_s23  ;;  %6831 = vrot.lane.b32.xlu1 %v5955_v47, %s10606_s11  ;;  %v6914_v0 = vsel %vm3275_vm0, %v14485_v6, %v12198_v8 }
 0x2f2   : > { %14483 = vst [vmem:[#allocation20_spill] sm:$0xff] %v12548_v15  ;;  %v7862_v57 = vadd.f32 %v12515_v13, %v7861_v24  ;;  %v4715_v26 = vadd.f32 %v12500_v1, %v4714_v45  ;;  %v7863_v27 = vpop.f32.mrb[69].mxu1  ;;  %v10132_v20 = vpop.f32.mrb[206].mxu0  ;;  %v7416_v24 = vsel %vm7388_vm5, %v7319_v33, %v11539_v36 }
 0x2f3   : > { %v4726_v48 = vadd.f32 %v12500_v1, %v10132_v20  ;;  %v7864_v21 = vpop.f32.mrb[70].mxu1  ;;  %v4717_v38 = vpop.f32.mrb[207].mxu0  ;;  %v5671_v45 = vmax.f32 %v4723_v29, 0.0 }
 0x2f4   : > { %v7865_v30 = vadd.f32 %v12515_v13, %v7864_v21  ;;  %v4718_v47 = vadd.f32 %v12500_v1, %v4717_v38  ;;  %v6818_v15 = vpop.permute.xlu0 %6817  ;;  %v7866_v3 = vpop.f32.mrb[71].mxu1  ;;  %v8246_v20 = vmax.f32 %v7862_v57, 0.0  ;;  %v5669_v21 = vmax.f32 %v4715_v26, 0.0 }
 0x2f5   : > { %v5672_v27 = vmax.f32 %v4726_v48, 0.0  ;;  %v12570_v10 = vpop.permute.xlu1 %6724  ;;  %10238 = vmatmul.mubr.msk.bf16.gmra.mrb[56].mxu0 %vm3275_vm0, %v10552_v50  ;;  %6270 = vrot.lane.b32.xlu0 %v12544_v32, %s10603_s24  ;;  %v7525_v8 = vsel %vm7481_vm6, %v7416_v24, %v6818_v15  ;;  %v7030_v3 = vsel %vm7010_vm1, %v6914_v0, %v12195_v53 }
 0x2f6   : > { %v8247_v6 = vmax.f32 %v7865_v30, 0.0  ;;  %v5670_v38 = vmax.f32 %v4718_v47, 0.0  ;;  %6142 = vrot.lane.b32.xlu1 %v5957_v16, %s10601_s22  ;;  %7964 = vmatmul.mubr.bf16.gmra.mrb[120].mxu1 %v7525_v8  ;;  %v7127_v15 = vsel %vm7097_vm2, %v7030_v3, %v12418_v39  ;;  %v6917_v39 = vsel %vm3275_vm0, %v11702_v4, %v12230_v23 }
 0x2f7   : > { %v12579_v33 = vpack.c.bf16 %v5672_v27, %v5671_v45  ;;  %9670 = vmatprep.mubr.msk.bf16.mxu1 %vm3275_vm0, %v12156_v37  ;;  %10241 = vmatprep.mubr.msk.bf16.mxu0 %vm3275_vm0, %v10553_v12  ;;  %v7222_v53 = vsel %vm7190_vm3, %v7127_v15, %v12421_v60  ;;  %v10554_v12 = vld [vmem:[%s11083_s20 + $0x4f8] sm:$0xff]   ;;  %v10555_v60 = vld [vmem:[%s11083_s20 + $0x500] sm:$0xff]  }
 0x2f8   : > { %v12586_v29 = vpack.c.bf16 %v8247_v6, %v8246_v20  ;;  %v5959_v50 = vpack.c.bf16 %v5670_v38, %v5669_v21  ;;  %v12588_v57 = vpop.permute.xlu0 %6128  ;;  %v10135_v26 = vpop.f32.mrb[208].mxu0  ;;  %v7032_v38 = vsel %vm7010_vm1, %v6917_v39, %v12235_v59 }
 0x2f9   : > { %v12592_v48 = vpop.permute.xlu1 %6256  ;;  %v4739_v0 = vadd.f32 %v12500_v1, %v10135_v26  ;;  %v7869_v30 = vpop.f32.mrb[72].mxu1  ;;  %6833 = vrot.lane.b32.xlu0 %v5957_v16, %s10606_s11  ;;  %v7321_v16 = vsel %vm7289_vm4, %v7222_v53, %v12430_v46 }
 0x2fa   : > { %14486 = vst [vmem:[#allocation16_spill] sm:$0xff] %v12586_v29  ;;  %v7870_v47 = vadd.f32 %v12515_v13, %v7869_v30  ;;  %v4730_v24 = vpop.f32.mrb[209].mxu0  ;;  %v7871_v45 = vpop.f32.mrb[73].mxu1  ;;  %6738 = vrot.lane.b32.xlu1 %v12579_v33, %s10602_s23  ;;  %v7418_v3 = vsel %vm7388_vm5, %v7321_v16, %v12536_v28  ;;  %v7129_v28 = vsel %vm7097_vm2, %v7032_v38, %v12413_v35 }
 0x2fb   : > { %v4731_v27 = vadd.f32 %v12500_v1, %v4730_v24  ;;  %v10136_v8 = vpop.f32.mrb[210].mxu0  ;;  %v7872_v20 = vpop.f32.mrb[74].mxu1  ;;  %v5675_v15 = vmax.f32 %v4739_v0, 0.0 }
 0x2fc   : > { %v4742_v21 = vadd.f32 %v12500_v1, %v10136_v8  ;;  %v7873_v6 = vadd.f32 %v12515_v13, %v7872_v20  ;;  %v4733_v4 = vpop.f32.mrb[211].mxu0  ;;  %v12609_v23 = vpop.permute.xlu0 %6726  ;;  %v8248_v46 = vmax.f32 %v7870_v47, 0.0 }
 0x2fd   : > { %v4734_v26 = vadd.f32 %v12500_v1, %v4733_v4  ;;  %v7874_v30 = vpop.f32.mrb[75].mxu1  ;;  %v6820_v24 = vpop.permute.xlu1 %6819  ;;  %10242 = vmatmul.mubr.msk.bf16.gmra.mrb[60].mxu0 %vm3275_vm0, %v10554_v12  ;;  %6144 = vrot.lane.b32.xlu0 %v5959_v50, %s10601_s22  ;;  %v5673_v0 = vmax.f32 %v4731_v27, 0.0  ;;  %v7224_v12 = vsel %vm7190_vm3, %v7129_v28, %v12452_v58  ;;  %v10556_v27 = vld [vmem:[%s11083_s20 + $0x508] sm:$0xff]  }
 0x2fe   : > { %v5676_v53 = vmax.f32 %v4742_v21, 0.0  ;;  %v8249_v45 = vmax.f32 %v7873_v6, 0.0  ;;  %6272 = vrot.lane.b32.xlu1 %v12579_v33, %s10603_s24  ;;  %v7528_v59 = vsel %vm7481_vm6, %v7418_v3, %v6820_v24  ;;  %10245 = vmatprep.mubr.msk.bf16.mxu0 %vm3275_vm0, %v10555_v60  ;;  %v7323_v3 = vsel %vm7289_vm4, %v7224_v12, %v12436_v19  ;;  %v10557_v24 = vld [vmem:[%s11083_s20 + $0x510] sm:$0xff]  }
 0x2ff   : > { %v5674_v39 = vmax.f32 %v4734_v26, 0.0  ;;  %7972 = vmatmul.mubr.bf16.gmra.mrb[124].mxu1 %v7528_v59 }
 0x300   : > { %v12626_v47 = vpack.c.bf16 %v5676_v53, %v5675_v15  ;;  %v12628_v8 = vpack.c.bf16 %v8249_v45, %v8248_v46  ;;  %9671 = vmatprep.mubr.msk.bf16.mxu1 %vm3275_vm0, %v12191_v25  ;;  %v12632_v20 = vpop.permute.xlu0 %6258  ;;  %v10139_v60 = vpop.f32.mrb[212].mxu0  ;;  %v6920_v46 = vsel %vm3275_vm0, %v11729_v40, %v12273_v14  ;;  %v7420_v53 = vsel %vm7388_vm5, %v7323_v3, %v12570_v10 }
 0x301   : > { %v5961_v16 = vpack.c.bf16 %v5674_v39, %v5673_v0  ;;  %v12634_v21 = vpop.permute.xlu1 %6130  ;;  %v7877_v35 = vpop.f32.mrb[76].mxu1  ;;  %v4755_v6 = vadd.f32 %v12500_v1, %v10139_v60  ;;  %v7034_v10 = vsel %vm7010_vm1, %v6920_v46, %v12270_v54 }
 0x302   : > { %14487 = vst [vmem:[#allocation53_spill] sm:$0xff] %v12628_v8  ;;  %v7878_v58 = vadd.f32 %v12515_v13, %v7877_v35  ;;  %v4746_v4 = vpop.f32.mrb[213].mxu0  ;;  %6740 = vrot.lane.b32.xlu0 %v12626_v47, %s10602_s23  ;;  %v7879_v38 = vpop.f32.mrb[77].mxu1  ;;  %6835 = vrot.lane.b32.xlu1 %v5959_v50, %s10606_s11 }
 0x303   : > { %v4747_v15 = vadd.f32 %v12500_v1, %v4746_v4  ;;  %v10140_v26 = vpop.f32.mrb[214].mxu0  ;;  %v7880_v30 = vpop.f32.mrb[78].mxu1  ;;  %v5679_v60 = vmax.f32 %v4755_v6, 0.0 }
 0x304   : > { %v4758_v45 = vadd.f32 %v12500_v1, %v10140_v26  ;;  %v7881_v59 = vadd.f32 %v12515_v13, %v7880_v30  ;;  %v4749_v50 = vpop.f32.mrb[215].mxu0  ;;  %v6822_v28 = vpop.permute.xlu0 %6821  ;;  %v8250_v40 = vmax.f32 %v7878_v58, 0.0 }
 0x305   : > { %v4750_v19 = vadd.f32 %v12500_v1, %v4749_v50  ;;  %v7882_v0 = vpop.f32.mrb[79].mxu1  ;;  %v12654_v39 = vpop.permute.xlu1 %6728  ;;  %10246 = vmatmul.mubr.msk.bf16.gmra.mrb[64].mxu0 %vm3275_vm0, %v10556_v27  ;;  %v7531_v12 = vsel %vm7481_vm6, %v7420_v53, %v6822_v28  ;;  %v5677_v4 = vmax.f32 %v4747_v15, 0.0  ;;  %v7131_v27 = vsel %vm7097_vm2, %v7034_v10, %v12438_v42  ;;  %v10558_v42 = vld [vmem:[%s11083_s20 + $0x518] sm:$0xff]  }
 0x306   : > { %v5680_v14 = vmax.f32 %v4758_v45, 0.0  ;;  %v8251_v35 = vmax.f32 %v7881_v59, 0.0  ;;  %6274 = vrot.lane.b32.xlu0 %v12626_v47, %s10603_s24  ;;  %6146 = vrot.lane.b32.xlu1 %v5961_v16, %s10601_s22  ;;  %v7226_v54 = vsel %vm7190_vm3, %v7131_v27, %v12455_v31  ;;  %v6923_v53 = vsel %vm3275_vm0, %v11765_v44, %v12306_v62 }
 0x307   : > { %v5678_v38 = vmax.f32 %v4750_v19, 0.0  ;;  %7980 = vmatmul.mubr.bf16.gmra.mrb[128].mxu1 %v7531_v12  ;;  %10249 = vmatprep.mubr.msk.bf16.mxu0 %vm3275_vm0, %v10557_v24  ;;  %v7325_v0 = vsel %vm7289_vm4, %v7226_v54, %v12464_v9 }
 0x308   : > { %v12666_v6 = vpack.c.bf16 %v5680_v14, %v5679_v60  ;;  %v12668_v58 = vpack.c.bf16 %v8251_v35, %v8250_v40  ;;  %9672 = vmatprep.mubr.msk.bf16.mxu1 %vm3275_vm0, %v12226_v34  ;;  %v12672_v3 = vpop.permute.xlu0 %6132  ;;  %v10143_v26 = vpop.f32.mrb[216].mxu0  ;;  %v7422_v40 = vsel %vm7388_vm5, %v7325_v0, %v12609_v23 }
 0x309   : > { %v5963_v15 = vpack.c.bf16 %v5678_v38, %v5677_v4  ;;  %v12676_v30 = vpop.permute.xlu1 %6260  ;;  %v4771_v24 = vadd.f32 %v12500_v1, %v10143_v26  ;;  %v7885_v46 = vpop.f32.mrb[80].mxu1 }
 0x30a   : > { %14488 = vst [vmem:[#allocation54_spill] sm:$0xff] %v12668_v58  ;;  %v7886_v45 = vadd.f32 %v12515_v13, %v7885_v46  ;;  %v4762_v59 = vpop.f32.mrb[217].mxu0  ;;  %6837 = vrot.lane.b32.xlu0 %v5961_v16, %s10606_s11  ;;  %v7887_v50 = vpop.f32.mrb[81].mxu1  ;;  %6742 = vrot.lane.b32.xlu1 %v12666_v6, %s10602_s23  ;;  %v7036_v16 = vsel %vm7010_vm1, %v6923_v53, %v12311_v17 }
 0x30b   : > { %v4763_v31 = vadd.f32 %v12500_v1, %v4762_v59  ;;  %v10144_v28 = vpop.f32.mrb[218].mxu0  ;;  %v7888_v19 = vpop.f32.mrb[82].mxu1  ;;  %v5683_v14 = vmax.f32 %v4771_v24, 0.0  ;;  %v7133_v23 = vsel %vm7097_vm2, %v7036_v16, %v12447_v41  ;;  %v6926_v16 = vsel %vm3275_vm0, %v11794_v49, %v12349_v18 }
 0x30c   : > { %v4774_v12 = vadd.f32 %v12500_v1, %v10144_v28  ;;  %v7889_v44 = vadd.f32 %v12515_v13, %v7888_v19  ;;  %v4765_v62 = vpop.f32.mrb[219].mxu0  ;;  %v12692_v60 = vpop.permute.xlu0 %6730  ;;  %v8252_v9 = vmax.f32 %v7886_v45, 0.0  ;;  %v7228_v24 = vsel %vm7190_vm3, %v7133_v23, %v12486_v51 }
 0x30d   : > { %v4766_v35 = vadd.f32 %v12500_v1, %v4765_v62  ;;  %v7890_v10 = vpop.f32.mrb[83].mxu1  ;;  %v6824_v4 = vpop.permute.xlu1 %6823  ;;  %10250 = vmatmul.mubr.msk.bf16.gmra.mrb[68].mxu0 %vm3275_vm0, %v10558_v42  ;;  %v5681_v26 = vmax.f32 %v4763_v31, 0.0  ;;  %v7327_v0 = vsel %vm7289_vm4, %v7228_v24, %v12470_v43  ;;  %v7038_v18 = vsel %vm7010_vm1, %v6926_v16, %v12346_v56 }
 0x30e   : > { %v5684_v38 = vmax.f32 %v4774_v12, 0.0  ;;  %v8253_v27 = vmax.f32 %v7889_v44, 0.0  ;;  %6148 = vrot.lane.b32.xlu0 %v5963_v15, %s10601_s22  ;;  %6276 = vrot.lane.b32.xlu1 %v12666_v6, %s10603_s24  ;;  %v7534_v17 = vsel %vm7481_vm6, %v7422_v40, %v6824_v4  ;;  %v7424_v40 = vsel %vm7388_vm5, %v7327_v0, %v12654_v39 }
 0x30f   : > { %v5682_v54 = vmax.f32 %v4766_v35, 0.0  ;;  %7988 = vmatmul.mubr.bf16.gmra.mrb[132].mxu1 %v7534_v17 }
 0x310   : > { %v12708_v46 = vpack.c.bf16 %v5684_v38, %v5683_v14  ;;  %v12710_v42 = vpack.c.bf16 %v8253_v27, %v8252_v9  ;;  %9673 = vmatprep.mubr.msk.bf16.mxu1 %vm3275_vm0, %v12266_v7  ;;  %v12714_v53 = vpop.permute.xlu0 %6262  ;;  %v10147_v45 = vpop.f32.mrb[220].mxu0 }
 0x311   : > { %v5965_v59 = vpack.c.bf16 %v5682_v54, %v5681_v26  ;;  %v12716_v50 = vpop.permute.xlu1 %6134  ;;  %v7893_v41 = vpop.f32.mrb[84].mxu1  ;;  %v4787_v31 = vadd.f32 %v12500_v1, %v10147_v45  ;;  %v7135_v54 = vsel %vm7097_vm2, %v7038_v18, %v12472_v11 }
 0x312   : > { %14489 = vst [vmem:[#allocation55_spill] sm:$0xff] %v12710_v42  ;;  %v7894_v28 = vadd.f32 %v12515_v13, %v7893_v41  ;;  %v4778_v19 = vpop.f32.mrb[221].mxu0  ;;  %6744 = vrot.lane.b32.xlu0 %v12708_v46, %s10602_s23  ;;  %v7895_v51 = vpop.f32.mrb[85].mxu1  ;;  %6839 = vrot.lane.b32.xlu1 %v5963_v15, %s10606_s11 }
 0x313   : > { %v4779_v12 = vadd.f32 %v12500_v1, %v4778_v19  ;;  %v10148_v44 = vpop.f32.mrb[222].mxu0  ;;  %v7896_v62 = vpop.f32.mrb[86].mxu1  ;;  %v5687_v27 = vmax.f32 %v4787_v31, 0.0 }
 0x314   : > { %v4790_v14 = vadd.f32 %v12500_v1, %v10148_v44  ;;  %v7897_v35 = vadd.f32 %v12515_v13, %v7896_v62  ;;  %v4781_v10 = vpop.f32.mrb[223].mxu0  ;;  %v6826_v15 = vpop.permute.xlu0 %6825  ;;  %v8254_v17 = vmax.f32 %v7894_v28, 0.0  ;;  %v7230_v28 = vsel %vm7190_vm3, %v7135_v54, %v12489_v55 }
 0x315   : > { %v4782_v4 = vadd.f32 %v12500_v1, %v4781_v10  ;;  %v7898_v43 = vpop.f32.mrb[87].mxu1  ;;  %v12734_v9 = vpop.permute.xlu1 %6732  ;;  %v7537_v38 = vsel %vm7481_vm6, %v7424_v40, %v6826_v15  ;;  %v5685_v39 = vmax.f32 %v4779_v12, 0.0  ;;  %v6929_v55 = vsel %vm3275_vm0, %v14472_v2, %v12382_v5 }
 0x316   : > { %v5688_v23 = vmax.f32 %v4790_v14, 0.0  ;;  %v8255_v49 = vmax.f32 %v7897_v35, 0.0  ;;  %6278 = vrot.lane.b32.xlu0 %v12708_v46, %s10603_s24  ;;  %6150 = vrot.lane.b32.xlu1 %v5965_v59, %s10601_s22  ;;  %v7329_v14 = vsel %vm7289_vm4, %v7230_v28, %v12503_v52  ;;  %v14495_v28 = vld [vmem:[#allocation51_spill] sm:$0xff] }
 0x317   : > { %v5686_v26 = vmax.f32 %v4782_v4, 0.0  ;;  %7996 = vmatmul.mubr.bf16.gmra.mrb[136].mxu1 %v7537_v38  ;;  %v7426_v4 = vsel %vm7388_vm5, %v7329_v14, %v12692_v60  ;;  %v14493_v60 = vld [vmem:[#allocation19_spill] sm:$0xff] }
 0x318   : > { %v12744_v24 = vpack.c.bf16 %v5688_v23, %v5687_v27  ;;  %v12746_v45 = vpack.c.bf16 %v8255_v49, %v8254_v17  ;;  %9674 = vmatprep.mubr.msk.bf16.mxu1 %vm3275_vm0, %v12302_v22  ;;  %v12750_v41 = vpop.permute.xlu0 %6136  ;;  %v10151_v31 = vpop.f32.mrb[224].mxu0  ;;  %v7040_v49 = vsel %vm7010_vm1, %v6929_v55, %v12367_v63 }
 0x319   : > { %v5967_v56 = vpack.c.bf16 %v5686_v26, %v5685_v39  ;;  %v12754_v19 = vpop.permute.xlu1 %6264  ;;  %v4803_v51 = vadd.f32 %v12500_v1, %v10151_v31  ;;  %v7901_v0 = vpop.f32.mrb[88].mxu1  ;;  %v7137_v26 = vsel %vm7097_vm2, %v7040_v49, %v14493_v60 }
 0x31a   : > { %14490 = vst [vmem:[#allocation56_spill] sm:$0xff] %v12744_v24  ;;  %14491 = vst [vmem:[#allocation57_spill] sm:$0xff] %v12746_v45  ;;  %v7902_v11 = vadd.f32 %v12515_v13, %v7901_v0  ;;  %v4794_v12 = vpop.f32.mrb[225].mxu0  ;;  %6841 = vrot.lane.b32.xlu0 %v5965_v59, %s10606_s11  ;;  %v7903_v44 = vpop.f32.mrb[89].mxu1  ;;  %6280 = vrot.lane.b32.xlu1 %v12744_v24, %s10603_s24  ;;  %v14496_v0 = vld [vmem:[#allocation21_spill] sm:$0xff] }
 0x31b   : > { %v4795_v62 = vadd.f32 %v12500_v1, %v4794_v12  ;;  %v10152_v16 = vpop.f32.mrb[226].mxu0  ;;  %v7904_v40 = vpop.f32.mrb[90].mxu1  ;;  %v5691_v43 = vmax.f32 %v4803_v51, 0.0 }
 0x31c   : > { %v4806_v35 = vadd.f32 %v12500_v1, %v10152_v16  ;;  %v7905_v10 = vadd.f32 %v12515_v13, %v7904_v40  ;;  %v4797_v59 = vpop.f32.mrb[227].mxu0  ;;  %v12769_v15 = vpop.permute.xlu0 %6266  ;;  %v8256_v23 = vmax.f32 %v7902_v11, 0.0 }
 0x31d   : > { %14492 = vst [vmem:[#allocation58_spill] sm:$0xff] %v12769_v15  ;;  %v4798_v38 = vadd.f32 %v12500_v1, %v4797_v59  ;;  %v7906_v27 = vpop.f32.mrb[91].mxu1  ;;  %v6828_v17 = vpop.permute.xlu1 %6827  ;;  %v5689_v18 = vmax.f32 %v4795_v62, 0.0 }
 0x31e   : > { %v5692_v2 = vmax.f32 %v4806_v35, 0.0  ;;  %v8257_v5 = vmax.f32 %v7905_v10, 0.0  ;;  %6152 = vrot.lane.b32.xlu0 %v5967_v56, %s10601_s22  ;;  %6843 = vrot.lane.b32.xlu1 %v5967_v56, %s10606_s11  ;;  %v7540_v52 = vsel %vm7481_vm6, %v7426_v4, %v6828_v17  ;;  %v7232_v56 = vsel %vm7190_vm3, %v7137_v26, %v14496_v0  ;;  %v14497_v35 = vld [vmem:[#allocation8_spill] sm:$0xff] }
 0x31f   : > { %v5690_v39 = vmax.f32 %v4798_v38, 0.0  ;;  %8004 = vmatmul.mubr.bf16.gmra.mrb[140].mxu1 %v7540_v52  ;;  %v7331_v10 = vsel %vm7289_vm4, %v7232_v56, %v14497_v35 }
 0x320   : > { %v5970_v54 = vpack.c.bf16 %v5692_v2, %v5691_v43  ;;  %v12781_v31 = vpack.c.bf16 %v8257_v5, %v8256_v23  ;;  %9675 = vmatprep.mubr.msk.bf16.mxu1 %vm3275_vm0, %v14495_v28  ;;  %v10155_v51 = vpop.f32.mrb[228].mxu0  ;;  %v6830_v12 = vpop.permute.xlu0 %6829  ;;  %v7428_v4 = vsel %vm7388_vm5, %v7331_v10, %v12734_v9 }
 0x321   : > { %v5969_v11 = vpack.c.bf16 %v5690_v39, %v5689_v18  ;;  %v4819_v63 = vadd.f32 %v12500_v1, %v10155_v51  ;;  %v4810_v44 = vpop.f32.mrb[229].mxu0  ;;  %v12788_v62 = vpop.permute.xlu1 %6138  ;;  %v7543_v23 = vsel %vm7481_vm6, %v7428_v4, %v6830_v12 }
 0x322   : > { %14494 = vst [vmem:[#allocation19_spill] sm:$0xff] %v12781_v31  ;;  %v4811_v16 = vadd.f32 %v12500_v1, %v4810_v44  ;;  %6648 = vrot.lane.b32.xlu1 %v5970_v54, %s10604_s9  ;;  %v10156_v40 = vpop.f32.mrb[230].mxu0 }
 0x323   : > { %v4822_v55 = vadd.f32 %v12500_v1, %v10156_v40  ;;  %6543 = vrot.lane.b32.xlu0 %v5969_v11, %s10605_s10  ;;  %v4813_v14 = vpop.f32.mrb[231].mxu0  ;;  %v5695_v43 = vmax.f32 %v4819_v63, 0.0 }
 0x324   : > { %v4814_v59 = vadd.f32 %v12500_v1, %v4813_v14  ;;  %v5693_v27 = vmax.f32 %v4811_v16, 0.0  ;;  %v12801_v5 = vpop.permute.xlu0 %6634 }
 0x325   : > { %v5696_v38 = vmax.f32 %v4822_v55, 0.0  ;;  %v12803_v49 = vpop.permute.xlu1 %6529 }
 0x326   : > { %v5694_v17 = vmax.f32 %v4814_v59, 0.0  ;;  %6402 = vrot.lane.b32.xlu1 %v5970_v54, %s10600_s21 }
 0x327   : > { %v5972_v2 = vpack.c.bf16 %v5696_v38, %v5695_v43  ;;  %8012 = vmatmul.mubr.bf16.gmra.mrb[144].mxu1 %v7543_v23 }
 0x328   : > { %v5971_v52 = vpack.c.bf16 %v5694_v17, %v5693_v27  ;;  %9676 = vmatprep.mubr.msk.bf16.mxu1 %vm3275_vm0, %v12508_v61  ;;  %v10159_v18 = vpop.f32.mrb[232].mxu0  ;;  %v12815_v56 = vpop.permute.xlu0 %6390 }
 0x329   : > { %v4835_v9 = vadd.f32 %v12500_v1, %v10159_v18  ;;  %v4826_v39 = vpop.f32.mrb[233].mxu0  ;;  %6404 = vrot.lane.b32.xlu0 %v5972_v2, %s10600_s21 }
 0x32a   : > { %v4827_v60 = vadd.f32 %v12500_v1, %v4826_v39  ;;  %6650 = vrot.lane.b32.xlu1 %v5972_v2, %s10604_s9  ;;  %v10160_v26 = vpop.f32.mrb[234].mxu0 }
 0x32b   : > { %v4838_v54 = vadd.f32 %v12500_v1, %v10160_v26  ;;  %v4829_v28 = vpop.f32.mrb[235].mxu0  ;;  %v12813_v0 = vpop.permute.xlu1 %6392  ;;  %v5699_v11 = vmax.f32 %v4835_v9, 0.0 }
 0x32c   : > { %v4830_v51 = vadd.f32 %v12500_v1, %v4829_v28  ;;  %v5697_v63 = vmax.f32 %v4827_v60, 0.0  ;;  %v12824_v43 = vpop.permute.xlu0 %6636 }
 0x32d   : > { %v5700_v12 = vmax.f32 %v4838_v54, 0.0  ;;  %6545 = vrot.lane.b32.xlu0 %v5971_v52, %s10605_s10 }
 0x32e   : > { %v5698_v44 = vmax.f32 %v4830_v51, 0.0 }
 0x32f   : > { %v5974_v16 = vpack.c.bf16 %v5700_v12, %v5699_v11  ;;  %v12821_v10 = vpop.permute.xlu1 %6531 }
 0x330   : > { %v5973_v40 = vpack.c.bf16 %v5698_v44, %v5697_v63  ;;  %v10163_v55 = vpop.f32.mrb[236].mxu0 }
 0x331   : > { %v4851_v14 = vadd.f32 %v12500_v1, %v10163_v55  ;;  %v4842_v35 = vpop.f32.mrb[237].mxu0  ;;  %6652 = vrot.lane.b32.xlu0 %v5974_v16, %s10604_s9  ;;  %6406 = vrot.lane.b32.xlu1 %v5974_v16, %s10600_s21 }
 0x332   : > { %v4843_v59 = vadd.f32 %v12500_v1, %v4842_v35  ;;  %v10164_v4 = vpop.f32.mrb[238].mxu0 }
 0x333   : > { %v4854_v38 = vadd.f32 %v12500_v1, %v10164_v4  ;;  %v4845_v27 = vpop.f32.mrb[239].mxu0  ;;  %v5703_v23 = vmax.f32 %v4851_v14, 0.0  ;;  %v12829_v39 = vpop.permute.xlu0 %6394 }
 0x334   : > { %v4846_v17 = vadd.f32 %v12500_v1, %v4845_v27  ;;  %v5701_v52 = vmax.f32 %v4843_v59, 0.0  ;;  %v12831_v26 = vpop.permute.xlu1 %6638 }
 0x335   : > { %v5704_v2 = vmax.f32 %v4854_v38, 0.0  ;;  %6547 = vrot.lane.b32.xlu1 %v5973_v40, %s10605_s10 }
 0x336   : > { %v5702_v18 = vmax.f32 %v4846_v17, 0.0 }
 0x337   : > { %v5976_v9 = vpack.c.bf16 %v5704_v2, %v5703_v23  ;;  %v12841_v55 = vpop.permute.xlu0 %6533 }
 0x338   : > { %v5975_v60 = vpack.c.bf16 %v5702_v18, %v5701_v52  ;;  %v10167_v54 = vpop.f32.mrb[240].mxu0 }
 0x339   : > { %v4867_v28 = vadd.f32 %v12500_v1, %v10167_v54  ;;  %v4858_v51 = vpop.f32.mrb[241].mxu0  ;;  %6408 = vrot.lane.b32.xlu0 %v5976_v9, %s10600_s21  ;;  %6654 = vrot.lane.b32.xlu1 %v5976_v9, %s10604_s9 }
 0x33a   : > { %v4859_v11 = vadd.f32 %v12500_v1, %v4858_v51  ;;  %v10168_v12 = vpop.f32.mrb[242].mxu0 }
 0x33b   : > { %v4870_v63 = vadd.f32 %v12500_v1, %v10168_v12  ;;  %v4861_v44 = vpop.f32.mrb[243].mxu0  ;;  %v12839_v40 = vpop.permute.xlu1 %6396  ;;  %v5707_v14 = vmax.f32 %v4867_v28, 0.0 }
 0x33c   : > { %v4862_v16 = vadd.f32 %v12500_v1, %v4861_v44  ;;  %v5705_v59 = vmax.f32 %v4859_v11, 0.0  ;;  %v12850_v54 = vpop.permute.xlu0 %6640 }
 0x33d   : > { %v5708_v35 = vmax.f32 %v4870_v63, 0.0  ;;  %6549 = vrot.lane.b32.xlu0 %v5975_v60, %s10605_s10 }
 0x33e   : > { %v5706_v4 = vmax.f32 %v4862_v16, 0.0 }
 0x33f   : > { %v5978_v38 = vpack.c.bf16 %v5708_v35, %v5707_v14  ;;  %v12847_v52 = vpop.permute.xlu1 %6535 }
 0x340   : > { %v5977_v27 = vpack.c.bf16 %v5706_v4, %v5705_v59  ;;  %v10171_v17 = vpop.f32.mrb[244].mxu0 }
 0x341   : > { %v4883_v23 = vadd.f32 %v12500_v1, %v10171_v17  ;;  %v4874_v2 = vpop.f32.mrb[245].mxu0  ;;  %6656 = vrot.lane.b32.xlu0 %v5978_v38, %s10604_s9  ;;  %6410 = vrot.lane.b32.xlu1 %v5978_v38, %s10600_s21 }
 0x342   : > { %v4875_v18 = vadd.f32 %v12500_v1, %v4874_v2  ;;  %v10172_v9 = vpop.f32.mrb[246].mxu0 }
 0x343   : > { %v4886_v60 = vadd.f32 %v12500_v1, %v10172_v9  ;;  %v4877_v28 = vpop.f32.mrb[247].mxu0  ;;  %v5711_v11 = vmax.f32 %v4883_v23, 0.0  ;;  %v12855_v14 = vpop.permute.xlu0 %6398 }
 0x344   : > { %v4878_v51 = vadd.f32 %v12500_v1, %v4877_v28  ;;  %v5709_v63 = vmax.f32 %v4875_v18, 0.0  ;;  %v12857_v59 = vpop.permute.xlu1 %6642 }
 0x345   : > { %v5712_v12 = vmax.f32 %v4886_v60, 0.0  ;;  %6551 = vrot.lane.b32.xlu1 %v5977_v27, %s10605_s10 }
 0x346   : > { %v5710_v44 = vmax.f32 %v4878_v51, 0.0 }
 0x347   : > { %v5980_v16 = vpack.c.bf16 %v5712_v12, %v5711_v11  ;;  %v12868_v11 = vpop.permute.xlu0 %6537 }
 0x348   : > { %v5979_v35 = vpack.c.bf16 %v5710_v44, %v5709_v63  ;;  %v10175_v4 = vpop.f32.mrb[248].mxu0 }
 0x349   : > { %v4899_v38 = vadd.f32 %v12500_v1, %v10175_v4  ;;  %v4890_v17 = vpop.f32.mrb[249].mxu0  ;;  %6412 = vrot.lane.b32.xlu0 %v5980_v16, %s10600_s21  ;;  %6658 = vrot.lane.b32.xlu1 %v5980_v16, %s10604_s9 }
 0x34a   : > { %v4891_v23 = vadd.f32 %v12500_v1, %v4890_v17  ;;  %v10176_v2 = vpop.f32.mrb[250].mxu0 }
 0x34b   : > { %v4902_v27 = vadd.f32 %v12500_v1, %v10176_v2  ;;  %v4893_v18 = vpop.f32.mrb[251].mxu0  ;;  %v12865_v60 = vpop.permute.xlu1 %6400  ;;  %v5715_v28 = vmax.f32 %v4899_v38, 0.0 }
 0x34c   : > { %v4894_v9 = vadd.f32 %v12500_v1, %v4893_v18  ;;  %14498 = vst [vmem:[#allocation51_spill] sm:$0xff] %v12865_v60  ;;  %v5713_v12 = vmax.f32 %v4891_v23, 0.0  ;;  %v12877_v23 = vpop.permute.xlu0 %6644 }
 0x34d   : > { %v5716_v51 = vmax.f32 %v4902_v27, 0.0  ;;  %6553 = vrot.lane.b32.xlu0 %v5979_v35, %s10605_s10 }
 0x34e   : > { %v5714_v63 = vmax.f32 %v4894_v9, 0.0 }
 0x34f   : > { %v5982_v44 = vpack.c.bf16 %v5716_v51, %v5715_v28  ;;  %v12870_v17 = vpop.permute.xlu1 %6539 }
 0x350   : > { %v5981_v16 = vpack.c.bf16 %v5714_v63, %v5713_v12  ;;  %v10179_v4 = vpop.f32.mrb[252].mxu0 }
 0x351   : > { %v4915_v2 = vadd.f32 %v12500_v1, %v10179_v4  ;;  %v4906_v31 = vpop.f32.mrb[253].mxu0  ;;  %6660 = vrot.lane.b32.xlu0 %v5982_v44, %s10604_s9 }
 0x352   : > { %v4907_v18 = vadd.f32 %v12500_v1, %v4906_v31  ;;  %v10180_v38 = vpop.f32.mrb[254].mxu0  ;;  %6555 = vrot.lane.b32.xlu1 %v5981_v16, %s10605_s10  ;;  %v14502_v16 = vld [vmem:[#allocation43_spill] sm:$0xff] }
 0x353   : > { %v4918_v35 = vadd.f32 %v12500_v1, %v10180_v38  ;;  %v4909_v27 = vpop.f32.mrb[255].mxu0  ;;  %v5719_v28 = vmax.f32 %v4915_v2, 0.0  ;;  %v12882_v45 = vpop.permute.xlu1 %6646  ;;  %v6931_v38 = vsel %vm3275_vm0, 0, %v14502_v16  ;;  %v14503_v2 = vld [vmem:[#allocation52_spill] sm:$0xff] }
 0x354   : > { %v4910_v9 = vadd.f32 %v12500_v1, %v4909_v27  ;;  %v5717_v12 = vmax.f32 %v4907_v18, 0.0  ;;  %14500 = vst [vmem:[#allocation8_spill] sm:$0xff] %v12882_v45  ;;  %v12884_v31 = vpop.permute.xlu0 %6541  ;;  %v7042_v18 = vsel %vm7010_vm1, %v6931_v38, %v14503_v2  ;;  %v14504_v38 = vld [vmem:[#allocation9_spill] sm:$0xff] }
 0x355   : > { %v5720_v51 = vmax.f32 %v4918_v35, 0.0  ;;  %14501 = vst [vmem:[#allocation59_spill] sm:$0xff] %v12884_v31 }
 0x356   : > { %v5718_v63 = vmax.f32 %v4910_v9, 0.0 }
 0x357   : > { %v12880_v4 = vpack.c.bf16 %v5720_v51, %v5719_v28 }
 0x358   : > { %v5983_v44 = vpack.c.bf16 %v5718_v63, %v5717_v12  ;;  %v10183_v42 = vpop.f32.mrb[0].mxu0 }
 0x359   : > { %14499 = vst [vmem:[#allocation21_spill] sm:$0xff] %v12880_v4  ;;  %v4931_v8 = vadd.f32 %v12500_v1, %v10183_v42  ;;  %v7909_v58 = vpop.f32.mrb[92].mxu1  ;;  %v4922_v29 = vpop.f32.mrb[1].mxu0  ;;  %6746 = vrot.lane.b32.xlu0 %v12880_v4, %s10602_s23 }
 0x35a   : > { %v7910_v35 = vadd.f32 %v12515_v13, %v7909_v58  ;;  %v4923_v27 = vadd.f32 %v12500_v1, %v4922_v29  ;;  %v7911_v9 = vpop.f32.mrb[93].mxu1  ;;  %v10184_v28 = vpop.f32.mrb[2].mxu0  ;;  %6154 = vrot.lane.b32.xlu1 %v5983_v44, %s10601_s22  ;;  %v7138_v58 = vsel %vm7097_vm2, %v7042_v18, %v14504_v38 }
 0x35b   : > { %v4934_v51 = vadd.f32 %v12500_v1, %v10184_v28  ;;  %v7912_v12 = vpop.f32.mrb[94].mxu1  ;;  %v4925_v42 = vpop.f32.mrb[3].mxu0  ;;  %v5723_v2 = vmax.f32 %v4931_v8, 0.0 }
 0x35c   : > { %v7913_v63 = vadd.f32 %v12515_v13, %v7912_v12  ;;  %v4926_v16 = vadd.f32 %v12500_v1, %v4925_v42  ;;  %v7914_v61 = vpop.f32.mrb[95].mxu1  ;;  %v12899_v45 = vpop.permute.xlu1 %6734  ;;  %v8258_v9 = vmax.f32 %v7910_v35, 0.0  ;;  %v5721_v31 = vmax.f32 %v4923_v27, 0.0 }
 0x35d   : > { %v5724_v29 = vmax.f32 %v4934_v51, 0.0  ;;  %6282 = vrot.lane.b32.xlu0 %v12880_v4, %s10603_s24  ;;  %v7234_v12 = vsel %vm7190_vm3, %v7138_v58, %v12803_v49  ;;  %v12909_v61 = vpop.permute.xlu0 %6140  ;;  %v14506_v51 = vld [vmem:[#allocation48_spill] sm:$0xff] }
 0x35e   : > { %v8259_v28 = vmax.f32 %v7913_v63, 0.0  ;;  %v5722_v24 = vmax.f32 %v4926_v16, 0.0  ;;  %v6934_v35 = vsel %vm3275_vm0, %v14506_v51, %v12588_v57  ;;  %v7333_v49 = vsel %vm7289_vm4, %v7234_v12, %v12801_v5 }
 0x35f   : > { %v12907_v60 = vpack.c.bf16 %v5724_v29, %v5723_v2 }
 0x360   : > { %v12911_v42 = vpack.c.bf16 %v8259_v28, %v8258_v9  ;;  %v5985_v15 = vpack.c.bf16 %v5722_v24, %v5721_v31  ;;  %v12913_v18 = vpop.permute.xlu1 %6268  ;;  %v10187_v8 = vpop.f32.mrb[4].mxu0  ;;  %v7044_v28 = vsel %vm7010_vm1, %v6934_v35, %v12592_v48 }
 0x361   : > { %v4947_v27 = vadd.f32 %v12500_v1, %v10187_v8  ;;  %v7917_v63 = vpop.f32.mrb[96].mxu1  ;;  %v4938_v16 = vpop.f32.mrb[5].mxu0  ;;  %6845 = vrot.lane.b32.xlu0 %v5983_v44, %s10606_s11  ;;  %6748 = vrot.lane.b32.xlu1 %v12907_v60, %s10602_s23 }
 0x362   : > { %14505 = vst [vmem:[#allocation43_spill] sm:$0xff] %v12911_v42  ;;  %v7918_v24 = vadd.f32 %v12515_v13, %v7917_v63  ;;  %v4939_v31 = vadd.f32 %v12500_v1, %v4938_v16  ;;  %v7919_v58 = vpop.f32.mrb[97].mxu1  ;;  %v10188_v2 = vpop.f32.mrb[6].mxu0 }
 0x363   : > { %v4950_v57 = vadd.f32 %v12500_v1, %v10188_v2  ;;  %v7920_v29 = vpop.f32.mrb[98].mxu1  ;;  %v4941_v9 = vpop.f32.mrb[7].mxu0  ;;  %v5727_v12 = vmax.f32 %v4947_v27, 0.0  ;;  %v7429_v58 = vsel %vm7388_vm5, %v7333_v49, %v11539_v36  ;;  %v7140_v2 = vsel %vm7097_vm2, %v7044_v28, %v12815_v56  ;;  %v12959_v56 = vld [vmem:[%s14364_s2] ss:$0 sm:$0xff] }
 0x364   : > { %v7921_v44 = vadd.f32 %v12515_v13, %v7920_v29  ;;  %v4942_v8 = vadd.f32 %v12500_v1, %v4941_v9  ;;  %v12931_v51 = vpop.permute.xlu0 %6736  ;;  %v7922_v5 = vpop.f32.mrb[99].mxu1  ;;  %v8260_v63 = vmax.f32 %v7918_v24, 0.0  ;;  %v5725_v48 = vmax.f32 %v4939_v31, 0.0 }
 0x365   : > { %v5728_v42 = vmax.f32 %v4950_v57, 0.0  ;;  %v6832_v16 = vpop.permute.xlu1 %6831  ;;  %6156 = vrot.lane.b32.xlu0 %v5985_v15, %s10601_s22  ;;  %6284 = vrot.lane.b32.xlu1 %v12907_v60, %s10603_s24  ;;  %v7236_v24 = vsel %vm7190_vm3, %v7140_v2, %v12821_v10 }
 0x366   : > { %v8261_v35 = vmax.f32 %v7921_v44, 0.0  ;;  %v5726_v13 = vmax.f32 %v4942_v8, 0.0  ;;  %v7546_v1 = vsel %vm7481_vm6, %v7429_v58, %v6832_v16  ;;  %v6937_v58 = vsel %vm3275_vm0, %v12156_v37, %v12634_v21 }
 0x367   : > { %v12941_v27 = vpack.c.bf16 %v5728_v42, %v5727_v12  ;;  %8020 = vmatmul.mubr.bf16.gmra.mrb[148].mxu1 %v7546_v1  ;;  %v12965_v42 = vld [vmem:[%s14366_s4] ss:$0 sm:$0xff]  ;;  %v7335_v12 = vsel %vm7289_vm4, %v7236_v24, %v12824_v43 }
 0x368   : > { %v12945_v57 = vpack.c.bf16 %v8261_v35, %v8260_v63  ;;  %v5987_v29 = vpack.c.bf16 %v5726_v13, %v5725_v48  ;;  %9677 = vmatprep.mubr.msk.bf16.mxu1 %vm3275_vm0, %v12544_v32  ;;  %v12949_v49 = vpop.permute.xlu0 %6270  ;;  %v10191_v31 = vpop.f32.mrb[8].mxu0  ;;  %v7431_v48 = vsel %vm7388_vm5, %v7335_v12, %v12899_v45 }
 0x369   : > { %v12951_v9 = vpop.permute.xlu1 %6142  ;;  %v7925_v44 = vpop.f32.mrb[100].mxu1  ;;  %6750 = vrot.lane.b32.xlu0 %v12941_v27, %s10602_s23  ;;  %6847 = vrot.lane.b32.xlu1 %v5985_v15, %s10606_s11  ;;  %v4963_v10 = vadd.f32 %v12959_v56, %v10191_v31 }
 0x36a   : > { %14507 = vst [vmem:[#allocation52_spill] sm:$0xff] %v12945_v57  ;;  %v7926_v28 = vadd.f32 %v12965_v42, %v7925_v44  ;;  %v4954_v8 = vpop.f32.mrb[9].mxu0  ;;  %v7927_v5 = vpop.f32.mrb[101].mxu1 }
 0x36b   : > { %v4955_v15 = vadd.f32 %v12959_v56, %v4954_v8  ;;  %v10192_v63 = vpop.f32.mrb[10].mxu0  ;;  %v7928_v16 = vpop.f32.mrb[102].mxu1  ;;  %v5731_v21 = vmax.f32 %v4963_v10, 0.0  ;;  %v7046_v5 = vsel %vm7010_vm1, %v6937_v58, %v12632_v20 }
 0x36c   : > { %v4966_v35 = vadd.f32 %v12959_v56, %v10192_v63  ;;  %v7929_v13 = vadd.f32 %v12965_v42, %v7928_v16  ;;  %v4957_v1 = vpop.f32.mrb[11].mxu0  ;;  %v6834_v2 = vpop.permute.xlu0 %6833  ;;  %v8262_v45 = vmax.f32 %v7926_v28, 0.0  ;;  %v7142_v16 = vsel %vm7097_vm2, %v7046_v5, %v12813_v0 }
 0x36d   : > { %v4958_v31 = vadd.f32 %v12959_v56, %v4957_v1  ;;  %v7930_v43 = vpop.f32.mrb[103].mxu1  ;;  %v12979_v24 = vpop.permute.xlu1 %6738  ;;  %6286 = vrot.lane.b32.xlu0 %v12941_v27, %s10603_s24  ;;  %6158 = vrot.lane.b32.xlu1 %v5987_v29, %s10601_s22  ;;  %v7549_v37 = vsel %vm7481_vm6, %v7431_v48, %v6834_v2  ;;  %v5729_v12 = vmax.f32 %v4955_v15, 0.0  ;;  %v7238_v48 = vsel %vm7190_vm3, %v7142_v16, %v12841_v55 }
 0x36e   : > { %v5732_v44 = vmax.f32 %v4966_v35, 0.0  ;;  %v8263_v8 = vmax.f32 %v7929_v13, 0.0  ;;  %v6940_v0 = vsel %vm3275_vm0, %v12191_v25, %v12672_v3 }
 0x36f   : > { %v5730_v63 = vmax.f32 %v4958_v31, 0.0  ;;  %8028 = vmatmul.mubr.bf16.gmra.mrb[152].mxu1 %v7549_v37  ;;  %v7048_v3 = vsel %vm7010_vm1, %v6940_v0, %v12676_v30 }
 0x370   : > { %v12989_v1 = vpack.c.bf16 %v5732_v44, %v5731_v21  ;;  %v12991_v43 = vpack.c.bf16 %v8263_v8, %v8262_v45  ;;  %9678 = vmatprep.mubr.msk.bf16.mxu1 %vm3275_vm0, %v12579_v33  ;;  %v12995_v10 = vpop.permute.xlu0 %6144  ;;  %v10195_v28 = vpop.f32.mrb[12].mxu0  ;;  %v7337_v45 = vsel %vm7289_vm4, %v7238_v48, %v12831_v26  ;;  %v7144_v30 = vsel %vm7097_vm2, %v7048_v3, %v12829_v39 }
 0x371   : > { %v5989_v20 = vpack.c.bf16 %v5730_v63, %v5729_v12  ;;  %v12999_v15 = vpop.permute.xlu1 %6272  ;;  %v4979_v58 = vadd.f32 %v12959_v56, %v10195_v28  ;;  %v7933_v35 = vpop.f32.mrb[104].mxu1  ;;  %6849 = vrot.lane.b32.xlu0 %v5987_v29, %s10606_s11  ;;  %v7433_v5 = vsel %vm7388_vm5, %v7337_v45, %v12931_v51 }
 0x372   : > { %14508 = vst [vmem:[#allocation48_spill] sm:$0xff] %v12991_v43  ;;  %v7934_v13 = vadd.f32 %v12965_v42, %v7933_v35  ;;  %v4970_v2 = vpop.f32.mrb[13].mxu0  ;;  %v7935_v31 = vpop.f32.mrb[105].mxu1  ;;  %6752 = vrot.lane.b32.xlu1 %v12989_v1, %s10602_s23 }
 0x373   : > { %v4971_v55 = vadd.f32 %v12959_v56, %v4970_v2  ;;  %v10196_v37 = vpop.f32.mrb[14].mxu0  ;;  %v7936_v21 = vpop.f32.mrb[106].mxu1  ;;  %v5735_v12 = vmax.f32 %v4979_v58, 0.0  ;;  %v7240_v58 = vsel %vm7190_vm3, %v7144_v30, %v12847_v52 }
 0x374   : > { %v4982_v29 = vadd.f32 %v12959_v56, %v10196_v37  ;;  %v7937_v44 = vadd.f32 %v12965_v42, %v7936_v21  ;;  %v4973_v8 = vpop.f32.mrb[15].mxu0  ;;  %v13014_v25 = vpop.permute.xlu0 %6740  ;;  %v8264_v26 = vmax.f32 %v7934_v13, 0.0  ;;  %v7339_v3 = vsel %vm7289_vm4, %v7240_v58, %v12850_v54 }
 0x375   : > { %v4974_v63 = vadd.f32 %v12959_v56, %v4973_v8  ;;  %v7938_v16 = vpop.f32.mrb[107].mxu1  ;;  %v6836_v28 = vpop.permute.xlu1 %6835  ;;  %6160 = vrot.lane.b32.xlu0 %v5989_v20, %s10601_s22  ;;  %v5733_v0 = vmax.f32 %v4971_v55, 0.0 }
 0x376   : > { %v5736_v48 = vmax.f32 %v4982_v29, 0.0  ;;  %v8265_v35 = vmax.f32 %v7937_v44, 0.0  ;;  %6288 = vrot.lane.b32.xlu1 %v12989_v1, %s10603_s24  ;;  %v7552_v2 = vsel %vm7481_vm6, %v7433_v5, %v6836_v28  ;;  %v6943_v16 = vsel %vm3275_vm0, %v12226_v34, %v12716_v50 }
 0x377   : > { %v5734_v51 = vmax.f32 %v4974_v63, 0.0  ;;  %8036 = vmatmul.mubr.bf16.gmra.mrb[156].mxu1 %v7552_v2  ;;  %v7435_v28 = vsel %vm7388_vm5, %v7339_v3, %v12979_v24  ;;  %v7050_v50 = vsel %vm7010_vm1, %v6943_v16, %v12714_v53 }
 0x378   : > { %v13029_v31 = vpack.c.bf16 %v5736_v48, %v5735_v12  ;;  %v13031_v37 = vpack.c.bf16 %v8265_v35, %v8264_v26  ;;  %9679 = vmatprep.mubr.msk.bf16.mxu1 %vm3275_vm0, %v12626_v47  ;;  %v13035_v13 = vpop.permute.xlu0 %6274  ;;  %v10199_v21 = vpop.f32.mrb[16].mxu0 }
 0x379   : > { %v5991_v45 = vpack.c.bf16 %v5734_v51, %v5733_v0  ;;  %v13037_v29 = vpop.permute.xlu1 %6146  ;;  %v7941_v39 = vpop.f32.mrb[108].mxu1  ;;  %v4995_v55 = vadd.f32 %v12959_v56, %v10199_v21 }
 0x37a   : > { %14509 = vst [vmem:[#allocation60_spill] sm:$0xff] %v13031_v37  ;;  %v7942_v44 = vadd.f32 %v12965_v42, %v7941_v39  ;;  %v4986_v8 = vpop.f32.mrb[17].mxu0  ;;  %6754 = vrot.lane.b32.xlu0 %v13029_v31, %s10602_s23  ;;  %v7943_v52 = vpop.f32.mrb[109].mxu1  ;;  %6851 = vrot.lane.b32.xlu1 %v5989_v20, %s10606_s11 }
 0x37b   : > { %v4987_v5 = vadd.f32 %v12959_v56, %v4986_v8  ;;  %v10200_v12 = vpop.f32.mrb[18].mxu0  ;;  %v7944_v63 = vpop.f32.mrb[110].mxu1  ;;  %v5739_v51 = vmax.f32 %v4995_v55, 0.0  ;;  %v7146_v8 = vsel %vm7097_vm2, %v7050_v50, %v12839_v40  ;;  %v6946_v40 = vsel %vm3275_vm0, %v12266_v7, %v12750_v41 }
 0x37c   : > { %v4998_v26 = vadd.f32 %v12959_v56, %v10200_v12  ;;  %v7945_v48 = vadd.f32 %v12965_v42, %v7944_v63  ;;  %v4989_v35 = vpop.f32.mrb[19].mxu0  ;;  %v6838_v20 = vpop.permute.xlu0 %6837  ;;  %v8266_v58 = vmax.f32 %v7942_v44, 0.0  ;;  %v7242_v12 = vsel %vm7190_vm3, %v7146_v8, %v12868_v11  ;;  %v10559_v11 = vld [vmem:[%s14367_s5] sm:$0xff]  }
 0x37d   : > { %v4990_v2 = vadd.f32 %v12959_v56, %v4989_v35  ;;  %v7946_v54 = vpop.f32.mrb[111].mxu1  ;;  %v13055_v30 = vpop.permute.xlu1 %6742  ;;  %v7555_v0 = vsel %vm7481_vm6, %v7435_v28, %v6838_v20  ;;  %v5737_v24 = vmax.f32 %v4987_v5, 0.0  ;;  %v7341_v7 = vsel %vm7289_vm4, %v7242_v12, %v12857_v59  ;;  %8920 = vmatpush1.bf16.msra.mxu1 %v10559_v11 }
 0x37e   : > { %v5740_v21 = vmax.f32 %v4998_v26, 0.0  ;;  %v8267_v34 = vmax.f32 %v7945_v48, 0.0  ;;  %6290 = vrot.lane.b32.xlu0 %v13029_v31, %s10603_s24  ;;  %6162 = vrot.lane.b32.xlu1 %v5991_v45, %s10601_s22  ;;  %v14511_v59 = vmov 0  }
 0x37f   : > { %v5738_v39 = vmax.f32 %v4990_v2, 0.0  ;;  %8044 = vmatmul.mubr.bf16.gmra.mrb[160].mxu1 %v7555_v0  ;;  %8921 = vmatprep.subr.bf16.mxu1 %v14511_v59 }
 0x380   : > { %v13065_v52 = vpack.c.bf16 %v5740_v21, %v5739_v51  ;;  %v13067_v55 = vpack.c.bf16 %v8267_v34, %v8266_v58  ;;  %9680 = vmatprep.mubr.msk.bf16.mxu1 %vm3275_vm0, %v12666_v6  ;;  %v13071_v44 = vpop.permute.xlu0 %6148  ;;  %v10203_v3 = vpop.f32.mrb[20].mxu0  ;;  %v7052_v51 = vsel %vm7010_vm1, %v6946_v40, %v12754_v19  ;;  %v7437_v58 = vsel %vm7388_vm5, %v7341_v7, %v13014_v25 }
 0x381   : > { %v5993_v53 = vpack.c.bf16 %v5738_v39, %v5737_v24  ;;  %v13075_v5 = vpop.permute.xlu1 %6276  ;;  %v5011_v63 = vadd.f32 %v12959_v56, %v10203_v3  ;;  %v7949_v16 = vpop.f32.mrb[112].mxu1  ;;  %v7148_v25 = vsel %vm7097_vm2, %v7052_v51, %v12855_v14 }
 0x382   : > { %14510 = vst [vmem:[#allocation61_spill] sm:$0xff] %v13067_v55  ;;  %v7950_v28 = vadd.f32 %v12965_v42, %v7949_v16  ;;  %v5002_v26 = vpop.f32.mrb[21].mxu0  ;;  %6853 = vrot.lane.b32.xlu0 %v5991_v45, %s10606_s11  ;;  %v7951_v48 = vpop.f32.mrb[113].mxu1  ;;  %6756 = vrot.lane.b32.xlu1 %v13065_v52, %s10602_s23  ;;  %v7244_v16 = vsel %vm7190_vm3, %v7148_v25, %v12870_v17 }
 0x383   : > { %v5003_v35 = vadd.f32 %v12959_v56, %v5002_v26  ;;  %v10204_v20 = vpop.f32.mrb[22].mxu0  ;;  %v7952_v2 = vpop.f32.mrb[114].mxu1  ;;  %v5743_v21 = vmax.f32 %v5011_v63, 0.0 }
 0x384   : > { %v5014_v41 = vadd.f32 %v12959_v56, %v10204_v20  ;;  %v7953_v54 = vadd.f32 %v12965_v42, %v7952_v2  ;;  %v5005_v45 = vpop.f32.mrb[23].mxu0  ;;  %v13093_v0 = vpop.permute.xlu0 %6744  ;;  %v8268_v39 = vmax.f32 %v7950_v28, 0.0 }
 0x385   : > { %v5006_v34 = vadd.f32 %v12959_v56, %v5005_v45  ;;  %v7954_v50 = vpop.f32.mrb[115].mxu1  ;;  %v6840_v24 = vpop.permute.xlu1 %6839  ;;  %v5741_v12 = vmax.f32 %v5003_v35, 0.0 }
 0x386   : > { %v5744_v8 = vmax.f32 %v5014_v41, 0.0  ;;  %v8269_v3 = vmax.f32 %v7953_v54, 0.0  ;;  %6164 = vrot.lane.b32.xlu0 %v5993_v53, %s10601_s22  ;;  %6292 = vrot.lane.b32.xlu1 %v13065_v52, %s10603_s24  ;;  %v7558_v19 = vsel %vm7481_vm6, %v7437_v58, %v6840_v24  ;;  %v7343_v41 = vsel %vm7289_vm4, %v7244_v16, %v12877_v23 }
 0x387   : > { %v5742_v63 = vmax.f32 %v5006_v34, 0.0  ;;  %8052 = vmatmul.mubr.bf16.gmra.mrb[164].mxu1 %v7558_v19  ;;  %v6949_v58 = vsel %vm3275_vm0, %v12302_v22, %v12788_v62  ;;  %v14515_v62 = vld [vmem:[#allocation58_spill] sm:$0xff] }
 0x388   : > { %v13109_v40 = vpack.c.bf16 %v5744_v8, %v5743_v21  ;;  %v13111_v28 = vpack.c.bf16 %v8269_v3, %v8268_v39  ;;  %9681 = vmatprep.mubr.msk.bf16.mxu1 %vm3275_vm0, %v12708_v46  ;;  %v13115_v26 = vpop.permute.xlu0 %6278  ;;  %v10207_v48 = vpop.f32.mrb[24].mxu0  ;;  %v7439_v21 = vsel %vm7388_vm5, %v7343_v41, %v13055_v30  ;;  %v7054_v30 = vsel %vm7010_vm1, %v6949_v58, %v14515_v62  ;;  %v14519_v41 = vld [vmem:[#allocation59_spill] sm:$0xff] }
 0x389   : > { %v5995_v11 = vpack.c.bf16 %v5742_v63, %v5741_v12  ;;  %v13117_v20 = vpop.permute.xlu1 %6150  ;;  %v7957_v14 = vpop.f32.mrb[116].mxu1  ;;  %v5027_v35 = vadd.f32 %v12959_v56, %v10207_v48  ;;  %v14516_v48 = vld [vmem:[#allocation51_spill] sm:$0xff] }
 0x38a   : > { %14512 = vst [vmem:[#allocation62_spill] sm:$0xff] %v13109_v40  ;;  %14513 = vst [vmem:[#allocation63_spill] sm:$0xff] %v13111_v28  ;;  %v7958_v2 = vadd.f32 %v12965_v42, %v7957_v14  ;;  %v5018_v7 = vpop.f32.mrb[25].mxu0  ;;  %6294 = vrot.lane.b32.xlu0 %v13109_v40, %s10603_s24  ;;  %v7959_v17 = vpop.f32.mrb[117].mxu1  ;;  %6855 = vrot.lane.b32.xlu1 %v5993_v53, %s10606_s11  ;;  %v7150_v14 = vsel %vm7097_vm2, %v7054_v30, %v14516_v48 }
 0x38b   : > { %v5019_v54 = vadd.f32 %v12959_v56, %v5018_v7  ;;  %v10208_v45 = vpop.f32.mrb[26].mxu0  ;;  %v7960_v51 = vpop.f32.mrb[118].mxu1  ;;  %v5747_v19 = vmax.f32 %v5027_v35, 0.0  ;;  %v14518_v35 = vld [vmem:[#allocation56_spill] sm:$0xff] }
 0x38c   : > { %v5030_v34 = vadd.f32 %v12959_v56, %v10208_v45  ;;  %v7961_v50 = vadd.f32 %v12965_v42, %v7960_v51  ;;  %v5021_v24 = vpop.f32.mrb[27].mxu0  ;;  %v6842_v53 = vpop.permute.xlu0 %6841  ;;  %v8270_v25 = vmax.f32 %v7958_v2, 0.0  ;;  %v7246_v45 = vsel %vm7190_vm3, %v7150_v14, %v14519_v41 }
 0x38d   : > { %v5022_v39 = vadd.f32 %v12959_v56, %v5021_v24  ;;  %v7962_v23 = vpop.f32.mrb[119].mxu1  ;;  %v13135_v8 = vpop.permute.xlu1 %6280  ;;  %v7561_v3 = vsel %vm7481_vm6, %v7439_v21, %v6842_v53  ;;  %v5745_v63 = vmax.f32 %v5019_v54, 0.0 }
 0x38e   : > { %14514 = vst [vmem:[#allocation64_spill] sm:$0xff] %v13135_v8  ;;  %v5748_v12 = vmax.f32 %v5030_v34, 0.0  ;;  %v8271_v22 = vmax.f32 %v7961_v50, 0.0  ;;  %6857 = vrot.lane.b32.xlu0 %v5995_v11, %s10606_s11  ;;  %6166 = vrot.lane.b32.xlu1 %v5995_v11, %s10601_s22 }
 0x38f   : > { %v5746_v16 = vmax.f32 %v5022_v39, 0.0  ;;  %8060 = vmatmul.mubr.bf16.gmra.mrb[168].mxu1 %v7561_v3  ;;  %v14520_v39 = vld [vmem:[#allocation8_spill] sm:$0xff] }
 0x390   : > { %v5998_v7 = vpack.c.bf16 %v5748_v12, %v5747_v19  ;;  %v13144_v17 = vpack.c.bf16 %v8271_v22, %v8270_v25  ;;  %9682 = vmatprep.mubr.msk.bf16.mxu1 %vm3275_vm0, %v14518_v35  ;;  %v10211_v2 = vpop.f32.mrb[28].mxu0  ;;  %v13150_v51 = vpop.permute.xlu0 %6152  ;;  %v7345_v23 = vsel %vm7289_vm4, %v7246_v45, %v14520_v39 }
 0x391   : > { %v5997_v11 = vpack.c.bf16 %v5746_v16, %v5745_v63  ;;  %v5043_v54 = vadd.f32 %v12959_v56, %v10211_v2  ;;  %v5034_v58 = vpop.f32.mrb[29].mxu0  ;;  %v6844_v21 = vpop.permute.xlu1 %6843  ;;  %v7441_v19 = vsel %vm7388_vm5, %v7345_v23, %v13093_v0 }
 0x392   : > { %14517 = vst [vmem:[#allocation58_spill] sm:$0xff] %v13144_v17  ;;  %v5035_v34 = vadd.f32 %v12959_v56, %v5034_v58  ;;  %6662 = vrot.lane.b32.xlu0 %v5998_v7, %s10604_s9  ;;  %v10212_v50 = vpop.f32.mrb[30].mxu0  ;;  %v7564_v30 = vsel %vm7481_vm6, %v7441_v19, %v6844_v21 }
 0x393   : > { %v5046_v24 = vadd.f32 %v12959_v56, %v10212_v50  ;;  %6557 = vrot.lane.b32.xlu1 %v5997_v11, %s10605_s10  ;;  %v5037_v53 = vpop.f32.mrb[31].mxu0  ;;  %v5751_v25 = vmax.f32 %v5043_v54, 0.0 }
 0x394   : > { %v5038_v3 = vadd.f32 %v12959_v56, %v5037_v53  ;;  %v5749_v22 = vmax.f32 %v5035_v34, 0.0 }
 0x395   : > { %v5752_v12 = vmax.f32 %v5046_v24, 0.0  ;;  %v13164_v16 = vpop.permute.xlu0 %6543  ;;  %v13166_v14 = vpop.permute.xlu1 %6648 }
 0x396   : > { %v5750_v62 = vmax.f32 %v5038_v3, 0.0  ;;  %6414 = vrot.lane.b32.xlu0 %v5998_v7, %s10600_s21 }
 0x397   : > { %v6000_v63 = vpack.c.bf16 %v5752_v12, %v5751_v25  ;;  %8068 = vmatmul.mubr.bf16.gmra.mrb[172].mxu1 %v7564_v30 }
 0x398   : > { %v5999_v48 = vpack.c.bf16 %v5750_v62, %v5749_v22  ;;  %9683 = vmatprep.mubr.msk.bf16.mxu1 %vm3275_vm0, %v12880_v4  ;;  %v10215_v35 = vpop.f32.mrb[32].mxu0 }
 0x399   : > { %v5059_v0 = vadd.f32 %v12959_v56, %v10215_v35  ;;  %v5050_v2 = vpop.f32.mrb[33].mxu0  ;;  %6416 = vrot.lane.b32.xlu1 %v6000_v63, %s10600_s21  ;;  %v13179_v50 = vpop.permute.xlu1 %6402 }
 0x39a   : > { %v5051_v7 = vadd.f32 %v12959_v56, %v5050_v2  ;;  %6664 = vrot.lane.b32.xlu0 %v6000_v63, %s10604_s9  ;;  %v10216_v41 = vpop.f32.mrb[34].mxu0 }
 0x39b   : > { %v5062_v45 = vadd.f32 %v12959_v56, %v10216_v41  ;;  %v5053_v11 = vpop.f32.mrb[35].mxu0  ;;  %v13175_v54 = vpop.permute.xlu0 %6404  ;;  %v5755_v21 = vmax.f32 %v5059_v0, 0.0 }
 0x39c   : > { %v5054_v58 = vadd.f32 %v12959_v56, %v5053_v11  ;;  %v5753_v24 = vmax.f32 %v5051_v7, 0.0 }
 0x39d   : > { %v5756_v34 = vmax.f32 %v5062_v45, 0.0  ;;  %6559 = vrot.lane.b32.xlu1 %v5999_v48, %s10605_s10  ;;  %v13188_v48 = vpop.permute.xlu1 %6650 }
 0x39e   : > { %v5754_v53 = vmax.f32 %v5054_v58, 0.0 }
 0x39f   : > { %v6002_v39 = vpack.c.bf16 %v5756_v34, %v5755_v21  ;;  %v13181_v19 = vpop.permute.xlu0 %6545 }
 0x3a0   : > { %v6001_v23 = vpack.c.bf16 %v5754_v53, %v5753_v24  ;;  %v10219_v3 = vpop.f32.mrb[36].mxu0 }
 0x3a1   : > { %v5075_v25 = vadd.f32 %v12959_v56, %v10219_v3  ;;  %v5066_v12 = vpop.f32.mrb[37].mxu0  ;;  %6418 = vrot.lane.b32.xlu0 %v6002_v39, %s10600_s21  ;;  %6666 = vrot.lane.b32.xlu1 %v6002_v39, %s10604_s9 }
 0x3a2   : > { %v5067_v22 = vadd.f32 %v12959_v56, %v5066_v12  ;;  %v10220_v62 = vpop.f32.mrb[38].mxu0 }
 0x3a3   : > { %v5078_v30 = vadd.f32 %v12959_v56, %v10220_v62  ;;  %v5069_v63 = vpop.f32.mrb[39].mxu0  ;;  %v5759_v0 = vmax.f32 %v5075_v25, 0.0  ;;  %v13192_v11 = vpop.permute.xlu0 %6652 }
 0x3a4   : > { %v5070_v35 = vadd.f32 %v12959_v56, %v5069_v63  ;;  %v5757_v7 = vmax.f32 %v5067_v22, 0.0  ;;  %v13194_v21 = vpop.permute.xlu1 %6406  ;;  %v10560_v63 = vld [vmem:[%s14367_s5 + $0x8] sm:$0xff]  }
 0x3a5   : > { %v5760_v2 = vmax.f32 %v5078_v30, 0.0  ;;  %6561 = vrot.lane.b32.xlu0 %v6001_v23, %s10605_s10  ;;  %8922 = vmatpush1.bf16.msra.mxu1 %v10560_v63 }
 0x3a6   : > { %v5758_v41 = vmax.f32 %v5070_v35, 0.0  ;;  %8923 = vmatprep.subr.bf16.mxu1 %v14511_v59 }
 0x3a7   : > { %v6004_v45 = vpack.c.bf16 %v5760_v2, %v5759_v0 }
 0x3a8   : > { %v6003_v58 = vpack.c.bf16 %v5758_v41, %v5757_v7  ;;  %v10223_v34 = vpop.f32.mrb[40].mxu0  ;;  %v13208_v35 = vpop.permute.xlu1 %6547 }
 0x3a9   : > { %v5091_v24 = vadd.f32 %v12959_v56, %v10223_v34  ;;  %v5082_v53 = vpop.f32.mrb[41].mxu0  ;;  %6668 = vrot.lane.b32.xlu0 %v6004_v45, %s10604_s9  ;;  %6420 = vrot.lane.b32.xlu1 %v6004_v45, %s10600_s21 }
 0x3aa   : > { %v5083_v39 = vadd.f32 %v12959_v56, %v5082_v53  ;;  %v10224_v3 = vpop.f32.mrb[42].mxu0 }
 0x3ab   : > { %v5094_v23 = vadd.f32 %v12959_v56, %v10224_v3  ;;  %v5085_v25 = vpop.f32.mrb[43].mxu0  ;;  %v13201_v12 = vpop.permute.xlu0 %6408  ;;  %v5763_v62 = vmax.f32 %v5091_v24, 0.0 }
 0x3ac   : > { %v5086_v22 = vadd.f32 %v12959_v56, %v5085_v25  ;;  %v5761_v0 = vmax.f32 %v5083_v39, 0.0  ;;  %v13218_v25 = vpop.permute.xlu1 %6654 }
 0x3ad   : > { %v5764_v30 = vmax.f32 %v5094_v23, 0.0  ;;  %6563 = vrot.lane.b32.xlu1 %v6003_v58, %s10605_s10 }
 0x3ae   : > { %v5762_v2 = vmax.f32 %v5086_v22, 0.0 }
 0x3af   : > { %v6006_v7 = vpack.c.bf16 %v5764_v30, %v5763_v62  ;;  %v13211_v34 = vpop.permute.xlu0 %6549 }
 0x3b0   : > { %v6005_v41 = vpack.c.bf16 %v5762_v2, %v5761_v0  ;;  %v10227_v45 = vpop.f32.mrb[44].mxu0 }
 0x3b1   : > { %v5107_v24 = vadd.f32 %v12959_v56, %v10227_v45  ;;  %v5098_v53 = vpop.f32.mrb[45].mxu0  ;;  %6422 = vrot.lane.b32.xlu0 %v6006_v7, %s10600_s21  ;;  %6670 = vrot.lane.b32.xlu1 %v6006_v7, %s10604_s9 }
 0x3b2   : > { %v5099_v58 = vadd.f32 %v12959_v56, %v5098_v53  ;;  %v10228_v3 = vpop.f32.mrb[46].mxu0 }
 0x3b3   : > { %v5110_v39 = vadd.f32 %v12959_v56, %v10228_v3  ;;  %v5101_v23 = vpop.f32.mrb[47].mxu0  ;;  %v5767_v62 = vmax.f32 %v5107_v24, 0.0  ;;  %v13222_v45 = vpop.permute.xlu0 %6656 }
 0x3b4   : > { %v5102_v22 = vadd.f32 %v12959_v56, %v5101_v23  ;;  %v5765_v63 = vmax.f32 %v5099_v58, 0.0  ;;  %v13224_v28 = vpop.permute.xlu1 %6410 }
 0x3b5   : > { %v5768_v30 = vmax.f32 %v5110_v39, 0.0  ;;  %6565 = vrot.lane.b32.xlu0 %v6005_v41, %s10605_s10 }
 0x3b6   : > { %v5766_v0 = vmax.f32 %v5102_v22, 0.0 }
 0x3b7   : > { %v6008_v2 = vpack.c.bf16 %v5768_v30, %v5767_v62 }
 0x3b8   : > { %v6007_v7 = vpack.c.bf16 %v5766_v0, %v5765_v63  ;;  %v10231_v53 = vpop.f32.mrb[48].mxu0  ;;  %v13235_v63 = vpop.permute.xlu1 %6551 }
 0x3b9   : > { %v5123_v3 = vadd.f32 %v12959_v56, %v10231_v53  ;;  %v5114_v17 = vpop.f32.mrb[49].mxu0  ;;  %6672 = vrot.lane.b32.xlu0 %v6008_v2, %s10604_s9  ;;  %6424 = vrot.lane.b32.xlu1 %v6008_v2, %s10600_s21 }
 0x3ba   : > { %v5115_v24 = vadd.f32 %v12959_v56, %v5114_v17  ;;  %v10232_v39 = vpop.f32.mrb[50].mxu0 }
 0x3bb   : > { %v5126_v41 = vadd.f32 %v12959_v56, %v10232_v39  ;;  %v5117_v58 = vpop.f32.mrb[51].mxu0  ;;  %v13231_v23 = vpop.permute.xlu0 %6412  ;;  %v5771_v62 = vmax.f32 %v5123_v3, 0.0 }
 0x3bc   : > { %14521 = vst [vmem:[#allocation51_spill] sm:$0xff] %v13231_v23  ;;  %v5118_v22 = vadd.f32 %v12959_v56, %v5117_v58  ;;  %v5769_v0 = vmax.f32 %v5115_v24, 0.0  ;;  %v13244_v24 = vpop.permute.xlu1 %6658 }
 0x3bd   : > { %v5772_v30 = vmax.f32 %v5126_v41, 0.0  ;;  %6567 = vrot.lane.b32.xlu1 %v6007_v7, %s10605_s10 }
 0x3be   : > { %v5770_v53 = vmax.f32 %v5118_v22, 0.0 }
 0x3bf   : > { %v6010_v55 = vpack.c.bf16 %v5772_v30, %v5771_v62  ;;  %v13237_v17 = vpop.permute.xlu0 %6553 }
 0x3c0   : > { %v6009_v2 = vpack.c.bf16 %v5770_v53, %v5769_v0  ;;  %v10235_v37 = vpop.f32.mrb[52].mxu0 }
 0x3c1   : > { %v5139_v39 = vadd.f32 %v12959_v56, %v10235_v37  ;;  %v5130_v57 = vpop.f32.mrb[53].mxu0  ;;  %6674 = vrot.lane.b32.xlu1 %v6010_v55, %s10604_s9 }
 0x3c2   : > { %v5131_v58 = vadd.f32 %v12959_v56, %v5130_v57  ;;  %v10236_v3 = vpop.f32.mrb[54].mxu0  ;;  %6569 = vrot.lane.b32.xlu0 %v6009_v2, %s10605_s10  ;;  %v6951_v57 = vsel %vm3275_vm0, 0, %v12909_v61 }
 0x3c3   : > { %v5142_v7 = vadd.f32 %v12959_v56, %v10236_v3  ;;  %v5133_v41 = vpop.f32.mrb[55].mxu0  ;;  %v5775_v62 = vmax.f32 %v5139_v39, 0.0  ;;  %v13249_v43 = vpop.permute.xlu0 %6660  ;;  %v7056_v4 = vsel %vm7010_vm1, %v6951_v57, %v12913_v18 }
 0x3c4   : > { %v5134_v22 = vadd.f32 %v12959_v56, %v5133_v41  ;;  %v5773_v0 = vmax.f32 %v5131_v58, 0.0  ;;  %14523 = vst [vmem:[#allocation59_spill] sm:$0xff] %v13249_v43  ;;  %v13253_v2 = vpop.permute.xlu1 %6555  ;;  %v7151_v57 = vsel %vm7097_vm2, %v7056_v4, %v14504_v38 }
 0x3c5   : > { %v5776_v30 = vmax.f32 %v5142_v7, 0.0  ;;  %14524 = vst [vmem:[#allocation8_spill] sm:$0xff] %v13253_v2 }
 0x3c6   : > { %v5774_v53 = vmax.f32 %v5134_v22, 0.0 }
 0x3c7   : > { %v13247_v37 = vpack.c.bf16 %v5776_v30, %v5775_v62 }
 0x3c8   : > { %v6011_v55 = vpack.c.bf16 %v5774_v53, %v5773_v0  ;;  %v10239_v3 = vpop.f32.mrb[56].mxu0 }
 0x3c9   : > { %14522 = vst [vmem:[#allocation56_spill] sm:$0xff] %v13247_v37  ;;  %v5155_v41 = vadd.f32 %v12959_v56, %v10239_v3  ;;  %v7965_v39 = vpop.f32.mrb[120].mxu1  ;;  %v5146_v7 = vpop.f32.mrb[57].mxu0  ;;  %6758 = vrot.lane.b32.xlu1 %v13247_v37, %s10602_s23 }
 0x3ca   : > { %v7966_v58 = vadd.f32 %v12965_v42, %v7965_v39  ;;  %v5147_v22 = vadd.f32 %v12959_v56, %v5146_v7  ;;  %v7967_v62 = vpop.f32.mrb[121].mxu1  ;;  %v10240_v61 = vpop.f32.mrb[58].mxu0  ;;  %6168 = vrot.lane.b32.xlu0 %v6011_v55, %s10601_s22  ;;  %v7248_v39 = vsel %vm7190_vm3, %v7151_v57, %v13164_v16 }
 0x3cb   : > { %v5779_v30 = vmax.f32 %v5155_v41, 0.0  ;;  %v5158_v0 = vadd.f32 %v12959_v56, %v10240_v61  ;;  %v7968_v53 = vpop.f32.mrb[122].mxu1  ;;  %v13264_v18 = vpop.permute.xlu0 %6746 }
 0x3cc   : > { %v7969_v3 = vadd.f32 %v12965_v42, %v7968_v53  ;;  %v7970_v43 = vpop.f32.mrb[123].mxu1  ;;  %v5149_v2 = vpop.f32.mrb[59].mxu0  ;;  %v5777_v7 = vmax.f32 %v5147_v22, 0.0  ;;  %v8272_v41 = vmax.f32 %v7966_v58, 0.0 }
 0x3cd   : > { %v5780_v62 = vmax.f32 %v5158_v0, 0.0  ;;  %v5150_v40 = vadd.f32 %v12959_v56, %v5149_v2  ;;  %6296 = vrot.lane.b32.xlu1 %v13247_v37, %s10603_s24  ;;  %v7347_v43 = vsel %vm7289_vm4, %v7248_v39, %v13166_v14  ;;  %v13282_v16 = vpop.permute.xlu1 %6154 }
 0x3ce   : > { %v8273_v61 = vmax.f32 %v7969_v3, 0.0 }
 0x3cf   : > { %v13274_v23 = vpack.c.bf16 %v5780_v62, %v5779_v30  ;;  %v5778_v8 = vmax.f32 %v5150_v40, 0.0  ;;  %v13276_v4 = vpop.permute.xlu0 %6282  ;;  %v14526_v40 = vld [vmem:[#allocation24_spill] sm:$0xff] }
 0x3d0   : > { %v13280_v53 = vpack.c.bf16 %v8273_v61, %v8272_v41  ;;  %v10243_v22 = vpop.f32.mrb[60].mxu0  ;;  %v6954_v30 = vsel %vm3275_vm0, %v14526_v40, %v12951_v9  ;;  %v7442_v61 = vsel %vm7388_vm5, %v7347_v43, %v11539_v36 }
 0x3d1   : > { %v6013_v0 = vpack.c.bf16 %v5778_v8, %v5777_v7  ;;  %v5171_v2 = vadd.f32 %v12959_v56, %v10243_v22  ;;  %6760 = vrot.lane.b32.xlu0 %v13274_v23, %s10602_s23  ;;  %6859 = vrot.lane.b32.xlu1 %v6011_v55, %s10606_s11  ;;  %v5162_v58 = vpop.f32.mrb[61].mxu0 }
 0x3d2   : > { %14525 = vst [vmem:[#allocation65_spill] sm:$0xff] %v13280_v53  ;;  %v7973_v57 = vpop.f32.mrb[124].mxu1  ;;  %v5163_v14 = vadd.f32 %v12959_v56, %v5162_v58  ;;  %v10244_v3 = vpop.f32.mrb[62].mxu0 }
 0x3d3   : > { %v7974_v39 = vadd.f32 %v12965_v42, %v7973_v57  ;;  %v5783_v62 = vmax.f32 %v5171_v2, 0.0  ;;  %v7975_v8 = vpop.f32.mrb[125].mxu1  ;;  %v5174_v7 = vadd.f32 %v12959_v56, %v10244_v3  ;;  %v6846_v41 = vpop.permute.xlu0 %6845  ;;  %v14527_v2 = vld [vmem:[#allocation7_spill] sm:$0xff]  ;;  %v7058_v57 = vsel %vm7010_vm1, %v6954_v30, %v12949_v49 }
 0x3d4   : > { %v7976_v55 = vpop.f32.mrb[126].mxu1  ;;  %v13296_v22 = vpop.permute.xlu1 %6748  ;;  %v7567_v53 = vsel %vm7481_vm6, %v7442_v61, %v6846_v41  ;;  %v5781_v3 = vmax.f32 %v5163_v14, 0.0  ;;  %v7153_v8 = vsel %vm7097_vm2, %v7058_v57, %v13179_v50 }
 0x3d5   : > { %v7977_v9 = vadd.f32 %v12965_v42, %v7976_v55  ;;  %v5784_v40 = vmax.f32 %v5174_v7, 0.0  ;;  %v7978_v58 = vpop.f32.mrb[127].mxu1  ;;  %v5165_v38 = vpop.f32.mrb[63].mxu0  ;;  %6861 = vrot.lane.b32.xlu0 %v6013_v0, %s10606_s11  ;;  %6676 = vrot.lane.b32.xlu1 %v14527_v2, %s10604_s9  ;;  %v8274_v41 = vmax.f32 %v7974_v39, 0.0  ;;  %v14528_v39 = vld [vmem:[#allocation36_spill] sm:$0xff] }
 0x3d6   : > { %v5166_v43 = vadd.f32 %v12959_v56, %v5165_v38  ;;  %8076 = vmatmul.mubr.bf16.gmra.mrb[176].mxu1 %v7567_v53  ;;  %v7250_v58 = vsel %vm7190_vm3, %v7153_v8, %v13181_v19 }
 0x3d7   : > { %v8275_v61 = vmax.f32 %v7977_v9, 0.0  ;;  %v13308_v7 = vpack.c.bf16 %v5784_v40, %v5783_v62  ;;  %9684 = vmatprep.mubr.msk.bf16.mxu1 %vm3275_vm0, %v12907_v60  ;;  %v13312_v55 = vpop.permute.xlu0 %6156  ;;  %v6957_v62 = vsel %vm3275_vm0, %v12544_v32, %v12995_v10 }
 0x3d8   : > { %v5782_v49 = vmax.f32 %v5166_v43, 0.0  ;;  %v13316_v30 = vpop.permute.xlu1 %6284  ;;  %v10247_v38 = vpop.f32.mrb[64].mxu0  ;;  %v7349_v43 = vsel %vm7289_vm4, %v7250_v58, %v13188_v48 }
 0x3d9   : > { %v13318_v53 = vpack.c.bf16 %v8275_v61, %v8274_v41  ;;  %v5187_v50 = vadd.f32 %v12959_v56, %v10247_v38  ;;  %v5178_v14 = vpop.f32.mrb[65].mxu0  ;;  %6873 = vrot.lane.b32.xlu0 %v14528_v39, %s10606_s11  ;;  %6170 = vrot.lane.b32.xlu1 %v6013_v0, %s10601_s22  ;;  %v7444_v32 = vsel %vm7388_vm5, %v7349_v43, %v13264_v18  ;;  %v10561_v18 = vld [vmem:[%s14367_s5 + $0x10] sm:$0xff]  }
 0x3da   : > { %v13327_v9 = vpack.c.bf16 %v5782_v49, %v5781_v3  ;;  %v7981_v19 = vpop.f32.mrb[128].mxu1  ;;  %v5179_v40 = vadd.f32 %v12959_v56, %v5178_v14  ;;  %v10248_v57 = vpop.f32.mrb[66].mxu0  ;;  %v7060_v49 = vsel %vm7010_vm1, %v6957_v62, %v12999_v15  ;;  %8924 = vmatpush1.bf16.msra.mxu1 %v10561_v18 }
 0x3db   : > { %v5787_v8 = vmax.f32 %v5187_v50, 0.0  ;;  %v7982_v41 = vadd.f32 %v12965_v42, %v7981_v19  ;;  %v7983_v61 = vpop.f32.mrb[129].mxu1  ;;  %v5190_v38 = vadd.f32 %v12959_v56, %v10248_v57  ;;  %v13334_v0 = vpop.permute.xlu0 %6750  ;;  %v7155_v15 = vsel %vm7097_vm2, %v7060_v49, %v13175_v54  ;;  %8925 = vmatprep.subr.bf16.mxu1 %v14511_v59 }
 0x3dc   : > { %v7984_v10 = vpop.f32.mrb[130].mxu1  ;;  %v6848_v3 = vpop.permute.xlu1 %6847  ;;  %v5785_v62 = vmax.f32 %v5179_v40, 0.0  ;;  %v7252_v57 = vsel %vm7190_vm3, %v7155_v15, %v13208_v35 }
 0x3dd   : > { %v5788_v14 = vmax.f32 %v5190_v38, 0.0  ;;  %v7985_v39 = vadd.f32 %v12965_v42, %v7984_v10  ;;  %v7986_v48 = vpop.f32.mrb[131].mxu1  ;;  %v5181_v58 = vpop.f32.mrb[67].mxu0  ;;  %6298 = vrot.lane.b32.xlu0 %v13274_v23, %s10603_s24  ;;  %6762 = vrot.lane.b32.xlu1 %v13308_v7, %s10602_s23  ;;  %v7570_v50 = vsel %vm7481_vm6, %v7444_v32, %v6848_v3  ;;  %v8276_v43 = vmax.f32 %v7982_v41, 0.0 }
 0x3de   : > { %v5182_v19 = vadd.f32 %v12959_v56, %v5181_v58  ;;  %8084 = vmatmul.mubr.bf16.gmra.mrb[180].mxu1 %v7570_v50  ;;  %v7351_v41 = vsel %vm7289_vm4, %v7252_v57, %v13192_v11  ;;  %v6960_v11 = vsel %vm3275_vm0, %v12579_v33, %v13037_v29 }
 0x3df   : > { %v13354_v61 = vpack.c.bf16 %v5788_v14, %v5787_v8  ;;  %v8277_v38 = vmax.f32 %v7985_v39, 0.0  ;;  %9685 = vmatprep.mubr.msk.bf16.mxu1 %vm3275_vm0, %v12941_v27  ;;  %v13358_v32 = vpop.permute.xlu0 %6286  ;;  %v7446_v58 = vsel %vm7388_vm5, %v7351_v41, %v13296_v22  ;;  %v7062_v33 = vsel %vm7010_vm1, %v6960_v11, %v13035_v13  ;;  %v14529_v13 = vld [vmem:[#allocation23_spill] sm:$0xff] }
 0x3e0   : > { %v5786_v10 = vmax.f32 %v5182_v19, 0.0  ;;  %v13360_v3 = vpop.permute.xlu1 %6158  ;;  %v10251_v54 = vpop.f32.mrb[68].mxu0 }
 0x3e1   : > { %v13363_v40 = vpack.c.bf16 %v8277_v38, %v8276_v43  ;;  %v5203_v35 = vadd.f32 %v12959_v56, %v10251_v54  ;;  %6764 = vrot.lane.b32.xlu0 %v13354_v61, %s10602_s23  ;;  %6863 = vrot.lane.b32.xlu1 %v13327_v9, %s10606_s11  ;;  %v5194_v8 = vpop.f32.mrb[69].mxu0 }
 0x3e2   : > { %v13372_v49 = vpack.c.bf16 %v5786_v10, %v5785_v62  ;;  %v7989_v14 = vpop.f32.mrb[132].mxu1  ;;  %v5195_v39 = vadd.f32 %v12959_v56, %v5194_v8  ;;  %v10252_v48 = vpop.f32.mrb[70].mxu0 }
 0x3e3   : > { %v7990_v50 = vadd.f32 %v12965_v42, %v7989_v14  ;;  %v5791_v18 = vmax.f32 %v5203_v35, 0.0  ;;  %v7991_v15 = vpop.f32.mrb[133].mxu1  ;;  %v5206_v19 = vadd.f32 %v12959_v56, %v10252_v48  ;;  %v6850_v43 = vpop.permute.xlu0 %6849 }
 0x3e4   : > { %v7992_v62 = vpop.f32.mrb[134].mxu1  ;;  %v6753_v57 = vpop.permute.xlu1 %6752  ;;  %v7573_v38 = vsel %vm7481_vm6, %v7446_v58, %v6850_v43  ;;  %v5789_v35 = vmax.f32 %v5195_v39, 0.0  ;;  %v7157_v15 = vsel %vm7097_vm2, %v7062_v33, %v13194_v21  ;;  %v6963_v21 = vsel %vm3275_vm0, %v12626_v47, %v13071_v44 }
 0x3e5   : > { %v7993_v10 = vadd.f32 %v12965_v42, %v7992_v62  ;;  %v5792_v54 = vmax.f32 %v5206_v19, 0.0  ;;  %v7994_v8 = vpop.f32.mrb[135].mxu1  ;;  %v5197_v22 = vpop.f32.mrb[71].mxu0  ;;  %6865 = vrot.lane.b32.xlu0 %v13372_v49, %s10606_s11  ;;  %6426 = vrot.lane.b32.xlu1 %v14527_v2, %s10600_s21  ;;  %v8278_v29 = vmax.f32 %v7990_v50, 0.0  ;;  %v14530_v50 = vld [vmem:[#allocation22_spill] sm:$0xff]  ;;  %v7064_v47 = vsel %vm7010_vm1, %v6963_v21, %v13075_v5 }
 0x3e6   : > { %v5198_v41 = vadd.f32 %v12959_v56, %v5197_v22  ;;  %8092 = vmatmul.mubr.bf16.gmra.mrb[184].mxu1 %v7573_v38  ;;  %v7254_v56 = vsel %vm7190_vm3, %v7157_v15, %v13211_v34 }
 0x3e7   : > { %v8279_v14 = vmax.f32 %v7993_v10, 0.0  ;;  %v13391_v48 = vpack.c.bf16 %v5792_v54, %v5791_v18  ;;  %9686 = vmatprep.mubr.msk.bf16.mxu1 %vm3275_vm0, %v12989_v1  ;;  %v13395_v58 = vpop.permute.xlu0 %6160  ;;  %v7353_v34 = vsel %vm7289_vm4, %v7254_v56, %v13218_v25  ;;  %v7159_v25 = vsel %vm7097_vm2, %v7064_v47, %v13201_v12 }
 0x3e8   : > { %v5790_v2 = vmax.f32 %v5198_v41, 0.0  ;;  %v13399_v39 = vpop.permute.xlu1 %6288  ;;  %v7448_v54 = vsel %vm7388_vm5, %v7353_v34, %v13334_v0  ;;  %v14531_v41 = vld [vmem:[#allocation35_spill] sm:$0xff]  ;;  %v14533_v34 = vld [vmem:[#allocation38_spill] sm:$0xff] }
 0x3e9   : > { %v13403_v19 = vpack.c.bf16 %v8279_v14, %v8278_v29  ;;  %6573 = vrot.lane.b32.xlu0 %v14529_v13, %s10605_s10  ;;  %6678 = vrot.lane.b32.xlu1 %v14530_v50, %s10604_s9  ;;  %v6966_v13 = vsel %vm3275_vm0, %v12666_v6, %v13117_v20 }
 0x3ea   : > { %v13409_v18 = vpack.c.bf16 %v5790_v2, %v5789_v35  ;;  %v7997_v43 = vpop.f32.mrb[136].mxu1 }
 0x3eb   : > { %v7998_v11 = vadd.f32 %v12965_v42, %v7997_v43  ;;  %v7999_v62 = vpop.f32.mrb[137].mxu1 }
 0x3ec   : > { %v8000_v38 = vpop.f32.mrb[138].mxu1  ;;  %v6755_v10 = vpop.permute.xlu0 %6754 }
 0x3ed   : > { %v8001_v8 = vadd.f32 %v12965_v42, %v8000_v38  ;;  %v8002_v22 = vpop.f32.mrb[139].mxu1  ;;  %v6852_v35 = vpop.permute.xlu1 %6851  ;;  %6770 = vrot.lane.b32.xlu0 %v14531_v41, %s10602_s23  ;;  %6766 = vrot.lane.b32.xlu1 %v13391_v48, %s10602_s23  ;;  %v8280_v33 = vmax.f32 %v7998_v11, 0.0  ;;  %v7256_v42 = vsel %vm7190_vm3, %v7159_v25, %v13235_v63  ;;  %v13448_v63 = vld [vmem:[%s14366_s4] ss:$0 sm:$0xff]  ;;  %v6969_v25 = vsel %vm3275_vm0, %v12708_v46, %v13150_v51  ;;  %v14538_v51 = vld [vmem:[#allocation64_spill] sm:$0xff] }
 0x3ee   : > { %v7576_v44 = vsel %vm7481_vm6, %v7448_v54, %v6852_v35  ;;  %v7355_v12 = vsel %vm7289_vm4, %v7256_v42, %v13222_v45  ;;  %v7066_v54 = vsel %vm7010_vm1, %v6966_v13, %v13115_v26  ;;  %v14535_v26 = vld [vmem:[#allocation25_spill] sm:$0xff]  ;;  %v14537_v13 = vld [vmem:[#allocation26_spill] sm:$0xff] }
 0x3ef   : > { %v8281_v0 = vmax.f32 %v8001_v8, 0.0  ;;  %8100 = vmatmul.mubr.bf16.gmra.mrb[188].mxu1 %v7576_v44 }
 0x3f0   : > { %9687 = vmatprep.mubr.msk.bf16.mxu1 %vm3275_vm0, %v13029_v31  ;;  %v13433_v29 = vpop.permute.xlu0 %6290 }
 0x3f1   : > { %v13435_v14 = vpack.c.bf16 %v8281_v0, %v8280_v33  ;;  %v13437_v15 = vpop.permute.xlu1 %6162  ;;  %6172 = vrot.lane.b32.xlu0 %v13327_v9, %s10601_s22  ;;  %6867 = vrot.lane.b32.xlu1 %v13409_v18, %s10606_s11  ;;  %v7450_v9 = vsel %vm7388_vm5, %v7355_v12, %v6753_v57  ;;  %v7161_v57 = vsel %vm7097_vm2, %v7066_v54, %v13224_v28 }
 0x3f2   : > { %v8005_v5 = vpop.f32.mrb[140].mxu1 }
 0x3f3   : > { %14532 = vst [vmem:[#allocation24_spill] sm:$0xff] %v13435_v14  ;;  %v8006_v2 = vadd.f32 %v13448_v63, %v8005_v5  ;;  %v8007_v56 = vpop.f32.mrb[141].mxu1 }
 0x3f4   : > { %v8008_v43 = vpop.f32.mrb[142].mxu1  ;;  %v6854_v21 = vpop.permute.xlu0 %6853  ;;  %v14536_v56 = vld [vmem:[#allocation40_spill] sm:$0xff] }
 0x3f5   : > { %v8009_v11 = vadd.f32 %v13448_v63, %v8008_v43  ;;  %v8010_v62 = vpop.f32.mrb[143].mxu1  ;;  %v6757_v45 = vpop.permute.xlu1 %6756  ;;  %6428 = vrot.lane.b32.xlu0 %v14530_v50, %s10600_s21  ;;  %6875 = vrot.lane.b32.xlu1 %v14533_v34, %s10606_s11  ;;  %v7579_v38 = vsel %vm7481_vm6, %v7450_v9, %v6854_v21  ;;  %v8282_v6 = vmax.f32 %v8006_v2, 0.0  ;;  %v7258_v50 = vsel %vm7190_vm3, %v7161_v57, %v13237_v17  ;;  %v14539_v21 = vld [vmem:[#allocation51_spill] sm:$0xff] }
 0x3f6   : > { %v7357_v17 = vsel %vm7289_vm4, %v7258_v50, %v13244_v24  ;;  %v7068_v24 = vsel %vm7010_vm1, %v6969_v25, %v14538_v51  ;;  %v14541_v62 = vld [vmem:[#allocation8_spill] sm:$0xff]  ;;  %v14544_v57 = vld [vmem:[#allocation59_spill] sm:$0xff] }
 0x3f7   : > { %v8283_v20 = vmax.f32 %v8009_v11, 0.0  ;;  %8108 = vmatmul.mubr.bf16.gmra.mrb[192].mxu1 %v7579_v38  ;;  %v7452_v42 = vsel %vm7388_vm5, %v7357_v17, %v6755_v10  ;;  %v7163_v10 = vsel %vm7097_vm2, %v7068_v24, %v14539_v21  ;;  %v14540_v11 = vld [vmem:[#allocation62_spill] sm:$0xff]  ;;  %v14551_v51 = vld [vmem:[#allocation3_spill] sm:$0xff]  ;;  %v14553_v21 = vld [vmem:[#allocation41_spill] sm:$0xff] }
 0x3f8   : > { %9688 = vmatprep.mubr.msk.bf16.mxu1 %vm3275_vm0, %v13065_v52  ;;  %v13467_v8 = vpop.permute.xlu0 %6164  ;;  %v7260_v34 = vsel %vm7190_vm3, %v7163_v10, %v14541_v62  ;;  %v14552_v24 = vld [vmem:[#allocation30_spill] sm:$0xff]  ;;  %v14554_v62 = vld [vmem:[#allocation32_spill] sm:$0xff] }
 0x3f9   : > { %v13471_v22 = vpack.c.bf16 %v8283_v20, %v8282_v6  ;;  %v13473_v35 = vpop.permute.xlu1 %6292  ;;  %6680 = vrot.lane.b32.xlu0 %v14535_v26, %s10604_s9  ;;  %6300 = vrot.lane.b32.xlu1 %v13308_v7, %s10603_s24  ;;  %v14543_v6 = vld [vmem:[#allocation37_spill] sm:$0xff]  ;;  %v7359_v50 = vsel %vm7289_vm4, %v7260_v34, %v14544_v57  ;;  %v14555_v34 = vld [vmem:[#allocation4_spill] sm:$0xff] }
 0x3fa   : > { %v8013_v47 = vpop.f32.mrb[144].mxu1  ;;  %v14556_v57 = vld [vmem:[#allocation44_spill] sm:$0xff] }
 0x3fb   : > { %14534 = vst [vmem:[#allocation7_spill] sm:$0xff] %v13471_v22  ;;  %v8014_v28 = vadd.f32 %v13448_v63, %v8013_v47  ;;  %v8015_v44 = vpop.f32.mrb[145].mxu1  ;;  %v10562_v47 = vld [vmem:[%s14367_s5 + $0x18] sm:$0xff]  }
 0x3fc   : > { %v8016_v33 = vpop.f32.mrb[146].mxu1  ;;  %v13485_v0 = vpop.permute.xlu0 %6294  ;;  %v14545_v44 = vld [vmem:[#allocation28_spill] sm:$0xff]  ;;  %8926 = vmatpush1.bf16.msra.mxu1 %v10562_v47 }
 0x3fd   : > { %v8017_v5 = vadd.f32 %v13448_v63, %v8016_v33  ;;  %v8018_v12 = vpop.f32.mrb[147].mxu1  ;;  %v6856_v2 = vpop.permute.xlu1 %6855  ;;  %6877 = vrot.lane.b32.xlu0 %v14536_v56, %s10606_s11  ;;  %6575 = vrot.lane.b32.xlu1 %v14537_v13, %s10605_s10  ;;  %v8284_v9 = vmax.f32 %v8014_v28, 0.0  ;;  %v7454_v28 = vsel %vm7388_vm5, %v7359_v50, %v6757_v45  ;;  %v14546_v33 = vld [vmem:[#allocation39_spill] sm:$0xff]  ;;  %v14549_v56 = vld [vmem:[#allocation42_spill] sm:$0xff]  ;;  %v10564_v47 = vld [vmem:[%s14367_s5 + $0x28] sm:$0xff]  }
 0x3fe   : > { %v7582_v46 = vsel %vm7481_vm6, %v7452_v42, %v6856_v2  ;;  %8927 = vmatprep.subr.bf16.mxu1 %v14511_v59  ;;  %v14547_v42 = vld [vmem:[#allocation27_spill] sm:$0xff]  ;;  %v14548_v2 = vld [vmem:[#allocation29_spill] sm:$0xff] }
 0x3ff   : > { %v8285_v43 = vmax.f32 %v8017_v5, 0.0  ;;  %8116 = vmatmul.mubr.bf16.gmra.mrb[196].mxu1 %v7582_v46 }
 0x400   : > { %9689 = vmatprep.mubr.msk.bf16.mxu1 %vm3275_vm0, %v14540_v11  ;;  %v6858_v20 = vpop.permute.xlu0 %6857 }
 0x401   : > { %v13502_v38 = vpack.c.bf16 %v8285_v43, %v8284_v9  ;;  %v13504_v54 = vpop.permute.xlu1 %6166  ;;  %6302 = vrot.lane.b32.xlu0 %v13354_v61, %s10603_s24  ;;  %6772 = vrot.lane.b32.xlu1 %v14543_v6, %s10602_s23  ;;  %v7585_v25 = vsel %vm7481_vm6, %v7454_v28, %v6858_v20  ;;  %v10563_v20 = vld [vmem:[%s14367_s5 + $0x20] sm:$0xff]   ;;  %v14557_v28 = vld [vmem:[#allocation6_spill] sm:$0xff] }
 0x402   : > { %8928 = vmatpush1.bf16.msra.mxu1 %v10563_v20  ;;  %v14561_v20 = vld [vmem:[#allocation5_spill] sm:$0xff] }
 0x403   : > { %14542 = vst [vmem:[#allocation36_spill] sm:$0xff] %v13502_v38  ;;  %8929 = vmatprep.subr.bf16.mxu1 %v14511_v59 }
 0x404   : > { %v13530_v45 = vpop.permute.xlu0 %6662 }
 0x405   : > { %6577 = vrot.lane.b32.xlu0 %v14545_v44, %s10605_s10  ;;  %6174 = vrot.lane.b32.xlu1 %v13372_v49, %s10601_s22  ;;  %v13521_v17 = vpop.permute.xlu1 %6557  ;;  %v14558_v44 = vld [vmem:[#allocation31_spill] sm:$0xff] }
 0x406   : > { %8930 = vmatpush1.bf16.msra.mxu1 %v10564_v47  ;;  %v10567_v47 = vld [vmem:[%s14367_s5 + $0x40] sm:$0xff]  }
 0x407   : > { %8124 = vmatmul.mubr.bf16.gmra.mrb[200].mxu1 %v7585_v25  ;;  %8931 = vmatprep.subr.bf16.mxu1 %v14511_v59 }
 0x408   : > { %9690 = vmatprep.mubr.msk.bf16.mxu1 %vm3275_vm0, %v13247_v37  ;;  %v13538_v5 = vpop.permute.xlu0 %6414  ;;  %v14566_v37 = vld [vmem:[#allocation9_spill] sm:$0xff] }
 0x409   : > { %6774 = vrot.lane.b32.xlu0 %v14546_v33, %s10602_s23  ;;  %6430 = vrot.lane.b32.xlu1 %v14535_v26, %s10600_s21  ;;  %v14550_v26 = vld [vmem:[#allocation45_spill] sm:$0xff] }
 0x40b   : > { %v13532_v49 = vpop.permute.xlu1 %6416 }
 0x40c   : > { %v13550_v13 = vpop.permute.xlu0 %6664 }
 0x40d   : > { %6432 = vrot.lane.b32.xlu0 %v14547_v42, %s10600_s21  ;;  %6682 = vrot.lane.b32.xlu1 %v14547_v42, %s10604_s9 }
 0x40f   : > { %v13540_v12 = vpop.permute.xlu1 %6559 }
 0x411   : > { %6684 = vrot.lane.b32.xlu0 %v14548_v2, %s10604_s9  ;;  %6879 = vrot.lane.b32.xlu1 %v14549_v56, %s10606_s11  ;;  %v14559_v56 = vld [vmem:[#allocation47_spill] sm:$0xff] }
 0x413   : > { %v13552_v46 = vpop.permute.xlu1 %6666  ;;  %v13558_v9 = vpop.permute.xlu0 %6418 }
 0x415   : > { %6881 = vrot.lane.b32.xlu0 %v14550_v26, %s10606_s11  ;;  %6304 = vrot.lane.b32.xlu1 %v13391_v48, %s10603_s24  ;;  %v10566_v26 = vld [vmem:[%s14367_s5 + $0x38] sm:$0xff]  }
 0x417   : > { %v13566_v10 = vpop.permute.xlu0 %6561 }
 0x419   : > { %6306 = vrot.lane.b32.xlu0 %v14551_v51, %s10603_s24  ;;  %6579 = vrot.lane.b32.xlu1 %v14552_v24, %s10605_s10 }
 0x41b   : > { %v13560_v43 = vpop.permute.xlu1 %6420 }
 0x41d   : > { %6176 = vrot.lane.b32.xlu0 %v13409_v18, %s10601_s22  ;;  %6776 = vrot.lane.b32.xlu1 %v14553_v21, %s10602_s23  ;;  %v13581_v18 = vpop.permute.xlu0 %6668 }
 0x41f   : > { %v13568_v11 = vpop.permute.xlu1 %6563 }
 0x421   : > { %6581 = vrot.lane.b32.xlu0 %v14554_v62, %s10605_s10  ;;  %6178 = vrot.lane.b32.xlu1 %v14555_v34, %s10601_s22  ;;  %v14560_v34 = vld [vmem:[#allocation33_spill] sm:$0xff] }
 0x423   : > { %v13583_v50 = vpop.permute.xlu1 %6670  ;;  %v13593_v25 = vpop.permute.xlu0 %6422 }
 0x425   : > { %6778 = vrot.lane.b32.xlu0 %v14556_v57, %s10602_s23  ;;  %6434 = vrot.lane.b32.xlu1 %v14548_v2, %s10600_s21  ;;  %v10565_v2 = vld [vmem:[%s14367_s5 + $0x30] sm:$0xff]   ;;  %v14565_v57 = vld [vmem:[#allocation46_spill] sm:$0xff] }
 0x426   : > { %8932 = vmatpush1.bf16.msra.mxu1 %v10565_v2 }
 0x427   : > { %8933 = vmatprep.subr.bf16.mxu1 %v14511_v59  ;;  %v13609_v24 = vpop.permute.xlu0 %6565 }
 0x429   : > { %6180 = vrot.lane.b32.xlu0 %v14557_v28, %s10601_s22  ;;  %6686 = vrot.lane.b32.xlu1 %v14558_v44, %s10604_s9  ;;  %v14562_v28 = vld [vmem:[#allocation50_spill] sm:$0xff] }
 0x42a   : > { %8934 = vmatpush1.bf16.msra.mxu1 %v10566_v26  ;;  %v6971_v26 = vsel %vm3275_vm0, 0, %v13282_v16 }
 0x42b   : > { %v13595_v42 = vpop.permute.xlu1 %6424  ;;  %8935 = vmatprep.subr.bf16.mxu1 %v14511_v59  ;;  %v13625_v2 = vpop.permute.xlu0 %6672 }
 0x42d   : > { %6436 = vrot.lane.b32.xlu0 %v14558_v44, %s10600_s21  ;;  %6883 = vrot.lane.b32.xlu1 %v14559_v56, %s10606_s11  ;;  %v14563_v44 = vld [vmem:[#allocation34_spill] sm:$0xff] }
 0x42e   : > { %8936 = vmatpush1.bf16.msra.mxu1 %v10567_v47 }
 0x42f   : > { %v13611_v62 = vpop.permute.xlu1 %6567 }
 0x431   : > { %6688 = vrot.lane.b32.xlu0 %v14560_v34, %s10604_s9  ;;  %6308 = vrot.lane.b32.xlu1 %v14561_v20, %s10603_s24  ;;  %v14564_v34 = vld [vmem:[#allocation16_spill] sm:$0xff] }
 0x433   : > { %v13627_v56 = vpop.permute.xlu1 %6674 }
 0x434   : > { %v13637_v21 = vpop.permute.xlu0 %6569 }
 0x435   : > { %6885 = vrot.lane.b32.xlu0 %v14562_v28, %s10606_s11  ;;  %6583 = vrot.lane.b32.xlu1 %v14563_v44, %s10605_s10  ;;  %v7070_v28 = vsel %vm7010_vm1, %v6971_v26, %v13276_v4 }
 0x436   : > { %v7164_v16 = vsel %vm7097_vm2, %v7070_v28, %v14566_v37 }
 0x437   : > { %v7262_v4 = vsel %vm7190_vm3, %v7164_v16, %v13521_v17  ;;  %v14573_v17 = vld [vmem:[#allocation21_spill] sm:$0xff] }
 0x438   : > { %v7361_v28 = vsel %vm7289_vm4, %v7262_v4, %v13530_v45 }
 0x439   : > { %8538 = vrot.lane.b32.xlu0 %v14564_v34, %s10604_s9  ;;  %6780 = vrot.lane.b32.xlu1 %v14565_v57, %s10602_s23  ;;  %v14567_v57 = vld [vmem:[#allocation20_spill] sm:$0xff]  ;;  %v7455_v45 = vsel %vm7388_vm5, %v7361_v28, %v11539_v36 }
 0x43a   : > { %v8021_v44 = vpop.f32.mrb[148].mxu1 }
 0x43b   : > { %v8022_v33 = vadd.f32 %v13448_v63, %v8021_v44  ;;  %v8023_v47 = vpop.f32.mrb[149].mxu1  ;;  %v6759_v6 = vpop.permute.xlu1 %6758 }
 0x43c   : > { %v8024_v38 = vpop.f32.mrb[150].mxu1  ;;  %v13649_v47 = vpop.permute.xlu0 %6168 }
 0x43d   : > { %v8025_v22 = vadd.f32 %v13448_v63, %v8024_v38  ;;  %v8026_v14 = vpop.f32.mrb[151].mxu1  ;;  %8466 = vrot.lane.b32.xlu0 %v14564_v34, %s10600_s21  ;;  %8506 = vrot.lane.b32.xlu1 %v14567_v57, %s10605_s10  ;;  %v8286_v26 = vmax.f32 %v8022_v33, 0.0  ;;  %14568 = vst [vmem:[#allocation23_spill] sm:$0xff] %v13649_v47  ;;  %v14572_v34 = vld [vmem:[#allocation43_spill] sm:$0xff] }
 0x43e   : > { %v14571_v14 = vld [vmem:[#allocation54_spill] sm:$0xff] }
 0x43f   : > { %v8287_v44 = vmax.f32 %v8025_v22, 0.0  ;;  %v13651_v41 = vpop.permute.xlu1 %6296  ;;  %v6974_v22 = vsel %vm3275_vm0, %v14573_v17, %v13312_v55 }
 0x440   : > { %14569 = vst [vmem:[#allocation22_spill] sm:$0xff] %v13651_v41 }
 0x441   : > { %v13655_v38 = vpack.c.bf16 %v8287_v44, %v8286_v26  ;;  %8540 = vrot.lane.b32.xlu0 %v14571_v14, %s10604_s9  ;;  %8582 = vrot.lane.b32.xlu1 %v14572_v34, %s10606_s11  ;;  %v14574_v44 = vld [vmem:[#allocation48_spill] sm:$0xff] }
 0x442   : > { %v8029_v57 = vpop.f32.mrb[152].mxu1 }
 0x443   : > { %14570 = vst [vmem:[#allocation38_spill] sm:$0xff] %v13655_v38  ;;  %v8030_v33 = vadd.f32 %v13448_v63, %v8029_v57  ;;  %v8031_v16 = vpop.f32.mrb[153].mxu1  ;;  %v6761_v37 = vpop.permute.xlu0 %6760  ;;  %v14575_v38 = vld [vmem:[#allocation53_spill] sm:$0xff]  ;;  %v7072_v57 = vsel %vm7010_vm1, %v6974_v22, %v13316_v30  ;;  %v14577_v30 = vld [vmem:[#allocation52_spill] sm:$0xff]  ;;  %v6977_v22 = vsel %vm3275_vm0, %v12907_v60, %v13360_v3 }
 0x444   : > { %v8032_v41 = vpop.f32.mrb[154].mxu1  ;;  %v6860_v47 = vpop.permute.xlu1 %6859  ;;  %v7166_v17 = vsel %vm7097_vm2, %v7072_v57, %v13538_v5  ;;  %v7074_v3 = vsel %vm7010_vm1, %v6977_v22, %v13358_v32 }
 0x445   : > { %v8033_v4 = vadd.f32 %v13448_v63, %v8032_v41  ;;  %v8034_v26 = vpop.f32.mrb[155].mxu1  ;;  %8584 = vrot.lane.b32.xlu0 %v14574_v44, %s10606_s11  ;;  %8508 = vrot.lane.b32.xlu1 %v14575_v38, %s10605_s10  ;;  %v7588_v55 = vsel %vm7481_vm6, %v7455_v45, %v6860_v47  ;;  %v8288_v16 = vmax.f32 %v8030_v33, 0.0  ;;  %v14576_v47 = vld [vmem:[#allocation55_spill] sm:$0xff] }
 0x446   : > { %8132 = vmatmul.mubr.bf16.gmra.mrb[204].mxu1 %v7588_v55  ;;  %v7264_v26 = vsel %vm7190_vm3, %v7166_v17, %v13540_v12 }
 0x447   : > { %v8289_v28 = vmax.f32 %v8033_v4, 0.0  ;;  %9691 = vmatprep.mubr.msk.bf16.mxu1 %vm3275_vm0, %v13274_v23  ;;  %v6862_v41 = vpop.permute.xlu0 %6861  ;;  %v7363_v33 = vsel %vm7289_vm4, %v7264_v26, %v13550_v13 }
 0x448   : > { %v13681_v36 = vpop.permute.xlu1 %6676  ;;  %v7457_v55 = vsel %vm7388_vm5, %v7363_v33, %v6759_v6  ;;  %v7168_v6 = vsel %vm7097_vm2, %v7074_v3, %v13532_v49  ;;  %v6980_v49 = vsel %vm3275_vm0, %v12941_v27, %v13395_v58 }
 0x449   : > { %v13683_v38 = vpack.c.bf16 %v8289_v28, %v8288_v16  ;;  %8510 = vrot.lane.b32.xlu0 %v14576_v47, %s10605_s10  ;;  %8564 = vrot.lane.b32.xlu1 %v14577_v30, %s10602_s23  ;;  %v14578_v47 = vld [vmem:[#allocation60_spill] sm:$0xff]  ;;  %v7591_v60 = vsel %vm7481_vm6, %v7457_v55, %v6862_v41  ;;  %v7266_v33 = vsel %vm7190_vm3, %v7168_v6, %v13566_v10  ;;  %v14579_v41 = vld [vmem:[#allocation57_spill] sm:$0xff] }
 0x44a   : > { %v8037_v5 = vpop.f32.mrb[156].mxu1  ;;  %v7365_v22 = vsel %vm7289_vm4, %v7266_v33, %v13552_v46  ;;  %v14580_v6 = vld [vmem:[#allocation61_spill] sm:$0xff]  ;;  %v7076_v58 = vsel %vm7010_vm1, %v6980_v49, %v13399_v39  ;;  %v14582_v39 = vld [vmem:[#allocation19_spill] sm:$0xff]  ;;  %v6983_v49 = vsel %vm3275_vm0, %v12989_v1, %v13437_v15 }
 0x44b   : > { %v8038_v12 = vadd.f32 %v13448_v63, %v8037_v5  ;;  %v8039_v45 = vpop.f32.mrb[157].mxu1  ;;  %v13695_v4 = vpop.permute.xlu0 %6873  ;;  %v14583_v1 = vld [vmem:[#allocation63_spill] sm:$0xff] }
 0x44c   : > { %v8040_v57 = vpop.f32.mrb[158].mxu1  ;;  %v13698_v17 = vpop.permute.xlu1 %6170 }
 0x44d   : > { %v8041_v16 = vadd.f32 %v13448_v63, %v8040_v57  ;;  %v8042_v28 = vpop.f32.mrb[159].mxu1  ;;  %8566 = vrot.lane.b32.xlu0 %v14578_v47, %s10602_s23  ;;  %8468 = vrot.lane.b32.xlu1 %v14571_v14, %s10600_s21  ;;  %v8290_v13 = vmax.f32 %v8038_v12, 0.0  ;;  %v7459_v57 = vsel %vm7388_vm5, %v7365_v22, %v6761_v37  ;;  %v7170_v37 = vsel %vm7097_vm2, %v7076_v58, %v13558_v9  ;;  %v14581_v22 = vld [vmem:[#allocation58_spill] sm:$0xff] }
 0x44e   : > { %8140 = vmatmul.mubr.bf16.gmra.mrb[208].mxu1 %v7591_v60  ;;  %v7268_v33 = vsel %vm7190_vm3, %v7170_v37, %v13568_v11 }
 0x44f   : > { %v8291_v26 = vmax.f32 %v8041_v16, 0.0  ;;  %9692 = vmatprep.mubr.msk.bf16.mxu1 %vm3275_vm0, %v13308_v7  ;;  %v13712_v5 = vpop.permute.xlu0 %6298 }
 0x450   : > { %v6763_v14 = vpop.permute.xlu1 %6762 }
 0x451   : > { %v13716_v45 = vpack.c.bf16 %v8291_v26, %v8290_v13  ;;  %8470 = vrot.lane.b32.xlu0 %v14579_v41, %s10600_s21  ;;  %8542 = vrot.lane.b32.xlu1 %v14579_v41, %s10604_s9 }
 0x452   : > { %v8045_v32 = vpop.f32.mrb[160].mxu1 }
 0x453   : > { %v8046_v12 = vadd.f32 %v13448_v63, %v8045_v32  ;;  %v8047_v10 = vpop.f32.mrb[161].mxu1  ;;  %v6765_v55 = vpop.permute.xlu0 %6764 }
 0x454   : > { %v8048_v16 = vpop.f32.mrb[162].mxu1  ;;  %v6864_v28 = vpop.permute.xlu1 %6863 }
 0x455   : > { %v8049_v60 = vadd.f32 %v13448_v63, %v8048_v16  ;;  %v8050_v3 = vpop.f32.mrb[163].mxu1  ;;  %8544 = vrot.lane.b32.xlu0 %v14511_v59, %s10604_s9  ;;  %8586 = vrot.lane.b32.xlu1 %v14580_v6, %s10606_s11  ;;  %v7594_v27 = vsel %vm7481_vm6, %v7459_v57, %v6864_v28  ;;  %v8292_v46 = vmax.f32 %v8046_v12, 0.0  ;;  %v7367_v12 = vsel %vm7289_vm4, %v7268_v33, %v13581_v18 }
 0x456   : > { %8148 = vmatmul.mubr.bf16.gmra.mrb[212].mxu1 %v7594_v27  ;;  %v7461_v16 = vsel %vm7388_vm5, %v7367_v12, %v6763_v14  ;;  %v7078_v18 = vsel %vm7010_vm1, %v6983_v49, %v13433_v29 }
 0x457   : > { %v8293_v13 = vmax.f32 %v8049_v60, 0.0  ;;  %9693 = vmatprep.mubr.msk.bf16.mxu1 %vm3275_vm0, %v13354_v61  ;;  %v6866_v26 = vpop.permute.xlu0 %6865  ;;  %v7172_v14 = vsel %vm7097_vm2, %v7078_v18, %v13560_v43 }
 0x458   : > { %v13743_v41 = vpop.permute.xlu1 %6426  ;;  %v7597_v15 = vsel %vm7481_vm6, %v7461_v16, %v6866_v26  ;;  %v6986_v26 = vsel %vm3275_vm0, %v13029_v31, %v13467_v8 }
 0x459   : > { %v13745_v32 = vpack.c.bf16 %v8293_v13, %v8292_v46  ;;  %8588 = vrot.lane.b32.xlu0 %v14581_v22, %s10606_s11  ;;  %8512 = vrot.lane.b32.xlu1 %v14582_v39, %s10605_s10  ;;  %v7270_v13 = vsel %vm7190_vm3, %v7172_v14, %v13609_v24  ;;  %v7080_v31 = vsel %vm7010_vm1, %v6986_v26, %v13473_v35 }
 0x45a   : > { %v8053_v9 = vpop.f32.mrb[164].mxu1  ;;  %v7369_v39 = vsel %vm7289_vm4, %v7270_v13, %v13583_v50  ;;  %v14584_v50 = vld [vmem:[#allocation65_spill] sm:$0xff] }
 0x45b   : > { %v8054_v11 = vadd.f32 %v13448_v63, %v8053_v9  ;;  %v8055_v10 = vpop.f32.mrb[165].mxu1  ;;  %v13757_v57 = vpop.permute.xlu0 %6573  ;;  %v7463_v8 = vsel %vm7388_vm5, %v7369_v39, %v6765_v55  ;;  %v6989_v55 = vsel %vm3275_vm0, %v13065_v52, %v13504_v54 }
 0x45c   : > { %v8056_v28 = vpop.f32.mrb[166].mxu1  ;;  %v13760_v60 = vpop.permute.xlu1 %6678  ;;  %v7174_v10 = vsel %vm7097_vm2, %v7080_v31, %v13593_v25  ;;  %v7082_v52 = vsel %vm7010_vm1, %v6989_v55, %v13485_v0  ;;  %v14585_v0 = vld [vmem:[#allocation13_spill] sm:$0xff]  ;;  %v14591_v55 = vld [vmem:[#allocation35_spill] sm:$0xff] }
 0x45d   : > { %v8057_v3 = vadd.f32 %v13448_v63, %v8056_v28  ;;  %v8058_v27 = vpop.f32.mrb[167].mxu1  ;;  %8436 = vrot.lane.b32.xlu0 %v14577_v30, %s10603_s24  ;;  %8568 = vrot.lane.b32.xlu1 %v14583_v1, %s10602_s23  ;;  %v8294_v58 = vmax.f32 %v8054_v11, 0.0  ;;  %v7272_v35 = vsel %vm7190_vm3, %v7174_v10, %v13611_v62  ;;  %v7176_v14 = vsel %vm7097_vm2, %v7082_v52, %v13595_v42  ;;  %v14588_v10 = vld [vmem:[#allocation12_spill] sm:$0xff] }
 0x45e   : > { %8156 = vmatmul.mubr.bf16.gmra.mrb[216].mxu1 %v7597_v15  ;;  %v7371_v15 = vsel %vm7289_vm4, %v7272_v35, %v13625_v2  ;;  %v14590_v35 = vld [vmem:[#allocation14_spill] sm:$0xff] }
 0x45f   : > { %v8295_v37 = vmax.f32 %v8057_v3, 0.0  ;;  %9694 = vmatprep.mubr.msk.bf16.mxu1 %vm3275_vm0, %v13391_v48  ;;  %v13774_v46 = vpop.permute.xlu0 %6770 }
 0x460   : > { %v6767_v33 = vpop.permute.xlu1 %6766 }
 0x461   : > { %v13781_v29 = vpack.c.bf16 %v8295_v37, %v8294_v58  ;;  %8546 = vrot.lane.b32.xlu0 %v13318_v53, %s10604_s9  ;;  %8403 = vrot.lane.b32.xlu1 %v14572_v34, %s10601_s22  ;;  %v7465_v54 = vsel %vm7388_vm5, %v7371_v15, %v6767_v33 }
 0x462   : > { %v8061_v43 = vpop.f32.mrb[168].mxu1  ;;  %v7603_v42 = vsel %vm7481_vm6, %v7465_v54, %v14585_v0 }
 0x463   : > { %v8062_v9 = vadd.f32 %v13448_v63, %v8061_v43  ;;  %v8063_v24 = vpop.f32.mrb[169].mxu1  ;;  %v13790_v49 = vpop.permute.xlu0 %6172 }
 0x464   : > { %v8064_v12 = vpop.f32.mrb[170].mxu1  ;;  %v6868_v11 = vpop.permute.xlu1 %6867 }
 0x465   : > { %v8065_v34 = vadd.f32 %v13448_v63, %v8064_v12  ;;  %v8066_v16 = vpop.f32.mrb[171].mxu1  ;;  %8405 = vrot.lane.b32.xlu0 %v14574_v44, %s10601_s22  ;;  %8514 = vrot.lane.b32.xlu1 %v14584_v50, %s10605_s10  ;;  %v7600_v28 = vsel %vm7481_vm6, %v7463_v8, %v6868_v11  ;;  %v8296_v25 = vmax.f32 %v8062_v9, 0.0  ;;  %v14586_v8 = vld [vmem:[#allocation23_spill] sm:$0xff]  ;;  %v14589_v50 = vld [vmem:[#allocation9_spill] sm:$0xff] }
 0x466   : > { %8164 = vmatmul.mubr.bf16.gmra.mrb[220].mxu1 %v7600_v28  ;;  %v6991_v12 = vsel %vm3275_vm0, 0, %v14586_v8 }
 0x467   : > { %v8297_v3 = vmax.f32 %v8065_v34, 0.0  ;;  %9695 = vmatprep.mubr.msk.bf16.mxu1 %vm3275_vm0, %v14551_v51  ;;  %v13810_v27 = vpop.permute.xlu0 %6428 }
 0x468   : > { %v13812_v44 = vpop.permute.xlu1 %6875 }
 0x469   : > { %v13816_v18 = vpack.c.bf16 %v8297_v3, %v8296_v25  ;;  %8472 = vrot.lane.b32.xlu0 %v13318_v53, %s10600_s21  ;;  %8438 = vrot.lane.b32.xlu1 %v14578_v47, %s10603_s24  ;;  %v7274_v53 = vsel %vm7190_vm3, %v7176_v14, %v13637_v21  ;;  %v14592_v3 = vld [vmem:[#allocation15_spill] sm:$0xff] }
 0x46a   : > { %v8069_v62 = vpop.f32.mrb[172].mxu1  ;;  %v7373_v33 = vsel %vm7289_vm4, %v7274_v53, %v13627_v56  ;;  %v14596_v53 = vld [vmem:[#allocation56_spill] sm:$0xff] }
 0x46b   : > { %v8070_v58 = vadd.f32 %v13448_v63, %v8069_v62  ;;  %v8071_v2 = vpop.f32.mrb[173].mxu1  ;;  %v13828_v37 = vpop.permute.xlu0 %6680 }
 0x46c   : > { %v8072_v13 = vpop.f32.mrb[174].mxu1  ;;  %v6301_v26 = vpop.permute.xlu1 %6300 }
 0x46d   : > { %v8073_v43 = vadd.f32 %v13448_v63, %v8072_v13  ;;  %v8074_v39 = vpop.f32.mrb[175].mxu1  ;;  %8548 = vrot.lane.b32.xlu0 %v13403_v19, %s10604_s9  ;;  %8516 = vrot.lane.b32.xlu1 %v13363_v40, %s10605_s10  ;;  %v8298_v9 = vmax.f32 %v8070_v58, 0.0  ;;  %v14587_v40 = vld [vmem:[#allocation22_spill] sm:$0xff]  ;;  %v14595_v58 = vld [vmem:[#allocation11_spill] sm:$0xff]  ;;  %v6994_v13 = vsel %vm3275_vm0, %v14596_v53, %v13698_v17 }
 0x46e   : > { %8172 = vmatmul.mubr.bf16.gmra.mrb[224].mxu1 %v7603_v42  ;;  %v7084_v56 = vsel %vm7010_vm1, %v6991_v12, %v14587_v40  ;;  %v7086_v39 = vsel %vm7010_vm1, %v6994_v13, %v13712_v5  ;;  %v14598_v42 = vld [vmem:[#allocation37_spill] sm:$0xff] }
 0x46f   : > { %v8299_v21 = vmax.f32 %v8073_v43, 0.0  ;;  %9696 = vmatprep.mubr.msk.bf16.mxu1 %vm3275_vm0, %v14561_v20  ;;  %v13843_v24 = vpop.permute.xlu0 %6877  ;;  %v7467_v20 = vsel %vm7388_vm5, %v7373_v33, %v14588_v10  ;;  %v7177_v28 = vsel %vm7097_vm2, %v7084_v56, %v14589_v50  ;;  %v14597_v43 = vld [vmem:[#allocation36_spill] sm:$0xff]  ;;  %v7179_v0 = vsel %vm7097_vm2, %v7086_v39, %v13743_v41  ;;  %v14603_v39 = vld [vmem:[#allocation46_spill] sm:$0xff] }
 0x470   : > { %v6576_v31 = vpop.permute.xlu1 %6575  ;;  %v7276_v15 = vsel %vm7190_vm3, %v7177_v28, %v14592_v3  ;;  %v7278_v33 = vsel %vm7190_vm3, %v7179_v0, %v13757_v57 }
 0x471   : > { %v13847_v11 = vpack.c.bf16 %v8299_v21, %v8298_v9  ;;  %8440 = vrot.lane.b32.xlu0 %v14583_v1, %s10603_s24  ;;  %8407 = vrot.lane.b32.xlu1 %v14580_v6, %s10601_s22  ;;  %v7606_v6 = vsel %vm7481_vm6, %v7467_v20, %v14590_v35  ;;  %v7375_v54 = vsel %vm7289_vm4, %v7276_v15, %v13681_v36 }
 0x472   : > { %v7468_v2 = vsel %vm7388_vm5, %v7375_v54, %v14595_v58  ;;  %v6997_v21 = vsel %vm3275_vm0, %v13274_v23, %v13790_v49  ;;  %v7377_v41 = vsel %vm7289_vm4, %v7278_v33, %v13760_v60  ;;  %v14600_v60 = vld [vmem:[#allocation39_spill] sm:$0xff] }
 0x473   : > { %v6303_v34 = vpop.permute.xlu0 %6302  ;;  %v7609_v36 = vsel %vm7481_vm6, %v7468_v2, %v13695_v4  ;;  %v14599_v4 = vld [vmem:[#allocation38_spill] sm:$0xff]  ;;  %v7088_v5 = vsel %vm7010_vm1, %v6997_v21, %v6301_v26  ;;  %v7470_v57 = vsel %vm7388_vm5, %v7377_v41, %v13774_v46  ;;  %v14604_v41 = vld [vmem:[#allocation49_spill] sm:$0xff] }
 0x474   : > { %v6773_v16 = vpop.permute.xlu1 %6772  ;;  %v7181_v40 = vsel %vm7097_vm2, %v7088_v5, %v13810_v27  ;;  %v7612_v23 = vsel %vm7481_vm6, %v7470_v57, %v13812_v44 }
 0x475   : > { %8409 = vrot.lane.b32.xlu0 %v14581_v22, %s10601_s22  ;;  %8474 = vrot.lane.b32.xlu1 %v13403_v19, %s10600_s21  ;;  %v14593_v22 = vld [vmem:[#allocation24_spill] sm:$0xff]  ;;  %v14594_v19 = vld [vmem:[#allocation7_spill] sm:$0xff]  ;;  %v7280_v49 = vsel %vm7190_vm3, %v7181_v40, %v6576_v31 }
 0x476   : > { %8180 = vmatmul.mubr.bf16.gmra.mrb[228].mxu1 %v7606_v6  ;;  %v7379_v27 = vsel %vm7289_vm4, %v7280_v49, %v13828_v37 }
 0x477   : > { %9697 = vmatprep.mubr.msk.bf16.mxu1 %vm3275_vm0, %v14591_v55  ;;  %v6578_v25 = vpop.permute.xlu0 %6577  ;;  %v7472_v44 = vsel %vm7388_vm5, %v7379_v27, %v6773_v16 }
 0x478   : > { %v6175_v52 = vpop.permute.xlu1 %6174 }
 0x479   : > { %8518 = vrot.lane.b32.xlu0 %v14593_v22, %s10605_s10  ;;  %8550 = vrot.lane.b32.xlu1 %v14594_v19, %s10604_s9  ;;  %v7000_v56 = vsel %vm3275_vm0, %v13308_v7, %v6175_v52  ;;  %v7615_v7 = vsel %vm7481_vm6, %v7472_v44, %v13843_v24  ;;  %v14602_v22 = vld [vmem:[#allocation44_spill] sm:$0xff] }
 0x47a   : > { %v7090_v10 = vsel %vm7010_vm1, %v7000_v56, %v6303_v34 }
 0x47b   : > { %v6775_v62 = vpop.permute.xlu0 %6774 }
 0x47c   : > { %v6431_v14 = vpop.permute.xlu1 %6430 }
 0x47d   : > { %8520 = vrot.lane.b32.xlu0 %v14597_v43, %s10605_s10  ;;  %8476 = vrot.lane.b32.xlu1 %v14594_v19, %s10600_s21  ;;  %v7183_v28 = vsel %vm7097_vm2, %v7090_v10, %v6431_v14 }
 0x47e   : > { %8188 = vmatmul.mubr.bf16.gmra.mrb[232].mxu1 %v7609_v36  ;;  %v7282_v16 = vsel %vm7190_vm3, %v7183_v28, %v6578_v25 }
 0x47f   : > { %9698 = vmatprep.mubr.msk.bf16.mxu1 %vm3275_vm0, %v14598_v42  ;;  %v6433_v17 = vpop.permute.xlu0 %6432 }
 0x480   : > { %v6683_v9 = vpop.permute.xlu1 %6682 }
 0x481   : > { %8442 = vrot.lane.b32.xlu0 %v13683_v38, %s10603_s24  ;;  %8590 = vrot.lane.b32.xlu1 %v14599_v4, %s10606_s11  ;;  %v7381_v6 = vsel %vm7289_vm4, %v7282_v16, %v6683_v9  ;;  %v14605_v16 = vld [vmem:[#allocation18_spill] sm:$0xff] }
 0x482   : > { %v7474_v52 = vsel %vm7388_vm5, %v7381_v6, %v6775_v62 }
 0x483   : > { %v6685_v8 = vpop.permute.xlu0 %6684 }
 0x484   : > { %v6880_v12 = vpop.permute.xlu1 %6879 }
 0x485   : > { %8592 = vrot.lane.b32.xlu0 %v13716_v45, %s10606_s11  ;;  %8411 = vrot.lane.b32.xlu1 %v14599_v4, %s10601_s22 }
 0x486   : > { %8196 = vmatmul.mubr.bf16.gmra.mrb[236].mxu1 %v7612_v23 }
 0x487   : > { %9699 = vmatprep.mubr.msk.bf16.mxu1 %vm3275_vm0, %v14600_v60  ;;  %v6882_v46 = vpop.permute.xlu0 %6881 }
 0x488   : > { %v6305_v26 = vpop.permute.xlu1 %6304 }
 0x489   : > { %8413 = vrot.lane.b32.xlu0 %v13716_v45, %s10601_s22  ;;  %8570 = vrot.lane.b32.xlu1 %v13683_v38, %s10602_s23  ;;  %v14601_v45 = vld [vmem:[#allocation41_spill] sm:$0xff] }
 0x48b   : > { %v6307_v31 = vpop.permute.xlu0 %6306 }
 0x48c   : > { %v6580_v20 = vpop.permute.xlu1 %6579 }
 0x48d   : > { %8572 = vrot.lane.b32.xlu0 %v13745_v32, %s10602_s23  ;;  %8444 = vrot.lane.b32.xlu1 %v13745_v32, %s10603_s24 }
 0x48e   : > { %8204 = vmatmul.mubr.bf16.gmra.mrb[240].mxu1 %v7615_v7 }
 0x48f   : > { %9700 = vmatprep.mubr.msk.bf16.mxu1 %vm3275_vm0, %v14601_v45  ;;  %v6177_v37 = vpop.permute.xlu0 %6176 }
 0x490   : > { %v7003_v34 = vsel %vm3275_vm0, %v13354_v61, %v6177_v37  ;;  %v6777_v35 = vpop.permute.xlu1 %6776  ;;  %v7618_v61 = vsel %vm7481_vm6, %v7474_v52, %v6880_v12 }
 0x491   : > { %v7092_v55 = vsel %vm7010_vm1, %v7003_v34, %v6305_v26  ;;  %8446 = vrot.lane.b32.xlu0 %v13816_v18, %s10603_s24  ;;  %8594 = vrot.lane.b32.xlu1 %v13781_v29, %s10606_s11 }
 0x492   : > { %v7185_v24 = vsel %vm7097_vm2, %v7092_v55, %v6433_v17 }
 0x493   : > { %v6582_v3 = vpop.permute.xlu0 %6581  ;;  %v7284_v15 = vsel %vm7190_vm3, %v7185_v24, %v6580_v20 }
 0x494   : > { %v6179_v25 = vpop.permute.xlu1 %6178  ;;  %v7383_v54 = vsel %vm7289_vm4, %v7284_v15, %v6685_v8 }
 0x495   : > { %8596 = vrot.lane.b32.xlu0 %v13847_v11, %s10606_s11  ;;  %8415 = vrot.lane.b32.xlu1 %v13781_v29, %s10601_s22  ;;  %v7006_v2 = vsel %vm3275_vm0, %v13391_v48, %v6179_v25  ;;  %v7476_v29 = vsel %vm7388_vm5, %v7383_v54, %v6777_v35 }
 0x496   : > { %8212 = vmatmul.mubr.bf16.gmra.mrb[244].mxu1 %v7618_v61  ;;  %v7094_v53 = vsel %vm7010_vm1, %v7006_v2, %v6307_v31  ;;  %v7621_v36 = vsel %vm7481_vm6, %v7476_v29, %v6882_v46  ;;  %v14606_v29 = vld [vmem:[#allocation17_spill] sm:$0xff] }
 0x497   : > { %9701 = vmatprep.mubr.msk.bf16.mxu1 %vm3275_vm0, %v14602_v22  ;;  %v6779_v19 = vpop.permute.xlu0 %6778 }
 0x498   : > { %v6435_v14 = vpop.permute.xlu1 %6434 }
 0x499   : > { %8417 = vrot.lane.b32.xlu0 %v13847_v11, %s10601_s22  ;;  %8574 = vrot.lane.b32.xlu1 %v13816_v18, %s10602_s23  ;;  %v7187_v43 = vsel %vm7097_vm2, %v7094_v53, %v6435_v14 }
 0x49a   : > { %v7286_v11 = vsel %vm7190_vm3, %v7187_v43, %v6582_v3 }
 0x49b   : > { %v6181_v62 = vpop.permute.xlu0 %6180 }
 0x49c   : > { %v6687_v13 = vpop.permute.xlu1 %6686  ;;  %v7009_v33 = vsel %vm3275_vm0, %v14551_v51, %v6181_v62 }
 0x49d   : > { %v7385_v42 = vsel %vm7289_vm4, %v7286_v11, %v6687_v13 }
 0x49e   : > { %8220 = vmatmul.mubr.bf16.gmra.mrb[248].mxu1 %v7621_v36  ;;  %v7478_v21 = vsel %vm7388_vm5, %v7385_v42, %v6779_v19 }
 0x49f   : > { %9702 = vmatprep.mubr.msk.bf16.mxu1 %vm3275_vm0, %v14603_v39  ;;  %v6437_v48 = vpop.permute.xlu0 %6436 }
 0x4a0   : > { %v6884_v0 = vpop.permute.xlu1 %6883 }
 0x4a1   : > { %v7624_v5 = vsel %vm7481_vm6, %v7478_v21, %v6884_v0 }
 0x4a3   : > { %v6689_v17 = vpop.permute.xlu0 %6688 }
 0x4a4   : > { %v6309_v9 = vpop.permute.xlu1 %6308 }
 0x4a5   : > { %v7096_v4 = vsel %vm7010_vm1, %v7009_v33, %v6309_v9 }
 0x4a6   : > { %8228 = vmatmul.mubr.bf16.gmra.mrb[252].mxu1 %v7624_v5  ;;  %v7189_v57 = vsel %vm7097_vm2, %v7096_v4, %v6437_v48 }
 0x4a7   : > { %9703 = vmatprep.mubr.msk.bf16.mxu1 %vm3275_vm0, %v14604_v41  ;;  %v6886_v8 = vpop.permute.xlu0 %6885 }
 0x4a8   : > { %v6584_v12 = vpop.permute.xlu1 %6583 }
 0x4a9   : > { %v7288_v40 = vsel %vm7190_vm3, %v7189_v57, %v6584_v12  ;;  %v8077_v23 = vpop.f32.mrb[176].mxu1 }
 0x4aa   : > { %v8078_v51 = vadd.f32 %v13448_v63, %v8077_v23  ;;  %v8079_v49 = vpop.f32.mrb[177].mxu1  ;;  %v7387_v56 = vsel %vm7289_vm4, %v7288_v40, %v6689_v17 }
 0x4ab   : > { %v8080_v60 = vpop.f32.mrb[178].mxu1  ;;  %v8539_v46 = vpop.permute.xlu0 %8538 }
 0x4ac   : > { %v8081_v26 = vadd.f32 %v13448_v63, %v8080_v60  ;;  %v8082_v27 = vpop.f32.mrb[179].mxu1  ;;  %v6781_v44 = vpop.permute.xlu1 %6780  ;;  %v8300_v10 = vmax.f32 %v8078_v51, 0.0 }
 0x4ad   : > { %v7480_v31 = vsel %vm7388_vm5, %v7387_v56, %v6781_v44 }
 0x4ae   : > { %v8301_v20 = vmax.f32 %v8081_v26, 0.0  ;;  %v7627_v28 = vsel %vm7481_vm6, %v7480_v31, %v6886_v8 }
 0x4af   : > { %8236 = vmatmul.mubr.bf16.gmra.mrb[0].mxu1 %v7627_v28  ;;  %v8467_v7 = vpop.permute.xlu0 %8466 }
 0x4b0   : > { %v8370_v45 = vpack.c.bf16 %v8301_v20, %v8300_v10  ;;  %9714 = vmatprep.mubr.msk.bf16.mxu1 %vm3275_vm0, %v14577_v30  ;;  %v8507_v37 = vpop.permute.xlu1 %8506  ;;  %v8663_v62 = vsel %vm7097_vm2, %v14606_v29, %v8467_v7 }
 0x4b1   : > { %v8690_v34 = vsel %vm7190_vm3, %v14605_v16, %v8507_v37  ;;  %v8085_v35 = vpop.f32.mrb[180].mxu1 }
 0x4b2   : > { %v8722_v6 = vsel %vm7289_vm4, %v8690_v34, %v8539_v46  ;;  %v8086_v55 = vadd.f32 %v13448_v63, %v8085_v35  ;;  %v8087_v24 = vpop.f32.mrb[181].mxu1  ;;  %8522 = vrot.lane.b32.xlu1 %v8370_v45, %s10605_s10 }
 0x4b3   : > { %v8088_v3 = vpop.f32.mrb[182].mxu1  ;;  %v8541_v15 = vpop.permute.xlu0 %8540  ;;  %v8750_v25 = vsel %vm7388_vm5, %v8722_v6, %v14595_v58 }
 0x4b4   : > { %v8089_v52 = vadd.f32 %v13448_v63, %v8088_v3  ;;  %v8090_v61 = vpop.f32.mrb[183].mxu1  ;;  %v8583_v54 = vpop.permute.xlu1 %8582  ;;  %v8302_v19 = vmax.f32 %v8086_v55, 0.0 }
 0x4b5   : > { %v8776_v22 = vsel %vm7481_vm6, %v8750_v25, %v8583_v54 }
 0x4b6   : > { %v8303_v14 = vmax.f32 %v8089_v52, 0.0 }
 0x4b7   : > { %8952 = vmatmul.mubr.bf16.vlgmr.msra.gmra.mrb[4].mxu1 %v8776_v22  ;;  %v8585_v2 = vpop.permute.xlu0 %8584 }
 0x4b8   : > { %v8371_v53 = vpack.c.bf16 %v8303_v14, %v8302_v19  ;;  %9715 = vmatprep.mubr.msk.bf16.mxu1 %vm3275_vm0, %v14578_v47  ;;  %v8509_v13 = vpop.permute.xlu1 %8508 }
 0x4b9   : > { %v8692_v43 = vsel %vm7190_vm3, %v8663_v62, %v8509_v13  ;;  %v8093_v36 = vpop.f32.mrb[184].mxu1 }
 0x4ba   : > { %v8094_v39 = vadd.f32 %v13448_v63, %v8093_v36  ;;  %v8095_v48 = vpop.f32.mrb[185].mxu1  ;;  %8552 = vrot.lane.b32.xlu0 %v8371_v53, %s10604_s9  ;;  %v8724_v33 = vsel %vm7289_vm4, %v8692_v43, %v8541_v15 }
 0x4bb   : > { %v8096_v11 = vpop.f32.mrb[186].mxu1  ;;  %v8511_v0 = vpop.permute.xlu0 %8510 }
 0x4bc   : > { %v8097_v42 = vadd.f32 %v13448_v63, %v8096_v11  ;;  %v8098_v17 = vpop.f32.mrb[187].mxu1  ;;  %v8565_v9 = vpop.permute.xlu1 %8564  ;;  %v8304_v4 = vmax.f32 %v8094_v39, 0.0 }
 0x4bd   : > { %v8752_v21 = vsel %vm7388_vm5, %v8724_v33, %v8565_v9 }
 0x4be   : > { %v8305_v5 = vmax.f32 %v8097_v42, 0.0  ;;  %v8779_v41 = vsel %vm7481_vm6, %v8752_v21, %v8585_v2  ;;  %8478 = vrot.lane.b32.xlu0 %v8371_v53, %s10600_s21 }
 0x4bf   : > { %8960 = vmatmul.mubr.bf16.gmra.mrb[8].mxu1 %v8779_v41  ;;  %v8567_v8 = vpop.permute.xlu0 %8566 }
 0x4c0   : > { %v8372_v57 = vpack.c.bf16 %v8305_v5, %v8304_v4  ;;  %9716 = vmatprep.mubr.msk.bf16.mxu1 %vm3275_vm0, %v14583_v1  ;;  %v8469_v12 = vpop.permute.xlu1 %8468 }
 0x4c1   : > { %v8665_v40 = vsel %vm7097_vm2, %v14606_v29, %v8469_v12 }
 0x4c2   : > { %v8101_v23 = vpop.f32.mrb[188].mxu1  ;;  %8524 = vrot.lane.b32.xlu1 %v8372_v57, %s10605_s10  ;;  %v8694_v26 = vsel %vm7190_vm3, %v8665_v40, %v8511_v0  ;;  %v14039_v0 = vld [vmem:[%s14366_s4] ss:$0 sm:$0xff] }
 0x4c3   : > { %v8102_v51 = vadd.f32 %v13448_v63, %v8101_v23  ;;  %v8103_v49 = vpop.f32.mrb[189].mxu1  ;;  %v8471_v60 = vpop.permute.xlu0 %8470 }
 0x4c4   : > { %v8104_v46 = vpop.f32.mrb[190].mxu1  ;;  %v8543_v27 = vpop.permute.xlu1 %8542  ;;  %v8667_v24 = vsel %vm7097_vm2, %v14606_v29, %v8471_v60 }
 0x4c5   : > { %v8105_v56 = vadd.f32 %v13448_v63, %v8104_v46  ;;  %v8106_v44 = vpop.f32.mrb[191].mxu1  ;;  %v8726_v31 = vsel %vm7289_vm4, %v8694_v26, %v8543_v27  ;;  %v8306_v10 = vmax.f32 %v8102_v51, 0.0 }
 0x4c6   : > { %v8754_v7 = vsel %vm7388_vm5, %v8726_v31, %v8567_v8 }
 0x4c7   : > { %v8307_v20 = vmax.f32 %v8105_v56, 0.0  ;;  %v14016_v28 = vpop.permute.xlu0 %8544 }
 0x4c8   : > { %v8587_v45 = vpop.permute.xlu1 %8586 }
 0x4c9   : > { %v8373_v37 = vpack.c.bf16 %v8307_v20, %v8306_v10  ;;  %v8782_v16 = vsel %vm7481_vm6, %v8754_v7, %v8587_v45 }
 0x4ca   : > { %v8109_v34 = vpop.f32.mrb[192].mxu1  ;;  %8968 = vmatmul.mubr.bf16.gmra.mrb[12].mxu1 %v8782_v16 }
 0x4cb   : > { %v8110_v35 = vadd.f32 %v13448_v63, %v8109_v34  ;;  %v8111_v6 = vpop.f32.mrb[193].mxu1  ;;  %8554 = vrot.lane.b32.xlu0 %v8373_v37, %s10604_s9  ;;  %8480 = vrot.lane.b32.xlu1 %v8373_v37, %s10600_s21  ;;  %v8589_v55 = vpop.permute.xlu0 %8588 }
 0x4cc   : > { %v8112_v3 = vpop.f32.mrb[194].mxu1  ;;  %v8513_v15 = vpop.permute.xlu1 %8512  ;;  %8975 = vmatprep.mubr.bf16.mxu1 %v14511_v59 }
 0x4cd   : > { %v8113_v25 = vadd.f32 %v13448_v63, %v8112_v3  ;;  %v8114_v52 = vpop.f32.mrb[195].mxu1  ;;  %v8696_v61 = vsel %vm7190_vm3, %v8667_v24, %v8513_v15  ;;  %v8308_v54 = vmax.f32 %v8110_v35, 0.0 }
 0x4ce   : > { %v8728_v14 = vsel %vm7289_vm4, %v8696_v61, %v14016_v28 }
 0x4cf   : > { %v8309_v22 = vmax.f32 %v8113_v25, 0.0  ;;  %v8437_v19 = vpop.permute.xlu0 %8436 }
 0x4d0   : > { %v8569_v2 = vpop.permute.xlu1 %8568 }
 0x4d1   : > { %v8374_v62 = vpack.c.bf16 %v8309_v22, %v8308_v54  ;;  %v8756_v53 = vsel %vm7388_vm5, %v8728_v14, %v8569_v2 }
 0x4d2   : > { %v8785_v29 = vsel %vm7481_vm6, %v8756_v53, %v8589_v55  ;;  %v8117_v13 = vpop.f32.mrb[196].mxu1 }
 0x4d3   : > { %v8118_v43 = vadd.f32 %v13448_v63, %v8117_v13  ;;  %8526 = vrot.lane.b32.xlu0 %v8374_v62, %s10605_s10  ;;  %v8119_v36 = vpop.f32.mrb[197].mxu1  ;;  %8976 = vmatmul.mubr.bf16.gmra.mrb[16].mxu1 %v8785_v29  ;;  %v8547_v39 = vpop.permute.xlu0 %8546 }
 0x4d4   : > { %v8120_v48 = vpop.f32.mrb[198].mxu1  ;;  %9717 = vmatprep.mubr.msk.bf16.mxu1 %vm3275_vm0, %v13683_v38  ;;  %v8404_v11 = vpop.permute.xlu1 %8403 }
 0x4d5   : > { %v8121_v42 = vadd.f32 %v14039_v0, %v8120_v48  ;;  %v8122_v17 = vpop.f32.mrb[199].mxu1  ;;  %v8310_v33 = vmax.f32 %v8118_v43, 0.0  ;;  %v8609_v31 = vsel %vm3275_vm0, 0, %v8404_v11 }
 0x4d6   : > { %v8642_v20 = vsel %vm7010_vm1, %v8609_v31, %v8437_v19 }
 0x4d7   : > { %v8311_v63 = vmax.f32 %v8121_v42, 0.0  ;;  %v8406_v9 = vpop.permute.xlu0 %8405  ;;  %v8668_v45 = vsel %vm7097_vm2, %v8642_v20, %v14589_v50 }
 0x4d8   : > { %v8515_v21 = vpop.permute.xlu1 %8514  ;;  %v8612_v3 = vsel %vm3275_vm0, %v14577_v30, %v8406_v9 }
 0x4d9   : > { %v14042_v4 = vpack.c.bf16 %v8311_v63, %v8310_v33  ;;  %v8698_v34 = vsel %vm7190_vm3, %v8668_v45, %v8515_v21 }
 0x4da   : > { %v8125_v5 = vpop.f32.mrb[200].mxu1  ;;  %v8730_v55 = vsel %vm7289_vm4, %v8698_v34, %v8547_v39 }
 0x4db   : > { %v8126_v41 = vadd.f32 %v14039_v0, %v8125_v5  ;;  %v8127_v8 = vpop.f32.mrb[201].mxu1  ;;  %8556 = vrot.lane.b32.xlu1 %v14042_v4, %s10604_s9  ;;  %v8473_v57 = vpop.permute.xlu0 %8472  ;;  %v8757_v15 = vsel %vm7388_vm5, %v8730_v55, %v14595_v58 }
 0x4dc   : > { %v8128_v12 = vpop.f32.mrb[202].mxu1  ;;  %v8439_v40 = vpop.permute.xlu1 %8438 }
 0x4dd   : > { %v8129_v23 = vadd.f32 %v14039_v0, %v8128_v12  ;;  %v8130_v51 = vpop.f32.mrb[203].mxu1  ;;  %v8312_v49 = vmax.f32 %v8126_v41, 0.0  ;;  %v8644_v52 = vsel %vm7010_vm1, %v8612_v3, %v8439_v40  ;;  %v14607_v41 = vld [vmem:[#allocation10_spill] sm:$0xff] }
 0x4de   : > { %v8670_v22 = vsel %vm7097_vm2, %v8644_v52, %v8473_v57 }
 0x4df   : > { %v8313_v60 = vmax.f32 %v8129_v23, 0.0  ;;  %v8549_v46 = vpop.permute.xlu0 %8548 }
 0x4e0   : > { %v8517_v26 = vpop.permute.xlu1 %8516 }
 0x4e1   : > { %v14048_v27 = vpack.c.bf16 %v8313_v60, %v8312_v49  ;;  %v8700_v14 = vsel %vm7190_vm3, %v8670_v22, %v8517_v26 }
 0x4e2   : > { %v8732_v29 = vsel %vm7289_vm4, %v8700_v14, %v8549_v46 }
 0x4e3   : > { %v8441_v56 = vpop.permute.xlu0 %8440 }
 0x4e4   : > { %v8408_v44 = vpop.permute.xlu1 %8407 }
 0x4e5   : > { %v8615_v62 = vsel %vm3275_vm0, %v14578_v47, %v8408_v44 }
 0x4e6   : > { %v8646_v36 = vsel %vm7010_vm1, %v8615_v62, %v8441_v56 }
 0x4e7   : > { %v8410_v10 = vpop.permute.xlu0 %8409 }
 0x4e8   : > { %v8475_v7 = vpop.permute.xlu1 %8474  ;;  %v8618_v63 = vsel %vm3275_vm0, %v14583_v1, %v8410_v10 }
 0x4e9   : > { %v8672_v48 = vsel %vm7097_vm2, %v8646_v36, %v8475_v7  ;;  %v8647_v8 = vsel %vm7010_vm1, %v8618_v63, %v14607_v41 }
 0x4eb   : > { %v8519_v37 = vpop.permute.xlu0 %8518 }
 0x4ec   : > { %v8551_v16 = vpop.permute.xlu1 %8550  ;;  %v8702_v11 = vsel %vm7190_vm3, %v8672_v48, %v8519_v37 }
 0x4ed   : > { %v8734_v9 = vsel %vm7289_vm4, %v8702_v11, %v8551_v16 }
 0x4ef   : > { %v8521_v35 = vpop.permute.xlu0 %8520 }
 0x4f0   : > { %v8477_v6 = vpop.permute.xlu1 %8476 }
 0x4f1   : > { %v8674_v57 = vsel %vm7097_vm2, %v8647_v8, %v8477_v6 }
 0x4f2   : > { %v8704_v23 = vsel %vm7190_vm3, %v8674_v57, %v8521_v35 }
 0x4f3   : > { %v8443_v24 = vpop.permute.xlu0 %8442  ;;  %v8735_v49 = vsel %vm7289_vm4, %v8704_v23, %v14016_v28 }
 0x4f4   : > { %v8591_v25 = vpop.permute.xlu1 %8590 }
 0x4f5   : > { %v8788_v61 = vsel %vm7481_vm6, %v8757_v15, %v8591_v25 }
 0x4f6   : > { %8984 = vmatmul.mubr.bf16.gmra.mrb[20].mxu1 %v8788_v61 }
 0x4f7   : > { %9718 = vmatprep.mubr.msk.bf16.mxu1 %vm3275_vm0, %v13745_v32  ;;  %v8593_v54 = vpop.permute.xlu0 %8592 }
 0x4f8   : > { %v8412_v19 = vpop.permute.xlu1 %8411 }
 0x4f9   : > { %v8620_v30 = vsel %vm3275_vm0, 0, %v8412_v19 }
 0x4fa   : > { %v14068_v2 = vsel %vm7010_vm1, %v8620_v30, %v8443_v24 }
 0x4fb   : > { %v8414_v53 = vpop.permute.xlu0 %8413 }
 0x4fc   : > { %v8571_v13 = vpop.permute.xlu1 %8570  ;;  %v8623_v42 = vsel %vm3275_vm0, %v13683_v38, %v8414_v53 }
 0x4fd   : > { %v8759_v43 = vsel %vm7388_vm5, %v8732_v29, %v8571_v13 }
 0x4fe   : > { %v8791_v39 = vsel %vm7481_vm6, %v8759_v43, %v8593_v54 }
 0x4ff   : > { %8992 = vmatmul.mubr.bf16.gmra.mrb[24].mxu1 %v8791_v39  ;;  %v8573_v17 = vpop.permute.xlu0 %8572 }
 0x500   : > { %9719 = vmatprep.mubr.msk.bf16.mxu1 %vm3275_vm0, %v13816_v18  ;;  %v8445_v47 = vpop.permute.xlu1 %8444  ;;  %v8761_v21 = vsel %vm7388_vm5, %v8734_v9, %v8573_v17 }
 0x501   : > { %v14083_v33 = vsel %vm7010_vm1, %v8623_v42, %v8445_v47 }
 0x503   : > { %v8447_v12 = vpop.permute.xlu0 %8446 }
 0x504   : > { %v8595_v5 = vpop.permute.xlu1 %8594 }
 0x505   : > { %v8794_v38 = vsel %vm7481_vm6, %v8761_v21, %v8595_v5 }
 0x507   : > { %9000 = vmatmul.mubr.bf16.gmra.mrb[28].mxu1 %v8794_v38  ;;  %v8597_v46 = vpop.permute.xlu0 %8596 }
 0x508   : > { %v8416_v40 = vpop.permute.xlu1 %8415  ;;  %9007 = vmatprep.mubr.bf16.mxu1 %v14511_v59 }
 0x509   : > { %v8626_v1 = vsel %vm3275_vm0, %v13745_v32, %v8416_v40 }
 0x50a   : > { %v14098_v51 = vsel %vm7010_vm1, %v8626_v1, %v8447_v12 }
 0x50c   : > { %v8575_v60 = vpop.permute.xlu1 %8574 }
 0x50d   : > { %v8763_v26 = vsel %vm7388_vm5, %v8735_v49, %v8575_v60 }
 0x50e   : > { %v8797_v56 = vsel %vm7481_vm6, %v8763_v26, %v8597_v46 }
 0x50f   : > { %9008 = vmatmul.mubr.bf16.gmra.mrb[32].mxu1 %v8797_v56 }
 0x519   : > { %v8133_v44 = vpop.f32.mrb[204].mxu1 }
 0x51a   : > { %v8134_v31 = vadd.f32 %v14039_v0, %v8133_v44  ;;  %v8135_v10 = vpop.f32.mrb[205].mxu1 }
 0x51b   : > { %v8136_v20 = vpop.f32.mrb[206].mxu1 }
 0x51c   : > { %v8137_v32 = vadd.f32 %v14039_v0, %v8136_v20  ;;  %v8138_v7 = vpop.f32.mrb[207].mxu1  ;;  %v8314_v45 = vmax.f32 %v8134_v31, 0.0 }
 0x51e   : > { %v8315_v37 = vmax.f32 %v8137_v32, 0.0 }
 0x520   : > { %v8377_v16 = vpack.c.bf16 %v8315_v37, %v8314_v45 }
 0x521   : > { %v8141_v34 = vpop.f32.mrb[208].mxu1 }
 0x522   : > { %v8142_v35 = vadd.f32 %v14039_v0, %v8141_v34  ;;  %v8143_v6 = vpop.f32.mrb[209].mxu1  ;;  %8598 = vrot.lane.b32.xlu1 %v8377_v16, %s10606_s11 }
 0x523   : > { %v8144_v55 = vpop.f32.mrb[210].mxu1 }
 0x524   : > { %v8145_v24 = vadd.f32 %v14039_v0, %v8144_v55  ;;  %v8146_v3 = vpop.f32.mrb[211].mxu1  ;;  %v8316_v15 = vmax.f32 %v8142_v35, 0.0 }
 0x526   : > { %v8317_v25 = vmax.f32 %v8145_v24, 0.0  ;;  %8482 = vrot.lane.b32.xlu1 %v14042_v4, %s10600_s21 }
 0x528   : > { %v14111_v52 = vpack.c.bf16 %v8317_v25, %v8316_v15 }
 0x529   : > { %v8149_v61 = vpop.f32.mrb[212].mxu1 }
 0x52a   : > { %v8150_v54 = vadd.f32 %v14039_v0, %v8149_v61  ;;  %v8151_v22 = vpop.f32.mrb[213].mxu1  ;;  %8576 = vrot.lane.b32.xlu1 %v14111_v52, %s10602_s23  ;;  %9720 = vmatprep.mubr.msk.bf16.mxu1 %vm3275_vm0, %v14111_v52 }
 0x52b   : > { %v8152_v19 = vpop.f32.mrb[214].mxu1 }
 0x52c   : > { %v8153_v14 = vadd.f32 %v14039_v0, %v8152_v19  ;;  %v8154_v30 = vpop.f32.mrb[215].mxu1  ;;  %v8318_v62 = vmax.f32 %v8150_v54, 0.0 }
 0x52e   : > { %v8319_v53 = vmax.f32 %v8153_v14, 0.0  ;;  %8419 = vrot.lane.b32.xlu1 %v8377_v16, %s10601_s22 }
 0x530   : > { %v8379_v4 = vpack.c.bf16 %v8319_v53, %v8318_v62 }
 0x531   : > { %v8157_v29 = vpop.f32.mrb[216].mxu1 }
 0x532   : > { %v8158_v13 = vadd.f32 %v14039_v0, %v8157_v29  ;;  %v8159_v43 = vpop.f32.mrb[217].mxu1  ;;  %8600 = vrot.lane.b32.xlu0 %v8379_v4, %s10606_s11 }
 0x533   : > { %v8160_v36 = vpop.f32.mrb[218].mxu1 }
 0x534   : > { %v8161_v39 = vadd.f32 %v14039_v0, %v8160_v36  ;;  %v8162_v48 = vpop.f32.mrb[219].mxu1  ;;  %v8320_v11 = vmax.f32 %v8158_v13, 0.0 }
 0x536   : > { %v8321_v42 = vmax.f32 %v8161_v39, 0.0  ;;  %8528 = vrot.lane.b32.xlu0 %v14048_v27, %s10605_s10 }
 0x538   : > { %v14125_v47 = vpack.c.bf16 %v8321_v42, %v8320_v11 }
 0x539   : > { %v8165_v17 = vpop.f32.mrb[220].mxu1 }
 0x53a   : > { %v8166_v63 = vadd.f32 %v14039_v0, %v8165_v17  ;;  %8578 = vrot.lane.b32.xlu0 %v14125_v47, %s10602_s23  ;;  %v8167_v9 = vpop.f32.mrb[221].mxu1 }
 0x53b   : > { %v8168_v21 = vpop.f32.mrb[222].mxu1 }
 0x53c   : > { %v8169_v5 = vadd.f32 %v14039_v0, %v8168_v21  ;;  %v8170_v8 = vpop.f32.mrb[223].mxu1  ;;  %v8322_v38 = vmax.f32 %v8166_v63, 0.0 }
 0x53e   : > { %v8323_v57 = vmax.f32 %v8169_v5, 0.0  ;;  %8448 = vrot.lane.b32.xlu0 %v14111_v52, %s10603_s24 }
 0x540   : > { %v14133_v12 = vpack.c.bf16 %v8323_v57, %v8322_v38 }
 0x541   : > { %v8173_v27 = vpop.f32.mrb[224].mxu1 }
 0x542   : > { %v8174_v40 = vadd.f32 %v14039_v0, %v8173_v27  ;;  %v8175_v23 = vpop.f32.mrb[225].mxu1  ;;  %8602 = vrot.lane.b32.xlu1 %v14133_v12, %s10606_s11 }
 0x543   : > { %v8176_v1 = vpop.f32.mrb[226].mxu1 }
 0x544   : > { %v8177_v49 = vadd.f32 %v14039_v0, %v8176_v1  ;;  %v8178_v60 = vpop.f32.mrb[227].mxu1  ;;  %v8324_v46 = vmax.f32 %v8174_v40, 0.0 }
 0x546   : > { %v8325_v26 = vmax.f32 %v8177_v49, 0.0  ;;  %8606 = vrot.lane.b32.xlu1 %v14511_v59, %s10606_s11 }
 0x548   : > { %v14141_v56 = vpack.c.bf16 %v8325_v26, %v8324_v46 }
 0x549   : > { %v8181_v44 = vpop.f32.mrb[228].mxu1 }
 0x54a   : > { %v8182_v31 = vadd.f32 %v14039_v0, %v8181_v44  ;;  %v8183_v10 = vpop.f32.mrb[229].mxu1  ;;  %8580 = vrot.lane.b32.xlu1 %v14141_v56, %s10602_s23 }
 0x54b   : > { %v8184_v20 = vpop.f32.mrb[230].mxu1 }
 0x54c   : > { %v8185_v32 = vadd.f32 %v14039_v0, %v8184_v20  ;;  %v8186_v7 = vpop.f32.mrb[231].mxu1  ;;  %v8326_v45 = vmax.f32 %v8182_v31, 0.0 }
 0x54e   : > { %v8327_v37 = vmax.f32 %v8185_v32, 0.0 }
 0x550   : > { %v14147_v16 = vpack.c.bf16 %v8327_v37, %v8326_v45 }
 0x551   : > { %v8189_v34 = vpop.f32.mrb[232].mxu1 }
 0x552   : > { %v8190_v35 = vadd.f32 %v14039_v0, %v8189_v34  ;;  %v8191_v6 = vpop.f32.mrb[233].mxu1  ;;  %8604 = vrot.lane.b32.xlu0 %v14147_v16, %s10606_s11 }
 0x553   : > { %v8192_v55 = vpop.f32.mrb[234].mxu1 }
 0x554   : > { %v8193_v24 = vadd.f32 %v14039_v0, %v8192_v55  ;;  %v8194_v3 = vpop.f32.mrb[235].mxu1  ;;  %v8328_v15 = vmax.f32 %v8190_v35, 0.0 }
 0x556   : > { %v8329_v25 = vmax.f32 %v8193_v24, 0.0  ;;  %8421 = vrot.lane.b32.xlu0 %v8379_v4, %s10601_s22 }
 0x558   : > { %v8384_v61 = vpack.c.bf16 %v8329_v25, %v8328_v15  ;;  %v8523_v25 = vpop.permute.xlu1 %8522 }
 0x559   : > { %v8197_v54 = vpop.f32.mrb[236].mxu1 }
 0x55a   : > { %v8198_v22 = vadd.f32 %v14039_v0, %v8197_v54  ;;  %v8199_v19 = vpop.f32.mrb[237].mxu1  ;;  %8530 = vrot.lane.b32.xlu1 %v8384_v61, %s10605_s10 }
 0x55b   : > { %v8200_v14 = vpop.f32.mrb[238].mxu1 }
 0x55c   : > { %v8201_v30 = vadd.f32 %v14039_v0, %v8200_v14  ;;  %v8202_v62 = vpop.f32.mrb[239].mxu1  ;;  %v8330_v53 = vmax.f32 %v8198_v22, 0.0 }
 0x55e   : > { %v8331_v29 = vmax.f32 %v8201_v30, 0.0  ;;  %8450 = vrot.lane.b32.xlu1 %v14125_v47, %s10603_s24  ;;  %v8525_v30 = vpop.permute.xlu1 %8524 }
 0x560   : > { %v8385_v13 = vpack.c.bf16 %v8331_v29, %v8330_v53  ;;  %v14183_v53 = vpop.permute.xlu0 %8417 }
 0x561   : > { %v8205_v43 = vpop.f32.mrb[240].mxu1 }
 0x562   : > { %v8206_v4 = vadd.f32 %v14039_v0, %v8205_v43  ;;  %8558 = vrot.lane.b32.xlu0 %v8385_v13, %s10604_s9  ;;  %v8207_v36 = vpop.f32.mrb[241].mxu1  ;;  %v14191_v43 = vld [vmem:[%s14368_s6] ss:$0 sm:$0xff] }
 0x563   : > { %v8208_v39 = vpop.f32.mrb[242].mxu1 }
 0x564   : > { %v8209_v48 = vadd.f32 %v14039_v0, %v8208_v39  ;;  %v8210_v11 = vpop.f32.mrb[243].mxu1  ;;  %v8332_v42 = vmax.f32 %v8206_v4, 0.0  ;;  %v8553_v36 = vpop.permute.xlu0 %8552  ;;  %v8675_v39 = vsel %vm7097_vm2, %v14068_v2, %v14589_v50 }
 0x565   : > { %v8706_v11 = vsel %vm7190_vm3, %v8675_v39, %v8523_v25 }
 0x566   : > { %v8333_v17 = vmax.f32 %v8209_v48, 0.0  ;;  %8484 = vrot.lane.b32.xlu0 %v8385_v13, %s10600_s21  ;;  %v14186_v13 = vpop.permute.xlu1 %8480 }
 0x568   : > { %v8386_v63 = vpack.c.bf16 %v8333_v17, %v8332_v42  ;;  %v8737_v17 = vsel %vm7289_vm4, %v8706_v11, %v8553_v36 }
 0x569   : > { %v8213_v9 = vpop.f32.mrb[244].mxu1  ;;  %v8764_v2 = vsel %vm7388_vm5, %v8737_v17, %v14595_v58 }
 0x56a   : > { %v8214_v21 = vadd.f32 %v14039_v0, %v8213_v9  ;;  %8532 = vrot.lane.b32.xlu1 %v8386_v63, %s10605_s10  ;;  %v8215_v5 = vpop.f32.mrb[245].mxu1  ;;  %v14198_v42 = vpop.permute.xlu1 %8556 }
 0x56b   : > { %v8216_v8 = vpop.f32.mrb[246].mxu1 }
 0x56c   : > { %v8217_v38 = vadd.f32 %v14039_v0, %v8216_v8  ;;  %v8218_v57 = vpop.f32.mrb[247].mxu1  ;;  %v8334_v27 = vmax.f32 %v8214_v21, 0.0 }
 0x56e   : > { %v8335_v40 = vmax.f32 %v8217_v38, 0.0  ;;  %8423 = vrot.lane.b32.xlu1 %v14133_v12, %s10601_s22 }
 0x570   : > { %v8387_v23 = vpack.c.bf16 %v8335_v40, %v8334_v27 }
 0x571   : > { %v8221_v1 = vpop.f32.mrb[248].mxu1 }
 0x572   : > { %v8222_v49 = vadd.f32 %v14039_v0, %v8221_v1  ;;  %8560 = vrot.lane.b32.xlu0 %v8387_v23, %s10604_s9  ;;  %8486 = vrot.lane.b32.xlu1 %v8387_v23, %s10600_s21  ;;  %v8223_v60 = vpop.f32.mrb[249].mxu1 }
 0x573   : > { %v8224_v46 = vpop.f32.mrb[250].mxu1 }
 0x574   : > { %v8225_v26 = vadd.f32 %v14039_v0, %v8224_v46  ;;  %v8226_v44 = vpop.f32.mrb[251].mxu1  ;;  %v8336_v31 = vmax.f32 %v8222_v49, 0.0 }
 0x575   : > { %v8479_v44 = vpop.permute.xlu0 %8478 }
 0x576   : > { %v8337_v10 = vmax.f32 %v8225_v26, 0.0  ;;  %8452 = vrot.lane.b32.xlu0 %v14141_v56, %s10603_s24 }
 0x578   : > { %v8388_v20 = vpack.c.bf16 %v8337_v10, %v8336_v31 }
 0x579   : > { %v8229_v12 = vpop.f32.mrb[252].mxu1 }
 0x57a   : > { %v8230_v32 = vadd.f32 %v14039_v0, %v8229_v12  ;;  %8534 = vrot.lane.b32.xlu0 %v8388_v20, %s10605_s10  ;;  %v8231_v7 = vpop.f32.mrb[253].mxu1 }
 0x57b   : > { %v8232_v45 = vpop.f32.mrb[254].mxu1  ;;  %v8555_v7 = vpop.permute.xlu0 %8554 }
 0x57c   : > { %v8233_v37 = vadd.f32 %v14039_v0, %v8232_v45  ;;  %v8234_v34 = vpop.f32.mrb[255].mxu1  ;;  %v8338_v35 = vmax.f32 %v8230_v32, 0.0 }
 0x57e   : > { %v8339_v6 = vmax.f32 %v8233_v37, 0.0  ;;  %8425 = vrot.lane.b32.xlu0 %v14147_v16, %s10601_s22 }
 0x580   : > { %v8389_v55 = vpack.c.bf16 %v8339_v6, %v8338_v35  ;;  %v8527_v6 = vpop.permute.xlu0 %8526 }
 0x582   : > { %8562 = vrot.lane.b32.xlu1 %v8389_v55, %s10604_s9  ;;  %v8237_v24 = vpop.f32.mrb[0].mxu1 }
 0x583   : > { %v8238_v3 = vadd.f32 %v14039_v0, %v8237_v24  ;;  %v8239_v15 = vpop.f32.mrb[1].mxu1 }
 0x584   : > { %v8240_v61 = vpop.f32.mrb[2].mxu1  ;;  %v8677_v15 = vsel %vm7097_vm2, %v14083_v33, %v8479_v44 }
 0x585   : > { %v8241_v54 = vadd.f32 %v14039_v0, %v8240_v61  ;;  %v8242_v22 = vpop.f32.mrb[3].mxu1  ;;  %v8340_v19 = vmax.f32 %v8238_v3, 0.0  ;;  %v8708_v61 = vsel %vm7190_vm3, %v8677_v15, %v8525_v30 }
 0x586   : > { %8488 = vrot.lane.b32.xlu1 %v8389_v55, %s10600_s21  ;;  %s9249_s21 = sshll.u32 %s9242_s27, 1 }
 0x587   : > { %v8341_v14 = vmax.f32 %v8241_v54, 0.0  ;;  %p1882_p8 = scmp.lt.s32.totalorder %s9249_s21, 3 }
 0x589   : > { %v8390_v62 = vpack.c.bf16 %v8341_v14, %v8340_v19  ;;  %v8739_v19 = vsel %vm7289_vm4, %v8708_v61, %v8555_v7  ;;  %s14612_s21 = smov (!%p1882_p8, %s9249_s21), 3 }
 0x58a   : > { %v8953_v16 = vpop.f32.mrb[4].mxu1  ;;  %s9250_s26 = sshll.u32 %s14612_s21, 3 }
 0x58b   : > { %8536 = vrot.lane.b32.xlu0 %v8390_v62, %s10605_s10  ;;  %v8955_v29 = vpop.f32.mrb[5].mxu1  ;;  %v8954_v48 = vadd.f32 %v14191_v43, %v8953_v16  ;;  %s1885_s9 = scalar_lea.vmem %s14369_s7, %s9250_s26 }
 0x58c   : > { %v8956_v0 = vpop.f32.mrb[6].mxu1 }
 0x58d   : > { %v8958_v4 = vpop.f32.mrb[7].mxu1  ;;  %v8957_v63 = vadd.f32 %v14191_v43, %v8956_v0  ;;  %v9080_v21 = vmax.f32 %v8954_v48, 0.0 }
 0x58f   : > { %v9081_v27 = vmax.f32 %v8957_v63, 0.0  ;;  %v9113_v60 = vsel %vm9112_vm7, %v9080_v21, 0.0 }
 0x591   : > { %v9144_v10 = vsel %vm9112_vm7, %v9081_v27, 0.0 }
 0x592   : > { %v8961_v9 = vpop.f32.mrb[8].mxu1 }
 0x593   : > { %v8962_v5 = vadd.f32 %v14191_v43, %v8961_v9  ;;  %v8963_v8 = vpop.f32.mrb[9].mxu1 }
 0x594   : > { %v8964_v38 = vpop.f32.mrb[10].mxu1  ;;  %v8599_v57 = vpop.permute.xlu1 %8598 }
 0x595   : > { %v9082_v40 = vmax.f32 %v8962_v5, 0.0  ;;  %v8965_v23 = vadd.f32 %v14191_v43, %v8964_v38  ;;  %v8800_v1 = vsel %vm7481_vm6, %v8764_v2, %v8599_v57  ;;  %v8966_v49 = vpop.f32.mrb[11].mxu1  ;;  %v8679_v57 = vsel %vm7097_vm2, %v14098_v51, %v14186_v13 }
 0x596   : > { %9016 = vmatmul.mubr.bf16.gmra.mrb[36].mxu1 %v8800_v1 }
 0x597   : > { %v9114_v46 = vsel %vm9112_vm7, %v9082_v40, 0.0  ;;  %v9083_v26 = vmax.f32 %v8965_v23, 0.0  ;;  %9721 = vmatprep.mubr.msk.bf16.mxu1 %vm3275_vm0, %v14125_v47  ;;  %v8710_v40 = vsel %vm7190_vm3, %v8679_v57, %v8527_v6 }
 0x598   : > { %v9115_v31 = vadd.f32 %v9114_v46, %v9113_v60  ;;  %v8483_v32 = vpop.permute.xlu1 %8482  ;;  %v8741_v23 = vsel %vm7289_vm4, %v8710_v40, %v14198_v42  ;;  %v8629_v46 = vsel %vm3275_vm0, %v13816_v18, %v14183_v53 }
 0x599   : > { %v9145_v20 = vsel %vm9112_vm7, %v9083_v26, 0.0  ;;  %v8654_v51 = vsel %vm7010_vm1, %v8629_v46, %v14607_v41 }
 0x59a   : > { %v9146_v12 = vadd.f32 %v9145_v20, %v9144_v10  ;;  %v8681_v13 = vsel %vm7097_vm2, %v8654_v51, %v8483_v32 }
 0x59c   : > { %v8577_v25 = vpop.permute.xlu1 %8576 }
 0x59d   : > { %v8969_v45 = vpop.f32.mrb[12].mxu1  ;;  %v8766_v62 = vsel %vm7388_vm5, %v8739_v19, %v8577_v25 }
 0x59e   : > { %v8970_v37 = vadd.f32 %v14191_v43, %v8969_v45  ;;  %v8971_v34 = vpop.f32.mrb[13].mxu1 }
 0x59f   : > { %v8972_v35 = vpop.f32.mrb[14].mxu1 }
 0x5a0   : > { %v9084_v55 = vmax.f32 %v8970_v37, 0.0  ;;  %v8973_v24 = vadd.f32 %v14191_v43, %v8972_v35  ;;  %v8974_v3 = vpop.f32.mrb[15].mxu1  ;;  %v8420_v2 = vpop.permute.xlu1 %8419 }
 0x5a2   : > { %v9116_v54 = vsel %vm9112_vm7, %v9084_v55, 0.0  ;;  %v9085_v22 = vmax.f32 %v8973_v24, 0.0  ;;  %v8631_v24 = vsel %vm3275_vm0, 0, %v8420_v2 }
 0x5a3   : > { %v9117_v14 = vadd.f32 %v9116_v54, %v9115_v31 }
 0x5a4   : > { %v9147_v16 = vsel %vm9112_vm7, %v9085_v22, 0.0  ;;  %v8601_v29 = vpop.permute.xlu0 %8600 }
 0x5a5   : > { %v9148_v0 = vadd.f32 %v9147_v16, %v9146_v12  ;;  %v8803_v4 = vsel %vm7481_vm6, %v8766_v62, %v8601_v29 }
 0x5a6   : > { %v8977_v36 = vpop.f32.mrb[16].mxu1  ;;  %9024 = vmatmul.mubr.bf16.gmra.mrb[40].mxu1 %v8803_v4 }
 0x5a7   : > { %v8978_v33 = vadd.f32 %v14191_v43, %v8977_v36  ;;  %v8979_v39 = vpop.f32.mrb[17].mxu1  ;;  %9722 = vmatprep.mubr.msk.bf16.mxu1 %vm3275_vm0, %v14141_v56 }
 0x5a8   : > { %v8980_v30 = vpop.f32.mrb[18].mxu1  ;;  %v8529_v9 = vpop.permute.xlu0 %8528 }
 0x5a9   : > { %v9086_v48 = vmax.f32 %v8978_v33, 0.0  ;;  %v8981_v11 = vadd.f32 %v14191_v43, %v8980_v30  ;;  %v8982_v17 = vpop.f32.mrb[19].mxu1  ;;  %v8712_v42 = vsel %vm7190_vm3, %v8681_v13, %v8529_v9 }
 0x5aa   : > { %v8742_v10 = vsel %vm7289_vm4, %v8712_v42, %v14016_v28 }
 0x5ab   : > { %v9118_v63 = vsel %vm9112_vm7, %v9086_v48, 0.0  ;;  %v9087_v21 = vmax.f32 %v8981_v11, 0.0 }
 0x5ac   : > { %v9119_v5 = vadd.f32 %v9118_v63, %v9117_v14  ;;  %v8579_v27 = vpop.permute.xlu0 %8578 }
 0x5ad   : > { %v9149_v8 = vsel %vm9112_vm7, %v9087_v21, 0.0  ;;  %v8768_v1 = vsel %vm7388_vm5, %v8741_v23, %v8579_v27 }
 0x5ae   : > { %v9150_v38 = vadd.f32 %v9149_v8, %v9148_v0 }
 0x5b0   : > { %v8449_v44 = vpop.permute.xlu0 %8448 }
 0x5b1   : > { %v8656_v15 = vsel %vm7010_vm1, %v8631_v24, %v8449_v44 }
 0x5b2   : > { %v8682_v14 = vsel %vm7097_vm2, %v8656_v15, %v14589_v50 }
 0x5b4   : > { %v8603_v49 = vpop.permute.xlu1 %8602 }
 0x5b5   : > { %v8806_v60 = vsel %vm7481_vm6, %v8768_v1, %v8603_v49 }
 0x5b6   : > { %9032 = vmatmul.mubr.bf16.gmra.mrb[44].mxu1 %v8806_v60 }
 0x5b7   : > { %9039 = vmatprep.mubr.bf16.mxu1 %v14511_v59 }
 0x5b8   : > { %v14241_v26 = vpop.permute.xlu1 %8606 }
 0x5bc   : > { %v8581_v31 = vpop.permute.xlu1 %8580 }
 0x5bd   : > { %v8770_v20 = vsel %vm7388_vm5, %v8742_v10, %v8581_v31 }
 0x5c4   : > { %v8605_v12 = vpop.permute.xlu0 %8604 }
 0x5c5   : > { %v8809_v7 = vsel %vm7481_vm6, %v8770_v20, %v8605_v12 }
 0x5c6   : > { %9040 = vmatmul.mubr.bf16.gmra.mrb[48].mxu1 %v8809_v7 }
 0x5c7   : > { %9047 = vmatprep.mubr.bf16.mxu1 %v14511_v59 }
 0x5c8   : > { %v8422_v25 = vpop.permute.xlu0 %8421 }
 0x5c9   : > { %v8985_v18 = vpop.f32.mrb[20].mxu1  ;;  %v8634_v51 = vsel %vm3275_vm0, %v14111_v52, %v8422_v25 }
 0x5ca   : > { %v8986_v53 = vadd.f32 %v14191_v43, %v8985_v18  ;;  %v8987_v45 = vpop.f32.mrb[21].mxu1 }
 0x5cb   : > { %v8988_v32 = vpop.f32.mrb[22].mxu1 }
 0x5cc   : > { %v9088_v37 = vmax.f32 %v8986_v53, 0.0  ;;  %v8989_v34 = vadd.f32 %v14191_v43, %v8988_v32  ;;  %v8990_v35 = vpop.f32.mrb[23].mxu1  ;;  %v8531_v22 = vpop.permute.xlu1 %8530 }
 0x5cd   : > { %v8714_v29 = vsel %vm7190_vm3, %v8682_v14, %v8531_v22 }
 0x5ce   : > { %v9120_v6 = vsel %vm9112_vm7, %v9088_v37, 0.0  ;;  %v9089_v55 = vmax.f32 %v8989_v34, 0.0 }
 0x5cf   : > { %v9121_v3 = vadd.f32 %v9120_v6, %v9119_v5 }
 0x5d0   : > { %v9151_v61 = vsel %vm9112_vm7, %v9089_v55, 0.0  ;;  %v8451_v57 = vpop.permute.xlu1 %8450 }
 0x5d1   : > { %v9152_v54 = vadd.f32 %v9151_v61, %v9150_v38  ;;  %v8658_v44 = vsel %vm7010_vm1, %v8634_v51, %v8451_v57 }
 0x5d2   : > { %v8993_v19 = vpop.f32.mrb[24].mxu1 }
 0x5d3   : > { %v8994_v62 = vadd.f32 %v14191_v43, %v8993_v19  ;;  %v8995_v16 = vpop.f32.mrb[25].mxu1 }
 0x5d4   : > { %v8559_v0 = vpop.permute.xlu0 %8558  ;;  %v8996_v4 = vpop.f32.mrb[26].mxu1 }
 0x5d5   : > { %v9090_v36 = vmax.f32 %v8994_v62, 0.0  ;;  %v8744_v33 = vsel %vm7289_vm4, %v8714_v29, %v8559_v0  ;;  %v8997_v39 = vadd.f32 %v14191_v43, %v8996_v4  ;;  %v8998_v30 = vpop.f32.mrb[27].mxu1 }
 0x5d6   : > { %v8771_v48 = vsel %vm7388_vm5, %v8744_v33, %v14595_v58 }
 0x5d7   : > { %v9122_v11 = vsel %vm9112_vm7, %v9090_v36, 0.0  ;;  %v8812_v50 = vsel %vm7481_vm6, %v8771_v48, %v14241_v26  ;;  %v9091_v17 = vmax.f32 %v8997_v39, 0.0 }
 0x5d8   : > { %v9123_v63 = vadd.f32 %v9122_v11, %v9121_v3  ;;  %9048 = vmatmul.mubr.bf16.gmra.mrb[52].mxu1 %v8812_v50  ;;  %v8485_v60 = vpop.permute.xlu0 %8484 }
 0x5d9   : > { %v9153_v9 = vsel %vm9112_vm7, %v9091_v17, 0.0  ;;  %9055 = vmatprep.mubr.bf16.mxu1 %v14511_v59  ;;  %v8684_v20 = vsel %vm7097_vm2, %v8658_v44, %v8485_v60 }
 0x5da   : > { %v9154_v21 = vadd.f32 %v9153_v9, %v9152_v54  ;;  %v9001_v5 = vpop.f32.mrb[28].mxu1 }
 0x5db   : > { %v9002_v8 = vadd.f32 %v14191_v43, %v9001_v5  ;;  %v9003_v38 = vpop.f32.mrb[29].mxu1 }
 0x5dc   : > { %v9004_v2 = vpop.f32.mrb[30].mxu1  ;;  %v8533_v42 = vpop.permute.xlu1 %8532 }
 0x5dd   : > { %v9092_v27 = vmax.f32 %v9002_v8, 0.0  ;;  %v9005_v40 = vadd.f32 %v14191_v43, %v9004_v2  ;;  %v9006_v23 = vpop.f32.mrb[31].mxu1  ;;  %v8716_v18 = vsel %vm7190_vm3, %v8684_v20, %v8533_v42 }
 0x5df   : > { %v9124_v1 = vsel %vm9112_vm7, %v9092_v27, 0.0  ;;  %v9093_v49 = vmax.f32 %v9005_v40, 0.0 }
 0x5e0   : > { %v9125_v46 = vadd.f32 %v9124_v1, %v9123_v63  ;;  %v8424_v25 = vpop.permute.xlu1 %8423 }
 0x5e1   : > { %v9155_v13 = vsel %vm9112_vm7, %v9093_v49, 0.0  ;;  %v8637_v22 = vsel %vm3275_vm0, %v14125_v47, %v8424_v25 }
 0x5e2   : > { %v9156_v31 = vadd.f32 %v9155_v13, %v9154_v21  ;;  %v9009_v10 = vpop.f32.mrb[32].mxu1 }
 0x5e3   : > { %v9010_v12 = vadd.f32 %v14191_v43, %v9009_v10  ;;  %v9011_v7 = vpop.f32.mrb[33].mxu1 }
 0x5e4   : > { %v8561_v53 = vpop.permute.xlu0 %8560  ;;  %v9012_v45 = vpop.f32.mrb[34].mxu1 }
 0x5e5   : > { %v9094_v32 = vmax.f32 %v9010_v12, 0.0  ;;  %v8746_v37 = vsel %vm7289_vm4, %v8716_v18, %v8561_v53  ;;  %v9013_v52 = vadd.f32 %v14191_v43, %v9012_v45  ;;  %v9014_v34 = vpop.f32.mrb[35].mxu1  ;;  %v8487_v19 = vpop.permute.xlu1 %8486 }
 0x5e6   : > { %v8772_v35 = vsel %vm7388_vm5, %v8746_v37, %v14595_v58 }
 0x5e7   : > { %v9126_v6 = vsel %vm9112_vm7, %v9094_v32, 0.0  ;;  %v8814_v55 = vsel %vm7481_vm6, %v8772_v35, %v14241_v26  ;;  %v9095_v24 = vmax.f32 %v9013_v52, 0.0 }
 0x5e8   : > { %v9127_v3 = vadd.f32 %v9126_v6, %v9125_v46  ;;  %9056 = vmatmul.mubr.bf16.gmra.mrb[56].mxu1 %v8814_v55  ;;  %v8453_v54 = vpop.permute.xlu0 %8452 }
 0x5e9   : > { %v9157_v15 = vsel %vm9112_vm7, %v9095_v24, 0.0  ;;  %9063 = vmatprep.mubr.bf16.mxu1 %v14511_v59  ;;  %v8660_v14 = vsel %vm7010_vm1, %v8637_v22, %v8453_v54 }
 0x5ea   : > { %v9158_v61 = vadd.f32 %v9157_v15, %v9156_v31  ;;  %v8686_v16 = vsel %vm7097_vm2, %v8660_v14, %v8487_v19 }
 0x5ec   : > { %v8535_v62 = vpop.permute.xlu0 %8534 }
 0x5ed   : > { %v8718_v29 = vsel %vm7190_vm3, %v8686_v16, %v8535_v62 }
 0x5f0   : > { %v8426_v36 = vpop.permute.xlu0 %8425 }
 0x5f1   : > { %v8640_v47 = vsel %vm3275_vm0, %v14141_v56, %v8426_v36 }
 0x5f2   : > { %v8661_v48 = vsel %vm7010_vm1, %v8640_v47, %v14607_v41 }
 0x5f4   : > { %v8563_v0 = vpop.permute.xlu1 %8562 }
 0x5f5   : > { %v8748_v4 = vsel %vm7289_vm4, %v8718_v29, %v8563_v0 }
 0x5f6   : > { %v8773_v33 = vsel %vm7388_vm5, %v8748_v4, %v14595_v58 }
 0x5f7   : > { %v8816_v39 = vsel %vm7481_vm6, %v8773_v33, %v14241_v26 }
 0x5f8   : > { %9064 = vmatmul.mubr.bf16.gmra.mrb[60].mxu1 %v8816_v39  ;;  %v8489_v30 = vpop.permute.xlu1 %8488 }
 0x5f9   : > { %9071 = vmatprep.mubr.bf16.mxu1 %v14511_v59  ;;  %v8688_v11 = vsel %vm7097_vm2, %v8661_v48, %v8489_v30 }
 0x5fd   : > { %v8537_v50 = vpop.permute.xlu0 %8536 }
 0x5fe   : > { %v8720_v17 = vsel %vm7190_vm3, %v8688_v11, %v8537_v50 }
 0x5ff   : > { %v8749_v63 = vsel %vm7289_vm4, %v8720_v17, %v14016_v28 }
 0x600   : > { %v8774_v9 = vsel %vm7388_vm5, %v8749_v63, %v14595_v58 }
 0x601   : > { %v8818_v56 = vsel %vm7481_vm6, %v8774_v9, %v14241_v26 }
 0x602   : > { %9072 = vmatmul.mubr.bf16.gmra.mrb[64].mxu1 %v8818_v56 }
 0x669   : > { %v9017_v59 = vpop.f32.mrb[36].mxu1 }
 0x66a   : > { %v9018_v21 = vadd.f32 %v14191_v43, %v9017_v59  ;;  %v9019_v5 = vpop.f32.mrb[37].mxu1 }
 0x66b   : > { %v9020_v41 = vpop.f32.mrb[38].mxu1 }
 0x66c   : > { %v9096_v8 = vmax.f32 %v9018_v21, 0.0  ;;  %v9021_v38 = vadd.f32 %v14191_v43, %v9020_v41  ;;  %v9022_v2 = vpop.f32.mrb[39].mxu1 }
 0x66e   : > { %v9128_v57 = vsel %vm9112_vm7, %v9096_v8, 0.0  ;;  %v9097_v27 = vmax.f32 %v9021_v38, 0.0 }
 0x66f   : > { %v9129_v28 = vadd.f32 %v9128_v57, %v9127_v3 }
 0x670   : > { %v9159_v40 = vsel %vm9112_vm7, %v9097_v27, 0.0 }
 0x671   : > { %v9160_v58 = vadd.f32 %v9159_v40, %v9158_v61 }
 0x679   : > { %v9025_v23 = vpop.f32.mrb[40].mxu1 }
 0x67a   : > { %v9026_v26 = vadd.f32 %v14191_v43, %v9025_v23  ;;  %v9027_v1 = vpop.f32.mrb[41].mxu1 }
 0x67b   : > { %v9028_v49 = vpop.f32.mrb[42].mxu1 }
 0x67c   : > { %v9098_v60 = vmax.f32 %v9026_v26, 0.0  ;;  %v9029_v46 = vadd.f32 %v14191_v43, %v9028_v49  ;;  %v9030_v51 = vpop.f32.mrb[43].mxu1 }
 0x67e   : > { %v9130_v13 = vsel %vm9112_vm7, %v9098_v60, 0.0  ;;  %v9099_v42 = vmax.f32 %v9029_v46, 0.0 }
 0x67f   : > { %v9131_v44 = vadd.f32 %v9130_v13, %v9129_v28 }
 0x680   : > { %v9161_v31 = vsel %vm9112_vm7, %v9099_v42, 0.0 }
 0x681   : > { %v9162_v10 = vadd.f32 %v9161_v31, %v9160_v58 }
 0x689   : > { %v9033_v20 = vpop.f32.mrb[44].mxu1 }
 0x68a   : > { %v9034_v12 = vadd.f32 %v14191_v43, %v9033_v20  ;;  %v9035_v7 = vpop.f32.mrb[45].mxu1 }
 0x68b   : > { %v9036_v18 = vpop.f32.mrb[46].mxu1 }
 0x68c   : > { %v9100_v53 = vmax.f32 %v9034_v12, 0.0  ;;  %v9037_v45 = vadd.f32 %v14191_v43, %v9036_v18  ;;  %v9038_v32 = vpop.f32.mrb[47].mxu1 }
 0x68e   : > { %v9132_v37 = vsel %vm9112_vm7, %v9100_v53, 0.0  ;;  %v9101_v52 = vmax.f32 %v9037_v45, 0.0 }
 0x68f   : > { %v9133_v34 = vadd.f32 %v9132_v37, %v9131_v44 }
 0x690   : > { %v9163_v35 = vsel %vm9112_vm7, %v9101_v52, 0.0 }
 0x691   : > { %v9164_v6 = vadd.f32 %v9163_v35, %v9162_v10 }
 0x699   : > { %v9041_v55 = vpop.f32.mrb[48].mxu1 }
 0x69a   : > { %v9042_v24 = vadd.f32 %v14191_v43, %v9041_v55  ;;  %v9043_v3 = vpop.f32.mrb[49].mxu1 }
 0x69b   : > { %v9044_v15 = vpop.f32.mrb[50].mxu1 }
 0x69c   : > { %v9102_v25 = vmax.f32 %v9042_v24, 0.0  ;;  %v9045_v61 = vadd.f32 %v14191_v43, %v9044_v15  ;;  %v9046_v54 = vpop.f32.mrb[51].mxu1 }
 0x69e   : > { %v9134_v22 = vsel %vm9112_vm7, %v9102_v25, 0.0  ;;  %v9103_v19 = vmax.f32 %v9045_v61, 0.0 }
 0x69f   : > { %v9135_v14 = vadd.f32 %v9134_v22, %v9133_v34 }
 0x6a0   : > { %v9165_v62 = vsel %vm9112_vm7, %v9103_v19, 0.0 }
 0x6a1   : > { %v9166_v16 = vadd.f32 %v9165_v62, %v9164_v6 }
 0x6ab   : > { %v9049_v29 = vpop.f32.mrb[52].mxu1 }
 0x6ac   : > { %v9050_v0 = vadd.f32 %v14191_v43, %v9049_v29  ;;  %v9051_v4 = vpop.f32.mrb[53].mxu1 }
 0x6ad   : > { %v9052_v36 = vpop.f32.mrb[54].mxu1 }
 0x6ae   : > { %v9104_v33 = vmax.f32 %v9050_v0, 0.0  ;;  %v9053_v39 = vadd.f32 %v14191_v43, %v9052_v36  ;;  %v9054_v47 = vpop.f32.mrb[55].mxu1 }
 0x6b0   : > { %v9136_v30 = vsel %vm9112_vm7, %v9104_v33, 0.0  ;;  %v9105_v48 = vmax.f32 %v9053_v39, 0.0 }
 0x6b1   : > { %v9137_v11 = vadd.f32 %v9136_v30, %v9135_v14 }
 0x6b2   : > { %v9167_v50 = vsel %vm9112_vm7, %v9105_v48, 0.0 }
 0x6b3   : > { %v9168_v17 = vadd.f32 %v9167_v50, %v9166_v16 }
 0x6bb   : > { %v9057_v63 = vpop.f32.mrb[56].mxu1 }
 0x6bc   : > { %v9058_v9 = vadd.f32 %v14191_v43, %v9057_v63  ;;  %v9059_v56 = vpop.f32.mrb[57].mxu1 }
 0x6bd   : > { %v9060_v59 = vpop.f32.mrb[58].mxu1 }
 0x6be   : > { %v9106_v21 = vmax.f32 %v9058_v9, 0.0  ;;  %v9061_v5 = vadd.f32 %v14191_v43, %v9060_v59  ;;  %v9062_v41 = vpop.f32.mrb[59].mxu1 }
 0x6c0   : > { %v9138_v8 = vsel %vm9112_vm7, %v9106_v21, 0.0  ;;  %v9107_v38 = vmax.f32 %v9061_v5, 0.0 }
 0x6c1   : > { %v9139_v2 = vadd.f32 %v9138_v8, %v9137_v11 }
 0x6c2   : > { %v9169_v57 = vsel %vm9112_vm7, %v9107_v38, 0.0 }
 0x6c3   : > { %v9170_v27 = vadd.f32 %v9169_v57, %v9168_v17 }
 0x6cb   : > { %v9065_v28 = vpop.f32.mrb[60].mxu1 }
 0x6cc   : > { %v9066_v40 = vadd.f32 %v14191_v43, %v9065_v28  ;;  %v9067_v58 = vpop.f32.mrb[61].mxu1 }
 0x6cd   : > { %v9068_v23 = vpop.f32.mrb[62].mxu1 }
 0x6ce   : > { %v9108_v26 = vmax.f32 %v9066_v40, 0.0  ;;  %v9069_v1 = vadd.f32 %v14191_v43, %v9068_v23  ;;  %v9070_v49 = vpop.f32.mrb[63].mxu1 }
 0x6d0   : > { %v9140_v60 = vsel %vm9112_vm7, %v9108_v26, 0.0  ;;  %v9109_v46 = vmax.f32 %v9069_v1, 0.0 }
 0x6d1   : > { %v9141_v51 = vadd.f32 %v9140_v60, %v9139_v2 }
 0x6d2   : > { %v9171_v13 = vsel %vm9112_vm7, %v9109_v46, 0.0 }
 0x6d3   : > { %v9172_v42 = vadd.f32 %v9171_v13, %v9170_v27 }
 0x6d5   : > { %v9073_v44 = vpop.f32.mrb[64].mxu1 }
 0x6d6   : > { %v9074_v31 = vadd.f32 %v14191_v43, %v9073_v44  ;;  %v9075_v10 = vpop.f32.mrb[65].mxu1 }
 0x6d7   : > { %v9076_v20 = vpop.f32.mrb[66].mxu1 }
 0x6d8   : > { %v9110_v12 = vmax.f32 %v9074_v31, 0.0  ;;  %v9077_v7 = vadd.f32 %v14191_v43, %v9076_v20  ;;  %v9078_v18 = vpop.f32.mrb[67].mxu1 }
 0x6da   : > { %v9142_v53 = vsel %vm9112_vm7, %v9110_v12, 0.0  ;;  %v9111_v45 = vmax.f32 %v9077_v7, 0.0 }
 0x6db   : > { %v9143_v32 = vadd.f32 %v9142_v53, %v9141_v51 }
 0x6dc   : > { %v9173_v37 = vsel %vm9112_vm7, %v9111_v45, 0.0 }
 0x6dd   : > { %v9176_v52 = vmul.f32 0.0625, %v9143_v32  ;;  %v9174_v34 = vadd.f32 %v9173_v37, %v9172_v42 }
 0x6df   : > { %9178 = vst.msk [vmem:[%s1885_s9] sm:$0xff] %vm9112_vm7, %v9176_v52  ;;  %v9177_v35 = vmul.f32 0.0625, %v9174_v34 }
 0x6e1   : > { %9179 = vst.msk [vmem:[%s1885_s9 + $0x8] sm:$0xff] %vm9112_vm7, %v9177_v35 }
 0x6e2 PF: > { %p14_p9 = scmp.ge.s32.totalorder %s10664_s28, 4   ;;  %s14608_s24 = smov %s10593_s25 }
 0x6e3   : > { %s14609_s25 = smov %s10673_s8  ;;  %s14610_s26 = smov %s10664_s28 }
 0x6e4   :  { %16 = sbr.rel (!%p14_p9) target bundleno = 2 (0x2), region = 124 }

</bundles_post_ra>
